<compile_context>
chip_gen: v5e
topology: v5e:2x2
jax: 0.10.0
libtpu: 0.0.40
codegen_flags: <defaults>
</compile_context>

<pallas_src>
import functools

import jax
import jax.numpy as jnp
from jax.experimental import pallas as pl
from jax.experimental.pallas import tpu as pltpu


LANE = 128          # pad all channel dims to a multiple of the 128-lane axis
NEG_SLOPE = 0.1     # TODO(synk): nn.LeakyReLU default is 0.01; YOLOv7-style 0.1 assumed.


def make_divisible(x, divisor):
    # TODO(synk): reference make_divisible not provided; ceil-to-multiple assumed.
    return int((x + divisor - 1) // divisor) * divisor


def cpad(c):
    return ((c + LANE - 1) // LANE) * LANE


def _pad_axis(x, axis, target):
    if x.shape[axis] == target:
        return x
    cfg = [(0, 0)] * x.ndim
    cfg[axis] = (0, target - x.shape[axis])
    return jnp.pad(x, cfg)


# ---------------------------------------------------------------------------
# Fused multi-input / multi-tap convolution kernel
#   o = act( sum_i sum_t  x_i[window(t)] @ w_i[t]  + b )
# Handles 1x1, 3x3/s1 (incl. fused channel-concat) and phase-decomposed 3x3/s2.
# ---------------------------------------------------------------------------
def _conv_kernel(*refs, taps, ho, wo, apply_act, neg_slope):
    # refs = (x_0..x_{k-1}, w_0..w_{k-1}, bias, out); batch dim squeezed.
    # x_i : (Hp_i, Wp_i, Cin_i) bf16   w_i : (ntaps_i, Cin_i, Cout) bf16
    # bias: (1, Cout) f32              out : (ho, wo, Cout)
    n_in = len(taps)
    x_refs = refs[:n_in]
    w_refs = refs[n_in:2 * n_in]
    b_ref = refs[2 * n_in]
    o_ref = refs[2 * n_in + 1]

    m = ho * wo
    cout = o_ref.shape[-1]
    acc = jnp.zeros((m, cout), jnp.float32)
    for i in range(n_in):
        cin = x_refs[i].shape[-1]
        for t, (dy, dx) in enumerate(taps[i]):
            patch = x_refs[i][dy:dy + ho, dx:dx + wo, :].reshape(m, cin)
            acc = acc + jnp.dot(patch, w_refs[i][t],
                                preferred_element_type=jnp.float32)
    acc = acc + b_ref[...]
    if apply_act:
        acc = jnp.where(acc > 0, acc, neg_slope * acc)
    o_ref[...] = acc.reshape(ho, wo, cout).astype(o_ref.dtype)


def conv_fused(inputs, weights, bias, taps, out_hw, *, apply_act,
               out_dtype=jnp.bfloat16, neg_slope=NEG_SLOPE):
    assert len(inputs) == len(weights) == len(taps)
    n = inputs[0].shape[0]
    ho, wo = out_hw
    cout = weights[0].shape[-1]

    in_specs = []
    for x in inputs:
        _, hp, wp, cp = x.shape
        in_specs.append(pl.BlockSpec((None, hp, wp, cp), lambda b: (b, 0, 0, 0)))
    for w in weights:
        nt, cp, co = w.shape
        in_specs.append(pl.BlockSpec((nt, cp, co), lambda b: (0, 0, 0)))
    in_specs.append(pl.BlockSpec((1, cout), lambda b: (0, 0)))

    kernel = functools.partial(_conv_kernel, taps=tuple(map(tuple, taps)),
                               ho=ho, wo=wo, apply_act=apply_act,
                               neg_slope=neg_slope)
    return pl.pallas_call(
        kernel,
        out_shape=jax.ShapeDtypeStruct((n, ho, wo, cout), out_dtype),
        grid=(n,),
        in_specs=in_specs,
        out_specs=pl.BlockSpec((None, ho, wo, cout), lambda b: (b, 0, 0, 0)),
        compiler_params=pltpu.CompilerParams(dimension_semantics=("parallel",)),
    )(*inputs, *weights, bias.reshape(1, cout).astype(jnp.float32))


# ---------------------------------------------------------------------------
# MaxPool2d(2, 2): single kernel over a lane-packed view, batch-parallel grid.
# ---------------------------------------------------------------------------
def _maxpool_kernel(x_ref, o_ref):
    c = o_ref.shape[-1]
    x = x_ref[...]                       # (ho, 2, wo, 2c)
    m = jnp.max(x, axis=1)               # max over the row pair
    o_ref[...] = jnp.maximum(m[:, :, :c], m[:, :, c:])   # max over the col pair


def maxpool2x2(x):
    n, h, w, c = x.shape
    ho, wo = h // 2, w // 2
    xr = x.reshape(n, ho, 2, wo, 2 * c)  # free row-major view: cols packed into lanes
    return pl.pallas_call(
        _maxpool_kernel,
        out_shape=jax.ShapeDtypeStruct((n, ho, wo, c), x.dtype),
        grid=(n,),
        in_specs=[pl.BlockSpec((None, ho, 2, wo, 2 * c),
                               lambda b: (b, 0, 0, 0, 0))],
        out_specs=pl.BlockSpec((None, ho, wo, c), lambda b: (b, 0, 0, 0)),
        compiler_params=pltpu.CompilerParams(dimension_semantics=("parallel",)),
    )(xr)


# ---------------------------------------------------------------------------
# Conv flavors built on the fused kernel
# ---------------------------------------------------------------------------
FULL_3X3_TAPS = tuple((ky, kx) for ky in range(3) for kx in range(3))

# stride-2 3x3: phase (space-to-depth) decomposition of the padded input.
# Phase (a, b) holds Xpad[a::2, b::2]; original tap (ky, kx) acts on phase
# (ky % 2, kx % 2) at shifted offset (ky // 2, kx // 2).
_S2_PHASES = ((0, 0), (0, 1), (1, 0), (1, 1))
_S2_SRC_TAPS = (((0, 0), (0, 2), (2, 0), (2, 2)),
                ((0, 1), (2, 1)),
                ((1, 0), (1, 2)),
                ((1, 1),))
_S2_OFFSETS = (((0, 0), (0, 1), (1, 0), (1, 1)),
               ((0, 0), (1, 0)),
               ((0, 0), (0, 1)),
               ((0, 0),))


def conv1x1(x, w_packed, b_packed, *, apply_act):
    _, h, w, _ = x.shape
    return conv_fused([x], [w_packed], b_packed, (((0, 0),),), (h, w),
                      apply_act=apply_act)


def conv3x3_s1(inputs, w_segments, b_packed, *, apply_act):
    """3x3 / stride 1 / pad 1 conv over the (virtual) channel concat of `inputs`."""
    _, h, w, _ = inputs[0].shape
    padded = [jnp.pad(x, ((0, 0), (1, 1), (1, 1), (0, 0))) for x in inputs]
    taps = tuple(FULL_3X3_TAPS for _ in inputs)
    return conv_fused(padded, list(w_segments), b_packed, taps, (h, w),
                      apply_act=apply_act)


def conv3x3_s2(x, w_phases, b_packed, *, apply_act):
    """3x3 / stride 2 / pad 1 conv; all in-kernel windows are contiguous stride-1."""
    _, h, w, _ = x.shape
    ho, wo = h // 2, w // 2
    xp = jnp.pad(x, ((0, 0), (1, 1), (1, 1), (0, 0)))
    phases = [xp[:, a::2, b::2, :] for a, b in _S2_PHASES]
    return conv_fused(phases, list(w_phases), b_packed, _S2_OFFSETS, (ho, wo),
                      apply_act=apply_act)


# ---------------------------------------------------------------------------
# Weight packing (to padded, bf16, per-tap-matrix form) + synthetic init
# ---------------------------------------------------------------------------
def _pack_bias(b, cout_p):
    return _pad_axis(b.astype(jnp.float32), 0, cout_p)


def _pack_w_1x1(w, cin_p, cout_p):
    w2 = _pad_axis(_pad_axis(w[0, 0], 0, cin_p), 1, cout_p)
    return w2.astype(jnp.bfloat16)[None]                         # (1, cin_p, cout_p)


def _pack_w_3x3_segment(w, lo, hi, cin_p, cout_p):
    seg = w[:, :, lo:hi, :].reshape(9, hi - lo, w.shape[-1])      # tap order ky*3+kx
    seg = _pad_axis(_pad_axis(seg, 1, cin_p), 2, cout_p)
    return seg.astype(jnp.bfloat16)                               # (9, cin_p, cout_p)


def _pack_w_3x3_s2(w, cin_p, cout_p):
    out = []
    for srcs in _S2_SRC_TAPS:
        mats = jnp.stack([w[ky, kx] for ky, kx in srcs], axis=0)
        mats = _pad_axis(_pad_axis(mats, 1, cin_p), 2, cout_p)
        out.append(mats.astype(jnp.bfloat16))
    return out


def get_out_channels(c1, c2, c3):
    s2_out = make_divisible((2 * c1 + c2) // 2, 4)
    s3_out = make_divisible((2 * s2_out + c3) // 2, 4)
    return c1, s2_out, s3_out


def init_custom_pan_params(key, c1, c2, c3):
    """Deterministic synthetic weights packed into kernel-ready (padded bf16) form."""
    _, s2_out, s3_out = get_out_channels(c1, c2, c3)
    keys = iter(jax.random.split(key, 16))

    def conv_wb(kh, kw, cin, cout, scale=0.1):
        kw_, kb_ = jax.random.split(next(keys))
        w = scale * jax.random.normal(kw_, (kh, kw, cin, cout), jnp.float32)
        b = scale * jax.random.normal(kb_, (cout,), jnp.float32)
        return w, b

    def pack_downsample(c):
        # TODO(synk): DownSample2 source not provided; YOLOv7 "MP" block assumed:
        #   a: MaxPool(2) -> 1x1 conv ; b: 1x1 conv -> 3x3/s2 conv ; concat [a, b].
        cp = cpad(c)
        w1, b1 = conv_wb(1, 1, c, c)
        w2, b2 = conv_wb(1, 1, c, c)
        w3, b3 = conv_wb(3, 3, c, c)
        return {"w1": _pack_w_1x1(w1, cp, cp), "b1": _pack_bias(b1, cp),
                "w2": _pack_w_1x1(w2, cp, cp), "b2": _pack_bias(b2, cp),
                "w3": _pack_w_3x3_s2(w3, cp, cp), "b3": _pack_bias(b3, cp)}

    def pack_elanw(seg_channels, cout):
        # seg_channels: actual channels of each concat operand, in concat order.
        cin = sum(seg_channels)
        cop = cpad(cout)
        w, b = conv_wb(3, 3, cin, cout)
        segs, lo = [], 0
        for c in seg_channels:
            segs.append(_pack_w_3x3_segment(w, lo, lo + c, cpad(c), cop))
            lo += c
        return {"w_segs": segs, "b": _pack_bias(b, cop)}

    return {
        "ds1": pack_downsample(c1),
        "elanw2": pack_elanw((c2, c1, c1), s2_out),
        "ds2": pack_downsample(s2_out),
        "elanw3": pack_elanw((c3, s2_out, s2_out), s3_out),
    }


# ---------------------------------------------------------------------------
# CustomPAN.forward
# ---------------------------------------------------------------------------
def downsample2(x, p):
    a = maxpool2x2(x)
    a = conv1x1(a, p["w1"], p["b1"], apply_act=True)
    bb = conv1x1(x, p["w2"], p["b2"], apply_act=True)
    bb = conv3x3_s2(bb, p["w3"], p["b3"], apply_act=True)
    return a, bb        # concat is fused into the consuming conv (split-K)


def custom_pan_forward(params, stage1_nchw, stage2_nchw, stage3_nchw):
    c1, c2, c3 = stage1_nchw.shape[1], stage2_nchw.shape[1], stage3_nchw.shape[1]
    _, s2_out, s3_out = get_out_channels(c1, c2, c3)

    def to_nhwc(x):
        # NCHW f32 -> NHWC bf16, channels zero-padded to a lane-dense 128-multiple.
        xt = jnp.transpose(x, (0, 2, 3, 1)).astype(jnp.bfloat16)
        return _pad_axis(xt, 3, cpad(xt.shape[-1]))

    s1, s2, s3 = to_nhwc(stage1_nchw), to_nhwc(stage2_nchw), to_nhwc(stage3_nchw)

    a1, b1 = downsample2(s1, params["ds1"])
    # stage2_elanw over cat([stage2_out, stage1_mp2]) — concat fused via split-K.
    s2e = conv3x3_s1([s2, a1, b1], params["elanw2"]["w_segs"],
                     params["elanw2"]["b"], apply_act=False)

    a2, b2 = downsample2(s2e, params["ds2"])
    s3e = conv3x3_s1([s3, a2, b2], params["elanw3"]["w_segs"],
                     params["elanw3"]["b"], apply_act=False)

    def to_nchw(x, c):
        return jnp.transpose(x[..., :c], (0, 3, 1, 2)).astype(jnp.float32)

    return stage1_nchw, to_nchw(s2e, s2_out), to_nchw(s3e, s3_out)


# ---------------------------------------------------------------------------
if __name__ == "__main__":
    key = jax.random.PRNGKey(0)
    k_in, k_par = jax.random.split(key)

    # small shapes: batch=2; stage1 16x16, stage2 8x8, stage3 4x4; 8 channels each
    c1, c2, c3 = 8, 8, 8
    N = 2
    stage1_out = jax.random.normal(jax.random.fold_in(k_in, 0), (N, c1, 16, 16), jnp.float32)
    stage2_out = jax.random.normal(jax.random.fold_in(k_in, 1), (N, c2, 8, 8), jnp.float32)
    stage3_out = jax.random.normal(jax.random.fold_in(k_in, 2), (N, c3, 4, 4), jnp.float32)

    params = init_custom_pan_params(k_par, c1, c2, c3)

    fwd = jax.jit(custom_pan_forward)
    o1, o2, o3 = jax.block_until_ready(fwd(params, stage1_out, stage2_out, stage3_out))

    ec1, ec2, ec3 = get_out_channels(c1, c2, c3)
    assert o1.shape == (N, ec1, 16, 16)
    assert o2.shape == (N, ec2, 8, 8)
    assert o3.shape == (N, ec3, 4, 4)
    assert bool(jnp.all(jnp.isfinite(o2))) and bool(jnp.all(jnp.isfinite(o3)))
    print("KERNEL_OK")
</pallas_src>

<mosaic_0001>
module attributes {stable_mosaic.version = 11 : i64} {
  func.func @_conv_kernel(%arg0: i32, %arg1: memref<1x16x16x128xbf16, #tpu.memory_space<vmem>>, %arg2: memref<1x128x128xbf16, #tpu.memory_space<vmem>>, %arg3: memref<1x128xf32, #tpu.memory_space<vmem>>, %arg4: memref<1x16x16x128xbf16, #tpu.memory_space<vmem>>) attributes {dimension_semantics = [#tpu.dimension_semantics<parallel>], iteration_bounds = array<i64: 2>, scalar_prefetch = 0 : i64, scratch_operands = 0 : i64, tpu.core_type = #tpu.core_type<tc>, window_params = [{transform_indices = @transform_0, window_bounds = array<i64: 1, 16, 16, 128>}, {pipeline_mode = #tpu.pipeline_mode<synchronous>, transform_indices = @transform_1, window_bounds = array<i64: 1, 128, 128>}, {pipeline_mode = #tpu.pipeline_mode<synchronous>, transform_indices = @transform_2, window_bounds = array<i64: 1, 128>}, {transform_indices = @transform_3, window_bounds = array<i64: 1, 16, 16, 128>}]} {
    %cst = arith.constant 0.000000e+00 : f32
    %0 = vector.broadcast %cst : f32 to vector<256x128xf32>
    %c0 = arith.constant 0 : index
    %c0_0 = arith.constant 0 : index
    %c0_1 = arith.constant 0 : index
    %c0_2 = arith.constant 0 : index
    %1 = vector.load %arg1[%c0, %c0_0, %c0_1, %c0_2] : memref<1x16x16x128xbf16, #tpu.memory_space<vmem>>, vector<1x16x16x128xbf16>
    %2 = vector.shape_cast %1 : vector<1x16x16x128xbf16> to vector<16x16x128xbf16>
    %3 = vector.shape_cast %2 : vector<16x16x128xbf16> to vector<256x128xbf16>
    %c0_3 = arith.constant 0 : index
    %c0_4 = arith.constant 0 : index
    %c0_5 = arith.constant 0 : index
    %4 = vector.load %arg2[%c0_3, %c0_4, %c0_5] : memref<1x128x128xbf16, #tpu.memory_space<vmem>>, vector<1x128x128xbf16>
    %5 = vector.shape_cast %4 : vector<1x128x128xbf16> to vector<128x128xbf16>
    %cst_6 = arith.constant dense<0.000000e+00> : vector<256x128xf32>
    %6 = tpu.matmul %3, %5, %cst_6 {dimension_numbers = #tpu.dot_dimension_numbers<[1], [0], [0], [1], [0, 0, 1, 1], [], []>} : vector<256x128xbf16>, vector<128x128xbf16>, vector<256x128xf32> -> vector<256x128xf32>
    %7 = arith.addf %0, %6 : vector<256x128xf32>
    %c0_7 = arith.constant 0 : index
    %c0_8 = arith.constant 0 : index
    %8 = vector.load %arg3[%c0_7, %c0_8] : memref<1x128xf32, #tpu.memory_space<vmem>>, vector<1x128xf32>
    %9 = vector.broadcast %8 : vector<1x128xf32> to vector<256x128xf32>
    %10 = arith.addf %7, %9 : vector<256x128xf32>
    %cst_9 = arith.constant 0.000000e+00 : f32
    %11 = vector.broadcast %cst_9 : f32 to vector<256x128xf32>
    %12 = arith.cmpf ogt, %10, %11 : vector<256x128xf32>
    %cst_10 = arith.constant 1.000000e-01 : f32
    %13 = vector.broadcast %cst_10 : f32 to vector<256x128xf32>
    %14 = arith.mulf %13, %10 : vector<256x128xf32>
    %15 = arith.select %12, %10, %14 : vector<256x128xi1>, vector<256x128xf32>
    %16 = vector.shape_cast %15 : vector<256x128xf32> to vector<16x16x128xf32>
    %17 = arith.truncf %16 : vector<16x16x128xf32> to vector<16x16x128xbf16>
    %c0_11 = arith.constant 0 : index
    %c0_12 = arith.constant 0 : index
    %c0_13 = arith.constant 0 : index
    %c0_14 = arith.constant 0 : index
    %18 = vector.load %arg4[%c0_11, %c0_12, %c0_13, %c0_14] : memref<1x16x16x128xbf16, #tpu.memory_space<vmem>>, vector<1x16x16x128xbf16>
    %19 = vector.shape_cast %18 : vector<1x16x16x128xbf16> to vector<16x16x128xbf16>
    %20 = vector.shape_cast %17 : vector<16x16x128xbf16> to vector<1x16x16x128xbf16>
    tpu.vector_store %arg4[%c0_11, %c0_12, %c0_13, %c0_14], %20 {strides = array<i32>} : memref<1x16x16x128xbf16, #tpu.memory_space<vmem>>, vector<1x16x16x128xbf16>,
    return
  }
  func.func @transform_0(%arg0: i32) -> (i32, i32, i32, i32) {
    %c0_i32 = arith.constant 0 : i32
    %c0_i32_0 = arith.constant 0 : i32
    %c0_i32_1 = arith.constant 0 : i32
    %c0_i32_2 = arith.constant 0 : i32
    return %arg0, %c0_i32, %c0_i32_0, %c0_i32_1 : i32, i32, i32, i32
  }
  func.func @transform_1(%arg0: i32) -> (i32, i32, i32) {
    %c0_i32 = arith.constant 0 : i32
    %c0_i32_0 = arith.constant 0 : i32
    %c0_i32_1 = arith.constant 0 : i32
    %c0_i32_2 = arith.constant 0 : i32
    return %c0_i32, %c0_i32_0, %c0_i32_1 : i32, i32, i32
  }
  func.func @transform_2(%arg0: i32) -> (i32, i32) {
    %c0_i32 = arith.constant 0 : i32
    %c0_i32_0 = arith.constant 0 : i32
    %c0_i32_1 = arith.constant 0 : i32
    return %c0_i32, %c0_i32_0 : i32, i32
  }
  func.func @transform_3(%arg0: i32) -> (i32, i32, i32, i32) {
    %c0_i32 = arith.constant 0 : i32
    %c0_i32_0 = arith.constant 0 : i32
    %c0_i32_1 = arith.constant 0 : i32
    %c0_i32_2 = arith.constant 0 : i32
    return %arg0, %c0_i32, %c0_i32_0, %c0_i32_1 : i32, i32, i32, i32
  }
}

module attributes {stable_mosaic.version = 11 : i64} {
  func.func @_conv_kernel(%arg0: i32, %arg1: memref<1x9x9x128xbf16, #tpu.memory_space<vmem>>, %arg2: memref<1x9x9x128xbf16, #tpu.memory_space<vmem>>, %arg3: memref<1x9x9x128xbf16, #tpu.memory_space<vmem>>, %arg4: memref<1x9x9x128xbf16, #tpu.memory_space<vmem>>, %arg5: memref<4x128x128xbf16, #tpu.memory_space<vmem>>, %arg6: memref<2x128x128xbf16, #tpu.memory_space<vmem>>, %arg7: memref<2x128x128xbf16, #tpu.memory_space<vmem>>, %arg8: memref<1x128x128xbf16, #tpu.memory_space<vmem>>, %arg9: memref<1x128xf32, #tpu.memory_space<vmem>>, %arg10: memref<1x8x8x128xbf16, #tpu.memory_space<vmem>>) attributes {dimension_semantics = [#tpu.dimension_semantics<parallel>], iteration_bounds = array<i64: 2>, scalar_prefetch = 0 : i64, scratch_operands = 0 : i64, tpu.core_type = #tpu.core_type<tc>, window_params = [{transform_indices = @transform_0, window_bounds = array<i64: 1, 9, 9, 128>}, {transform_indices = @transform_1, window_bounds = array<i64: 1, 9, 9, 128>}, {transform_indices = @transform_2, window_bounds = array<i64: 1, 9, 9, 128>}, {transform_indices = @transform_3, window_bounds = array<i64: 1, 9, 9, 128>}, {pipeline_mode = #tpu.pipeline_mode<synchronous>, transform_indices = @transform_4, window_bounds = array<i64: 4, 128, 128>}, {pipeline_mode = #tpu.pipeline_mode<synchronous>, transform_indices = @transform_5, window_bounds = array<i64: 2, 128, 128>}, {pipeline_mode = #tpu.pipeline_mode<synchronous>, transform_indices = @transform_6, window_bounds = array<i64: 2, 128, 128>}, {pipeline_mode = #tpu.pipeline_mode<synchronous>, transform_indices = @transform_7, window_bounds = array<i64: 1, 128, 128>}, {pipeline_mode = #tpu.pipeline_mode<synchronous>, transform_indices = @transform_8, window_bounds = array<i64: 1, 128>}, {transform_indices = @transform_9, window_bounds = array<i64: 1, 8, 8, 128>}]} {
    %cst = arith.constant 0.000000e+00 : f32
    %0 = vector.broadcast %cst : f32 to vector<64x128xf32>
    %c0 = arith.constant 0 : index
    %c0_0 = arith.constant 0 : index
    %c0_1 = arith.constant 0 : index
    %c0_2 = arith.constant 0 : index
    %1 = vector.load %arg1[%c0, %c0_0, %c0_1, %c0_2] : memref<1x9x9x128xbf16, #tpu.memory_space<vmem>>, vector<1x8x8x128xbf16>
    %2 = vector.shape_cast %1 : vector<1x8x8x128xbf16> to vector<8x8x128xbf16>
    %3 = vector.shape_cast %2 : vector<8x8x128xbf16> to vector<64x128xbf16>
    %c0_3 = arith.constant 0 : index
    %c0_4 = arith.constant 0 : index
    %c0_5 = arith.constant 0 : index
    %4 = vector.load %arg5[%c0_3, %c0_4, %c0_5] : memref<4x128x128xbf16, #tpu.memory_space<vmem>>, vector<1x128x128xbf16>
    %5 = vector.shape_cast %4 : vector<1x128x128xbf16> to vector<128x128xbf16>
    %cst_6 = arith.constant dense<0.000000e+00> : vector<64x128xf32>
    %6 = tpu.matmul %3, %5, %cst_6 {dimension_numbers = #tpu.dot_dimension_numbers<[1], [0], [0], [1], [0, 0, 1, 1], [], []>} : vector<64x128xbf16>, vector<128x128xbf16>, vector<64x128xf32> -> vector<64x128xf32>
    %7 = arith.addf %0, %6 : vector<64x128xf32>
    %c0_7 = arith.constant 0 : index
    %c0_8 = arith.constant 0 : index
    %c1 = arith.constant 1 : index
    %c0_9 = arith.constant 0 : index
    %8 = vector.load %arg1[%c0_7, %c0_8, %c1, %c0_9] : memref<1x9x9x128xbf16, #tpu.memory_space<vmem>>, vector<1x8x8x128xbf16>
    %9 = vector.shape_cast %8 : vector<1x8x8x128xbf16> to vector<8x8x128xbf16>
    %10 = vector.shape_cast %9 : vector<8x8x128xbf16> to vector<64x128xbf16>
    %c1_10 = arith.constant 1 : index
    %c0_11 = arith.constant 0 : index
    %c0_12 = arith.constant 0 : index
    %11 = vector.load %arg5[%c1_10, %c0_11, %c0_12] : memref<4x128x128xbf16, #tpu.memory_space<vmem>>, vector<1x128x128xbf16>
    %12 = vector.shape_cast %11 : vector<1x128x128xbf16> to vector<128x128xbf16>
    %cst_13 = arith.constant dense<0.000000e+00> : vector<64x128xf32>
    %13 = tpu.matmul %10, %12, %cst_13 {dimension_numbers = #tpu.dot_dimension_numbers<[1], [0], [0], [1], [0, 0, 1, 1], [], []>} : vector<64x128xbf16>, vector<128x128xbf16>, vector<64x128xf32> -> vector<64x128xf32>
    %14 = arith.addf %7, %13 : vector<64x128xf32>
    %c0_14 = arith.constant 0 : index
    %c1_15 = arith.constant 1 : index
    %c0_16 = arith.constant 0 : index
    %c0_17 = arith.constant 0 : index
    %15 = vector.load %arg1[%c0_14, %c1_15, %c0_16, %c0_17] : memref<1x9x9x128xbf16, #tpu.memory_space<vmem>>, vector<1x8x8x128xbf16>
    %16 = vector.shape_cast %15 : vector<1x8x8x128xbf16> to vector<8x8x128xbf16>
    %17 = vector.shape_cast %16 : vector<8x8x128xbf16> to vector<64x128xbf16>
    %c2 = arith.constant 2 : index
    %c0_18 = arith.constant 0 : index
    %c0_19 = arith.constant 0 : index
    %18 = vector.load %arg5[%c2, %c0_18, %c0_19] : memref<4x128x128xbf16, #tpu.memory_space<vmem>>, vector<1x128x128xbf16>
    %19 = vector.shape_cast %18 : vector<1x128x128xbf16> to vector<128x128xbf16>
    %cst_20 = arith.constant dense<0.000000e+00> : vector<64x128xf32>
    %20 = tpu.matmul %17, %19, %cst_20 {dimension_numbers = #tpu.dot_dimension_numbers<[1], [0], [0], [1], [0, 0, 1, 1], [], []>} : vector<64x128xbf16>, vector<128x128xbf16>, vector<64x128xf32> -> vector<64x128xf32>
    %21 = arith.addf %14, %20 : vector<64x128xf32>
    %c0_21 = arith.constant 0 : index
    %c1_22 = arith.constant 1 : index
    %c1_23 = arith.constant 1 : index
    %c0_24 = arith.constant 0 : index
    %22 = vector.load %arg1[%c0_21, %c1_22, %c1_23, %c0_24] : memref<1x9x9x128xbf16, #tpu.memory_space<vmem>>, vector<1x8x8x128xbf16>
    %23 = vector.shape_cast %22 : vector<1x8x8x128xbf16> to vector<8x8x128xbf16>
    %24 = vector.shape_cast %23 : vector<8x8x128xbf16> to vector<64x128xbf16>
    %c3 = arith.constant 3 : index
    %c0_25 = arith.constant 0 : index
    %c0_26 = arith.constant 0 : index
    %25 = vector.load %arg5[%c3, %c0_25, %c0_26] : memref<4x128x128xbf16, #tpu.memory_space<vmem>>, vector<1x128x128xbf16>
    %26 = vector.shape_cast %25 : vector<1x128x128xbf16> to vector<128x128xbf16>
    %cst_27 = arith.constant dense<0.000000e+00> : vector<64x128xf32>
    %27 = tpu.matmul %24, %26, %cst_27 {dimension_numbers = #tpu.dot_dimension_numbers<[1], [0], [0], [1], [0, 0, 1, 1], [], []>} : vector<64x128xbf16>, vector<128x128xbf16>, vector<64x128xf32> -> vector<64x128xf32>
    %28 = arith.addf %21, %27 : vector<64x128xf32>
    %c0_28 = arith.constant 0 : index
    %c0_29 = arith.constant 0 : index
    %c0_30 = arith.constant 0 : index
    %c0_31 = arith.constant 0 : index
    %29 = vector.load %arg2[%c0_28, %c0_29, %c0_30, %c0_31] : memref<1x9x9x128xbf16, #tpu.memory_space<vmem>>, vector<1x8x8x128xbf16>
    %30 = vector.shape_cast %29 : vector<1x8x8x128xbf16> to vector<8x8x128xbf16>
    %31 = vector.shape_cast %30 : vector<8x8x128xbf16> to vector<64x128xbf16>
    %c0_32 = arith.constant 0 : index
    %c0_33 = arith.constant 0 : index
    %c0_34 = arith.constant 0 : index
    %32 = vector.load %arg6[%c0_32, %c0_33, %c0_34] : memref<2x128x128xbf16, #tpu.memory_space<vmem>>, vector<1x128x128xbf16>
    %33 = vector.shape_cast %32 : vector<1x128x128xbf16> to vector<128x128xbf16>
    %cst_35 = arith.constant dense<0.000000e+00> : vector<64x128xf32>
    %34 = tpu.matmul %31, %33, %cst_35 {dimension_numbers = #tpu.dot_dimension_numbers<[1], [0], [0], [1], [0, 0, 1, 1], [], []>} : vector<64x128xbf16>, vector<128x128xbf16>, vector<64x128xf32> -> vector<64x128xf32>
    %35 = arith.addf %28, %34 : vector<64x128xf32>
    %c0_36 = arith.constant 0 : index
    %c1_37 = arith.constant 1 : index
    %c0_38 = arith.constant 0 : index
    %c0_39 = arith.constant 0 : index
    %36 = vector.load %arg2[%c0_36, %c1_37, %c0_38, %c0_39] : memref<1x9x9x128xbf16, #tpu.memory_space<vmem>>, vector<1x8x8x128xbf16>
    %37 = vector.shape_cast %36 : vector<1x8x8x128xbf16> to vector<8x8x128xbf16>
    %38 = vector.shape_cast %37 : vector<8x8x128xbf16> to vector<64x128xbf16>
    %c1_40 = arith.constant 1 : index
    %c0_41 = arith.constant 0 : index
    %c0_42 = arith.constant 0 : index
    %39 = vector.load %arg6[%c1_40, %c0_41, %c0_42] : memref<2x128x128xbf16, #tpu.memory_space<vmem>>, vector<1x128x128xbf16>
    %40 = vector.shape_cast %39 : vector<1x128x128xbf16> to vector<128x128xbf16>
    %cst_43 = arith.constant dense<0.000000e+00> : vector<64x128xf32>
    %41 = tpu.matmul %38, %40, %cst_43 {dimension_numbers = #tpu.dot_dimension_numbers<[1], [0], [0], [1], [0, 0, 1, 1], [], []>} : vector<64x128xbf16>, vector<128x128xbf16>, vector<64x128xf32> -> vector<64x128xf32>
    %42 = arith.addf %35, %41 : vector<64x128xf32>
    %c0_44 = arith.constant 0 : index
    %c0_45 = arith.constant 0 : index
    %c0_46 = arith.constant 0 : index
    %c0_47 = arith.constant 0 : index
    %43 = vector.load %arg3[%c0_44, %c0_45, %c0_46, %c0_47] : memref<1x9x9x128xbf16, #tpu.memory_space<vmem>>, vector<1x8x8x128xbf16>
    %44 = vector.shape_cast %43 : vector<1x8x8x128xbf16> to vector<8x8x128xbf16>
    %45 = vector.shape_cast %44 : vector<8x8x128xbf16> to vector<64x128xbf16>
    %c0_48 = arith.constant 0 : index
    %c0_49 = arith.constant 0 : index
    %c0_50 = arith.constant 0 : index
    %46 = vector.load %arg7[%c0_48, %c0_49, %c0_50] : memref<2x128x128xbf16, #tpu.memory_space<vmem>>, vector<1x128x128xbf16>
    %47 = vector.shape_cast %46 : vector<1x128x128xbf16> to vector<128x128xbf16>
    %cst_51 = arith.constant dense<0.000000e+00> : vector<64x128xf32>
    %48 = tpu.matmul %45, %47, %cst_51 {dimension_numbers = #tpu.dot_dimension_numbers<[1], [0], [0], [1], [0, 0, 1, 1], [], []>} : vector<64x128xbf16>, vector<128x128xbf16>, vector<64x128xf32> -> vector<64x128xf32>
    %49 = arith.addf %42, %48 : vector<64x128xf32>
    %c0_52 = arith.constant 0 : index
    %c0_53 = arith.constant 0 : index
    %c1_54 = arith.constant 1 : index
    %c0_55 = arith.constant 0 : index
    %50 = vector.load %arg3[%c0_52, %c0_53, %c1_54, %c0_55] : memref<1x9x9x128xbf16, #tpu.memory_space<vmem>>, vector<1x8x8x128xbf16>
    %51 = vector.shape_cast %50 : vector<1x8x8x128xbf16> to vector<8x8x128xbf16>
    %52 = vector.shape_cast %51 : vector<8x8x128xbf16> to vector<64x128xbf16>
    %c1_56 = arith.constant 1 : index
    %c0_57 = arith.constant 0 : index
    %c0_58 = arith.constant 0 : index
    %53 = vector.load %arg7[%c1_56, %c0_57, %c0_58] : memref<2x128x128xbf16, #tpu.memory_space<vmem>>, vector<1x128x128xbf16>
    %54 = vector.shape_cast %53 : vector<1x128x128xbf16> to vector<128x128xbf16>
    %cst_59 = arith.constant dense<0.000000e+00> : vector<64x128xf32>
    %55 = tpu.matmul %52, %54, %cst_59 {dimension_numbers = #tpu.dot_dimension_numbers<[1], [0], [0], [1], [0, 0, 1, 1], [], []>} : vector<64x128xbf16>, vector<128x128xbf16>, vector<64x128xf32> -> vector<64x128xf32>
    %56 = arith.addf %49, %55 : vector<64x128xf32>
    %c0_60 = arith.constant 0 : index
    %c0_61 = arith.constant 0 : index
    %c0_62 = arith.constant 0 : index
    %c0_63 = arith.constant 0 : index
    %57 = vector.load %arg4[%c0_60, %c0_61, %c0_62, %c0_63] : memref<1x9x9x128xbf16, #tpu.memory_space<vmem>>, vector<1x8x8x128xbf16>
    %58 = vector.shape_cast %57 : vector<1x8x8x128xbf16> to vector<8x8x128xbf16>
    %59 = vector.shape_cast %58 : vector<8x8x128xbf16> to vector<64x128xbf16>
    %c0_64 = arith.constant 0 : index
    %c0_65 = arith.constant 0 : index
    %c0_66 = arith.constant 0 : index
    %60 = vector.load %arg8[%c0_64, %c0_65, %c0_66] : memref<1x128x128xbf16, #tpu.memory_space<vmem>>, vector<1x128x128xbf16>
    %61 = vector.shape_cast %60 : vector<1x128x128xbf16> to vector<128x128xbf16>
    %cst_67 = arith.constant dense<0.000000e+00> : vector<64x128xf32>
    %62 = tpu.matmul %59, %61, %cst_67 {dimension_numbers = #tpu.dot_dimension_numbers<[1], [0], [0], [1], [0, 0, 1, 1], [], []>} : vector<64x128xbf16>, vector<128x128xbf16>, vector<64x128xf32> -> vector<64x128xf32>
    %63 = arith.addf %56, %62 : vector<64x128xf32>
    %c0_68 = arith.constant 0 : index
    %c0_69 = arith.constant 0 : index
    %64 = vector.load %arg9[%c0_68, %c0_69] : memref<1x128xf32, #tpu.memory_space<vmem>>, vector<1x128xf32>
    %65 = vector.broadcast %64 : vector<1x128xf32> to vector<64x128xf32>
    %66 = arith.addf %63, %65 : vector<64x128xf32>
    %cst_70 = arith.constant 0.000000e+00 : f32
    %67 = vector.broadcast %cst_70 : f32 to vector<64x128xf32>
    %68 = arith.cmpf ogt, %66, %67 : vector<64x128xf32>
    %cst_71 = arith.constant 1.000000e-01 : f32
    %69 = vector.broadcast %cst_71 : f32 to vector<64x128xf32>
    %70 = arith.mulf %69, %66 : vector<64x128xf32>
    %71 = arith.select %68, %66, %70 : vector<64x128xi1>, vector<64x128xf32>
    %72 = vector.shape_cast %71 : vector<64x128xf32> to vector<8x8x128xf32>
    %73 = arith.truncf %72 : vector<8x8x128xf32> to vector<8x8x128xbf16>
    %c0_72 = arith.constant 0 : index
    %c0_73 = arith.constant 0 : index
    %c0_74 = arith.constant 0 : index
    %c0_75 = arith.constant 0 : index
    %74 = vector.load %arg10[%c0_72, %c0_73, %c0_74, %c0_75] : memref<1x8x8x128xbf16, #tpu.memory_space<vmem>>, vector<1x8x8x128xbf16>
    %75 = vector.shape_cast %74 : vector<1x8x8x128xbf16> to vector<8x8x128xbf16>
    %76 = vector.shape_cast %73 : vector<8x8x128xbf16> to vector<1x8x8x128xbf16>
    tpu.vector_store %arg10[%c0_72, %c0_73, %c0_74, %c0_75], %76 {strides = array<i32>} : memref<1x8x8x128xbf16, #tpu.memory_space<vmem>>, vector<1x8x8x128xbf16>,
    return
  }
  func.func @transform_0(%arg0: i32) -> (i32, i32, i32, i32) {
    %c0_i32 = arith.constant 0 : i32
    %c0_i32_0 = arith.constant 0 : i32
    %c0_i32_1 = arith.constant 0 : i32
    %c0_i32_2 = arith.constant 0 : i32
    return %arg0, %c0_i32, %c0_i32_0, %c0_i32_1 : i32, i32, i32, i32
  }
  func.func @transform_1(%arg0: i32) -> (i32, i32, i32, i32) {
    %c0_i32 = arith.constant 0 : i32
    %c0_i32_0 = arith.constant 0 : i32
    %c0_i32_1 = arith.constant 0 : i32
    %c0_i32_2 = arith.constant 0 : i32
    return %arg0, %c0_i32, %c0_i32_0, %c0_i32_1 : i32, i32, i32, i32
  }
  func.func @transform_2(%arg0: i32) -> (i32, i32, i32, i32) {
    %c0_i32 = arith.constant 0 : i32
    %c0_i32_0 = arith.constant 0 : i32
    %c0_i32_1 = arith.constant 0 : i32
    %c0_i32_2 = arith.constant 0 : i32
    return %arg0, %c0_i32, %c0_i32_0, %c0_i32_1 : i32, i32, i32, i32
  }
  func.func @transform_3(%arg0: i32) -> (i32, i32, i32, i32) {
    %c0_i32 = arith.constant 0 : i32
    %c0_i32_0 = arith.constant 0 : i32
    %c0_i32_1 = arith.constant 0 : i32
    %c0_i32_2 = arith.constant 0 : i32
    return %arg0, %c0_i32, %c0_i32_0, %c0_i32_1 : i32, i32, i32, i32
  }
  func.func @transform_4(%arg0: i32) -> (i32, i32, i32) {
    %c0_i32 = arith.constant 0 : i32
    %c0_i32_0 = arith.constant 0 : i32
    %c0_i32_1 = arith.constant 0 : i32
    %c0_i32_2 = arith.constant 0 : i32
    return %c0_i32, %c0_i32_0, %c0_i32_1 : i32, i32, i32
  }
  func.func @transform_5(%arg0: i32) -> (i32, i32, i32) {
    %c0_i32 = arith.constant 0 : i32
    %c0_i32_0 = arith.constant 0 : i32
    %c0_i32_1 = arith.constant 0 : i32
    %c0_i32_2 = arith.constant 0 : i32
    return %c0_i32, %c0_i32_0, %c0_i32_1 : i32, i32, i32
  }
  func.func @transform_6(%arg0: i32) -> (i32, i32, i32) {
    %c0_i32 = arith.constant 0 : i32
    %c0_i32_0 = arith.constant 0 : i32
    %c0_i32_1 = arith.constant 0 : i32
    %c0_i32_2 = arith.constant 0 : i32
    return %c0_i32, %c0_i32_0, %c0_i32_1 : i32, i32, i32
  }
  func.func @transform_7(%arg0: i32) -> (i32, i32, i32) {
    %c0_i32 = arith.constant 0 : i32
    %c0_i32_0 = arith.constant 0 : i32
    %c0_i32_1 = arith.constant 0 : i32
    %c0_i32_2 = arith.constant 0 : i32
    return %c0_i32, %c0_i32_0, %c0_i32_1 : i32, i32, i32
  }
  func.func @transform_8(%arg0: i32) -> (i32, i32) {
    %c0_i32 = arith.constant 0 : i32
    %c0_i32_0 = arith.constant 0 : i32
    %c0_i32_1 = arith.constant 0 : i32
    return %c0_i32, %c0_i32_0 : i32, i32
  }
  func.func @transform_9(%arg0: i32) -> (i32, i32, i32, i32) {
    %c0_i32 = arith.constant 0 : i32
    %c0_i32_0 = arith.constant 0 : i32
    %c0_i32_1 = arith.constant 0 : i32
    %c0_i32_2 = arith.constant 0 : i32
    return %arg0, %c0_i32, %c0_i32_0, %c0_i32_1 : i32, i32, i32, i32
  }
}

module attributes {stable_mosaic.version = 11 : i64} {
  func.func @_maxpool_kernel(%arg0: i32, %arg1: memref<1x8x2x8x256xbf16, #tpu.memory_space<vmem>>, %arg2: memref<1x8x8x128xbf16, #tpu.memory_space<vmem>>) attributes {dimension_semantics = [#tpu.dimension_semantics<parallel>], iteration_bounds = array<i64: 2>, scalar_prefetch = 0 : i64, scratch_operands = 0 : i64, tpu.core_type = #tpu.core_type<tc>, window_params = [{transform_indices = @transform_0, window_bounds = array<i64: 1, 8, 2, 8, 256>}, {transform_indices = @transform_1, window_bounds = array<i64: 1, 8, 8, 128>}]} {
    %c0 = arith.constant 0 : index
    %c0_0 = arith.constant 0 : index
    %c0_1 = arith.constant 0 : index
    %c0_2 = arith.constant 0 : index
    %c0_3 = arith.constant 0 : index
    %0 = vector.load %arg1[%c0, %c0_0, %c0_1, %c0_2, %c0_3] : memref<1x8x2x8x256xbf16, #tpu.memory_space<vmem>>, vector<1x8x2x8x256xbf16>
    %1 = vector.shape_cast %0 : vector<1x8x2x8x256xbf16> to vector<8x2x8x256xbf16>
    %cst = arith.constant dense<0xFF80> : vector<8x8x256xbf16>
    %2 = vector.multi_reduction <maximumf>, %1, %cst [1] : vector<8x2x8x256xbf16> to vector<8x8x256xbf16>
    %3 = vector.extract_strided_slice %2 {offsets = [0, 0, 0], sizes = [8, 8, 128], strides = [1, 1, 1]} : vector<8x8x256xbf16> to vector<8x8x128xbf16>
    %4 = vector.extract_strided_slice %2 {offsets = [0, 0, 128], sizes = [8, 8, 128], strides = [1, 1, 1]} : vector<8x8x256xbf16> to vector<8x8x128xbf16>
    %5 = arith.maximumf %3, %4 : vector<8x8x128xbf16>
    %c0_4 = arith.constant 0 : index
    %c0_5 = arith.constant 0 : index
    %c0_6 = arith.constant 0 : index
    %c0_7 = arith.constant 0 : index
    %6 = vector.load %arg2[%c0_4, %c0_5, %c0_6, %c0_7] : memref<1x8x8x128xbf16, #tpu.memory_space<vmem>>, vector<1x8x8x128xbf16>
    %7 = vector.shape_cast %6 : vector<1x8x8x128xbf16> to vector<8x8x128xbf16>
    %8 = vector.shape_cast %5 : vector<8x8x128xbf16> to vector<1x8x8x128xbf16>
    tpu.vector_store %arg2[%c0_4, %c0_5, %c0_6, %c0_7], %8 {strides = array<i32>} : memref<1x8x8x128xbf16, #tpu.memory_space<vmem>>, vector<1x8x8x128xbf16>,
    return
  }
  func.func @transform_0(%arg0: i32) -> (i32, i32, i32, i32, i32) {
    %c0_i32 = arith.constant 0 : i32
    %c0_i32_0 = arith.constant 0 : i32
    %c0_i32_1 = arith.constant 0 : i32
    %c0_i32_2 = arith.constant 0 : i32
    %c0_i32_3 = arith.constant 0 : i32
    return %arg0, %c0_i32, %c0_i32_0, %c0_i32_1, %c0_i32_2 : i32, i32, i32, i32, i32
  }
  func.func @transform_1(%arg0: i32) -> (i32, i32, i32, i32) {
    %c0_i32 = arith.constant 0 : i32
    %c0_i32_0 = arith.constant 0 : i32
    %c0_i32_1 = arith.constant 0 : i32
    %c0_i32_2 = arith.constant 0 : i32
    return %arg0, %c0_i32, %c0_i32_0, %c0_i32_1 : i32, i32, i32, i32
  }
}

module attributes {stable_mosaic.version = 11 : i64} {
  func.func @_conv_kernel(%arg0: i32, %arg1: memref<1x8x8x128xbf16, #tpu.memory_space<vmem>>, %arg2: memref<1x128x128xbf16, #tpu.memory_space<vmem>>, %arg3: memref<1x128xf32, #tpu.memory_space<vmem>>, %arg4: memref<1x8x8x128xbf16, #tpu.memory_space<vmem>>) attributes {dimension_semantics = [#tpu.dimension_semantics<parallel>], iteration_bounds = array<i64: 2>, scalar_prefetch = 0 : i64, scratch_operands = 0 : i64, tpu.core_type = #tpu.core_type<tc>, window_params = [{transform_indices = @transform_0, window_bounds = array<i64: 1, 8, 8, 128>}, {pipeline_mode = #tpu.pipeline_mode<synchronous>, transform_indices = @transform_1, window_bounds = array<i64: 1, 128, 128>}, {pipeline_mode = #tpu.pipeline_mode<synchronous>, transform_indices = @transform_2, window_bounds = array<i64: 1, 128>}, {transform_indices = @transform_3, window_bounds = array<i64: 1, 8, 8, 128>}]} {
    %cst = arith.constant 0.000000e+00 : f32
    %0 = vector.broadcast %cst : f32 to vector<64x128xf32>
    %c0 = arith.constant 0 : index
    %c0_0 = arith.constant 0 : index
    %c0_1 = arith.constant 0 : index
    %c0_2 = arith.constant 0 : index
    %1 = vector.load %arg1[%c0, %c0_0, %c0_1, %c0_2] : memref<1x8x8x128xbf16, #tpu.memory_space<vmem>>, vector<1x8x8x128xbf16>
    %2 = vector.shape_cast %1 : vector<1x8x8x128xbf16> to vector<8x8x128xbf16>
    %3 = vector.shape_cast %2 : vector<8x8x128xbf16> to vector<64x128xbf16>
    %c0_3 = arith.constant 0 : index
    %c0_4 = arith.constant 0 : index
    %c0_5 = arith.constant 0 : index
    %4 = vector.load %arg2[%c0_3, %c0_4, %c0_5] : memref<1x128x128xbf16, #tpu.memory_space<vmem>>, vector<1x128x128xbf16>
    %5 = vector.shape_cast %4 : vector<1x128x128xbf16> to vector<128x128xbf16>
    %cst_6 = arith.constant dense<0.000000e+00> : vector<64x128xf32>
    %6 = tpu.matmul %3, %5, %cst_6 {dimension_numbers = #tpu.dot_dimension_numbers<[1], [0], [0], [1], [0, 0, 1, 1], [], []>} : vector<64x128xbf16>, vector<128x128xbf16>, vector<64x128xf32> -> vector<64x128xf32>
    %7 = arith.addf %0, %6 : vector<64x128xf32>
    %c0_7 = arith.constant 0 : index
    %c0_8 = arith.constant 0 : index
    %8 = vector.load %arg3[%c0_7, %c0_8] : memref<1x128xf32, #tpu.memory_space<vmem>>, vector<1x128xf32>
    %9 = vector.broadcast %8 : vector<1x128xf32> to vector<64x128xf32>
    %10 = arith.addf %7, %9 : vector<64x128xf32>
    %cst_9 = arith.constant 0.000000e+00 : f32
    %11 = vector.broadcast %cst_9 : f32 to vector<64x128xf32>
    %12 = arith.cmpf ogt, %10, %11 : vector<64x128xf32>
    %cst_10 = arith.constant 1.000000e-01 : f32
    %13 = vector.broadcast %cst_10 : f32 to vector<64x128xf32>
    %14 = arith.mulf %13, %10 : vector<64x128xf32>
    %15 = arith.select %12, %10, %14 : vector<64x128xi1>, vector<64x128xf32>
    %16 = vector.shape_cast %15 : vector<64x128xf32> to vector<8x8x128xf32>
    %17 = arith.truncf %16 : vector<8x8x128xf32> to vector<8x8x128xbf16>
    %c0_11 = arith.constant 0 : index
    %c0_12 = arith.constant 0 : index
    %c0_13 = arith.constant 0 : index
    %c0_14 = arith.constant 0 : index
    %18 = vector.load %arg4[%c0_11, %c0_12, %c0_13, %c0_14] : memref<1x8x8x128xbf16, #tpu.memory_space<vmem>>, vector<1x8x8x128xbf16>
    %19 = vector.shape_cast %18 : vector<1x8x8x128xbf16> to vector<8x8x128xbf16>
    %20 = vector.shape_cast %17 : vector<8x8x128xbf16> to vector<1x8x8x128xbf16>
    tpu.vector_store %arg4[%c0_11, %c0_12, %c0_13, %c0_14], %20 {strides = array<i32>} : memref<1x8x8x128xbf16, #tpu.memory_space<vmem>>, vector<1x8x8x128xbf16>,
    return
  }
  func.func @transform_0(%arg0: i32) -> (i32, i32, i32, i32) {
    %c0_i32 = arith.constant 0 : i32
    %c0_i32_0 = arith.constant 0 : i32
    %c0_i32_1 = arith.constant 0 : i32
    %c0_i32_2 = arith.constant 0 : i32
    return %arg0, %c0_i32, %c0_i32_0, %c0_i32_1 : i32, i32, i32, i32
  }
  func.func @transform_1(%arg0: i32) -> (i32, i32, i32) {
    %c0_i32 = arith.constant 0 : i32
    %c0_i32_0 = arith.constant 0 : i32
    %c0_i32_1 = arith.constant 0 : i32
    %c0_i32_2 = arith.constant 0 : i32
    return %c0_i32, %c0_i32_0, %c0_i32_1 : i32, i32, i32
  }
  func.func @transform_2(%arg0: i32) -> (i32, i32) {
    %c0_i32 = arith.constant 0 : i32
    %c0_i32_0 = arith.constant 0 : i32
    %c0_i32_1 = arith.constant 0 : i32
    return %c0_i32, %c0_i32_0 : i32, i32
  }
  func.func @transform_3(%arg0: i32) -> (i32, i32, i32, i32) {
    %c0_i32 = arith.constant 0 : i32
    %c0_i32_0 = arith.constant 0 : i32
    %c0_i32_1 = arith.constant 0 : i32
    %c0_i32_2 = arith.constant 0 : i32
    return %arg0, %c0_i32, %c0_i32_0, %c0_i32_1 : i32, i32, i32, i32
  }
}

module attributes {stable_mosaic.version = 11 : i64} {
  func.func @_conv_kernel(%arg0: i32, %arg1: memref<1x10x10x128xbf16, #tpu.memory_space<vmem>>, %arg2: memref<1x10x10x128xbf16, #tpu.memory_space<vmem>>, %arg3: memref<1x10x10x128xbf16, #tpu.memory_space<vmem>>, %arg4: memref<9x128x128xbf16, #tpu.memory_space<vmem>>, %arg5: memref<9x128x128xbf16, #tpu.memory_space<vmem>>, %arg6: memref<9x128x128xbf16, #tpu.memory_space<vmem>>, %arg7: memref<1x128xf32, #tpu.memory_space<vmem>>, %arg8: memref<1x8x8x128xbf16, #tpu.memory_space<vmem>>) attributes {dimension_semantics = [#tpu.dimension_semantics<parallel>], iteration_bounds = array<i64: 2>, scalar_prefetch = 0 : i64, scratch_operands = 0 : i64, tpu.core_type = #tpu.core_type<tc>, window_params = [{transform_indices = @transform_0, window_bounds = array<i64: 1, 10, 10, 128>}, {transform_indices = @transform_1, window_bounds = array<i64: 1, 10, 10, 128>}, {transform_indices = @transform_2, window_bounds = array<i64: 1, 10, 10, 128>}, {pipeline_mode = #tpu.pipeline_mode<synchronous>, transform_indices = @transform_3, window_bounds = array<i64: 9, 128, 128>}, {pipeline_mode = #tpu.pipeline_mode<synchronous>, transform_indices = @transform_4, window_bounds = array<i64: 9, 128, 128>}, {pipeline_mode = #tpu.pipeline_mode<synchronous>, transform_indices = @transform_5, window_bounds = array<i64: 9, 128, 128>}, {pipeline_mode = #tpu.pipeline_mode<synchronous>, transform_indices = @transform_6, window_bounds = array<i64: 1, 128>}, {transform_indices = @transform_7, window_bounds = array<i64: 1, 8, 8, 128>}]} {
    %cst = arith.constant 0.000000e+00 : f32
    %0 = vector.broadcast %cst : f32 to vector<64x128xf32>
    %c0 = arith.constant 0 : index
    %c0_0 = arith.constant 0 : index
    %c0_1 = arith.constant 0 : index
    %c0_2 = arith.constant 0 : index
    %1 = vector.load %arg1[%c0, %c0_0, %c0_1, %c0_2] : memref<1x10x10x128xbf16, #tpu.memory_space<vmem>>, vector<1x8x8x128xbf16>
    %2 = vector.shape_cast %1 : vector<1x8x8x128xbf16> to vector<8x8x128xbf16>
    %3 = vector.shape_cast %2 : vector<8x8x128xbf16> to vector<64x128xbf16>
    %c0_3 = arith.constant 0 : index
    %c0_4 = arith.constant 0 : index
    %c0_5 = arith.constant 0 : index
    %4 = vector.load %arg4[%c0_3, %c0_4, %c0_5] : memref<9x128x128xbf16, #tpu.memory_space<vmem>>, vector<1x128x128xbf16>
    %5 = vector.shape_cast %4 : vector<1x128x128xbf16> to vector<128x128xbf16>
    %cst_6 = arith.constant dense<0.000000e+00> : vector<64x128xf32>
    %6 = tpu.matmul %3, %5, %cst_6 {dimension_numbers = #tpu.dot_dimension_numbers<[1], [0], [0], [1], [0, 0, 1, 1], [], []>} : vector<64x128xbf16>, vector<128x128xbf16>, vector<64x128xf32> -> vector<64x128xf32>
    %7 = arith.addf %0, %6 : vector<64x128xf32>
    %c0_7 = arith.constant 0 : index
    %c0_8 = arith.constant 0 : index
    %c1 = arith.constant 1 : index
    %c0_9 = arith.constant 0 : index
    %8 = vector.load %arg1[%c0_7, %c0_8, %c1, %c0_9] : memref<1x10x10x128xbf16, #tpu.memory_space<vmem>>, vector<1x8x8x128xbf16>
    %9 = vector.shape_cast %8 : vector<1x8x8x128xbf16> to vector<8x8x128xbf16>
    %10 = vector.shape_cast %9 : vector<8x8x128xbf16> to vector<64x128xbf16>
    %c1_10 = arith.constant 1 : index
    %c0_11 = arith.constant 0 : index
    %c0_12 = arith.constant 0 : index
    %11 = vector.load %arg4[%c1_10, %c0_11, %c0_12] : memref<9x128x128xbf16, #tpu.memory_space<vmem>>, vector<1x128x128xbf16>
    %12 = vector.shape_cast %11 : vector<1x128x128xbf16> to vector<128x128xbf16>
    %cst_13 = arith.constant dense<0.000000e+00> : vector<64x128xf32>
    %13 = tpu.matmul %10, %12, %cst_13 {dimension_numbers = #tpu.dot_dimension_numbers<[1], [0], [0], [1], [0, 0, 1, 1], [], []>} : vector<64x128xbf16>, vector<128x128xbf16>, vector<64x128xf32> -> vector<64x128xf32>
    %14 = arith.addf %7, %13 : vector<64x128xf32>
    %c0_14 = arith.constant 0 : index
    %c0_15 = arith.constant 0 : index
    %c2 = arith.constant 2 : index
    %c0_16 = arith.constant 0 : index
    %15 = vector.load %arg1[%c0_14, %c0_15, %c2, %c0_16] : memref<1x10x10x128xbf16, #tpu.memory_space<vmem>>, vector<1x8x8x128xbf16>
    %16 = vector.shape_cast %15 : vector<1x8x8x128xbf16> to vector<8x8x128xbf16>
    %17 = vector.shape_cast %16 : vector<8x8x128xbf16> to vector<64x128xbf16>
    %c2_17 = arith.constant 2 : index
    %c0_18 = arith.constant 0 : index
    %c0_19 = arith.constant 0 : index
    %18 = vector.load %arg4[%c2_17, %c0_18, %c0_19] : memref<9x128x128xbf16, #tpu.memory_space<vmem>>, vector<1x128x128xbf16>
    %19 = vector.shape_cast %18 : vector<1x128x128xbf16> to vector<128x128xbf16>
    %cst_20 = arith.constant dense<0.000000e+00> : vector<64x128xf32>
    %20 = tpu.matmul %17, %19, %cst_20 {dimension_numbers = #tpu.dot_dimension_numbers<[1], [0], [0], [1], [0, 0, 1, 1], [], []>} : vector<64x128xbf16>, vector<128x128xbf16>, vector<64x128xf32> -> vector<64x128xf32>
    %21 = arith.addf %14, %20 : vector<64x128xf32>
    %c0_21 = arith.constant 0 : index
    %c1_22 = arith.constant 1 : index
    %c0_23 = arith.constant 0 : index
    %c0_24 = arith.constant 0 : index
    %22 = vector.load %arg1[%c0_21, %c1_22, %c0_23, %c0_24] : memref<1x10x10x128xbf16, #tpu.memory_space<vmem>>, vector<1x8x8x128xbf16>
    %23 = vector.shape_cast %22 : vector<1x8x8x128xbf16> to vector<8x8x128xbf16>
    %24 = vector.shape_cast %23 : vector<8x8x128xbf16> to vector<64x128xbf16>
    %c3 = arith.constant 3 : index
    %c0_25 = arith.constant 0 : index
    %c0_26 = arith.constant 0 : index
    %25 = vector.load %arg4[%c3, %c0_25, %c0_26] : memref<9x128x128xbf16, #tpu.memory_space<vmem>>, vector<1x128x128xbf16>
    %26 = vector.shape_cast %25 : vector<1x128x128xbf16> to vector<128x128xbf16>
    %cst_27 = arith.constant dense<0.000000e+00> : vector<64x128xf32>
    %27 = tpu.matmul %24, %26, %cst_27 {dimension_numbers = #tpu.dot_dimension_numbers<[1], [0], [0], [1], [0, 0, 1, 1], [], []>} : vector<64x128xbf16>, vector<128x128xbf16>, vector<64x128xf32> -> vector<64x128xf32>
    %28 = arith.addf %21, %27 : vector<64x128xf32>
    %c0_28 = arith.constant 0 : index
    %c1_29 = arith.constant 1 : index
    %c1_30 = arith.constant 1 : index
    %c0_31 = arith.constant 0 : index
    %29 = vector.load %arg1[%c0_28, %c1_29, %c1_30, %c0_31] : memref<1x10x10x128xbf16, #tpu.memory_space<vmem>>, vector<1x8x8x128xbf16>
    %30 = vector.shape_cast %29 : vector<1x8x8x128xbf16> to vector<8x8x128xbf16>
    %31 = vector.shape_cast %30 : vector<8x8x128xbf16> to vector<64x128xbf16>
    %c4 = arith.constant 4 : index
    %c0_32 = arith.constant 0 : index
    %c0_33 = arith.constant 0 : index
    %32 = vector.load %arg4[%c4, %c0_32, %c0_33] : memref<9x128x128xbf16, #tpu.memory_space<vmem>>, vector<1x128x128xbf16>
    %33 = vector.shape_cast %32 : vector<1x128x128xbf16> to vector<128x128xbf16>
    %cst_34 = arith.constant dense<0.000000e+00> : vector<64x128xf32>
    %34 = tpu.matmul %31, %33, %cst_34 {dimension_numbers = #tpu.dot_dimension_numbers<[1], [0], [0], [1], [0, 0, 1, 1], [], []>} : vector<64x128xbf16>, vector<128x128xbf16>, vector<64x128xf32> -> vector<64x128xf32>
    %35 = arith.addf %28, %34 : vector<64x128xf32>
    %c0_35 = arith.constant 0 : index
    %c1_36 = arith.constant 1 : index
    %c2_37 = arith.constant 2 : index
    %c0_38 = arith.constant 0 : index
    %36 = vector.load %arg1[%c0_35, %c1_36, %c2_37, %c0_38] : memref<1x10x10x128xbf16, #tpu.memory_space<vmem>>, vector<1x8x8x128xbf16>
    %37 = vector.shape_cast %36 : vector<1x8x8x128xbf16> to vector<8x8x128xbf16>
    %38 = vector.shape_cast %37 : vector<8x8x128xbf16> to vector<64x128xbf16>
    %c5 = arith.constant 5 : index
    %c0_39 = arith.constant 0 : index
    %c0_40 = arith.constant 0 : index
    %39 = vector.load %arg4[%c5, %c0_39, %c0_40] : memref<9x128x128xbf16, #tpu.memory_space<vmem>>, vector<1x128x128xbf16>
    %40 = vector.shape_cast %39 : vector<1x128x128xbf16> to vector<128x128xbf16>
    %cst_41 = arith.constant dense<0.000000e+00> : vector<64x128xf32>
    %41 = tpu.matmul %38, %40, %cst_41 {dimension_numbers = #tpu.dot_dimension_numbers<[1], [0], [0], [1], [0, 0, 1, 1], [], []>} : vector<64x128xbf16>, vector<128x128xbf16>, vector<64x128xf32> -> vector<64x128xf32>
    %42 = arith.addf %35, %41 : vector<64x128xf32>
    %c0_42 = arith.constant 0 : index
    %c2_43 = arith.constant 2 : index
    %c0_44 = arith.constant 0 : index
    %c0_45 = arith.constant 0 : index
    %43 = vector.load %arg1[%c0_42, %c2_43, %c0_44, %c0_45] : memref<1x10x10x128xbf16, #tpu.memory_space<vmem>>, vector<1x8x8x128xbf16>
    %44 = vector.shape_cast %43 : vector<1x8x8x128xbf16> to vector<8x8x128xbf16>
    %45 = vector.shape_cast %44 : vector<8x8x128xbf16> to vector<64x128xbf16>
    %c6 = arith.constant 6 : index
    %c0_46 = arith.constant 0 : index
    %c0_47 = arith.constant 0 : index
    %46 = vector.load %arg4[%c6, %c0_46, %c0_47] : memref<9x128x128xbf16, #tpu.memory_space<vmem>>, vector<1x128x128xbf16>
    %47 = vector.shape_cast %46 : vector<1x128x128xbf16> to vector<128x128xbf16>
    %cst_48 = arith.constant dense<0.000000e+00> : vector<64x128xf32>
    %48 = tpu.matmul %45, %47, %cst_48 {dimension_numbers = #tpu.dot_dimension_numbers<[1], [0], [0], [1], [0, 0, 1, 1], [], []>} : vector<64x128xbf16>, vector<128x128xbf16>, vector<64x128xf32> -> vector<64x128xf32>
    %49 = arith.addf %42, %48 : vector<64x128xf32>
    %c0_49 = arith.constant 0 : index
    %c2_50 = arith.constant 2 : index
    %c1_51 = arith.constant 1 : index
    %c0_52 = arith.constant 0 : index
    %50 = vector.load %arg1[%c0_49, %c2_50, %c1_51, %c0_52] : memref<1x10x10x128xbf16, #tpu.memory_space<vmem>>, vector<1x8x8x128xbf16>
    %51 = vector.shape_cast %50 : vector<1x8x8x128xbf16> to vector<8x8x128xbf16>
    %52 = vector.shape_cast %51 : vector<8x8x128xbf16> to vector<64x128xbf16>
    %c7 = arith.constant 7 : index
    %c0_53 = arith.constant 0 : index
    %c0_54 = arith.constant 0 : index
    %53 = vector.load %arg4[%c7, %c0_53, %c0_54] : memref<9x128x128xbf16, #tpu.memory_space<vmem>>, vector<1x128x128xbf16>
    %54 = vector.shape_cast %53 : vector<1x128x128xbf16> to vector<128x128xbf16>
    %cst_55 = arith.constant dense<0.000000e+00> : vector<64x128xf32>
    %55 = tpu.matmul %52, %54, %cst_55 {dimension_numbers = #tpu.dot_dimension_numbers<[1], [0], [0], [1], [0, 0, 1, 1], [], []>} : vector<64x128xbf16>, vector<128x128xbf16>, vector<64x128xf32> -> vector<64x128xf32>
    %56 = arith.addf %49, %55 : vector<64x128xf32>
    %c0_56 = arith.constant 0 : index
    %c2_57 = arith.constant 2 : index
    %c2_58 = arith.constant 2 : index
    %c0_59 = arith.constant 0 : index
    %57 = vector.load %arg1[%c0_56, %c2_57, %c2_58, %c0_59] : memref<1x10x10x128xbf16, #tpu.memory_space<vmem>>, vector<1x8x8x128xbf16>
    %58 = vector.shape_cast %57 : vector<1x8x8x128xbf16> to vector<8x8x128xbf16>
    %59 = vector.shape_cast %58 : vector<8x8x128xbf16> to vector<64x128xbf16>
    %c8 = arith.constant 8 : index
    %c0_60 = arith.constant 0 : index
    %c0_61 = arith.constant 0 : index
    %60 = vector.load %arg4[%c8, %c0_60, %c0_61] : memref<9x128x128xbf16, #tpu.memory_space<vmem>>, vector<1x128x128xbf16>
    %61 = vector.shape_cast %60 : vector<1x128x128xbf16> to vector<128x128xbf16>
    %cst_62 = arith.constant dense<0.000000e+00> : vector<64x128xf32>
    %62 = tpu.matmul %59, %61, %cst_62 {dimension_numbers = #tpu.dot_dimension_numbers<[1], [0], [0], [1], [0, 0, 1, 1], [], []>} : vector<64x128xbf16>, vector<128x128xbf16>, vector<64x128xf32> -> vector<64x128xf32>
    %63 = arith.addf %56, %62 : vector<64x128xf32>
    %c0_63 = arith.constant 0 : index
    %c0_64 = arith.constant 0 : index
    %c0_65 = arith.constant 0 : index
    %c0_66 = arith.constant 0 : index
    %64 = vector.load %arg2[%c0_63, %c0_64, %c0_65, %c0_66] : memref<1x10x10x128xbf16, #tpu.memory_space<vmem>>, vector<1x8x8x128xbf16>
    %65 = vector.shape_cast %64 : vector<1x8x8x128xbf16> to vector<8x8x128xbf16>
    %66 = vector.shape_cast %65 : vector<8x8x128xbf16> to vector<64x128xbf16>
    %c0_67 = arith.constant 0 : index
    %c0_68 = arith.constant 0 : index
    %c0_69 = arith.constant 0 : index
    %67 = vector.load %arg5[%c0_67, %c0_68, %c0_69] : memref<9x128x128xbf16, #tpu.memory_space<vmem>>, vector<1x128x128xbf16>
    %68 = vector.shape_cast %67 : vector<1x128x128xbf16> to vector<128x128xbf16>
    %cst_70 = arith.constant dense<0.000000e+00> : vector<64x128xf32>
    %69 = tpu.matmul %66, %68, %cst_70 {dimension_numbers = #tpu.dot_dimension_numbers<[1], [0], [0], [1], [0, 0, 1, 1], [], []>} : vector<64x128xbf16>, vector<128x128xbf16>, vector<64x128xf32> -> vector<64x128xf32>
    %70 = arith.addf %63, %69 : vector<64x128xf32>
    %c0_71 = arith.constant 0 : index
    %c0_72 = arith.constant 0 : index
    %c1_73 = arith.constant 1 : index
    %c0_74 = arith.constant 0 : index
    %71 = vector.load %arg2[%c0_71, %c0_72, %c1_73, %c0_74] : memref<1x10x10x128xbf16, #tpu.memory_space<vmem>>, vector<1x8x8x128xbf16>
    %72 = vector.shape_cast %71 : vector<1x8x8x128xbf16> to vector<8x8x128xbf16>
    %73 = vector.shape_cast %72 : vector<8x8x128xbf16> to vector<64x128xbf16>
    %c1_75 = arith.constant 1 : index
    %c0_76 = arith.constant 0 : index
    %c0_77 = arith.constant 0 : index
    %74 = vector.load %arg5[%c1_75, %c0_76, %c0_77] : memref<9x128x128xbf16, #tpu.memory_space<vmem>>, vector<1x128x128xbf16>
    %75 = vector.shape_cast %74 : vector<1x128x128xbf16> to vector<128x128xbf16>
    %cst_78 = arith.constant dense<0.000000e+00> : vector<64x128xf32>
    %76 = tpu.matmul %73, %75, %cst_78 {dimension_numbers = #tpu.dot_dimension_numbers<[1], [0], [0], [1], [0, 0, 1, 1], [], []>} : vector<64x128xbf16>, vector<128x128xbf16>, vector<64x128xf32> -> vector<64x128xf32>
    %77 = arith.addf %70, %76 : vector<64x128xf32>
    %c0_79 = arith.constant 0 : index
    %c0_80 = arith.constant 0 : index
    %c2_81 = arith.constant 2 : index
    %c0_82 = arith.constant 0 : index
    %78 = vector.load %arg2[%c0_79, %c0_80, %c2_81, %c0_82] : memref<1x10x10x128xbf16, #tpu.memory_space<vmem>>, vector<1x8x8x128xbf16>
    %79 = vector.shape_cast %78 : vector<1x8x8x128xbf16> to vector<8x8x128xbf16>
    %80 = vector.shape_cast %79 : vector<8x8x128xbf16> to vector<64x128xbf16>
    %c2_83 = arith.constant 2 : index
    %c0_84 = arith.constant 0 : index
    %c0_85 = arith.constant 0 : index
    %81 = vector.load %arg5[%c2_83, %c0_84, %c0_85] : memref<9x128x128xbf16, #tpu.memory_space<vmem>>, vector<1x128x128xbf16>
    %82 = vector.shape_cast %81 : vector<1x128x128xbf16> to vector<128x128xbf16>
    %cst_86 = arith.constant dense<0.000000e+00> : vector<64x128xf32>
    %83 = tpu.matmul %80, %82, %cst_86 {dimension_numbers = #tpu.dot_dimension_numbers<[1], [0], [0], [1], [0, 0, 1, 1], [], []>} : vector<64x128xbf16>, vector<128x128xbf16>, vector<64x128xf32> -> vector<64x128xf32>
    %84 = arith.addf %77, %83 : vector<64x128xf32>
    %c0_87 = arith.constant 0 : index
    %c1_88 = arith.constant 1 : index
    %c0_89 = arith.constant 0 : index
    %c0_90 = arith.constant 0 : index
    %85 = vector.load %arg2[%c0_87, %c1_88, %c0_89, %c0_90] : memref<1x10x10x128xbf16, #tpu.memory_space<vmem>>, vector<1x8x8x128xbf16>
    %86 = vector.shape_cast %85 : vector<1x8x8x128xbf16> to vector<8x8x128xbf16>
    %87 = vector.shape_cast %86 : vector<8x8x128xbf16> to vector<64x128xbf16>
    %c3_91 = arith.constant 3 : index
    %c0_92 = arith.constant 0 : index
    %c0_93 = arith.constant 0 : index
    %88 = vector.load %arg5[%c3_91, %c0_92, %c0_93] : memref<9x128x128xbf16, #tpu.memory_space<vmem>>, vector<1x128x128xbf16>
    %89 = vector.shape_cast %88 : vector<1x128x128xbf16> to vector<128x128xbf16>
    %cst_94 = arith.constant dense<0.000000e+00> : vector<64x128xf32>
    %90 = tpu.matmul %87, %89, %cst_94 {dimension_numbers = #tpu.dot_dimension_numbers<[1], [0], [0], [1], [0, 0, 1, 1], [], []>} : vector<64x128xbf16>, vector<128x128xbf16>, vector<64x128xf32> -> vector<64x128xf32>
    %91 = arith.addf %84, %90 : vector<64x128xf32>
    %c0_95 = arith.constant 0 : index
    %c1_96 = arith.constant 1 : index
    %c1_97 = arith.constant 1 : index
    %c0_98 = arith.constant 0 : index
    %92 = vector.load %arg2[%c0_95, %c1_96, %c1_97, %c0_98] : memref<1x10x10x128xbf16, #tpu.memory_space<vmem>>, vector<1x8x8x128xbf16>
    %93 = vector.shape_cast %92 : vector<1x8x8x128xbf16> to vector<8x8x128xbf16>
    %94 = vector.shape_cast %93 : vector<8x8x128xbf16> to vector<64x128xbf16>
    %c4_99 = arith.constant 4 : index
    %c0_100 = arith.constant 0 : index
    %c0_101 = arith.constant 0 : index
    %95 = vector.load %arg5[%c4_99, %c0_100, %c0_101] : memref<9x128x128xbf16, #tpu.memory_space<vmem>>, vector<1x128x128xbf16>
    %96 = vector.shape_cast %95 : vector<1x128x128xbf16> to vector<128x128xbf16>
    %cst_102 = arith.constant dense<0.000000e+00> : vector<64x128xf32>
    %97 = tpu.matmul %94, %96, %cst_102 {dimension_numbers = #tpu.dot_dimension_numbers<[1], [0], [0], [1], [0, 0, 1, 1], [], []>} : vector<64x128xbf16>, vector<128x128xbf16>, vector<64x128xf32> -> vector<64x128xf32>
    %98 = arith.addf %91, %97 : vector<64x128xf32>
    %c0_103 = arith.constant 0 : index
    %c1_104 = arith.constant 1 : index
    %c2_105 = arith.constant 2 : index
    %c0_106 = arith.constant 0 : index
    %99 = vector.load %arg2[%c0_103, %c1_104, %c2_105, %c0_106] : memref<1x10x10x128xbf16, #tpu.memory_space<vmem>>, vector<1x8x8x128xbf16>
    %100 = vector.shape_cast %99 : vector<1x8x8x128xbf16> to vector<8x8x128xbf16>
    %101 = vector.shape_cast %100 : vector<8x8x128xbf16> to vector<64x128xbf16>
    %c5_107 = arith.constant 5 : index
    %c0_108 = arith.constant 0 : index
    %c0_109 = arith.constant 0 : index
    %102 = vector.load %arg5[%c5_107, %c0_108, %c0_109] : memref<9x128x128xbf16, #tpu.memory_space<vmem>>, vector<1x128x128xbf16>
    %103 = vector.shape_cast %102 : vector<1x128x128xbf16> to vector<128x128xbf16>
    %cst_110 = arith.constant dense<0.000000e+00> : vector<64x128xf32>
    %104 = tpu.matmul %101, %103, %cst_110 {dimension_numbers = #tpu.dot_dimension_numbers<[1], [0], [0], [1], [0, 0, 1, 1], [], []>} : vector<64x128xbf16>, vector<128x128xbf16>, vector<64x128xf32> -> vector<64x128xf32>
    %105 = arith.addf %98, %104 : vector<64x128xf32>
    %c0_111 = arith.constant 0 : index
    %c2_112 = arith.constant 2 : index
    %c0_113 = arith.constant 0 : index
    %c0_114 = arith.constant 0 : index
    %106 = vector.load %arg2[%c0_111, %c2_112, %c0_113, %c0_114] : memref<1x10x10x128xbf16, #tpu.memory_space<vmem>>, vector<1x8x8x128xbf16>
    %107 = vector.shape_cast %106 : vector<1x8x8x128xbf16> to vector<8x8x128xbf16>
    %108 = vector.shape_cast %107 : vector<8x8x128xbf16> to vector<64x128xbf16>
    %c6_115 = arith.constant 6 : index
    %c0_116 = arith.constant 0 : index
    %c0_117 = arith.constant 0 : index
    %109 = vector.load %arg5[%c6_115, %c0_116, %c0_117] : memref<9x128x128xbf16, #tpu.memory_space<vmem>>, vector<1x128x128xbf16>
    %110 = vector.shape_cast %109 : vector<1x128x128xbf16> to vector<128x128xbf16>
    %cst_118 = arith.constant dense<0.000000e+00> : vector<64x128xf32>
    %111 = tpu.matmul %108, %110, %cst_118 {dimension_numbers = #tpu.dot_dimension_numbers<[1], [0], [0], [1], [0, 0, 1, 1], [], []>} : vector<64x128xbf16>, vector<128x128xbf16>, vector<64x128xf32> -> vector<64x128xf32>
    %112 = arith.addf %105, %111 : vector<64x128xf32>
    %c0_119 = arith.constant 0 : index
    %c2_120 = arith.constant 2 : index
    %c1_121 = arith.constant 1 : index
    %c0_122 = arith.constant 0 : index
    %113 = vector.load %arg2[%c0_119, %c2_120, %c1_121, %c0_122] : memref<1x10x10x128xbf16, #tpu.memory_space<vmem>>, vector<1x8x8x128xbf16>
    %114 = vector.shape_cast %113 : vector<1x8x8x128xbf16> to vector<8x8x128xbf16>
    %115 = vector.shape_cast %114 : vector<8x8x128xbf16> to vector<64x128xbf16>
    %c7_123 = arith.constant 7 : index
    %c0_124 = arith.constant 0 : index
    %c0_125 = arith.constant 0 : index
    %116 = vector.load %arg5[%c7_123, %c0_124, %c0_125] : memref<9x128x128xbf16, #tpu.memory_space<vmem>>, vector<1x128x128xbf16>
    %117 = vector.shape_cast %116 : vector<1x128x128xbf16> to vector<128x128xbf16>
    %cst_126 = arith.constant dense<0.000000e+00> : vector<64x128xf32>
    %118 = tpu.matmul %115, %117, %cst_126 {dimension_numbers = #tpu.dot_dimension_numbers<[1], [0], [0], [1], [0, 0, 1, 1], [], []>} : vector<64x128xbf16>, vector<128x128xbf16>, vector<64x128xf32> -> vector<64x128xf32>
    %119 = arith.addf %112, %118 : vector<64x128xf32>
    %c0_127 = arith.constant 0 : index
    %c2_128 = arith.constant 2 : index
    %c2_129 = arith.constant 2 : index
    %c0_130 = arith.constant 0 : index
    %120 = vector.load %arg2[%c0_127, %c2_128, %c2_129, %c0_130] : memref<1x10x10x128xbf16, #tpu.memory_space<vmem>>, vector<1x8x8x128xbf16>
    %121 = vector.shape_cast %120 : vector<1x8x8x128xbf16> to vector<8x8x128xbf16>
    %122 = vector.shape_cast %121 : vector<8x8x128xbf16> to vector<64x128xbf16>
    %c8_131 = arith.constant 8 : index
    %c0_132 = arith.constant 0 : index
    %c0_133 = arith.constant 0 : index
    %123 = vector.load %arg5[%c8_131, %c0_132, %c0_133] : memref<9x128x128xbf16, #tpu.memory_space<vmem>>, vector<1x128x128xbf16>
    %124 = vector.shape_cast %123 : vector<1x128x128xbf16> to vector<128x128xbf16>
    %cst_134 = arith.constant dense<0.000000e+00> : vector<64x128xf32>
    %125 = tpu.matmul %122, %124, %cst_134 {dimension_numbers = #tpu.dot_dimension_numbers<[1], [0], [0], [1], [0, 0, 1, 1], [], []>} : vector<64x128xbf16>, vector<128x128xbf16>, vector<64x128xf32> -> vector<64x128xf32>
    %126 = arith.addf %119, %125 : vector<64x128xf32>
    %c0_135 = arith.constant 0 : index
    %c0_136 = arith.constant 0 : index
    %c0_137 = arith.constant 0 : index
    %c0_138 = arith.constant 0 : index
    %127 = vector.load %arg3[%c0_135, %c0_136, %c0_137, %c0_138] : memref<1x10x10x128xbf16, #tpu.memory_space<vmem>>, vector<1x8x8x128xbf16>
    %128 = vector.shape_cast %127 : vector<1x8x8x128xbf16> to vector<8x8x128xbf16>
    %129 = vector.shape_cast %128 : vector<8x8x128xbf16> to vector<64x128xbf16>
    %c0_139 = arith.constant 0 : index
    %c0_140 = arith.constant 0 : index
    %c0_141 = arith.constant 0 : index
    %130 = vector.load %arg6[%c0_139, %c0_140, %c0_141] : memref<9x128x128xbf16, #tpu.memory_space<vmem>>, vector<1x128x128xbf16>
    %131 = vector.shape_cast %130 : vector<1x128x128xbf16> to vector<128x128xbf16>
    %cst_142 = arith.constant dense<0.000000e+00> : vector<64x128xf32>
    %132 = tpu.matmul %129, %131, %cst_142 {dimension_numbers = #tpu.dot_dimension_numbers<[1], [0], [0], [1], [0, 0, 1, 1], [], []>} : vector<64x128xbf16>, vector<128x128xbf16>, vector<64x128xf32> -> vector<64x128xf32>
    %133 = arith.addf %126, %132 : vector<64x128xf32>
    %c0_143 = arith.constant 0 : index
    %c0_144 = arith.constant 0 : index
    %c1_145 = arith.constant 1 : index
    %c0_146 = arith.constant 0 : index
    %134 = vector.load %arg3[%c0_143, %c0_144, %c1_145, %c0_146] : memref<1x10x10x128xbf16, #tpu.memory_space<vmem>>, vector<1x8x8x128xbf16>
    %135 = vector.shape_cast %134 : vector<1x8x8x128xbf16> to vector<8x8x128xbf16>
    %136 = vector.shape_cast %135 : vector<8x8x128xbf16> to vector<64x128xbf16>
    %c1_147 = arith.constant 1 : index
    %c0_148 = arith.constant 0 : index
    %c0_149 = arith.constant 0 : index
    %137 = vector.load %arg6[%c1_147, %c0_148, %c0_149] : memref<9x128x128xbf16, #tpu.memory_space<vmem>>, vector<1x128x128xbf16>
    %138 = vector.shape_cast %137 : vector<1x128x128xbf16> to vector<128x128xbf16>
    %cst_150 = arith.constant dense<0.000000e+00> : vector<64x128xf32>
    %139 = tpu.matmul %136, %138, %cst_150 {dimension_numbers = #tpu.dot_dimension_numbers<[1], [0], [0], [1], [0, 0, 1, 1], [], []>} : vector<64x128xbf16>, vector<128x128xbf16>, vector<64x128xf32> -> vector<64x128xf32>
    %140 = arith.addf %133, %139 : vector<64x128xf32>
    %c0_151 = arith.constant 0 : index
    %c0_152 = arith.constant 0 : index
    %c2_153 = arith.constant 2 : index
    %c0_154 = arith.constant 0 : index
    %141 = vector.load %arg3[%c0_151, %c0_152, %c2_153, %c0_154] : memref<1x10x10x128xbf16, #tpu.memory_space<vmem>>, vector<1x8x8x128xbf16>
    %142 = vector.shape_cast %141 : vector<1x8x8x128xbf16> to vector<8x8x128xbf16>
    %143 = vector.shape_cast %142 : vector<8x8x128xbf16> to vector<64x128xbf16>
    %c2_155 = arith.constant 2 : index
    %c0_156 = arith.constant 0 : index
    %c0_157 = arith.constant 0 : index
    %144 = vector.load %arg6[%c2_155, %c0_156, %c0_157] : memref<9x128x128xbf16, #tpu.memory_space<vmem>>, vector<1x128x128xbf16>
    %145 = vector.shape_cast %144 : vector<1x128x128xbf16> to vector<128x128xbf16>
    %cst_158 = arith.constant dense<0.000000e+00> : vector<64x128xf32>
    %146 = tpu.matmul %143, %145, %cst_158 {dimension_numbers = #tpu.dot_dimension_numbers<[1], [0], [0], [1], [0, 0, 1, 1], [], []>} : vector<64x128xbf16>, vector<128x128xbf16>, vector<64x128xf32> -> vector<64x128xf32>
    %147 = arith.addf %140, %146 : vector<64x128xf32>
    %c0_159 = arith.constant 0 : index
    %c1_160 = arith.constant 1 : index
    %c0_161 = arith.constant 0 : index
    %c0_162 = arith.constant 0 : index
    %148 = vector.load %arg3[%c0_159, %c1_160, %c0_161, %c0_162] : memref<1x10x10x128xbf16, #tpu.memory_space<vmem>>, vector<1x8x8x128xbf16>
    %149 = vector.shape_cast %148 : vector<1x8x8x128xbf16> to vector<8x8x128xbf16>
    %150 = vector.shape_cast %149 : vector<8x8x128xbf16> to vector<64x128xbf16>
    %c3_163 = arith.constant 3 : index
    %c0_164 = arith.constant 0 : index
    %c0_165 = arith.constant 0 : index
    %151 = vector.load %arg6[%c3_163, %c0_164, %c0_165] : memref<9x128x128xbf16, #tpu.memory_space<vmem>>, vector<1x128x128xbf16>
    %152 = vector.shape_cast %151 : vector<1x128x128xbf16> to vector<128x128xbf16>
    %cst_166 = arith.constant dense<0.000000e+00> : vector<64x128xf32>
    %153 = tpu.matmul %150, %152, %cst_166 {dimension_numbers = #tpu.dot_dimension_numbers<[1], [0], [0], [1], [0, 0, 1, 1], [], []>} : vector<64x128xbf16>, vector<128x128xbf16>, vector<64x128xf32> -> vector<64x128xf32>
    %154 = arith.addf %147, %153 : vector<64x128xf32>
    %c0_167 = arith.constant 0 : index
    %c1_168 = arith.constant 1 : index
    %c1_169 = arith.constant 1 : index
    %c0_170 = arith.constant 0 : index
    %155 = vector.load %arg3[%c0_167, %c1_168, %c1_169, %c0_170] : memref<1x10x10x128xbf16, #tpu.memory_space<vmem>>, vector<1x8x8x128xbf16>
    %156 = vector.shape_cast %155 : vector<1x8x8x128xbf16> to vector<8x8x128xbf16>
    %157 = vector.shape_cast %156 : vector<8x8x128xbf16> to vector<64x128xbf16>
    %c4_171 = arith.constant 4 : index
    %c0_172 = arith.constant 0 : index
    %c0_173 = arith.constant 0 : index
    %158 = vector.load %arg6[%c4_171, %c0_172, %c0_173] : memref<9x128x128xbf16, #tpu.memory_space<vmem>>, vector<1x128x128xbf16>
    %159 = vector.shape_cast %158 : vector<1x128x128xbf16> to vector<128x128xbf16>
    %cst_174 = arith.constant dense<0.000000e+00> : vector<64x128xf32>
    %160 = tpu.matmul %157, %159, %cst_174 {dimension_numbers = #tpu.dot_dimension_numbers<[1], [0], [0], [1], [0, 0, 1, 1], [], []>} : vector<64x128xbf16>, vector<128x128xbf16>, vector<64x128xf32> -> vector<64x128xf32>
    %161 = arith.addf %154, %160 : vector<64x128xf32>
    %c0_175 = arith.constant 0 : index
    %c1_176 = arith.constant 1 : index
    %c2_177 = arith.constant 2 : index
    %c0_178 = arith.constant 0 : index
    %162 = vector.load %arg3[%c0_175, %c1_176, %c2_177, %c0_178] : memref<1x10x10x128xbf16, #tpu.memory_space<vmem>>, vector<1x8x8x128xbf16>
    %163 = vector.shape_cast %162 : vector<1x8x8x128xbf16> to vector<8x8x128xbf16>
    %164 = vector.shape_cast %163 : vector<8x8x128xbf16> to vector<64x128xbf16>
    %c5_179 = arith.constant 5 : index
    %c0_180 = arith.constant 0 : index
    %c0_181 = arith.constant 0 : index
    %165 = vector.load %arg6[%c5_179, %c0_180, %c0_181] : memref<9x128x128xbf16, #tpu.memory_space<vmem>>, vector<1x128x128xbf16>
    %166 = vector.shape_cast %165 : vector<1x128x128xbf16> to vector<128x128xbf16>
    %cst_182 = arith.constant dense<0.000000e+00> : vector<64x128xf32>
    %167 = tpu.matmul %164, %166, %cst_182 {dimension_numbers = #tpu.dot_dimension_numbers<[1], [0], [0], [1], [0, 0, 1, 1], [], []>} : vector<64x128xbf16>, vector<128x128xbf16>, vector<64x128xf32> -> vector<64x128xf32>
    %168 = arith.addf %161, %167 : vector<64x128xf32>
    %c0_183 = arith.constant 0 : index
    %c2_184 = arith.constant 2 : index
    %c0_185 = arith.constant 0 : index
    %c0_186 = arith.constant 0 : index
    %169 = vector.load %arg3[%c0_183, %c2_184, %c0_185, %c0_186] : memref<1x10x10x128xbf16, #tpu.memory_space<vmem>>, vector<1x8x8x128xbf16>
    %170 = vector.shape_cast %169 : vector<1x8x8x128xbf16> to vector<8x8x128xbf16>
    %171 = vector.shape_cast %170 : vector<8x8x128xbf16> to vector<64x128xbf16>
    %c6_187 = arith.constant 6 : index
    %c0_188 = arith.constant 0 : index
    %c0_189 = arith.constant 0 : index
    %172 = vector.load %arg6[%c6_187, %c0_188, %c0_189] : memref<9x128x128xbf16, #tpu.memory_space<vmem>>, vector<1x128x128xbf16>
    %173 = vector.shape_cast %172 : vector<1x128x128xbf16> to vector<128x128xbf16>
    %cst_190 = arith.constant dense<0.000000e+00> : vector<64x128xf32>
    %174 = tpu.matmul %171, %173, %cst_190 {dimension_numbers = #tpu.dot_dimension_numbers<[1], [0], [0], [1], [0, 0, 1, 1], [], []>} : vector<64x128xbf16>, vector<128x128xbf16>, vector<64x128xf32> -> vector<64x128xf32>
    %175 = arith.addf %168, %174 : vector<64x128xf32>
    %c0_191 = arith.constant 0 : index
    %c2_192 = arith.constant 2 : index
    %c1_193 = arith.constant 1 : index
    %c0_194 = arith.constant 0 : index
    %176 = vector.load %arg3[%c0_191, %c2_192, %c1_193, %c0_194] : memref<1x10x10x128xbf16, #tpu.memory_space<vmem>>, vector<1x8x8x128xbf16>
    %177 = vector.shape_cast %176 : vector<1x8x8x128xbf16> to vector<8x8x128xbf16>
    %178 = vector.shape_cast %177 : vector<8x8x128xbf16> to vector<64x128xbf16>
    %c7_195 = arith.constant 7 : index
    %c0_196 = arith.constant 0 : index
    %c0_197 = arith.constant 0 : index
    %179 = vector.load %arg6[%c7_195, %c0_196, %c0_197] : memref<9x128x128xbf16, #tpu.memory_space<vmem>>, vector<1x128x128xbf16>
    %180 = vector.shape_cast %179 : vector<1x128x128xbf16> to vector<128x128xbf16>
    %cst_198 = arith.constant dense<0.000000e+00> : vector<64x128xf32>
    %181 = tpu.matmul %178, %180, %cst_198 {dimension_numbers = #tpu.dot_dimension_numbers<[1], [0], [0], [1], [0, 0, 1, 1], [], []>} : vector<64x128xbf16>, vector<128x128xbf16>, vector<64x128xf32> -> vector<64x128xf32>
    %182 = arith.addf %175, %181 : vector<64x128xf32>
    %c0_199 = arith.constant 0 : index
    %c2_200 = arith.constant 2 : index
    %c2_201 = arith.constant 2 : index
    %c0_202 = arith.constant 0 : index
    %183 = vector.load %arg3[%c0_199, %c2_200, %c2_201, %c0_202] : memref<1x10x10x128xbf16, #tpu.memory_space<vmem>>, vector<1x8x8x128xbf16>
    %184 = vector.shape_cast %183 : vector<1x8x8x128xbf16> to vector<8x8x128xbf16>
    %185 = vector.shape_cast %184 : vector<8x8x128xbf16> to vector<64x128xbf16>
    %c8_203 = arith.constant 8 : index
    %c0_204 = arith.constant 0 : index
    %c0_205 = arith.constant 0 : index
    %186 = vector.load %arg6[%c8_203, %c0_204, %c0_205] : memref<9x128x128xbf16, #tpu.memory_space<vmem>>, vector<1x128x128xbf16>
    %187 = vector.shape_cast %186 : vector<1x128x128xbf16> to vector<128x128xbf16>
    %cst_206 = arith.constant dense<0.000000e+00> : vector<64x128xf32>
    %188 = tpu.matmul %185, %187, %cst_206 {dimension_numbers = #tpu.dot_dimension_numbers<[1], [0], [0], [1], [0, 0, 1, 1], [], []>} : vector<64x128xbf16>, vector<128x128xbf16>, vector<64x128xf32> -> vector<64x128xf32>
    %189 = arith.addf %182, %188 : vector<64x128xf32>
    %c0_207 = arith.constant 0 : index
    %c0_208 = arith.constant 0 : index
    %190 = vector.load %arg7[%c0_207, %c0_208] : memref<1x128xf32, #tpu.memory_space<vmem>>, vector<1x128xf32>
    %191 = vector.broadcast %190 : vector<1x128xf32> to vector<64x128xf32>
    %192 = arith.addf %189, %191 : vector<64x128xf32>
    %193 = vector.shape_cast %192 : vector<64x128xf32> to vector<8x8x128xf32>
    %194 = arith.truncf %193 : vector<8x8x128xf32> to vector<8x8x128xbf16>
    %c0_209 = arith.constant 0 : index
    %c0_210 = arith.constant 0 : index
    %c0_211 = arith.constant 0 : index
    %c0_212 = arith.constant 0 : index
    %195 = vector.load %arg8[%c0_209, %c0_210, %c0_211, %c0_212] : memref<1x8x8x128xbf16, #tpu.memory_space<vmem>>, vector<1x8x8x128xbf16>
    %196 = vector.shape_cast %195 : vector<1x8x8x128xbf16> to vector<8x8x128xbf16>
    %197 = vector.shape_cast %194 : vector<8x8x128xbf16> to vector<1x8x8x128xbf16>
    tpu.vector_store %arg8[%c0_209, %c0_210, %c0_211, %c0_212], %197 {strides = array<i32>} : memref<1x8x8x128xbf16, #tpu.memory_space<vmem>>, vector<1x8x8x128xbf16>,
    return
  }
  func.func @transform_0(%arg0: i32) -> (i32, i32, i32, i32) {
    %c0_i32 = arith.constant 0 : i32
    %c0_i32_0 = arith.constant 0 : i32
    %c0_i32_1 = arith.constant 0 : i32
    %c0_i32_2 = arith.constant 0 : i32
    return %arg0, %c0_i32, %c0_i32_0, %c0_i32_1 : i32, i32, i32, i32
  }
  func.func @transform_1(%arg0: i32) -> (i32, i32, i32, i32) {
    %c0_i32 = arith.constant 0 : i32
    %c0_i32_0 = arith.constant 0 : i32
    %c0_i32_1 = arith.constant 0 : i32
    %c0_i32_2 = arith.constant 0 : i32
    return %arg0, %c0_i32, %c0_i32_0, %c0_i32_1 : i32, i32, i32, i32
  }
  func.func @transform_2(%arg0: i32) -> (i32, i32, i32, i32) {
    %c0_i32 = arith.constant 0 : i32
    %c0_i32_0 = arith.constant 0 : i32
    %c0_i32_1 = arith.constant 0 : i32
    %c0_i32_2 = arith.constant 0 : i32
    return %arg0, %c0_i32, %c0_i32_0, %c0_i32_1 : i32, i32, i32, i32
  }
  func.func @transform_3(%arg0: i32) -> (i32, i32, i32) {
    %c0_i32 = arith.constant 0 : i32
    %c0_i32_0 = arith.constant 0 : i32
    %c0_i32_1 = arith.constant 0 : i32
    %c0_i32_2 = arith.constant 0 : i32
    return %c0_i32, %c0_i32_0, %c0_i32_1 : i32, i32, i32
  }
  func.func @transform_4(%arg0: i32) -> (i32, i32, i32) {
    %c0_i32 = arith.constant 0 : i32
    %c0_i32_0 = arith.constant 0 : i32
    %c0_i32_1 = arith.constant 0 : i32
    %c0_i32_2 = arith.constant 0 : i32
    return %c0_i32, %c0_i32_0, %c0_i32_1 : i32, i32, i32
  }
  func.func @transform_5(%arg0: i32) -> (i32, i32, i32) {
    %c0_i32 = arith.constant 0 : i32
    %c0_i32_0 = arith.constant 0 : i32
    %c0_i32_1 = arith.constant 0 : i32
    %c0_i32_2 = arith.constant 0 : i32
    return %c0_i32, %c0_i32_0, %c0_i32_1 : i32, i32, i32
  }
  func.func @transform_6(%arg0: i32) -> (i32, i32) {
    %c0_i32 = arith.constant 0 : i32
    %c0_i32_0 = arith.constant 0 : i32
    %c0_i32_1 = arith.constant 0 : i32
    return %c0_i32, %c0_i32_0 : i32, i32
  }
  func.func @transform_7(%arg0: i32) -> (i32, i32, i32, i32) {
    %c0_i32 = arith.constant 0 : i32
    %c0_i32_0 = arith.constant 0 : i32
    %c0_i32_1 = arith.constant 0 : i32
    %c0_i32_2 = arith.constant 0 : i32
    return %arg0, %c0_i32, %c0_i32_0, %c0_i32_1 : i32, i32, i32, i32
  }
}

module attributes {stable_mosaic.version = 11 : i64} {
  func.func @_conv_kernel(%arg0: i32, %arg1: memref<1x5x5x128xbf16, #tpu.memory_space<vmem>>, %arg2: memref<1x5x5x128xbf16, #tpu.memory_space<vmem>>, %arg3: memref<1x5x5x128xbf16, #tpu.memory_space<vmem>>, %arg4: memref<1x5x5x128xbf16, #tpu.memory_space<vmem>>, %arg5: memref<4x128x128xbf16, #tpu.memory_space<vmem>>, %arg6: memref<2x128x128xbf16, #tpu.memory_space<vmem>>, %arg7: memref<2x128x128xbf16, #tpu.memory_space<vmem>>, %arg8: memref<1x128x128xbf16, #tpu.memory_space<vmem>>, %arg9: memref<1x128xf32, #tpu.memory_space<vmem>>, %arg10: memref<1x4x4x128xbf16, #tpu.memory_space<vmem>>) attributes {dimension_semantics = [#tpu.dimension_semantics<parallel>], iteration_bounds = array<i64: 2>, scalar_prefetch = 0 : i64, scratch_operands = 0 : i64, tpu.core_type = #tpu.core_type<tc>, window_params = [{transform_indices = @transform_0, window_bounds = array<i64: 1, 5, 5, 128>}, {transform_indices = @transform_1, window_bounds = array<i64: 1, 5, 5, 128>}, {transform_indices = @transform_2, window_bounds = array<i64: 1, 5, 5, 128>}, {transform_indices = @transform_3, window_bounds = array<i64: 1, 5, 5, 128>}, {pipeline_mode = #tpu.pipeline_mode<synchronous>, transform_indices = @transform_4, window_bounds = array<i64: 4, 128, 128>}, {pipeline_mode = #tpu.pipeline_mode<synchronous>, transform_indices = @transform_5, window_bounds = array<i64: 2, 128, 128>}, {pipeline_mode = #tpu.pipeline_mode<synchronous>, transform_indices = @transform_6, window_bounds = array<i64: 2, 128, 128>}, {pipeline_mode = #tpu.pipeline_mode<synchronous>, transform_indices = @transform_7, window_bounds = array<i64: 1, 128, 128>}, {pipeline_mode = #tpu.pipeline_mode<synchronous>, transform_indices = @transform_8, window_bounds = array<i64: 1, 128>}, {transform_indices = @transform_9, window_bounds = array<i64: 1, 4, 4, 128>}]} {
    %cst = arith.constant 0.000000e+00 : f32
    %0 = vector.broadcast %cst : f32 to vector<16x128xf32>
    %c0 = arith.constant 0 : index
    %c0_0 = arith.constant 0 : index
    %c0_1 = arith.constant 0 : index
    %c0_2 = arith.constant 0 : index
    %1 = vector.load %arg1[%c0, %c0_0, %c0_1, %c0_2] : memref<1x5x5x128xbf16, #tpu.memory_space<vmem>>, vector<1x4x4x128xbf16>
    %2 = vector.shape_cast %1 : vector<1x4x4x128xbf16> to vector<4x4x128xbf16>
    %3 = vector.shape_cast %2 : vector<4x4x128xbf16> to vector<16x128xbf16>
    %c0_3 = arith.constant 0 : index
    %c0_4 = arith.constant 0 : index
    %c0_5 = arith.constant 0 : index
    %4 = vector.load %arg5[%c0_3, %c0_4, %c0_5] : memref<4x128x128xbf16, #tpu.memory_space<vmem>>, vector<1x128x128xbf16>
    %5 = vector.shape_cast %4 : vector<1x128x128xbf16> to vector<128x128xbf16>
    %cst_6 = arith.constant dense<0.000000e+00> : vector<16x128xf32>
    %6 = tpu.matmul %3, %5, %cst_6 {dimension_numbers = #tpu.dot_dimension_numbers<[1], [0], [0], [1], [0, 0, 1, 1], [], []>} : vector<16x128xbf16>, vector<128x128xbf16>, vector<16x128xf32> -> vector<16x128xf32>
    %7 = arith.addf %0, %6 : vector<16x128xf32>
    %c0_7 = arith.constant 0 : index
    %c0_8 = arith.constant 0 : index
    %c1 = arith.constant 1 : index
    %c0_9 = arith.constant 0 : index
    %8 = vector.load %arg1[%c0_7, %c0_8, %c1, %c0_9] : memref<1x5x5x128xbf16, #tpu.memory_space<vmem>>, vector<1x4x4x128xbf16>
    %9 = vector.shape_cast %8 : vector<1x4x4x128xbf16> to vector<4x4x128xbf16>
    %10 = vector.shape_cast %9 : vector<4x4x128xbf16> to vector<16x128xbf16>
    %c1_10 = arith.constant 1 : index
    %c0_11 = arith.constant 0 : index
    %c0_12 = arith.constant 0 : index
    %11 = vector.load %arg5[%c1_10, %c0_11, %c0_12] : memref<4x128x128xbf16, #tpu.memory_space<vmem>>, vector<1x128x128xbf16>
    %12 = vector.shape_cast %11 : vector<1x128x128xbf16> to vector<128x128xbf16>
    %cst_13 = arith.constant dense<0.000000e+00> : vector<16x128xf32>
    %13 = tpu.matmul %10, %12, %cst_13 {dimension_numbers = #tpu.dot_dimension_numbers<[1], [0], [0], [1], [0, 0, 1, 1], [], []>} : vector<16x128xbf16>, vector<128x128xbf16>, vector<16x128xf32> -> vector<16x128xf32>
    %14 = arith.addf %7, %13 : vector<16x128xf32>
    %c0_14 = arith.constant 0 : index
    %c1_15 = arith.constant 1 : index
    %c0_16 = arith.constant 0 : index
    %c0_17 = arith.constant 0 : index
    %15 = vector.load %arg1[%c0_14, %c1_15, %c0_16, %c0_17] : memref<1x5x5x128xbf16, #tpu.memory_space<vmem>>, vector<1x4x4x128xbf16>
    %16 = vector.shape_cast %15 : vector<1x4x4x128xbf16> to vector<4x4x128xbf16>
    %17 = vector.shape_cast %16 : vector<4x4x128xbf16> to vector<16x128xbf16>
    %c2 = arith.constant 2 : index
    %c0_18 = arith.constant 0 : index
    %c0_19 = arith.constant 0 : index
    %18 = vector.load %arg5[%c2, %c0_18, %c0_19] : memref<4x128x128xbf16, #tpu.memory_space<vmem>>, vector<1x128x128xbf16>
    %19 = vector.shape_cast %18 : vector<1x128x128xbf16> to vector<128x128xbf16>
    %cst_20 = arith.constant dense<0.000000e+00> : vector<16x128xf32>
    %20 = tpu.matmul %17, %19, %cst_20 {dimension_numbers = #tpu.dot_dimension_numbers<[1], [0], [0], [1], [0, 0, 1, 1], [], []>} : vector<16x128xbf16>, vector<128x128xbf16>, vector<16x128xf32> -> vector<16x128xf32>
    %21 = arith.addf %14, %20 : vector<16x128xf32>
    %c0_21 = arith.constant 0 : index
    %c1_22 = arith.constant 1 : index
    %c1_23 = arith.constant 1 : index
    %c0_24 = arith.constant 0 : index
    %22 = vector.load %arg1[%c0_21, %c1_22, %c1_23, %c0_24] : memref<1x5x5x128xbf16, #tpu.memory_space<vmem>>, vector<1x4x4x128xbf16>
    %23 = vector.shape_cast %22 : vector<1x4x4x128xbf16> to vector<4x4x128xbf16>
    %24 = vector.shape_cast %23 : vector<4x4x128xbf16> to vector<16x128xbf16>
    %c3 = arith.constant 3 : index
    %c0_25 = arith.constant 0 : index
    %c0_26 = arith.constant 0 : index
    %25 = vector.load %arg5[%c3, %c0_25, %c0_26] : memref<4x128x128xbf16, #tpu.memory_space<vmem>>, vector<1x128x128xbf16>
    %26 = vector.shape_cast %25 : vector<1x128x128xbf16> to vector<128x128xbf16>
    %cst_27 = arith.constant dense<0.000000e+00> : vector<16x128xf32>
    %27 = tpu.matmul %24, %26, %cst_27 {dimension_numbers = #tpu.dot_dimension_numbers<[1], [0], [0], [1], [0, 0, 1, 1], [], []>} : vector<16x128xbf16>, vector<128x128xbf16>, vector<16x128xf32> -> vector<16x128xf32>
    %28 = arith.addf %21, %27 : vector<16x128xf32>
    %c0_28 = arith.constant 0 : index
    %c0_29 = arith.constant 0 : index
    %c0_30 = arith.constant 0 : index
    %c0_31 = arith.constant 0 : index
    %29 = vector.load %arg2[%c0_28, %c0_29, %c0_30, %c0_31] : memref<1x5x5x128xbf16, #tpu.memory_space<vmem>>, vector<1x4x4x128xbf16>
    %30 = vector.shape_cast %29 : vector<1x4x4x128xbf16> to vector<4x4x128xbf16>
    %31 = vector.shape_cast %30 : vector<4x4x128xbf16> to vector<16x128xbf16>
    %c0_32 = arith.constant 0 : index
    %c0_33 = arith.constant 0 : index
    %c0_34 = arith.constant 0 : index
    %32 = vector.load %arg6[%c0_32, %c0_33, %c0_34] : memref<2x128x128xbf16, #tpu.memory_space<vmem>>, vector<1x128x128xbf16>
    %33 = vector.shape_cast %32 : vector<1x128x128xbf16> to vector<128x128xbf16>
    %cst_35 = arith.constant dense<0.000000e+00> : vector<16x128xf32>
    %34 = tpu.matmul %31, %33, %cst_35 {dimension_numbers = #tpu.dot_dimension_numbers<[1], [0], [0], [1], [0, 0, 1, 1], [], []>} : vector<16x128xbf16>, vector<128x128xbf16>, vector<16x128xf32> -> vector<16x128xf32>
    %35 = arith.addf %28, %34 : vector<16x128xf32>
    %c0_36 = arith.constant 0 : index
    %c1_37 = arith.constant 1 : index
    %c0_38 = arith.constant 0 : index
    %c0_39 = arith.constant 0 : index
    %36 = vector.load %arg2[%c0_36, %c1_37, %c0_38, %c0_39] : memref<1x5x5x128xbf16, #tpu.memory_space<vmem>>, vector<1x4x4x128xbf16>
    %37 = vector.shape_cast %36 : vector<1x4x4x128xbf16> to vector<4x4x128xbf16>
    %38 = vector.shape_cast %37 : vector<4x4x128xbf16> to vector<16x128xbf16>
    %c1_40 = arith.constant 1 : index
    %c0_41 = arith.constant 0 : index
    %c0_42 = arith.constant 0 : index
    %39 = vector.load %arg6[%c1_40, %c0_41, %c0_42] : memref<2x128x128xbf16, #tpu.memory_space<vmem>>, vector<1x128x128xbf16>
    %40 = vector.shape_cast %39 : vector<1x128x128xbf16> to vector<128x128xbf16>
    %cst_43 = arith.constant dense<0.000000e+00> : vector<16x128xf32>
    %41 = tpu.matmul %38, %40, %cst_43 {dimension_numbers = #tpu.dot_dimension_numbers<[1], [0], [0], [1], [0, 0, 1, 1], [], []>} : vector<16x128xbf16>, vector<128x128xbf16>, vector<16x128xf32> -> vector<16x128xf32>
    %42 = arith.addf %35, %41 : vector<16x128xf32>
    %c0_44 = arith.constant 0 : index
    %c0_45 = arith.constant 0 : index
    %c0_46 = arith.constant 0 : index
    %c0_47 = arith.constant 0 : index
    %43 = vector.load %arg3[%c0_44, %c0_45, %c0_46, %c0_47] : memref<1x5x5x128xbf16, #tpu.memory_space<vmem>>, vector<1x4x4x128xbf16>
    %44 = vector.shape_cast %43 : vector<1x4x4x128xbf16> to vector<4x4x128xbf16>
    %45 = vector.shape_cast %44 : vector<4x4x128xbf16> to vector<16x128xbf16>
    %c0_48 = arith.constant 0 : index
    %c0_49 = arith.constant 0 : index
    %c0_50 = arith.constant 0 : index
    %46 = vector.load %arg7[%c0_48, %c0_49, %c0_50] : memref<2x128x128xbf16, #tpu.memory_space<vmem>>, vector<1x128x128xbf16>
    %47 = vector.shape_cast %46 : vector<1x128x128xbf16> to vector<128x128xbf16>
    %cst_51 = arith.constant dense<0.000000e+00> : vector<16x128xf32>
    %48 = tpu.matmul %45, %47, %cst_51 {dimension_numbers = #tpu.dot_dimension_numbers<[1], [0], [0], [1], [0, 0, 1, 1], [], []>} : vector<16x128xbf16>, vector<128x128xbf16>, vector<16x128xf32> -> vector<16x128xf32>
    %49 = arith.addf %42, %48 : vector<16x128xf32>
    %c0_52 = arith.constant 0 : index
    %c0_53 = arith.constant 0 : index
    %c1_54 = arith.constant 1 : index
    %c0_55 = arith.constant 0 : index
    %50 = vector.load %arg3[%c0_52, %c0_53, %c1_54, %c0_55] : memref<1x5x5x128xbf16, #tpu.memory_space<vmem>>, vector<1x4x4x128xbf16>
    %51 = vector.shape_cast %50 : vector<1x4x4x128xbf16> to vector<4x4x128xbf16>
    %52 = vector.shape_cast %51 : vector<4x4x128xbf16> to vector<16x128xbf16>
    %c1_56 = arith.constant 1 : index
    %c0_57 = arith.constant 0 : index
    %c0_58 = arith.constant 0 : index
    %53 = vector.load %arg7[%c1_56, %c0_57, %c0_58] : memref<2x128x128xbf16, #tpu.memory_space<vmem>>, vector<1x128x128xbf16>
    %54 = vector.shape_cast %53 : vector<1x128x128xbf16> to vector<128x128xbf16>
    %cst_59 = arith.constant dense<0.000000e+00> : vector<16x128xf32>
    %55 = tpu.matmul %52, %54, %cst_59 {dimension_numbers = #tpu.dot_dimension_numbers<[1], [0], [0], [1], [0, 0, 1, 1], [], []>} : vector<16x128xbf16>, vector<128x128xbf16>, vector<16x128xf32> -> vector<16x128xf32>
    %56 = arith.addf %49, %55 : vector<16x128xf32>
    %c0_60 = arith.constant 0 : index
    %c0_61 = arith.constant 0 : index
    %c0_62 = arith.constant 0 : index
    %c0_63 = arith.constant 0 : index
    %57 = vector.load %arg4[%c0_60, %c0_61, %c0_62, %c0_63] : memref<1x5x5x128xbf16, #tpu.memory_space<vmem>>, vector<1x4x4x128xbf16>
    %58 = vector.shape_cast %57 : vector<1x4x4x128xbf16> to vector<4x4x128xbf16>
    %59 = vector.shape_cast %58 : vector<4x4x128xbf16> to vector<16x128xbf16>
    %c0_64 = arith.constant 0 : index
    %c0_65 = arith.constant 0 : index
    %c0_66 = arith.constant 0 : index
    %60 = vector.load %arg8[%c0_64, %c0_65, %c0_66] : memref<1x128x128xbf16, #tpu.memory_space<vmem>>, vector<1x128x128xbf16>
    %61 = vector.shape_cast %60 : vector<1x128x128xbf16> to vector<128x128xbf16>
    %cst_67 = arith.constant dense<0.000000e+00> : vector<16x128xf32>
    %62 = tpu.matmul %59, %61, %cst_67 {dimension_numbers = #tpu.dot_dimension_numbers<[1], [0], [0], [1], [0, 0, 1, 1], [], []>} : vector<16x128xbf16>, vector<128x128xbf16>, vector<16x128xf32> -> vector<16x128xf32>
    %63 = arith.addf %56, %62 : vector<16x128xf32>
    %c0_68 = arith.constant 0 : index
    %c0_69 = arith.constant 0 : index
    %64 = vector.load %arg9[%c0_68, %c0_69] : memref<1x128xf32, #tpu.memory_space<vmem>>, vector<1x128xf32>
    %65 = vector.broadcast %64 : vector<1x128xf32> to vector<16x128xf32>
    %66 = arith.addf %63, %65 : vector<16x128xf32>
    %cst_70 = arith.constant 0.000000e+00 : f32
    %67 = vector.broadcast %cst_70 : f32 to vector<16x128xf32>
    %68 = arith.cmpf ogt, %66, %67 : vector<16x128xf32>
    %cst_71 = arith.constant 1.000000e-01 : f32
    %69 = vector.broadcast %cst_71 : f32 to vector<16x128xf32>
    %70 = arith.mulf %69, %66 : vector<16x128xf32>
    %71 = arith.select %68, %66, %70 : vector<16x128xi1>, vector<16x128xf32>
    %72 = vector.shape_cast %71 : vector<16x128xf32> to vector<4x4x128xf32>
    %73 = arith.truncf %72 : vector<4x4x128xf32> to vector<4x4x128xbf16>
    %c0_72 = arith.constant 0 : index
    %c0_73 = arith.constant 0 : index
    %c0_74 = arith.constant 0 : index
    %c0_75 = arith.constant 0 : index
    %74 = vector.load %arg10[%c0_72, %c0_73, %c0_74, %c0_75] : memref<1x4x4x128xbf16, #tpu.memory_space<vmem>>, vector<1x4x4x128xbf16>
    %75 = vector.shape_cast %74 : vector<1x4x4x128xbf16> to vector<4x4x128xbf16>
    %76 = vector.shape_cast %73 : vector<4x4x128xbf16> to vector<1x4x4x128xbf16>
    tpu.vector_store %arg10[%c0_72, %c0_73, %c0_74, %c0_75], %76 {strides = array<i32>} : memref<1x4x4x128xbf16, #tpu.memory_space<vmem>>, vector<1x4x4x128xbf16>,
    return
  }
  func.func @transform_0(%arg0: i32) -> (i32, i32, i32, i32) {
    %c0_i32 = arith.constant 0 : i32
    %c0_i32_0 = arith.constant 0 : i32
    %c0_i32_1 = arith.constant 0 : i32
    %c0_i32_2 = arith.constant 0 : i32
    return %arg0, %c0_i32, %c0_i32_0, %c0_i32_1 : i32, i32, i32, i32
  }
  func.func @transform_1(%arg0: i32) -> (i32, i32, i32, i32) {
    %c0_i32 = arith.constant 0 : i32
    %c0_i32_0 = arith.constant 0 : i32
    %c0_i32_1 = arith.constant 0 : i32
    %c0_i32_2 = arith.constant 0 : i32
    return %arg0, %c0_i32, %c0_i32_0, %c0_i32_1 : i32, i32, i32, i32
  }
  func.func @transform_2(%arg0: i32) -> (i32, i32, i32, i32) {
    %c0_i32 = arith.constant 0 : i32
    %c0_i32_0 = arith.constant 0 : i32
    %c0_i32_1 = arith.constant 0 : i32
    %c0_i32_2 = arith.constant 0 : i32
    return %arg0, %c0_i32, %c0_i32_0, %c0_i32_1 : i32, i32, i32, i32
  }
  func.func @transform_3(%arg0: i32) -> (i32, i32, i32, i32) {
    %c0_i32 = arith.constant 0 : i32
    %c0_i32_0 = arith.constant 0 : i32
    %c0_i32_1 = arith.constant 0 : i32
    %c0_i32_2 = arith.constant 0 : i32
    return %arg0, %c0_i32, %c0_i32_0, %c0_i32_1 : i32, i32, i32, i32
  }
  func.func @transform_4(%arg0: i32) -> (i32, i32, i32) {
    %c0_i32 = arith.constant 0 : i32
    %c0_i32_0 = arith.constant 0 : i32
    %c0_i32_1 = arith.constant 0 : i32
    %c0_i32_2 = arith.constant 0 : i32
    return %c0_i32, %c0_i32_0, %c0_i32_1 : i32, i32, i32
  }
  func.func @transform_5(%arg0: i32) -> (i32, i32, i32) {
    %c0_i32 = arith.constant 0 : i32
    %c0_i32_0 = arith.constant 0 : i32
    %c0_i32_1 = arith.constant 0 : i32
    %c0_i32_2 = arith.constant 0 : i32
    return %c0_i32, %c0_i32_0, %c0_i32_1 : i32, i32, i32
  }
  func.func @transform_6(%arg0: i32) -> (i32, i32, i32) {
    %c0_i32 = arith.constant 0 : i32
    %c0_i32_0 = arith.constant 0 : i32
    %c0_i32_1 = arith.constant 0 : i32
    %c0_i32_2 = arith.constant 0 : i32
    return %c0_i32, %c0_i32_0, %c0_i32_1 : i32, i32, i32
  }
  func.func @transform_7(%arg0: i32) -> (i32, i32, i32) {
    %c0_i32 = arith.constant 0 : i32
    %c0_i32_0 = arith.constant 0 : i32
    %c0_i32_1 = arith.constant 0 : i32
    %c0_i32_2 = arith.constant 0 : i32
    return %c0_i32, %c0_i32_0, %c0_i32_1 : i32, i32, i32
  }
  func.func @transform_8(%arg0: i32) -> (i32, i32) {
    %c0_i32 = arith.constant 0 : i32
    %c0_i32_0 = arith.constant 0 : i32
    %c0_i32_1 = arith.constant 0 : i32
    return %c0_i32, %c0_i32_0 : i32, i32
  }
  func.func @transform_9(%arg0: i32) -> (i32, i32, i32, i32) {
    %c0_i32 = arith.constant 0 : i32
    %c0_i32_0 = arith.constant 0 : i32
    %c0_i32_1 = arith.constant 0 : i32
    %c0_i32_2 = arith.constant 0 : i32
    return %arg0, %c0_i32, %c0_i32_0, %c0_i32_1 : i32, i32, i32, i32
  }
}

module attributes {stable_mosaic.version = 11 : i64} {
  func.func @_maxpool_kernel(%arg0: i32, %arg1: memref<1x4x2x4x256xbf16, #tpu.memory_space<vmem>>, %arg2: memref<1x4x4x128xbf16, #tpu.memory_space<vmem>>) attributes {dimension_semantics = [#tpu.dimension_semantics<parallel>], iteration_bounds = array<i64: 2>, scalar_prefetch = 0 : i64, scratch_operands = 0 : i64, tpu.core_type = #tpu.core_type<tc>, window_params = [{transform_indices = @transform_0, window_bounds = array<i64: 1, 4, 2, 4, 256>}, {transform_indices = @transform_1, window_bounds = array<i64: 1, 4, 4, 128>}]} {
    %c0 = arith.constant 0 : index
    %c0_0 = arith.constant 0 : index
    %c0_1 = arith.constant 0 : index
    %c0_2 = arith.constant 0 : index
    %c0_3 = arith.constant 0 : index
    %0 = vector.load %arg1[%c0, %c0_0, %c0_1, %c0_2, %c0_3] : memref<1x4x2x4x256xbf16, #tpu.memory_space<vmem>>, vector<1x4x2x4x256xbf16>
    %1 = vector.shape_cast %0 : vector<1x4x2x4x256xbf16> to vector<4x2x4x256xbf16>
    %cst = arith.constant dense<0xFF80> : vector<4x4x256xbf16>
    %2 = vector.multi_reduction <maximumf>, %1, %cst [1] : vector<4x2x4x256xbf16> to vector<4x4x256xbf16>
    %3 = vector.extract_strided_slice %2 {offsets = [0, 0, 0], sizes = [4, 4, 128], strides = [1, 1, 1]} : vector<4x4x256xbf16> to vector<4x4x128xbf16>
    %4 = vector.extract_strided_slice %2 {offsets = [0, 0, 128], sizes = [4, 4, 128], strides = [1, 1, 1]} : vector<4x4x256xbf16> to vector<4x4x128xbf16>
    %5 = arith.maximumf %3, %4 : vector<4x4x128xbf16>
    %c0_4 = arith.constant 0 : index
    %c0_5 = arith.constant 0 : index
    %c0_6 = arith.constant 0 : index
    %c0_7 = arith.constant 0 : index
    %6 = vector.load %arg2[%c0_4, %c0_5, %c0_6, %c0_7] : memref<1x4x4x128xbf16, #tpu.memory_space<vmem>>, vector<1x4x4x128xbf16>
    %7 = vector.shape_cast %6 : vector<1x4x4x128xbf16> to vector<4x4x128xbf16>
    %8 = vector.shape_cast %5 : vector<4x4x128xbf16> to vector<1x4x4x128xbf16>
    tpu.vector_store %arg2[%c0_4, %c0_5, %c0_6, %c0_7], %8 {strides = array<i32>} : memref<1x4x4x128xbf16, #tpu.memory_space<vmem>>, vector<1x4x4x128xbf16>,
    return
  }
  func.func @transform_0(%arg0: i32) -> (i32, i32, i32, i32, i32) {
    %c0_i32 = arith.constant 0 : i32
    %c0_i32_0 = arith.constant 0 : i32
    %c0_i32_1 = arith.constant 0 : i32
    %c0_i32_2 = arith.constant 0 : i32
    %c0_i32_3 = arith.constant 0 : i32
    return %arg0, %c0_i32, %c0_i32_0, %c0_i32_1, %c0_i32_2 : i32, i32, i32, i32, i32
  }
  func.func @transform_1(%arg0: i32) -> (i32, i32, i32, i32) {
    %c0_i32 = arith.constant 0 : i32
    %c0_i32_0 = arith.constant 0 : i32
    %c0_i32_1 = arith.constant 0 : i32
    %c0_i32_2 = arith.constant 0 : i32
    return %arg0, %c0_i32, %c0_i32_0, %c0_i32_1 : i32, i32, i32, i32
  }
}

module attributes {stable_mosaic.version = 11 : i64} {
  func.func @_conv_kernel(%arg0: i32, %arg1: memref<1x4x4x128xbf16, #tpu.memory_space<vmem>>, %arg2: memref<1x128x128xbf16, #tpu.memory_space<vmem>>, %arg3: memref<1x128xf32, #tpu.memory_space<vmem>>, %arg4: memref<1x4x4x128xbf16, #tpu.memory_space<vmem>>) attributes {dimension_semantics = [#tpu.dimension_semantics<parallel>], iteration_bounds = array<i64: 2>, scalar_prefetch = 0 : i64, scratch_operands = 0 : i64, tpu.core_type = #tpu.core_type<tc>, window_params = [{transform_indices = @transform_0, window_bounds = array<i64: 1, 4, 4, 128>}, {pipeline_mode = #tpu.pipeline_mode<synchronous>, transform_indices = @transform_1, window_bounds = array<i64: 1, 128, 128>}, {pipeline_mode = #tpu.pipeline_mode<synchronous>, transform_indices = @transform_2, window_bounds = array<i64: 1, 128>}, {transform_indices = @transform_3, window_bounds = array<i64: 1, 4, 4, 128>}]} {
    %cst = arith.constant 0.000000e+00 : f32
    %0 = vector.broadcast %cst : f32 to vector<16x128xf32>
    %c0 = arith.constant 0 : index
    %c0_0 = arith.constant 0 : index
    %c0_1 = arith.constant 0 : index
    %c0_2 = arith.constant 0 : index
    %1 = vector.load %arg1[%c0, %c0_0, %c0_1, %c0_2] : memref<1x4x4x128xbf16, #tpu.memory_space<vmem>>, vector<1x4x4x128xbf16>
    %2 = vector.shape_cast %1 : vector<1x4x4x128xbf16> to vector<4x4x128xbf16>
    %3 = vector.shape_cast %2 : vector<4x4x128xbf16> to vector<16x128xbf16>
    %c0_3 = arith.constant 0 : index
    %c0_4 = arith.constant 0 : index
    %c0_5 = arith.constant 0 : index
    %4 = vector.load %arg2[%c0_3, %c0_4, %c0_5] : memref<1x128x128xbf16, #tpu.memory_space<vmem>>, vector<1x128x128xbf16>
    %5 = vector.shape_cast %4 : vector<1x128x128xbf16> to vector<128x128xbf16>
    %cst_6 = arith.constant dense<0.000000e+00> : vector<16x128xf32>
    %6 = tpu.matmul %3, %5, %cst_6 {dimension_numbers = #tpu.dot_dimension_numbers<[1], [0], [0], [1], [0, 0, 1, 1], [], []>} : vector<16x128xbf16>, vector<128x128xbf16>, vector<16x128xf32> -> vector<16x128xf32>
    %7 = arith.addf %0, %6 : vector<16x128xf32>
    %c0_7 = arith.constant 0 : index
    %c0_8 = arith.constant 0 : index
    %8 = vector.load %arg3[%c0_7, %c0_8] : memref<1x128xf32, #tpu.memory_space<vmem>>, vector<1x128xf32>
    %9 = vector.broadcast %8 : vector<1x128xf32> to vector<16x128xf32>
    %10 = arith.addf %7, %9 : vector<16x128xf32>
    %cst_9 = arith.constant 0.000000e+00 : f32
    %11 = vector.broadcast %cst_9 : f32 to vector<16x128xf32>
    %12 = arith.cmpf ogt, %10, %11 : vector<16x128xf32>
    %cst_10 = arith.constant 1.000000e-01 : f32
    %13 = vector.broadcast %cst_10 : f32 to vector<16x128xf32>
    %14 = arith.mulf %13, %10 : vector<16x128xf32>
    %15 = arith.select %12, %10, %14 : vector<16x128xi1>, vector<16x128xf32>
    %16 = vector.shape_cast %15 : vector<16x128xf32> to vector<4x4x128xf32>
    %17 = arith.truncf %16 : vector<4x4x128xf32> to vector<4x4x128xbf16>
    %c0_11 = arith.constant 0 : index
    %c0_12 = arith.constant 0 : index
    %c0_13 = arith.constant 0 : index
    %c0_14 = arith.constant 0 : index
    %18 = vector.load %arg4[%c0_11, %c0_12, %c0_13, %c0_14] : memref<1x4x4x128xbf16, #tpu.memory_space<vmem>>, vector<1x4x4x128xbf16>
    %19 = vector.shape_cast %18 : vector<1x4x4x128xbf16> to vector<4x4x128xbf16>
    %20 = vector.shape_cast %17 : vector<4x4x128xbf16> to vector<1x4x4x128xbf16>
    tpu.vector_store %arg4[%c0_11, %c0_12, %c0_13, %c0_14], %20 {strides = array<i32>} : memref<1x4x4x128xbf16, #tpu.memory_space<vmem>>, vector<1x4x4x128xbf16>,
    return
  }
  func.func @transform_0(%arg0: i32) -> (i32, i32, i32, i32) {
    %c0_i32 = arith.constant 0 : i32
    %c0_i32_0 = arith.constant 0 : i32
    %c0_i32_1 = arith.constant 0 : i32
    %c0_i32_2 = arith.constant 0 : i32
    return %arg0, %c0_i32, %c0_i32_0, %c0_i32_1 : i32, i32, i32, i32
  }
  func.func @transform_1(%arg0: i32) -> (i32, i32, i32) {
    %c0_i32 = arith.constant 0 : i32
    %c0_i32_0 = arith.constant 0 : i32
    %c0_i32_1 = arith.constant 0 : i32
    %c0_i32_2 = arith.constant 0 : i32
    return %c0_i32, %c0_i32_0, %c0_i32_1 : i32, i32, i32
  }
  func.func @transform_2(%arg0: i32) -> (i32, i32) {
    %c0_i32 = arith.constant 0 : i32
    %c0_i32_0 = arith.constant 0 : i32
    %c0_i32_1 = arith.constant 0 : i32
    return %c0_i32, %c0_i32_0 : i32, i32
  }
  func.func @transform_3(%arg0: i32) -> (i32, i32, i32, i32) {
    %c0_i32 = arith.constant 0 : i32
    %c0_i32_0 = arith.constant 0 : i32
    %c0_i32_1 = arith.constant 0 : i32
    %c0_i32_2 = arith.constant 0 : i32
    return %arg0, %c0_i32, %c0_i32_0, %c0_i32_1 : i32, i32, i32, i32
  }
}

module attributes {stable_mosaic.version = 11 : i64} {
  func.func @_conv_kernel(%arg0: i32, %arg1: memref<1x6x6x128xbf16, #tpu.memory_space<vmem>>, %arg2: memref<1x6x6x128xbf16, #tpu.memory_space<vmem>>, %arg3: memref<1x6x6x128xbf16, #tpu.memory_space<vmem>>, %arg4: memref<9x128x128xbf16, #tpu.memory_space<vmem>>, %arg5: memref<9x128x128xbf16, #tpu.memory_space<vmem>>, %arg6: memref<9x128x128xbf16, #tpu.memory_space<vmem>>, %arg7: memref<1x128xf32, #tpu.memory_space<vmem>>, %arg8: memref<1x4x4x128xbf16, #tpu.memory_space<vmem>>) attributes {dimension_semantics = [#tpu.dimension_semantics<parallel>], iteration_bounds = array<i64: 2>, scalar_prefetch = 0 : i64, scratch_operands = 0 : i64, tpu.core_type = #tpu.core_type<tc>, window_params = [{transform_indices = @transform_0, window_bounds = array<i64: 1, 6, 6, 128>}, {transform_indices = @transform_1, window_bounds = array<i64: 1, 6, 6, 128>}, {transform_indices = @transform_2, window_bounds = array<i64: 1, 6, 6, 128>}, {pipeline_mode = #tpu.pipeline_mode<synchronous>, transform_indices = @transform_3, window_bounds = array<i64: 9, 128, 128>}, {pipeline_mode = #tpu.pipeline_mode<synchronous>, transform_indices = @transform_4, window_bounds = array<i64: 9, 128, 128>}, {pipeline_mode = #tpu.pipeline_mode<synchronous>, transform_indices = @transform_5, window_bounds = array<i64: 9, 128, 128>}, {pipeline_mode = #tpu.pipeline_mode<synchronous>, transform_indices = @transform_6, window_bounds = array<i64: 1, 128>}, {transform_indices = @transform_7, window_bounds = array<i64: 1, 4, 4, 128>}]} {
    %cst = arith.constant 0.000000e+00 : f32
    %0 = vector.broadcast %cst : f32 to vector<16x128xf32>
    %c0 = arith.constant 0 : index
    %c0_0 = arith.constant 0 : index
    %c0_1 = arith.constant 0 : index
    %c0_2 = arith.constant 0 : index
    %1 = vector.load %arg1[%c0, %c0_0, %c0_1, %c0_2] : memref<1x6x6x128xbf16, #tpu.memory_space<vmem>>, vector<1x4x4x128xbf16>
    %2 = vector.shape_cast %1 : vector<1x4x4x128xbf16> to vector<4x4x128xbf16>
    %3 = vector.shape_cast %2 : vector<4x4x128xbf16> to vector<16x128xbf16>
    %c0_3 = arith.constant 0 : index
    %c0_4 = arith.constant 0 : index
    %c0_5 = arith.constant 0 : index
    %4 = vector.load %arg4[%c0_3, %c0_4, %c0_5] : memref<9x128x128xbf16, #tpu.memory_space<vmem>>, vector<1x128x128xbf16>
    %5 = vector.shape_cast %4 : vector<1x128x128xbf16> to vector<128x128xbf16>
    %cst_6 = arith.constant dense<0.000000e+00> : vector<16x128xf32>
    %6 = tpu.matmul %3, %5, %cst_6 {dimension_numbers = #tpu.dot_dimension_numbers<[1], [0], [0], [1], [0, 0, 1, 1], [], []>} : vector<16x128xbf16>, vector<128x128xbf16>, vector<16x128xf32> -> vector<16x128xf32>
    %7 = arith.addf %0, %6 : vector<16x128xf32>
    %c0_7 = arith.constant 0 : index
    %c0_8 = arith.constant 0 : index
    %c1 = arith.constant 1 : index
    %c0_9 = arith.constant 0 : index
    %8 = vector.load %arg1[%c0_7, %c0_8, %c1, %c0_9] : memref<1x6x6x128xbf16, #tpu.memory_space<vmem>>, vector<1x4x4x128xbf16>
    %9 = vector.shape_cast %8 : vector<1x4x4x128xbf16> to vector<4x4x128xbf16>
    %10 = vector.shape_cast %9 : vector<4x4x128xbf16> to vector<16x128xbf16>
    %c1_10 = arith.constant 1 : index
    %c0_11 = arith.constant 0 : index
    %c0_12 = arith.constant 0 : index
    %11 = vector.load %arg4[%c1_10, %c0_11, %c0_12] : memref<9x128x128xbf16, #tpu.memory_space<vmem>>, vector<1x128x128xbf16>
    %12 = vector.shape_cast %11 : vector<1x128x128xbf16> to vector<128x128xbf16>
    %cst_13 = arith.constant dense<0.000000e+00> : vector<16x128xf32>
    %13 = tpu.matmul %10, %12, %cst_13 {dimension_numbers = #tpu.dot_dimension_numbers<[1], [0], [0], [1], [0, 0, 1, 1], [], []>} : vector<16x128xbf16>, vector<128x128xbf16>, vector<16x128xf32> -> vector<16x128xf32>
    %14 = arith.addf %7, %13 : vector<16x128xf32>
    %c0_14 = arith.constant 0 : index
    %c0_15 = arith.constant 0 : index
    %c2 = arith.constant 2 : index
    %c0_16 = arith.constant 0 : index
    %15 = vector.load %arg1[%c0_14, %c0_15, %c2, %c0_16] : memref<1x6x6x128xbf16, #tpu.memory_space<vmem>>, vector<1x4x4x128xbf16>
    %16 = vector.shape_cast %15 : vector<1x4x4x128xbf16> to vector<4x4x128xbf16>
    %17 = vector.shape_cast %16 : vector<4x4x128xbf16> to vector<16x128xbf16>
    %c2_17 = arith.constant 2 : index
    %c0_18 = arith.constant 0 : index
    %c0_19 = arith.constant 0 : index
    %18 = vector.load %arg4[%c2_17, %c0_18, %c0_19] : memref<9x128x128xbf16, #tpu.memory_space<vmem>>, vector<1x128x128xbf16>
    %19 = vector.shape_cast %18 : vector<1x128x128xbf16> to vector<128x128xbf16>
    %cst_20 = arith.constant dense<0.000000e+00> : vector<16x128xf32>
    %20 = tpu.matmul %17, %19, %cst_20 {dimension_numbers = #tpu.dot_dimension_numbers<[1], [0], [0], [1], [0, 0, 1, 1], [], []>} : vector<16x128xbf16>, vector<128x128xbf16>, vector<16x128xf32> -> vector<16x128xf32>
    %21 = arith.addf %14, %20 : vector<16x128xf32>
    %c0_21 = arith.constant 0 : index
    %c1_22 = arith.constant 1 : index
    %c0_23 = arith.constant 0 : index
    %c0_24 = arith.constant 0 : index
    %22 = vector.load %arg1[%c0_21, %c1_22, %c0_23, %c0_24] : memref<1x6x6x128xbf16, #tpu.memory_space<vmem>>, vector<1x4x4x128xbf16>
    %23 = vector.shape_cast %22 : vector<1x4x4x128xbf16> to vector<4x4x128xbf16>
    %24 = vector.shape_cast %23 : vector<4x4x128xbf16> to vector<16x128xbf16>
    %c3 = arith.constant 3 : index
    %c0_25 = arith.constant 0 : index
    %c0_26 = arith.constant 0 : index
    %25 = vector.load %arg4[%c3, %c0_25, %c0_26] : memref<9x128x128xbf16, #tpu.memory_space<vmem>>, vector<1x128x128xbf16>
    %26 = vector.shape_cast %25 : vector<1x128x128xbf16> to vector<128x128xbf16>
    %cst_27 = arith.constant dense<0.000000e+00> : vector<16x128xf32>
    %27 = tpu.matmul %24, %26, %cst_27 {dimension_numbers = #tpu.dot_dimension_numbers<[1], [0], [0], [1], [0, 0, 1, 1], [], []>} : vector<16x128xbf16>, vector<128x128xbf16>, vector<16x128xf32> -> vector<16x128xf32>
    %28 = arith.addf %21, %27 : vector<16x128xf32>
    %c0_28 = arith.constant 0 : index
    %c1_29 = arith.constant 1 : index
    %c1_30 = arith.constant 1 : index
    %c0_31 = arith.constant 0 : index
    %29 = vector.load %arg1[%c0_28, %c1_29, %c1_30, %c0_31] : memref<1x6x6x128xbf16, #tpu.memory_space<vmem>>, vector<1x4x4x128xbf16>
    %30 = vector.shape_cast %29 : vector<1x4x4x128xbf16> to vector<4x4x128xbf16>
    %31 = vector.shape_cast %30 : vector<4x4x128xbf16> to vector<16x128xbf16>
    %c4 = arith.constant 4 : index
    %c0_32 = arith.constant 0 : index
    %c0_33 = arith.constant 0 : index
    %32 = vector.load %arg4[%c4, %c0_32, %c0_33] : memref<9x128x128xbf16, #tpu.memory_space<vmem>>, vector<1x128x128xbf16>
    %33 = vector.shape_cast %32 : vector<1x128x128xbf16> to vector<128x128xbf16>
    %cst_34 = arith.constant dense<0.000000e+00> : vector<16x128xf32>
    %34 = tpu.matmul %31, %33, %cst_34 {dimension_numbers = #tpu.dot_dimension_numbers<[1], [0], [0], [1], [0, 0, 1, 1], [], []>} : vector<16x128xbf16>, vector<128x128xbf16>, vector<16x128xf32> -> vector<16x128xf32>
    %35 = arith.addf %28, %34 : vector<16x128xf32>
    %c0_35 = arith.constant 0 : index
    %c1_36 = arith.constant 1 : index
    %c2_37 = arith.constant 2 : index
    %c0_38 = arith.constant 0 : index
    %36 = vector.load %arg1[%c0_35, %c1_36, %c2_37, %c0_38] : memref<1x6x6x128xbf16, #tpu.memory_space<vmem>>, vector<1x4x4x128xbf16>
    %37 = vector.shape_cast %36 : vector<1x4x4x128xbf16> to vector<4x4x128xbf16>
    %38 = vector.shape_cast %37 : vector<4x4x128xbf16> to vector<16x128xbf16>
    %c5 = arith.constant 5 : index
    %c0_39 = arith.constant 0 : index
    %c0_40 = arith.constant 0 : index
    %39 = vector.load %arg4[%c5, %c0_39, %c0_40] : memref<9x128x128xbf16, #tpu.memory_space<vmem>>, vector<1x128x128xbf16>
    %40 = vector.shape_cast %39 : vector<1x128x128xbf16> to vector<128x128xbf16>
    %cst_41 = arith.constant dense<0.000000e+00> : vector<16x128xf32>
    %41 = tpu.matmul %38, %40, %cst_41 {dimension_numbers = #tpu.dot_dimension_numbers<[1], [0], [0], [1], [0, 0, 1, 1], [], []>} : vector<16x128xbf16>, vector<128x128xbf16>, vector<16x128xf32> -> vector<16x128xf32>
    %42 = arith.addf %35, %41 : vector<16x128xf32>
    %c0_42 = arith.constant 0 : index
    %c2_43 = arith.constant 2 : index
    %c0_44 = arith.constant 0 : index
    %c0_45 = arith.constant 0 : index
    %43 = vector.load %arg1[%c0_42, %c2_43, %c0_44, %c0_45] : memref<1x6x6x128xbf16, #tpu.memory_space<vmem>>, vector<1x4x4x128xbf16>
    %44 = vector.shape_cast %43 : vector<1x4x4x128xbf16> to vector<4x4x128xbf16>
    %45 = vector.shape_cast %44 : vector<4x4x128xbf16> to vector<16x128xbf16>
    %c6 = arith.constant 6 : index
    %c0_46 = arith.constant 0 : index
    %c0_47 = arith.constant 0 : index
    %46 = vector.load %arg4[%c6, %c0_46, %c0_47] : memref<9x128x128xbf16, #tpu.memory_space<vmem>>, vector<1x128x128xbf16>
    %47 = vector.shape_cast %46 : vector<1x128x128xbf16> to vector<128x128xbf16>
    %cst_48 = arith.constant dense<0.000000e+00> : vector<16x128xf32>
    %48 = tpu.matmul %45, %47, %cst_48 {dimension_numbers = #tpu.dot_dimension_numbers<[1], [0], [0], [1], [0, 0, 1, 1], [], []>} : vector<16x128xbf16>, vector<128x128xbf16>, vector<16x128xf32> -> vector<16x128xf32>
    %49 = arith.addf %42, %48 : vector<16x128xf32>
    %c0_49 = arith.constant 0 : index
    %c2_50 = arith.constant 2 : index
    %c1_51 = arith.constant 1 : index
    %c0_52 = arith.constant 0 : index
    %50 = vector.load %arg1[%c0_49, %c2_50, %c1_51, %c0_52] : memref<1x6x6x128xbf16, #tpu.memory_space<vmem>>, vector<1x4x4x128xbf16>
    %51 = vector.shape_cast %50 : vector<1x4x4x128xbf16> to vector<4x4x128xbf16>
    %52 = vector.shape_cast %51 : vector<4x4x128xbf16> to vector<16x128xbf16>
    %c7 = arith.constant 7 : index
    %c0_53 = arith.constant 0 : index
    %c0_54 = arith.constant 0 : index
    %53 = vector.load %arg4[%c7, %c0_53, %c0_54] : memref<9x128x128xbf16, #tpu.memory_space<vmem>>, vector<1x128x128xbf16>
    %54 = vector.shape_cast %53 : vector<1x128x128xbf16> to vector<128x128xbf16>
    %cst_55 = arith.constant dense<0.000000e+00> : vector<16x128xf32>
    %55 = tpu.matmul %52, %54, %cst_55 {dimension_numbers = #tpu.dot_dimension_numbers<[1], [0], [0], [1], [0, 0, 1, 1], [], []>} : vector<16x128xbf16>, vector<128x128xbf16>, vector<16x128xf32> -> vector<16x128xf32>
    %56 = arith.addf %49, %55 : vector<16x128xf32>
    %c0_56 = arith.constant 0 : index
    %c2_57 = arith.constant 2 : index
    %c2_58 = arith.constant 2 : index
    %c0_59 = arith.constant 0 : index
    %57 = vector.load %arg1[%c0_56, %c2_57, %c2_58, %c0_59] : memref<1x6x6x128xbf16, #tpu.memory_space<vmem>>, vector<1x4x4x128xbf16>
    %58 = vector.shape_cast %57 : vector<1x4x4x128xbf16> to vector<4x4x128xbf16>
    %59 = vector.shape_cast %58 : vector<4x4x128xbf16> to vector<16x128xbf16>
    %c8 = arith.constant 8 : index
    %c0_60 = arith.constant 0 : index
    %c0_61 = arith.constant 0 : index
    %60 = vector.load %arg4[%c8, %c0_60, %c0_61] : memref<9x128x128xbf16, #tpu.memory_space<vmem>>, vector<1x128x128xbf16>
    %61 = vector.shape_cast %60 : vector<1x128x128xbf16> to vector<128x128xbf16>
    %cst_62 = arith.constant dense<0.000000e+00> : vector<16x128xf32>
    %62 = tpu.matmul %59, %61, %cst_62 {dimension_numbers = #tpu.dot_dimension_numbers<[1], [0], [0], [1], [0, 0, 1, 1], [], []>} : vector<16x128xbf16>, vector<128x128xbf16>, vector<16x128xf32> -> vector<16x128xf32>
    %63 = arith.addf %56, %62 : vector<16x128xf32>
    %c0_63 = arith.constant 0 : index
    %c0_64 = arith.constant 0 : index
    %c0_65 = arith.constant 0 : index
    %c0_66 = arith.constant 0 : index
    %64 = vector.load %arg2[%c0_63, %c0_64, %c0_65, %c0_66] : memref<1x6x6x128xbf16, #tpu.memory_space<vmem>>, vector<1x4x4x128xbf16>
    %65 = vector.shape_cast %64 : vector<1x4x4x128xbf16> to vector<4x4x128xbf16>
    %66 = vector.shape_cast %65 : vector<4x4x128xbf16> to vector<16x128xbf16>
    %c0_67 = arith.constant 0 : index
    %c0_68 = arith.constant 0 : index
    %c0_69 = arith.constant 0 : index
    %67 = vector.load %arg5[%c0_67, %c0_68, %c0_69] : memref<9x128x128xbf16, #tpu.memory_space<vmem>>, vector<1x128x128xbf16>
    %68 = vector.shape_cast %67 : vector<1x128x128xbf16> to vector<128x128xbf16>
    %cst_70 = arith.constant dense<0.000000e+00> : vector<16x128xf32>
    %69 = tpu.matmul %66, %68, %cst_70 {dimension_numbers = #tpu.dot_dimension_numbers<[1], [0], [0], [1], [0, 0, 1, 1], [], []>} : vector<16x128xbf16>, vector<128x128xbf16>, vector<16x128xf32> -> vector<16x128xf32>
    %70 = arith.addf %63, %69 : vector<16x128xf32>
    %c0_71 = arith.constant 0 : index
    %c0_72 = arith.constant 0 : index
    %c1_73 = arith.constant 1 : index
    %c0_74 = arith.constant 0 : index
    %71 = vector.load %arg2[%c0_71, %c0_72, %c1_73, %c0_74] : memref<1x6x6x128xbf16, #tpu.memory_space<vmem>>, vector<1x4x4x128xbf16>
    %72 = vector.shape_cast %71 : vector<1x4x4x128xbf16> to vector<4x4x128xbf16>
    %73 = vector.shape_cast %72 : vector<4x4x128xbf16> to vector<16x128xbf16>
    %c1_75 = arith.constant 1 : index
    %c0_76 = arith.constant 0 : index
    %c0_77 = arith.constant 0 : index
    %74 = vector.load %arg5[%c1_75, %c0_76, %c0_77] : memref<9x128x128xbf16, #tpu.memory_space<vmem>>, vector<1x128x128xbf16>
    %75 = vector.shape_cast %74 : vector<1x128x128xbf16> to vector<128x128xbf16>
    %cst_78 = arith.constant dense<0.000000e+00> : vector<16x128xf32>
    %76 = tpu.matmul %73, %75, %cst_78 {dimension_numbers = #tpu.dot_dimension_numbers<[1], [0], [0], [1], [0, 0, 1, 1], [], []>} : vector<16x128xbf16>, vector<128x128xbf16>, vector<16x128xf32> -> vector<16x128xf32>
    %77 = arith.addf %70, %76 : vector<16x128xf32>
    %c0_79 = arith.constant 0 : index
    %c0_80 = arith.constant 0 : index
    %c2_81 = arith.constant 2 : index
    %c0_82 = arith.constant 0 : index
    %78 = vector.load %arg2[%c0_79, %c0_80, %c2_81, %c0_82] : memref<1x6x6x128xbf16, #tpu.memory_space<vmem>>, vector<1x4x4x128xbf16>
    %79 = vector.shape_cast %78 : vector<1x4x4x128xbf16> to vector<4x4x128xbf16>
    %80 = vector.shape_cast %79 : vector<4x4x128xbf16> to vector<16x128xbf16>
    %c2_83 = arith.constant 2 : index
    %c0_84 = arith.constant 0 : index
    %c0_85 = arith.constant 0 : index
    %81 = vector.load %arg5[%c2_83, %c0_84, %c0_85] : memref<9x128x128xbf16, #tpu.memory_space<vmem>>, vector<1x128x128xbf16>
    %82 = vector.shape_cast %81 : vector<1x128x128xbf16> to vector<128x128xbf16>
    %cst_86 = arith.constant dense<0.000000e+00> : vector<16x128xf32>
    %83 = tpu.matmul %80, %82, %cst_86 {dimension_numbers = #tpu.dot_dimension_numbers<[1], [0], [0], [1], [0, 0, 1, 1], [], []>} : vector<16x128xbf16>, vector<128x128xbf16>, vector<16x128xf32> -> vector<16x128xf32>
    %84 = arith.addf %77, %83 : vector<16x128xf32>
    %c0_87 = arith.constant 0 : index
    %c1_88 = arith.constant 1 : index
    %c0_89 = arith.constant 0 : index
    %c0_90 = arith.constant 0 : index
    %85 = vector.load %arg2[%c0_87, %c1_88, %c0_89, %c0_90] : memref<1x6x6x128xbf16, #tpu.memory_space<vmem>>, vector<1x4x4x128xbf16>
    %86 = vector.shape_cast %85 : vector<1x4x4x128xbf16> to vector<4x4x128xbf16>
    %87 = vector.shape_cast %86 : vector<4x4x128xbf16> to vector<16x128xbf16>
    %c3_91 = arith.constant 3 : index
    %c0_92 = arith.constant 0 : index
    %c0_93 = arith.constant 0 : index
    %88 = vector.load %arg5[%c3_91, %c0_92, %c0_93] : memref<9x128x128xbf16, #tpu.memory_space<vmem>>, vector<1x128x128xbf16>
    %89 = vector.shape_cast %88 : vector<1x128x128xbf16> to vector<128x128xbf16>
    %cst_94 = arith.constant dense<0.000000e+00> : vector<16x128xf32>
    %90 = tpu.matmul %87, %89, %cst_94 {dimension_numbers = #tpu.dot_dimension_numbers<[1], [0], [0], [1], [0, 0, 1, 1], [], []>} : vector<16x128xbf16>, vector<128x128xbf16>, vector<16x128xf32> -> vector<16x128xf32>
    %91 = arith.addf %84, %90 : vector<16x128xf32>
    %c0_95 = arith.constant 0 : index
    %c1_96 = arith.constant 1 : index
    %c1_97 = arith.constant 1 : index
    %c0_98 = arith.constant 0 : index
    %92 = vector.load %arg2[%c0_95, %c1_96, %c1_97, %c0_98] : memref<1x6x6x128xbf16, #tpu.memory_space<vmem>>, vector<1x4x4x128xbf16>
    %93 = vector.shape_cast %92 : vector<1x4x4x128xbf16> to vector<4x4x128xbf16>
    %94 = vector.shape_cast %93 : vector<4x4x128xbf16> to vector<16x128xbf16>
    %c4_99 = arith.constant 4 : index
    %c0_100 = arith.constant 0 : index
    %c0_101 = arith.constant 0 : index
    %95 = vector.load %arg5[%c4_99, %c0_100, %c0_101] : memref<9x128x128xbf16, #tpu.memory_space<vmem>>, vector<1x128x128xbf16>
    %96 = vector.shape_cast %95 : vector<1x128x128xbf16> to vector<128x128xbf16>
    %cst_102 = arith.constant dense<0.000000e+00> : vector<16x128xf32>
    %97 = tpu.matmul %94, %96, %cst_102 {dimension_numbers = #tpu.dot_dimension_numbers<[1], [0], [0], [1], [0, 0, 1, 1], [], []>} : vector<16x128xbf16>, vector<128x128xbf16>, vector<16x128xf32> -> vector<16x128xf32>
    %98 = arith.addf %91, %97 : vector<16x128xf32>
    %c0_103 = arith.constant 0 : index
    %c1_104 = arith.constant 1 : index
    %c2_105 = arith.constant 2 : index
    %c0_106 = arith.constant 0 : index
    %99 = vector.load %arg2[%c0_103, %c1_104, %c2_105, %c0_106] : memref<1x6x6x128xbf16, #tpu.memory_space<vmem>>, vector<1x4x4x128xbf16>
    %100 = vector.shape_cast %99 : vector<1x4x4x128xbf16> to vector<4x4x128xbf16>
    %101 = vector.shape_cast %100 : vector<4x4x128xbf16> to vector<16x128xbf16>
    %c5_107 = arith.constant 5 : index
    %c0_108 = arith.constant 0 : index
    %c0_109 = arith.constant 0 : index
    %102 = vector.load %arg5[%c5_107, %c0_108, %c0_109] : memref<9x128x128xbf16, #tpu.memory_space<vmem>>, vector<1x128x128xbf16>
    %103 = vector.shape_cast %102 : vector<1x128x128xbf16> to vector<128x128xbf16>
    %cst_110 = arith.constant dense<0.000000e+00> : vector<16x128xf32>
    %104 = tpu.matmul %101, %103, %cst_110 {dimension_numbers = #tpu.dot_dimension_numbers<[1], [0], [0], [1], [0, 0, 1, 1], [], []>} : vector<16x128xbf16>, vector<128x128xbf16>, vector<16x128xf32> -> vector<16x128xf32>
    %105 = arith.addf %98, %104 : vector<16x128xf32>
    %c0_111 = arith.constant 0 : index
    %c2_112 = arith.constant 2 : index
    %c0_113 = arith.constant 0 : index
    %c0_114 = arith.constant 0 : index
    %106 = vector.load %arg2[%c0_111, %c2_112, %c0_113, %c0_114] : memref<1x6x6x128xbf16, #tpu.memory_space<vmem>>, vector<1x4x4x128xbf16>
    %107 = vector.shape_cast %106 : vector<1x4x4x128xbf16> to vector<4x4x128xbf16>
    %108 = vector.shape_cast %107 : vector<4x4x128xbf16> to vector<16x128xbf16>
    %c6_115 = arith.constant 6 : index
    %c0_116 = arith.constant 0 : index
    %c0_117 = arith.constant 0 : index
    %109 = vector.load %arg5[%c6_115, %c0_116, %c0_117] : memref<9x128x128xbf16, #tpu.memory_space<vmem>>, vector<1x128x128xbf16>
    %110 = vector.shape_cast %109 : vector<1x128x128xbf16> to vector<128x128xbf16>
    %cst_118 = arith.constant dense<0.000000e+00> : vector<16x128xf32>
    %111 = tpu.matmul %108, %110, %cst_118 {dimension_numbers = #tpu.dot_dimension_numbers<[1], [0], [0], [1], [0, 0, 1, 1], [], []>} : vector<16x128xbf16>, vector<128x128xbf16>, vector<16x128xf32> -> vector<16x128xf32>
    %112 = arith.addf %105, %111 : vector<16x128xf32>
    %c0_119 = arith.constant 0 : index
    %c2_120 = arith.constant 2 : index
    %c1_121 = arith.constant 1 : index
    %c0_122 = arith.constant 0 : index
    %113 = vector.load %arg2[%c0_119, %c2_120, %c1_121, %c0_122] : memref<1x6x6x128xbf16, #tpu.memory_space<vmem>>, vector<1x4x4x128xbf16>
    %114 = vector.shape_cast %113 : vector<1x4x4x128xbf16> to vector<4x4x128xbf16>
    %115 = vector.shape_cast %114 : vector<4x4x128xbf16> to vector<16x128xbf16>
    %c7_123 = arith.constant 7 : index
    %c0_124 = arith.constant 0 : index
    %c0_125 = arith.constant 0 : index
    %116 = vector.load %arg5[%c7_123, %c0_124, %c0_125] : memref<9x128x128xbf16, #tpu.memory_space<vmem>>, vector<1x128x128xbf16>
    %117 = vector.shape_cast %116 : vector<1x128x128xbf16> to vector<128x128xbf16>
    %cst_126 = arith.constant dense<0.000000e+00> : vector<16x128xf32>
    %118 = tpu.matmul %115, %117, %cst_126 {dimension_numbers = #tpu.dot_dimension_numbers<[1], [0], [0], [1], [0, 0, 1, 1], [], []>} : vector<16x128xbf16>, vector<128x128xbf16>, vector<16x128xf32> -> vector<16x128xf32>
    %119 = arith.addf %112, %118 : vector<16x128xf32>
    %c0_127 = arith.constant 0 : index
    %c2_128 = arith.constant 2 : index
    %c2_129 = arith.constant 2 : index
    %c0_130 = arith.constant 0 : index
    %120 = vector.load %arg2[%c0_127, %c2_128, %c2_129, %c0_130] : memref<1x6x6x128xbf16, #tpu.memory_space<vmem>>, vector<1x4x4x128xbf16>
    %121 = vector.shape_cast %120 : vector<1x4x4x128xbf16> to vector<4x4x128xbf16>
    %122 = vector.shape_cast %121 : vector<4x4x128xbf16> to vector<16x128xbf16>
    %c8_131 = arith.constant 8 : index
    %c0_132 = arith.constant 0 : index
    %c0_133 = arith.constant 0 : index
    %123 = vector.load %arg5[%c8_131, %c0_132, %c0_133] : memref<9x128x128xbf16, #tpu.memory_space<vmem>>, vector<1x128x128xbf16>
    %124 = vector.shape_cast %123 : vector<1x128x128xbf16> to vector<128x128xbf16>
    %cst_134 = arith.constant dense<0.000000e+00> : vector<16x128xf32>
    %125 = tpu.matmul %122, %124, %cst_134 {dimension_numbers = #tpu.dot_dimension_numbers<[1], [0], [0], [1], [0, 0, 1, 1], [], []>} : vector<16x128xbf16>, vector<128x128xbf16>, vector<16x128xf32> -> vector<16x128xf32>
    %126 = arith.addf %119, %125 : vector<16x128xf32>
    %c0_135 = arith.constant 0 : index
    %c0_136 = arith.constant 0 : index
    %c0_137 = arith.constant 0 : index
    %c0_138 = arith.constant 0 : index
    %127 = vector.load %arg3[%c0_135, %c0_136, %c0_137, %c0_138] : memref<1x6x6x128xbf16, #tpu.memory_space<vmem>>, vector<1x4x4x128xbf16>
    %128 = vector.shape_cast %127 : vector<1x4x4x128xbf16> to vector<4x4x128xbf16>
    %129 = vector.shape_cast %128 : vector<4x4x128xbf16> to vector<16x128xbf16>
    %c0_139 = arith.constant 0 : index
    %c0_140 = arith.constant 0 : index
    %c0_141 = arith.constant 0 : index
    %130 = vector.load %arg6[%c0_139, %c0_140, %c0_141] : memref<9x128x128xbf16, #tpu.memory_space<vmem>>, vector<1x128x128xbf16>
    %131 = vector.shape_cast %130 : vector<1x128x128xbf16> to vector<128x128xbf16>
    %cst_142 = arith.constant dense<0.000000e+00> : vector<16x128xf32>
    %132 = tpu.matmul %129, %131, %cst_142 {dimension_numbers = #tpu.dot_dimension_numbers<[1], [0], [0], [1], [0, 0, 1, 1], [], []>} : vector<16x128xbf16>, vector<128x128xbf16>, vector<16x128xf32> -> vector<16x128xf32>
    %133 = arith.addf %126, %132 : vector<16x128xf32>
    %c0_143 = arith.constant 0 : index
    %c0_144 = arith.constant 0 : index
    %c1_145 = arith.constant 1 : index
    %c0_146 = arith.constant 0 : index
    %134 = vector.load %arg3[%c0_143, %c0_144, %c1_145, %c0_146] : memref<1x6x6x128xbf16, #tpu.memory_space<vmem>>, vector<1x4x4x128xbf16>
    %135 = vector.shape_cast %134 : vector<1x4x4x128xbf16> to vector<4x4x128xbf16>
    %136 = vector.shape_cast %135 : vector<4x4x128xbf16> to vector<16x128xbf16>
    %c1_147 = arith.constant 1 : index
    %c0_148 = arith.constant 0 : index
    %c0_149 = arith.constant 0 : index
    %137 = vector.load %arg6[%c1_147, %c0_148, %c0_149] : memref<9x128x128xbf16, #tpu.memory_space<vmem>>, vector<1x128x128xbf16>
    %138 = vector.shape_cast %137 : vector<1x128x128xbf16> to vector<128x128xbf16>
    %cst_150 = arith.constant dense<0.000000e+00> : vector<16x128xf32>
    %139 = tpu.matmul %136, %138, %cst_150 {dimension_numbers = #tpu.dot_dimension_numbers<[1], [0], [0], [1], [0, 0, 1, 1], [], []>} : vector<16x128xbf16>, vector<128x128xbf16>, vector<16x128xf32> -> vector<16x128xf32>
    %140 = arith.addf %133, %139 : vector<16x128xf32>
    %c0_151 = arith.constant 0 : index
    %c0_152 = arith.constant 0 : index
    %c2_153 = arith.constant 2 : index
    %c0_154 = arith.constant 0 : index
    %141 = vector.load %arg3[%c0_151, %c0_152, %c2_153, %c0_154] : memref<1x6x6x128xbf16, #tpu.memory_space<vmem>>, vector<1x4x4x128xbf16>
    %142 = vector.shape_cast %141 : vector<1x4x4x128xbf16> to vector<4x4x128xbf16>
    %143 = vector.shape_cast %142 : vector<4x4x128xbf16> to vector<16x128xbf16>
    %c2_155 = arith.constant 2 : index
    %c0_156 = arith.constant 0 : index
    %c0_157 = arith.constant 0 : index
    %144 = vector.load %arg6[%c2_155, %c0_156, %c0_157] : memref<9x128x128xbf16, #tpu.memory_space<vmem>>, vector<1x128x128xbf16>
    %145 = vector.shape_cast %144 : vector<1x128x128xbf16> to vector<128x128xbf16>
    %cst_158 = arith.constant dense<0.000000e+00> : vector<16x128xf32>
    %146 = tpu.matmul %143, %145, %cst_158 {dimension_numbers = #tpu.dot_dimension_numbers<[1], [0], [0], [1], [0, 0, 1, 1], [], []>} : vector<16x128xbf16>, vector<128x128xbf16>, vector<16x128xf32> -> vector<16x128xf32>
    %147 = arith.addf %140, %146 : vector<16x128xf32>
    %c0_159 = arith.constant 0 : index
    %c1_160 = arith.constant 1 : index
    %c0_161 = arith.constant 0 : index
    %c0_162 = arith.constant 0 : index
    %148 = vector.load %arg3[%c0_159, %c1_160, %c0_161, %c0_162] : memref<1x6x6x128xbf16, #tpu.memory_space<vmem>>, vector<1x4x4x128xbf16>
    %149 = vector.shape_cast %148 : vector<1x4x4x128xbf16> to vector<4x4x128xbf16>
    %150 = vector.shape_cast %149 : vector<4x4x128xbf16> to vector<16x128xbf16>
    %c3_163 = arith.constant 3 : index
    %c0_164 = arith.constant 0 : index
    %c0_165 = arith.constant 0 : index
    %151 = vector.load %arg6[%c3_163, %c0_164, %c0_165] : memref<9x128x128xbf16, #tpu.memory_space<vmem>>, vector<1x128x128xbf16>
    %152 = vector.shape_cast %151 : vector<1x128x128xbf16> to vector<128x128xbf16>
    %cst_166 = arith.constant dense<0.000000e+00> : vector<16x128xf32>
    %153 = tpu.matmul %150, %152, %cst_166 {dimension_numbers = #tpu.dot_dimension_numbers<[1], [0], [0], [1], [0, 0, 1, 1], [], []>} : vector<16x128xbf16>, vector<128x128xbf16>, vector<16x128xf32> -> vector<16x128xf32>
    %154 = arith.addf %147, %153 : vector<16x128xf32>
    %c0_167 = arith.constant 0 : index
    %c1_168 = arith.constant 1 : index
    %c1_169 = arith.constant 1 : index
    %c0_170 = arith.constant 0 : index
    %155 = vector.load %arg3[%c0_167, %c1_168, %c1_169, %c0_170] : memref<1x6x6x128xbf16, #tpu.memory_space<vmem>>, vector<1x4x4x128xbf16>
    %156 = vector.shape_cast %155 : vector<1x4x4x128xbf16> to vector<4x4x128xbf16>
    %157 = vector.shape_cast %156 : vector<4x4x128xbf16> to vector<16x128xbf16>
    %c4_171 = arith.constant 4 : index
    %c0_172 = arith.constant 0 : index
    %c0_173 = arith.constant 0 : index
    %158 = vector.load %arg6[%c4_171, %c0_172, %c0_173] : memref<9x128x128xbf16, #tpu.memory_space<vmem>>, vector<1x128x128xbf16>
    %159 = vector.shape_cast %158 : vector<1x128x128xbf16> to vector<128x128xbf16>
    %cst_174 = arith.constant dense<0.000000e+00> : vector<16x128xf32>
    %160 = tpu.matmul %157, %159, %cst_174 {dimension_numbers = #tpu.dot_dimension_numbers<[1], [0], [0], [1], [0, 0, 1, 1], [], []>} : vector<16x128xbf16>, vector<128x128xbf16>, vector<16x128xf32> -> vector<16x128xf32>
    %161 = arith.addf %154, %160 : vector<16x128xf32>
    %c0_175 = arith.constant 0 : index
    %c1_176 = arith.constant 1 : index
    %c2_177 = arith.constant 2 : index
    %c0_178 = arith.constant 0 : index
    %162 = vector.load %arg3[%c0_175, %c1_176, %c2_177, %c0_178] : memref<1x6x6x128xbf16, #tpu.memory_space<vmem>>, vector<1x4x4x128xbf16>
    %163 = vector.shape_cast %162 : vector<1x4x4x128xbf16> to vector<4x4x128xbf16>
    %164 = vector.shape_cast %163 : vector<4x4x128xbf16> to vector<16x128xbf16>
    %c5_179 = arith.constant 5 : index
    %c0_180 = arith.constant 0 : index
    %c0_181 = arith.constant 0 : index
    %165 = vector.load %arg6[%c5_179, %c0_180, %c0_181] : memref<9x128x128xbf16, #tpu.memory_space<vmem>>, vector<1x128x128xbf16>
    %166 = vector.shape_cast %165 : vector<1x128x128xbf16> to vector<128x128xbf16>
    %cst_182 = arith.constant dense<0.000000e+00> : vector<16x128xf32>
    %167 = tpu.matmul %164, %166, %cst_182 {dimension_numbers = #tpu.dot_dimension_numbers<[1], [0], [0], [1], [0, 0, 1, 1], [], []>} : vector<16x128xbf16>, vector<128x128xbf16>, vector<16x128xf32> -> vector<16x128xf32>
    %168 = arith.addf %161, %167 : vector<16x128xf32>
    %c0_183 = arith.constant 0 : index
    %c2_184 = arith.constant 2 : index
    %c0_185 = arith.constant 0 : index
    %c0_186 = arith.constant 0 : index
    %169 = vector.load %arg3[%c0_183, %c2_184, %c0_185, %c0_186] : memref<1x6x6x128xbf16, #tpu.memory_space<vmem>>, vector<1x4x4x128xbf16>
    %170 = vector.shape_cast %169 : vector<1x4x4x128xbf16> to vector<4x4x128xbf16>
    %171 = vector.shape_cast %170 : vector<4x4x128xbf16> to vector<16x128xbf16>
    %c6_187 = arith.constant 6 : index
    %c0_188 = arith.constant 0 : index
    %c0_189 = arith.constant 0 : index
    %172 = vector.load %arg6[%c6_187, %c0_188, %c0_189] : memref<9x128x128xbf16, #tpu.memory_space<vmem>>, vector<1x128x128xbf16>
    %173 = vector.shape_cast %172 : vector<1x128x128xbf16> to vector<128x128xbf16>
    %cst_190 = arith.constant dense<0.000000e+00> : vector<16x128xf32>
    %174 = tpu.matmul %171, %173, %cst_190 {dimension_numbers = #tpu.dot_dimension_numbers<[1], [0], [0], [1], [0, 0, 1, 1], [], []>} : vector<16x128xbf16>, vector<128x128xbf16>, vector<16x128xf32> -> vector<16x128xf32>
    %175 = arith.addf %168, %174 : vector<16x128xf32>
    %c0_191 = arith.constant 0 : index
    %c2_192 = arith.constant 2 : index
    %c1_193 = arith.constant 1 : index
    %c0_194 = arith.constant 0 : index
    %176 = vector.load %arg3[%c0_191, %c2_192, %c1_193, %c0_194] : memref<1x6x6x128xbf16, #tpu.memory_space<vmem>>, vector<1x4x4x128xbf16>
    %177 = vector.shape_cast %176 : vector<1x4x4x128xbf16> to vector<4x4x128xbf16>
    %178 = vector.shape_cast %177 : vector<4x4x128xbf16> to vector<16x128xbf16>
    %c7_195 = arith.constant 7 : index
    %c0_196 = arith.constant 0 : index
    %c0_197 = arith.constant 0 : index
    %179 = vector.load %arg6[%c7_195, %c0_196, %c0_197] : memref<9x128x128xbf16, #tpu.memory_space<vmem>>, vector<1x128x128xbf16>
    %180 = vector.shape_cast %179 : vector<1x128x128xbf16> to vector<128x128xbf16>
    %cst_198 = arith.constant dense<0.000000e+00> : vector<16x128xf32>
    %181 = tpu.matmul %178, %180, %cst_198 {dimension_numbers = #tpu.dot_dimension_numbers<[1], [0], [0], [1], [0, 0, 1, 1], [], []>} : vector<16x128xbf16>, vector<128x128xbf16>, vector<16x128xf32> -> vector<16x128xf32>
    %182 = arith.addf %175, %181 : vector<16x128xf32>
    %c0_199 = arith.constant 0 : index
    %c2_200 = arith.constant 2 : index
    %c2_201 = arith.constant 2 : index
    %c0_202 = arith.constant 0 : index
    %183 = vector.load %arg3[%c0_199, %c2_200, %c2_201, %c0_202] : memref<1x6x6x128xbf16, #tpu.memory_space<vmem>>, vector<1x4x4x128xbf16>
    %184 = vector.shape_cast %183 : vector<1x4x4x128xbf16> to vector<4x4x128xbf16>
    %185 = vector.shape_cast %184 : vector<4x4x128xbf16> to vector<16x128xbf16>
    %c8_203 = arith.constant 8 : index
    %c0_204 = arith.constant 0 : index
    %c0_205 = arith.constant 0 : index
    %186 = vector.load %arg6[%c8_203, %c0_204, %c0_205] : memref<9x128x128xbf16, #tpu.memory_space<vmem>>, vector<1x128x128xbf16>
    %187 = vector.shape_cast %186 : vector<1x128x128xbf16> to vector<128x128xbf16>
    %cst_206 = arith.constant dense<0.000000e+00> : vector<16x128xf32>
    %188 = tpu.matmul %185, %187, %cst_206 {dimension_numbers = #tpu.dot_dimension_numbers<[1], [0], [0], [1], [0, 0, 1, 1], [], []>} : vector<16x128xbf16>, vector<128x128xbf16>, vector<16x128xf32> -> vector<16x128xf32>
    %189 = arith.addf %182, %188 : vector<16x128xf32>
    %c0_207 = arith.constant 0 : index
    %c0_208 = arith.constant 0 : index
    %190 = vector.load %arg7[%c0_207, %c0_208] : memref<1x128xf32, #tpu.memory_space<vmem>>, vector<1x128xf32>
    %191 = vector.broadcast %190 : vector<1x128xf32> to vector<16x128xf32>
    %192 = arith.addf %189, %191 : vector<16x128xf32>
    %193 = vector.shape_cast %192 : vector<16x128xf32> to vector<4x4x128xf32>
    %194 = arith.truncf %193 : vector<4x4x128xf32> to vector<4x4x128xbf16>
    %c0_209 = arith.constant 0 : index
    %c0_210 = arith.constant 0 : index
    %c0_211 = arith.constant 0 : index
    %c0_212 = arith.constant 0 : index
    %195 = vector.load %arg8[%c0_209, %c0_210, %c0_211, %c0_212] : memref<1x4x4x128xbf16, #tpu.memory_space<vmem>>, vector<1x4x4x128xbf16>
    %196 = vector.shape_cast %195 : vector<1x4x4x128xbf16> to vector<4x4x128xbf16>
    %197 = vector.shape_cast %194 : vector<4x4x128xbf16> to vector<1x4x4x128xbf16>
    tpu.vector_store %arg8[%c0_209, %c0_210, %c0_211, %c0_212], %197 {strides = array<i32>} : memref<1x4x4x128xbf16, #tpu.memory_space<vmem>>, vector<1x4x4x128xbf16>,
    return
  }
  func.func @transform_0(%arg0: i32) -> (i32, i32, i32, i32) {
    %c0_i32 = arith.constant 0 : i32
    %c0_i32_0 = arith.constant 0 : i32
    %c0_i32_1 = arith.constant 0 : i32
    %c0_i32_2 = arith.constant 0 : i32
    return %arg0, %c0_i32, %c0_i32_0, %c0_i32_1 : i32, i32, i32, i32
  }
  func.func @transform_1(%arg0: i32) -> (i32, i32, i32, i32) {
    %c0_i32 = arith.constant 0 : i32
    %c0_i32_0 = arith.constant 0 : i32
    %c0_i32_1 = arith.constant 0 : i32
    %c0_i32_2 = arith.constant 0 : i32
    return %arg0, %c0_i32, %c0_i32_0, %c0_i32_1 : i32, i32, i32, i32
  }
  func.func @transform_2(%arg0: i32) -> (i32, i32, i32, i32) {
    %c0_i32 = arith.constant 0 : i32
    %c0_i32_0 = arith.constant 0 : i32
    %c0_i32_1 = arith.constant 0 : i32
    %c0_i32_2 = arith.constant 0 : i32
    return %arg0, %c0_i32, %c0_i32_0, %c0_i32_1 : i32, i32, i32, i32
  }
  func.func @transform_3(%arg0: i32) -> (i32, i32, i32) {
    %c0_i32 = arith.constant 0 : i32
    %c0_i32_0 = arith.constant 0 : i32
    %c0_i32_1 = arith.constant 0 : i32
    %c0_i32_2 = arith.constant 0 : i32
    return %c0_i32, %c0_i32_0, %c0_i32_1 : i32, i32, i32
  }
  func.func @transform_4(%arg0: i32) -> (i32, i32, i32) {
    %c0_i32 = arith.constant 0 : i32
    %c0_i32_0 = arith.constant 0 : i32
    %c0_i32_1 = arith.constant 0 : i32
    %c0_i32_2 = arith.constant 0 : i32
    return %c0_i32, %c0_i32_0, %c0_i32_1 : i32, i32, i32
  }
  func.func @transform_5(%arg0: i32) -> (i32, i32, i32) {
    %c0_i32 = arith.constant 0 : i32
    %c0_i32_0 = arith.constant 0 : i32
    %c0_i32_1 = arith.constant 0 : i32
    %c0_i32_2 = arith.constant 0 : i32
    return %c0_i32, %c0_i32_0, %c0_i32_1 : i32, i32, i32
  }
  func.func @transform_6(%arg0: i32) -> (i32, i32) {
    %c0_i32 = arith.constant 0 : i32
    %c0_i32_0 = arith.constant 0 : i32
    %c0_i32_1 = arith.constant 0 : i32
    return %c0_i32, %c0_i32_0 : i32, i32
  }
  func.func @transform_7(%arg0: i32) -> (i32, i32, i32, i32) {
    %c0_i32 = arith.constant 0 : i32
    %c0_i32_0 = arith.constant 0 : i32
    %c0_i32_1 = arith.constant 0 : i32
    %c0_i32_2 = arith.constant 0 : i32
    return %arg0, %c0_i32, %c0_i32_0, %c0_i32_1 : i32, i32, i32, i32
  }
}

</mosaic_0001>

<bundles_post_ra>
// kernel: custom_pan_forward.12
= control target key start
LH: loop header
LB: loop body
LE: loop exit
PB: predicated region body
PF: predicated region fallthrough
CT: control target
= control target key end

     0   :  { %s960_s12 = smov 0   ;;  %s1085_s0 = inlined_call_operand.vmem [shape: bf16[2,16,16,128], index: 0, kind: input, shape index: {}]   ;;  %s1086_s1 = inlined_call_operand.vmem [shape: bf16[1,128,128], index: 1, kind: input, shape index: {}]   ;;  %s1087_s2 = inlined_call_operand.vmem [shape: f32[1,128], index: 2, kind: input, shape index: {}]   ;;  %s1088_s3 = inlined_call_operand.vmem [shape: bf16[2,16,16,128], index: 3, kind: output, shape index: {}]  }
   0x1 LB: > { %s671_s13 = sadd.s32 4294967295, %s938_s12   ;;  %p675_p0 = scmp.ge.s32.totalorder %s938_s12, 1  ;;  %s938_s12 = sphi %s960_s12, %s13_s12  }
   0x2   : > { %p137_p1 = scmp.lt.s32.totalorder %s938_s12, 3 }
   0x4   : > { %p138_p2 = pnand %p675_p0, %p137_p1 }
   0x5   : > { %p161_p3 = scmp.lt.s32.totalorder (!%p138_p2), %s671_s13, 1 }
   0x6   : > { %141 = sbr.rel (%p138_p2) target bundleno = 241 (0xf1), region = 32 }
   0xb   : > { %v803_v0 = vld [vmem:[%s1086_s1 + $0x38] sm:$0xff]  ;;  %v802_v1 = vld [vmem:[%s1086_s1 + $0x30] sm:$0xff]  ;;  %v801_v2 = vld [vmem:[%s1086_s1 + $0x28] sm:$0xff]  ;;  %s1090_s13 = smov (!%p161_p3, %s671_s13), 1 }
   0xc   : > { %367 = vmatpush.bf16.msra.mxu0 %v803_v0  ;;  %899 = vmatpush.bf16.msra.mxu1 %v803_v0  ;;  %v800_v3 = vld [vmem:[%s1086_s1 + $0x20] sm:$0xff]  ;;  %v799_v4 = vld [vmem:[%s1086_s1 + $0x18] sm:$0xff]  ;;  %v798_v5 = vld [vmem:[%s1086_s1 + $0x10] sm:$0xff]  ;;  %s778_s28 = sshll.u32 %s1090_s13, 7 }
   0xd   : > { %900 = vmatpush.bf16.msra.mxu2 %v803_v0  ;;  %901 = vmatpush.bf16.msra.mxu3 %v803_v0  ;;  %v797_v6 = vld [vmem:[%s1086_s1 + $0x8] sm:$0xff]  ;;  %v796_v7 = vld [vmem:[%s1086_s1] sm:$0xff]  ;;  %s1004_s6 = scalar_lea.vmem %s1085_s0, %s778_s28  ;;  %s1038_s11 = scalar_lea.vmem %s1088_s3, %s778_s28 }
   0xe   : > { %v780_v8 = vld [vmem:[%s1004_s6] sm:$0xff]  ;;  %v781_v12 = vld [vmem:[%s1004_s6 + $0x8] sm:$0xff]  ;;  %v782_v16 = vld [vmem:[%s1004_s6 + $0x10] sm:$0xff] }
   0xf   : > { %v784_v9 = vld [vmem:[%s1004_s6 + $0x20] sm:$0xff]  ;;  %v785_v13 = vld [vmem:[%s1004_s6 + $0x28] sm:$0xff]  ;;  %v786_v17 = vld [vmem:[%s1004_s6 + $0x30] sm:$0xff] }
  0x10   : > { %368 = vmatpush.bf16.msra.mxu0 %v802_v1  ;;  %902 = vmatpush.bf16.msra.mxu1 %v802_v1  ;;  %v788_v10 = vld [vmem:[%s1004_s6 + $0x40] sm:$0xff]  ;;  %v789_v14 = vld [vmem:[%s1004_s6 + $0x48] sm:$0xff]  ;;  %v790_v18 = vld [vmem:[%s1004_s6 + $0x50] sm:$0xff] }
  0x11   : > { %903 = vmatpush.bf16.msra.mxu2 %v802_v1  ;;  %904 = vmatpush.bf16.msra.mxu3 %v802_v1  ;;  %v792_v11 = vld [vmem:[%s1004_s6 + $0x60] sm:$0xff]  ;;  %v793_v15 = vld [vmem:[%s1004_s6 + $0x68] sm:$0xff]  ;;  %v794_v19 = vld [vmem:[%s1004_s6 + $0x70] sm:$0xff] }
  0x12   : > { %v783_v20 = vld [vmem:[%s1004_s6 + $0x18] sm:$0xff]  ;;  %v1025_v26 = vld [vmem:[%s1087_s2] ss:$0 sm:$0xff] }
  0x13   : > { %v787_v21 = vld [vmem:[%s1004_s6 + $0x38] sm:$0xff] }
  0x14   : > { %369 = vmatpush.bf16.msra.mxu0 %v801_v2  ;;  %905 = vmatpush.bf16.msra.mxu1 %v801_v2  ;;  %v791_v22 = vld [vmem:[%s1004_s6 + $0x58] sm:$0xff] }
  0x15   : > { %906 = vmatpush.bf16.msra.mxu2 %v801_v2  ;;  %907 = vmatpush.bf16.msra.mxu3 %v801_v2  ;;  %v795_v23 = vld [vmem:[%s1004_s6 + $0x78] sm:$0xff] }
  0x18   : > { %370 = vmatpush.bf16.msra.mxu0 %v800_v3  ;;  %908 = vmatpush.bf16.msra.mxu1 %v800_v3 }
  0x19   : > { %909 = vmatpush.bf16.msra.mxu2 %v800_v3  ;;  %910 = vmatpush.bf16.msra.mxu3 %v800_v3 }
  0x1c   : > { %371 = vmatpush.bf16.msra.mxu0 %v799_v4  ;;  %911 = vmatpush.bf16.msra.mxu1 %v799_v4 }
  0x1d   : > { %912 = vmatpush.bf16.msra.mxu2 %v799_v4  ;;  %913 = vmatpush.bf16.msra.mxu3 %v799_v4 }
  0x20   : > { %372 = vmatpush.bf16.msra.mxu0 %v798_v5  ;;  %914 = vmatpush.bf16.msra.mxu1 %v798_v5 }
  0x21   : > { %915 = vmatpush.bf16.msra.mxu2 %v798_v5  ;;  %916 = vmatpush.bf16.msra.mxu3 %v798_v5 }
  0x24   : > { %373 = vmatpush.bf16.msra.mxu0 %v797_v6  ;;  %917 = vmatpush.bf16.msra.mxu1 %v797_v6 }
  0x25   : > { %918 = vmatpush.bf16.msra.mxu2 %v797_v6  ;;  %919 = vmatpush.bf16.msra.mxu3 %v797_v6 }
  0x28   : > { %374 = vmatpush.bf16.msra.mxu0 %v796_v7  ;;  %920 = vmatpush.bf16.msra.mxu1 %v796_v7 }
  0x29   : > { %921 = vmatpush.bf16.msra.mxu2 %v796_v7  ;;  %922 = vmatpush.bf16.msra.mxu3 %v796_v7 }
  0x2b   : > { %375 = vmatmul.bf16.vlgmr.msra.gmra.mxu0 %v780_v8  ;;  %395 = vmatmul.bf16.vlgmr.msra.gmra.mxu1 %v784_v9 }
  0x2c   : > { %415 = vmatmul.bf16.vlgmr.msra.gmra.mxu2 %v788_v10  ;;  %435 = vmatmul.bf16.vlgmr.msra.gmra.mxu3 %v792_v11 }
  0x3b   : > { %380 = vmatmul.bf16.gmra.mxu0 %v781_v12  ;;  %400 = vmatmul.bf16.gmra.mxu1 %v785_v13 }
  0x3c   : > { %420 = vmatmul.bf16.gmra.mxu2 %v789_v14  ;;  %440 = vmatmul.bf16.gmra.mxu3 %v793_v15 }
  0x4b   : > { %385 = vmatmul.bf16.gmra.mxu0 %v782_v16  ;;  %405 = vmatmul.bf16.gmra.mxu1 %v786_v17 }
  0x4c   : > { %425 = vmatmul.bf16.gmra.mxu2 %v790_v18  ;;  %445 = vmatmul.bf16.gmra.mxu3 %v794_v19 }
  0x5b   : > { %390 = vmatmul.bf16.gmra.mxu0 %v783_v20  ;;  %410 = vmatmul.bf16.gmra.mxu1 %v787_v21 }
  0x5c   : > { %430 = vmatmul.bf16.gmra.mxu2 %v791_v22  ;;  %450 = vmatmul.bf16.gmra.mxu3 %v795_v23 }
  0xa8   : > { %v376_v24 = vpop.f32.mrf.mxu0  ;;  %v396_v25 = vpop.f32.mrf.mxu1 }
  0xa9   : > { %v377_v27 = vadd.f32 %v1025_v26, %v376_v24  ;;  %v397_v28 = vadd.f32 %v1025_v26, %v396_v25 }
  0xab   : > { %v488_v33 = vmul.f32 0.1, %v377_v27  ;;  %v496_v34 = vmul.f32 0.1, %v397_v28  ;;  %vm456_vm0 = vcmp.gt.f32.partialorder %v377_v27, 0.0  ;;  %vm464_vm1 = vcmp.gt.f32.partialorder %v397_v28, 0.0 }
  0xad   : > { %v520_v41 = vsel %vm456_vm0, %v377_v27, %v488_v33  ;;  %v528_v42 = vsel %vm464_vm1, %v397_v28, %v496_v34 }
  0xaf   : > { %v416_v29 = vpop.f32.mrf.mxu2  ;;  %v436_v30 = vpop.f32.mrf.mxu3 }
  0xb0   : > { %v378_v31 = vpop.f32.mrf.mxu0  ;;  %v398_v32 = vpop.f32.mrf.mxu1  ;;  %v417_v39 = vadd.f32 %v1025_v26, %v416_v29  ;;  %v437_v40 = vadd.f32 %v1025_v26, %v436_v30 }
  0xb1   : > { %v379_v35 = vadd.f32 %v1025_v26, %v378_v31  ;;  %v399_v36 = vadd.f32 %v1025_v26, %v398_v32 }
  0xb2   : > { %v504_v49 = vmul.f32 0.1, %v417_v39  ;;  %v512_v50 = vmul.f32 0.1, %v437_v40  ;;  %vm472_vm4 = vcmp.gt.f32.partialorder %v417_v39, 0.0  ;;  %vm480_vm5 = vcmp.gt.f32.partialorder %v437_v40, 0.0 }
  0xb3   : > { %vm457_vm2 = vcmp.gt.f32.partialorder %v379_v35, 0.0  ;;  %v489_v37 = vmul.f32 0.1, %v379_v35  ;;  %vm465_vm3 = vcmp.gt.f32.partialorder %v399_v36, 0.0  ;;  %v497_v38 = vmul.f32 0.1, %v399_v36 }
  0xb4   : > { %v536_v57 = vsel %vm472_vm4, %v417_v39, %v504_v49  ;;  %v544_v58 = vsel %vm480_vm5, %v437_v40, %v512_v50 }
  0xb5   : > { %v521_v43 = vsel %vm457_vm2, %v379_v35, %v489_v37  ;;  %v529_v44 = vsel %vm465_vm3, %v399_v36, %v497_v38 }
  0xb6   : > { %v807_v45 = vpack.c.bf16 %v521_v43, %v520_v41  ;;  %v827_v46 = vpack.c.bf16 %v529_v44, %v528_v42 }
  0xb7   : > { %v418_v47 = vpop.f32.mrf.mxu2  ;;  %v438_v48 = vpop.f32.mrf.mxu3 }
  0xb8   : > { %808 = vst [vmem:[%s1038_s11] sm:$0xff] %v807_v45   ;;  %v419_v51 = vadd.f32 %v1025_v26, %v418_v47  ;;  %v439_v52 = vadd.f32 %v1025_v26, %v438_v48  ;;  %v381_v53 = vpop.f32.mrf.mxu0  ;;  %v401_v54 = vpop.f32.mrf.mxu1 }
  0xb9   : > { %887 = vst [vmem:[%s1038_s11 + $0x20] sm:$0xff] %v827_v46   ;;  %v382_v63 = vadd.f32 %v1025_v26, %v381_v53  ;;  %v402_v0 = vadd.f32 %v1025_v26, %v401_v54 }
  0xba   : > { %vm473_vm6 = vcmp.gt.f32.partialorder %v419_v51, 0.0  ;;  %v505_v55 = vmul.f32 0.1, %v419_v51  ;;  %vm481_vm7 = vcmp.gt.f32.partialorder %v439_v52, 0.0  ;;  %v513_v56 = vmul.f32 0.1, %v439_v52 }
  0xbb   : > { %v490_v5 = vmul.f32 0.1, %v382_v63  ;;  %v498_v6 = vmul.f32 0.1, %v402_v0  ;;  %vm458_vm8 = vcmp.gt.f32.partialorder %v382_v63, 0.0  ;;  %vm466_vm9 = vcmp.gt.f32.partialorder %v402_v0, 0.0 }
  0xbc   : > { %v537_v59 = vsel %vm473_vm6, %v419_v51, %v505_v55  ;;  %v545_v60 = vsel %vm481_vm7, %v439_v52, %v513_v56 }
  0xbd   : > { %v847_v61 = vpack.c.bf16 %v537_v59, %v536_v57  ;;  %v867_v62 = vpack.c.bf16 %v545_v60, %v544_v58  ;;  %v522_v13 = vsel %vm458_vm8, %v382_v63, %v490_v5  ;;  %v530_v14 = vsel %vm466_vm9, %v402_v0, %v498_v6 }
  0xbf   : > { %891 = vst [vmem:[%s1038_s11 + $0x40] sm:$0xff] %v847_v61   ;;  %v421_v1 = vpop.f32.mrf.mxu2  ;;  %v441_v2 = vpop.f32.mrf.mxu3 }
  0xc0   : > { %895 = vst [vmem:[%s1038_s11 + $0x60] sm:$0xff] %v867_v62   ;;  %v383_v3 = vpop.f32.mrf.mxu0  ;;  %v403_v4 = vpop.f32.mrf.mxu1  ;;  %v422_v11 = vadd.f32 %v1025_v26, %v421_v1  ;;  %v442_v12 = vadd.f32 %v1025_v26, %v441_v2 }
  0xc1   : > { %v384_v7 = vadd.f32 %v1025_v26, %v383_v3  ;;  %v404_v8 = vadd.f32 %v1025_v26, %v403_v4 }
  0xc2   : > { %v506_v21 = vmul.f32 0.1, %v422_v11  ;;  %v514_v22 = vmul.f32 0.1, %v442_v12  ;;  %vm474_vm12 = vcmp.gt.f32.partialorder %v422_v11, 0.0  ;;  %vm482_vm13 = vcmp.gt.f32.partialorder %v442_v12, 0.0 }
  0xc3   : > { %vm459_vm10 = vcmp.gt.f32.partialorder %v384_v7, 0.0  ;;  %v491_v9 = vmul.f32 0.1, %v384_v7  ;;  %vm467_vm11 = vcmp.gt.f32.partialorder %v404_v8, 0.0  ;;  %v499_v10 = vmul.f32 0.1, %v404_v8 }
  0xc4   : > { %v538_v30 = vsel %vm474_vm12, %v422_v11, %v506_v21  ;;  %v546_v31 = vsel %vm482_vm13, %v442_v12, %v514_v22 }
  0xc5   : > { %v523_v15 = vsel %vm459_vm10, %v384_v7, %v491_v9  ;;  %v531_v16 = vsel %vm467_vm11, %v404_v8, %v499_v10 }
  0xc6   : > { %v812_v17 = vpack.c.bf16 %v523_v15, %v522_v13  ;;  %v832_v18 = vpack.c.bf16 %v531_v16, %v530_v14 }
  0xc7   : > { %v423_v19 = vpop.f32.mrf.mxu2  ;;  %v443_v20 = vpop.f32.mrf.mxu3 }
  0xc8   : > { %884 = vst [vmem:[%s1038_s11 + $0x8] sm:$0xff] %v812_v17   ;;  %v424_v23 = vadd.f32 %v1025_v26, %v423_v19  ;;  %v444_v24 = vadd.f32 %v1025_v26, %v443_v20  ;;  %v386_v25 = vpop.f32.mrf.mxu0  ;;  %v406_v27 = vpop.f32.mrf.mxu1 }
  0xc9   : > { %888 = vst [vmem:[%s1038_s11 + $0x28] sm:$0xff] %v832_v18   ;;  %v387_v36 = vadd.f32 %v1025_v26, %v386_v25  ;;  %v407_v37 = vadd.f32 %v1025_v26, %v406_v27 }
  0xca   : > { %vm475_vm14 = vcmp.gt.f32.partialorder %v424_v23, 0.0  ;;  %v507_v28 = vmul.f32 0.1, %v424_v23  ;;  %vm483_vm15 = vcmp.gt.f32.partialorder %v444_v24, 0.0  ;;  %v515_v29 = vmul.f32 0.1, %v444_v24 }
  0xcb   : > { %v492_v42 = vmul.f32 0.1, %v387_v36  ;;  %v500_v43 = vmul.f32 0.1, %v407_v37  ;;  %vm460_vm0 = vcmp.gt.f32.partialorder %v387_v36, 0.0  ;;  %vm468_vm1 = vcmp.gt.f32.partialorder %v407_v37, 0.0 }
  0xcc   : > { %v539_v32 = vsel %vm475_vm14, %v424_v23, %v507_v28  ;;  %v547_v33 = vsel %vm483_vm15, %v444_v24, %v515_v29 }
  0xcd   : > { %v852_v34 = vpack.c.bf16 %v539_v32, %v538_v30  ;;  %v872_v35 = vpack.c.bf16 %v547_v33, %v546_v31  ;;  %v524_v50 = vsel %vm460_vm0, %v387_v36, %v492_v42  ;;  %v532_v51 = vsel %vm468_vm1, %v407_v37, %v500_v43 }
  0xcf   : > { %892 = vst [vmem:[%s1038_s11 + $0x48] sm:$0xff] %v852_v34   ;;  %v426_v38 = vpop.f32.mrf.mxu2  ;;  %v446_v39 = vpop.f32.mrf.mxu3 }
  0xd0   : > { %896 = vst [vmem:[%s1038_s11 + $0x68] sm:$0xff] %v872_v35   ;;  %v388_v40 = vpop.f32.mrf.mxu0  ;;  %v408_v41 = vpop.f32.mrf.mxu1  ;;  %v427_v48 = vadd.f32 %v1025_v26, %v426_v38  ;;  %v447_v49 = vadd.f32 %v1025_v26, %v446_v39 }
  0xd1   : > { %v389_v44 = vadd.f32 %v1025_v26, %v388_v40  ;;  %v409_v45 = vadd.f32 %v1025_v26, %v408_v41 }
  0xd2   : > { %v508_v58 = vmul.f32 0.1, %v427_v48  ;;  %v516_v59 = vmul.f32 0.1, %v447_v49  ;;  %vm476_vm4 = vcmp.gt.f32.partialorder %v427_v48, 0.0  ;;  %vm484_vm5 = vcmp.gt.f32.partialorder %v447_v49, 0.0 }
  0xd3   : > { %vm461_vm2 = vcmp.gt.f32.partialorder %v389_v44, 0.0  ;;  %v493_v46 = vmul.f32 0.1, %v389_v44  ;;  %vm469_vm3 = vcmp.gt.f32.partialorder %v409_v45, 0.0  ;;  %v501_v47 = vmul.f32 0.1, %v409_v45 }
  0xd4   : > { %v540_v2 = vsel %vm476_vm4, %v427_v48, %v508_v58  ;;  %v548_v3 = vsel %vm484_vm5, %v447_v49, %v516_v59 }
  0xd5   : > { %v525_v52 = vsel %vm461_vm2, %v389_v44, %v493_v46  ;;  %v533_v53 = vsel %vm469_vm3, %v409_v45, %v501_v47 }
  0xd6   : > { %v817_v54 = vpack.c.bf16 %v525_v52, %v524_v50  ;;  %v837_v55 = vpack.c.bf16 %v533_v53, %v532_v51 }
  0xd7   : > { %v428_v56 = vpop.f32.mrf.mxu2  ;;  %v448_v57 = vpop.f32.mrf.mxu3 }
  0xd8   : > { %885 = vst [vmem:[%s1038_s11 + $0x10] sm:$0xff] %v817_v54   ;;  %v429_v60 = vadd.f32 %v1025_v26, %v428_v56  ;;  %v449_v61 = vadd.f32 %v1025_v26, %v448_v57  ;;  %v391_v62 = vpop.f32.mrf.mxu0  ;;  %v411_v63 = vpop.f32.mrf.mxu1 }
  0xd9   : > { %889 = vst [vmem:[%s1038_s11 + $0x30] sm:$0xff] %v837_v55   ;;  %v392_v8 = vadd.f32 %v1025_v26, %v391_v62  ;;  %v412_v9 = vadd.f32 %v1025_v26, %v411_v63 }
  0xda   : > { %vm477_vm6 = vcmp.gt.f32.partialorder %v429_v60, 0.0  ;;  %v509_v0 = vmul.f32 0.1, %v429_v60  ;;  %vm485_vm7 = vcmp.gt.f32.partialorder %v449_v61, 0.0  ;;  %v517_v1 = vmul.f32 0.1, %v449_v61 }
  0xdb   : > { %v494_v14 = vmul.f32 0.1, %v392_v8  ;;  %v502_v15 = vmul.f32 0.1, %v412_v9  ;;  %vm462_vm8 = vcmp.gt.f32.partialorder %v392_v8, 0.0  ;;  %vm470_vm9 = vcmp.gt.f32.partialorder %v412_v9, 0.0 }
  0xdc   : > { %v541_v4 = vsel %vm477_vm6, %v429_v60, %v509_v0  ;;  %v549_v5 = vsel %vm485_vm7, %v449_v61, %v517_v1 }
  0xdd   : > { %v857_v6 = vpack.c.bf16 %v541_v4, %v540_v2  ;;  %v877_v7 = vpack.c.bf16 %v549_v5, %v548_v3  ;;  %v526_v22 = vsel %vm462_vm8, %v392_v8, %v494_v14  ;;  %v534_v23 = vsel %vm470_vm9, %v412_v9, %v502_v15 }
  0xdf   : > { %893 = vst [vmem:[%s1038_s11 + $0x50] sm:$0xff] %v857_v6   ;;  %v431_v10 = vpop.f32.mrf.mxu2  ;;  %v451_v11 = vpop.f32.mrf.mxu3 }
  0xe0   : > { %897 = vst [vmem:[%s1038_s11 + $0x70] sm:$0xff] %v877_v7   ;;  %v393_v12 = vpop.f32.mrf.mxu0  ;;  %v413_v13 = vpop.f32.mrf.mxu1  ;;  %v432_v20 = vadd.f32 %v1025_v26, %v431_v10  ;;  %v452_v21 = vadd.f32 %v1025_v26, %v451_v11 }
  0xe1   : > { %v394_v16 = vadd.f32 %v1025_v26, %v393_v12  ;;  %v414_v17 = vadd.f32 %v1025_v26, %v413_v13 }
  0xe2   : > { %v510_v31 = vmul.f32 0.1, %v432_v20  ;;  %v518_v32 = vmul.f32 0.1, %v452_v21  ;;  %vm478_vm12 = vcmp.gt.f32.partialorder %v432_v20, 0.0  ;;  %vm486_vm13 = vcmp.gt.f32.partialorder %v452_v21, 0.0 }
  0xe3   : > { %vm463_vm10 = vcmp.gt.f32.partialorder %v394_v16, 0.0  ;;  %v495_v18 = vmul.f32 0.1, %v394_v16  ;;  %vm471_vm11 = vcmp.gt.f32.partialorder %v414_v17, 0.0  ;;  %v503_v19 = vmul.f32 0.1, %v414_v17 }
  0xe4   : > { %v542_v37 = vsel %vm478_vm12, %v432_v20, %v510_v31  ;;  %v550_v38 = vsel %vm486_vm13, %v452_v21, %v518_v32 }
  0xe5   : > { %v527_v24 = vsel %vm463_vm10, %v394_v16, %v495_v18  ;;  %v535_v25 = vsel %vm471_vm11, %v414_v17, %v503_v19 }
  0xe6   : > { %v822_v27 = vpack.c.bf16 %v527_v24, %v526_v22  ;;  %v842_v28 = vpack.c.bf16 %v535_v25, %v534_v23 }
  0xe7   : > { %v433_v29 = vpop.f32.mrf.mxu2  ;;  %v453_v30 = vpop.f32.mrf.mxu3 }
  0xe8   : > { %886 = vst [vmem:[%s1038_s11 + $0x18] sm:$0xff] %v822_v27   ;;  %v434_v33 = vadd.f32 %v1025_v26, %v433_v29  ;;  %v454_v34 = vadd.f32 %v1025_v26, %v453_v30 }
  0xe9   : > { %890 = vst [vmem:[%s1038_s11 + $0x38] sm:$0xff] %v842_v28  }
  0xea   : > { %vm479_vm14 = vcmp.gt.f32.partialorder %v434_v33, 0.0  ;;  %v511_v35 = vmul.f32 0.1, %v434_v33  ;;  %vm487_vm15 = vcmp.gt.f32.partialorder %v454_v34, 0.0  ;;  %v519_v36 = vmul.f32 0.1, %v454_v34 }
  0xec   : > { %v543_v39 = vsel %vm479_vm14, %v434_v33, %v511_v35  ;;  %v551_v40 = vsel %vm487_vm15, %v454_v34, %v519_v36 }
  0xed   : > { %v862_v41 = vpack.c.bf16 %v543_v39, %v542_v37  ;;  %v882_v42 = vpack.c.bf16 %v551_v40, %v550_v38 }
  0xef   : > { %894 = vst [vmem:[%s1038_s11 + $0x58] sm:$0xff] %v862_v41  }
  0xf0   : > { %898 = vst [vmem:[%s1038_s11 + $0x78] sm:$0xff] %v882_v42  }
  0xf1 PF: > { %s13_s12 = sadd.s32 1, %s938_s12  }
  0xf2   : > { %p10_p4 = scmp.ge.s32.totalorder %s13_s12, 4  }
  0xf4   :  { %12 = sbr.rel (!%p10_p4) target bundleno = 1 (0x1), region = 62 }

// kernel: custom_pan_forward.10
= control target key start
LH: loop header
LB: loop body
LE: loop exit
PB: predicated region body
PF: predicated region fallthrough
CT: control target
= control target key end

     0   :  { %s370_s6 = smov 0   ;;  %s415_s0 = inlined_call_operand.vmem [shape: bf16[2,8,2,8,256], index: 0, kind: input, shape index: {}]   ;;  %s416_s1 = inlined_call_operand.vmem [shape: bf16[2,8,8,128], index: 1, kind: output, shape index: {}]  }
   0x1 LB: > { %s308_s7 = sadd.s32 4294967295, %s358_s6   ;;  %p312_p0 = scmp.ge.s32.totalorder %s358_s6, 1  ;;  %s358_s6 = sphi %s370_s6, %s11_s6  }
   0x2   : > { %p87_p1 = scmp.lt.s32.totalorder %s358_s6, 3 }
   0x4   : > { %p88_p2 = pnand %p312_p0, %p87_p1 }
   0x5   : > { %p107_p3 = scmp.lt.s32.totalorder (!%p88_p2), %s308_s7, 1 }
   0x6   : > { %91 = sbr.rel (%p88_p2) target bundleno = 45 (0x2d), region = 24 }
   0xb   : > { %s418_s7 = smov (!%p107_p3, %s308_s7), 1 }
   0xc   : > { %s319_s8 = sshll.u32 %s418_s7, 7  ;;  %s320_s12 = sshll.u32 %s418_s7, 5 }
   0xd   : > { %s384_s11 = scalar_lea.vmem %s415_s0, %s319_s8  ;;  %s405_s15 = scalar_lea.vmem %s416_s1, %s320_s12 }
   0xe   : > { %v117_v0 = vld [vmem:[%s384_s11] sm:$0xff]  ;;  %v118_v1 = vld [vmem:[%s384_s11 + $0x8] sm:$0xff]  ;;  %v119_v2 = vld [vmem:[%s384_s11 + $0x10] sm:$0xff] }
   0xf   : > { %v120_v3 = vld [vmem:[%s384_s11 + $0x18] sm:$0xff]  ;;  %v133_v4 = vunpack.c.l.bf16 %v117_v0  ;;  %v134_v5 = vunpack.c.h.bf16 %v117_v0  ;;  %v135_v6 = vunpack.c.l.bf16 %v118_v1  ;;  %v136_v7 = vunpack.c.h.bf16 %v118_v1  ;;  %v121_v8 = vld [vmem:[%s384_s11 + $0x20] sm:$0xff]  ;;  %v122_v9 = vld [vmem:[%s384_s11 + $0x28] sm:$0xff] }
  0x10   : > { %v137_v10 = vunpack.c.l.bf16 %v119_v2  ;;  %v138_v11 = vunpack.c.h.bf16 %v119_v2  ;;  %v139_v12 = vunpack.c.l.bf16 %v120_v3  ;;  %v140_v13 = vunpack.c.h.bf16 %v120_v3  ;;  %v123_v14 = vld [vmem:[%s384_s11 + $0x30] sm:$0xff]  ;;  %v124_v15 = vld [vmem:[%s384_s11 + $0x38] sm:$0xff]  ;;  %v125_v24 = vld [vmem:[%s384_s11 + $0x40] sm:$0xff] }
  0x11   : > { %v165_v16 = vmax.f32 %v133_v4, %v135_v6  ;;  %v166_v17 = vmax.f32 %v134_v5, %v136_v7  ;;  %v141_v18 = vunpack.c.l.bf16 %v121_v8  ;;  %v142_v19 = vunpack.c.h.bf16 %v121_v8  ;;  %v126_v29 = vld [vmem:[%s384_s11 + $0x48] sm:$0xff]  ;;  %v127_v34 = vld [vmem:[%s384_s11 + $0x50] sm:$0xff]  ;;  %v128_v37 = vld [vmem:[%s384_s11 + $0x58] sm:$0xff] }
  0x12   : > { %v167_v20 = vmax.f32 %v137_v10, %v139_v12  ;;  %v168_v21 = vmax.f32 %v138_v11, %v140_v13  ;;  %v143_v22 = vunpack.c.l.bf16 %v122_v9  ;;  %v144_v23 = vunpack.c.h.bf16 %v122_v9  ;;  %v129_v52 = vld [vmem:[%s384_s11 + $0x60] sm:$0xff]  ;;  %v130_v57 = vld [vmem:[%s384_s11 + $0x68] sm:$0xff]  ;;  %v131_v62 = vld [vmem:[%s384_s11 + $0x70] sm:$0xff] }
  0x13   : > { %v181_v25 = vpack.c.bf16 %v166_v17, %v165_v16  ;;  %v145_v26 = vunpack.c.l.bf16 %v123_v14  ;;  %v146_v27 = vunpack.c.h.bf16 %v123_v14  ;;  %v147_v28 = vunpack.c.l.bf16 %v124_v15  ;;  %v132_v1 = vld [vmem:[%s384_s11 + $0x78] sm:$0xff] }
  0x14   : > { %v182_v30 = vpack.c.bf16 %v168_v21, %v167_v20  ;;  %v148_v31 = vunpack.c.h.bf16 %v124_v15  ;;  %v169_v32 = vmax.f32 %v141_v18, %v143_v22  ;;  %v170_v33 = vmax.f32 %v142_v19, %v144_v23 }
  0x15   : > { %v205_v35 = vrot.slane %v181_v25, 4  ;;  %v171_v36 = vmax.f32 %v145_v26, %v147_v28  ;;  %v149_v38 = vunpack.c.l.bf16 %v125_v24  ;;  %v150_v39 = vunpack.c.h.bf16 %v125_v24 }
  0x16   : > { %v206_v40 = vrot.slane %v182_v30, 4  ;;  %v172_v41 = vmax.f32 %v146_v27, %v148_v31  ;;  %v183_v42 = vpack.c.bf16 %v170_v33, %v169_v32  ;;  %v151_v43 = vunpack.c.l.bf16 %v126_v29 }
  0x17   : > { %v221_v44 = vunpack.c.l.bf16 %v205_v35  ;;  %v152_v45 = vunpack.c.h.bf16 %v126_v29  ;;  %v153_v46 = vunpack.c.l.bf16 %v127_v34  ;;  %v154_v47 = vunpack.c.h.bf16 %v127_v34 }
  0x18   : > { %v222_v48 = vunpack.c.l.bf16 %v206_v40  ;;  %v184_v49 = vpack.c.bf16 %v172_v41, %v171_v36  ;;  %v207_v50 = vrot.slane %v183_v42, 4  ;;  %v155_v51 = vunpack.c.l.bf16 %v128_v37 }
  0x19   : > { %v229_v53 = vmax.f32 %v165_v16, %v221_v44  ;;  %v156_v54 = vunpack.c.h.bf16 %v128_v37  ;;  %v173_v55 = vmax.f32 %v149_v38, %v151_v43  ;;  %v174_v56 = vmax.f32 %v150_v39, %v152_v45 }
  0x1a   : > { %v230_v58 = vmax.f32 %v167_v20, %v222_v48  ;;  %v208_v59 = vrot.slane %v184_v49, 4  ;;  %v223_v60 = vunpack.c.l.bf16 %v207_v50  ;;  %v175_v61 = vmax.f32 %v153_v46, %v155_v51 }
  0x1b   : > { %v176_v63 = vmax.f32 %v154_v47, %v156_v54  ;;  %v185_v0 = vpack.c.bf16 %v174_v56, %v173_v55  ;;  %v157_v2 = vunpack.c.l.bf16 %v129_v52  ;;  %v158_v3 = vunpack.c.h.bf16 %v129_v52 }
  0x1c   : > { %v324_v4 = vpack.c.bf16 %v230_v58, %v229_v53  ;;  %v224_v5 = vunpack.c.l.bf16 %v208_v59  ;;  %v231_v6 = vmax.f32 %v169_v32, %v223_v60  ;;  %v159_v7 = vunpack.c.l.bf16 %v130_v57 }
  0x1d   : > { %v186_v8 = vpack.c.bf16 %v176_v63, %v175_v61  ;;  %v209_v9 = vrot.slane %v185_v0, 4  ;;  %v160_v10 = vunpack.c.h.bf16 %v130_v57  ;;  %v161_v11 = vunpack.c.l.bf16 %v131_v62 }
  0x1e   : > { %325 = vst [vmem:[%s405_s15] sm:$0xff] %v324_v4   ;;  %v232_v12 = vmax.f32 %v171_v36, %v224_v5  ;;  %v162_v13 = vunpack.c.h.bf16 %v131_v62  ;;  %v163_v14 = vunpack.c.l.bf16 %v132_v1  ;;  %v164_v15 = vunpack.c.h.bf16 %v132_v1 }
  0x1f   : > { %v210_v16 = vrot.slane %v186_v8, 4  ;;  %v225_v17 = vunpack.c.l.bf16 %v209_v9  ;;  %v177_v18 = vmax.f32 %v157_v2, %v159_v7  ;;  %v178_v19 = vmax.f32 %v158_v3, %v160_v10 }
  0x20   : > { %v329_v20 = vpack.c.bf16 %v232_v12, %v231_v6  ;;  %v179_v21 = vmax.f32 %v161_v11, %v163_v14  ;;  %v180_v22 = vmax.f32 %v162_v13, %v164_v15 }
  0x21   : > { %v226_v23 = vunpack.c.l.bf16 %v210_v16  ;;  %v233_v24 = vmax.f32 %v173_v55, %v225_v17  ;;  %v187_v25 = vpack.c.bf16 %v178_v19, %v177_v18 }
  0x22   : > { %341 = vst [vmem:[%s405_s15 + $0x8] sm:$0xff] %v329_v20   ;;  %v188_v26 = vpack.c.bf16 %v180_v22, %v179_v21 }
  0x23   : > { %v234_v27 = vmax.f32 %v175_v61, %v226_v23  ;;  %v211_v28 = vrot.slane %v187_v25, 4 }
  0x24   : > { %v212_v29 = vrot.slane %v188_v26, 4 }
  0x25   : > { %v334_v30 = vpack.c.bf16 %v234_v27, %v233_v24  ;;  %v227_v31 = vunpack.c.l.bf16 %v211_v28 }
  0x26   : > { %v228_v32 = vunpack.c.l.bf16 %v212_v29 }
  0x27   : > { %342 = vst [vmem:[%s405_s15 + $0x10] sm:$0xff] %v334_v30   ;;  %v235_v33 = vmax.f32 %v177_v18, %v227_v31 }
  0x28   : > { %v236_v34 = vmax.f32 %v179_v21, %v228_v32 }
  0x2a   : > { %v339_v35 = vpack.c.bf16 %v236_v34, %v235_v33 }
  0x2c   : > { %343 = vst [vmem:[%s405_s15 + $0x18] sm:$0xff] %v339_v35  }
  0x2d PF: > { %s11_s6 = sadd.s32 1, %s358_s6  }
  0x2e   : > { %p8_p4 = scmp.ge.s32.totalorder %s11_s6, 4  }
  0x30   :  { %10 = sbr.rel (!%p8_p4) target bundleno = 1 (0x1), region = 54 }

// kernel: custom_pan_forward.11
= control target key start
LH: loop header
LB: loop body
LE: loop exit
PB: predicated region body
PF: predicated region fallthrough
CT: control target
= control target key end

     0   :  { %s552_s12 = smov 0   ;;  %s607_s0 = inlined_call_operand.vmem [shape: bf16[2,8,8,128], index: 0, kind: input, shape index: {}]   ;;  %s608_s1 = inlined_call_operand.vmem [shape: bf16[1,128,128], index: 1, kind: input, shape index: {}]   ;;  %s609_s2 = inlined_call_operand.vmem [shape: f32[1,128], index: 2, kind: input, shape index: {}]   ;;  %s610_s3 = inlined_call_operand.vmem [shape: bf16[2,8,8,128], index: 3, kind: output, shape index: {}]  }
   0x1 LB: > { %s395_s13 = sadd.s32 4294967295, %s530_s12   ;;  %p399_p0 = scmp.ge.s32.totalorder %s530_s12, 1  ;;  %s530_s12 = sphi %s552_s12, %s13_s12  }
   0x2   : > { %p137_p1 = scmp.lt.s32.totalorder %s530_s12, 3 }
   0x4   : > { %p138_p2 = pnand %p399_p0, %p137_p1 }
   0x5   : > { %p161_p3 = scmp.lt.s32.totalorder (!%p138_p2), %s395_s13, 1 }
   0x6   : > { %141 = sbr.rel (%p138_p2) target bundleno = 193 (0xc1), region = 32 }
   0xb   : > { %v467_v0 = vld [vmem:[%s608_s1 + $0x38] sm:$0xff]  ;;  %v466_v1 = vld [vmem:[%s608_s1 + $0x30] sm:$0xff]  ;;  %v465_v2 = vld [vmem:[%s608_s1 + $0x28] sm:$0xff]  ;;  %s612_s13 = smov (!%p161_p3, %s395_s13), 1 }
   0xc   : > { %271 = vmatpush.bf16.msra.mxu0 %v467_v0  ;;  %491 = vmatpush.bf16.msra.mxu1 %v467_v0  ;;  %v464_v3 = vld [vmem:[%s608_s1 + $0x20] sm:$0xff]  ;;  %v463_v4 = vld [vmem:[%s608_s1 + $0x18] sm:$0xff]  ;;  %v462_v5 = vld [vmem:[%s608_s1 + $0x10] sm:$0xff]  ;;  %s454_s28 = sshll.u32 %s612_s13, 5 }
   0xd   : > { %492 = vmatpush.bf16.msra.mxu2 %v467_v0  ;;  %493 = vmatpush.bf16.msra.mxu3 %v467_v0  ;;  %v461_v6 = vld [vmem:[%s608_s1 + $0x8] sm:$0xff]  ;;  %v460_v7 = vld [vmem:[%s608_s1] sm:$0xff]  ;;  %s165_s6 = scalar_lea.vmem %s607_s0, %s454_s28  ;;  %s170_s11 = scalar_lea.vmem %s610_s3, %s454_s28 }
   0xe   : > { %v456_v8 = vld [vmem:[%s165_s6] sm:$0xff]  ;;  %v457_v9 = vld [vmem:[%s165_s6 + $0x8] sm:$0xff]  ;;  %v458_v10 = vld [vmem:[%s165_s6 + $0x10] sm:$0xff] }
   0xf   : > { %v459_v11 = vld [vmem:[%s165_s6 + $0x18] sm:$0xff]  ;;  %v523_v14 = vld [vmem:[%s609_s2] ss:$0 sm:$0xff] }
  0x10   : > { %272 = vmatpush.bf16.msra.mxu0 %v466_v1  ;;  %494 = vmatpush.bf16.msra.mxu1 %v466_v1 }
  0x11   : > { %495 = vmatpush.bf16.msra.mxu2 %v466_v1  ;;  %496 = vmatpush.bf16.msra.mxu3 %v466_v1 }
  0x14   : > { %273 = vmatpush.bf16.msra.mxu0 %v465_v2  ;;  %497 = vmatpush.bf16.msra.mxu1 %v465_v2 }
  0x15   : > { %498 = vmatpush.bf16.msra.mxu2 %v465_v2  ;;  %499 = vmatpush.bf16.msra.mxu3 %v465_v2 }
  0x18   : > { %274 = vmatpush.bf16.msra.mxu0 %v464_v3  ;;  %500 = vmatpush.bf16.msra.mxu1 %v464_v3 }
  0x19   : > { %501 = vmatpush.bf16.msra.mxu2 %v464_v3  ;;  %502 = vmatpush.bf16.msra.mxu3 %v464_v3 }
  0x1c   : > { %275 = vmatpush.bf16.msra.mxu0 %v463_v4  ;;  %503 = vmatpush.bf16.msra.mxu1 %v463_v4 }
  0x1d   : > { %504 = vmatpush.bf16.msra.mxu2 %v463_v4  ;;  %505 = vmatpush.bf16.msra.mxu3 %v463_v4 }
  0x20   : > { %276 = vmatpush.bf16.msra.mxu0 %v462_v5  ;;  %506 = vmatpush.bf16.msra.mxu1 %v462_v5 }
  0x21   : > { %507 = vmatpush.bf16.msra.mxu2 %v462_v5  ;;  %508 = vmatpush.bf16.msra.mxu3 %v462_v5 }
  0x24   : > { %277 = vmatpush.bf16.msra.mxu0 %v461_v6  ;;  %509 = vmatpush.bf16.msra.mxu1 %v461_v6 }
  0x25   : > { %510 = vmatpush.bf16.msra.mxu2 %v461_v6  ;;  %511 = vmatpush.bf16.msra.mxu3 %v461_v6 }
  0x28   : > { %278 = vmatpush.bf16.msra.mxu0 %v460_v7  ;;  %512 = vmatpush.bf16.msra.mxu1 %v460_v7 }
  0x29   : > { %513 = vmatpush.bf16.msra.mxu2 %v460_v7  ;;  %514 = vmatpush.bf16.msra.mxu3 %v460_v7 }
  0x2b   : > { %279 = vmatmul.bf16.vlgmr.msra.gmra.mxu0 %v456_v8  ;;  %284 = vmatmul.bf16.vlgmr.msra.gmra.mxu1 %v457_v9 }
  0x2c   : > { %289 = vmatmul.bf16.vlgmr.msra.gmra.mxu2 %v458_v10  ;;  %294 = vmatmul.bf16.vlgmr.msra.gmra.mxu3 %v459_v11 }
  0xa8   : > { %v280_v12 = vpop.f32.mrf.mxu0  ;;  %v285_v13 = vpop.f32.mrf.mxu1 }
  0xa9   : > { %v281_v15 = vadd.f32 %v523_v14, %v280_v12  ;;  %v286_v16 = vadd.f32 %v523_v14, %v285_v13 }
  0xab   : > { %v308_v21 = vmul.f32 0.1, %v281_v15  ;;  %v310_v22 = vmul.f32 0.1, %v286_v16  ;;  %vm300_vm0 = vcmp.gt.f32.partialorder %v281_v15, 0.0  ;;  %vm302_vm1 = vcmp.gt.f32.partialorder %v286_v16, 0.0 }
  0xad   : > { %v316_v29 = vsel %vm300_vm0, %v281_v15, %v308_v21  ;;  %v318_v30 = vsel %vm302_vm1, %v286_v16, %v310_v22 }
  0xaf   : > { %v290_v17 = vpop.f32.mrf.mxu2  ;;  %v295_v18 = vpop.f32.mrf.mxu3 }
  0xb0   : > { %v282_v19 = vpop.f32.mrf.mxu0  ;;  %v287_v20 = vpop.f32.mrf.mxu1  ;;  %v291_v27 = vadd.f32 %v523_v14, %v290_v17  ;;  %v296_v28 = vadd.f32 %v523_v14, %v295_v18 }
  0xb1   : > { %v283_v23 = vadd.f32 %v523_v14, %v282_v19  ;;  %v288_v24 = vadd.f32 %v523_v14, %v287_v20 }
  0xb2   : > { %v312_v37 = vmul.f32 0.1, %v291_v27  ;;  %v314_v38 = vmul.f32 0.1, %v296_v28  ;;  %vm304_vm4 = vcmp.gt.f32.partialorder %v291_v27, 0.0  ;;  %vm306_vm5 = vcmp.gt.f32.partialorder %v296_v28, 0.0 }
  0xb3   : > { %vm301_vm2 = vcmp.gt.f32.partialorder %v283_v23, 0.0  ;;  %v309_v25 = vmul.f32 0.1, %v283_v23  ;;  %vm303_vm3 = vcmp.gt.f32.partialorder %v288_v24, 0.0  ;;  %v311_v26 = vmul.f32 0.1, %v288_v24 }
  0xb4   : > { %v320_v43 = vsel %vm304_vm4, %v291_v27, %v312_v37  ;;  %v322_v44 = vsel %vm306_vm5, %v296_v28, %v314_v38 }
  0xb5   : > { %v317_v31 = vsel %vm301_vm2, %v283_v23, %v309_v25  ;;  %v319_v32 = vsel %vm303_vm3, %v288_v24, %v311_v26 }
  0xb6   : > { %v471_v33 = vpack.c.bf16 %v317_v31, %v316_v29  ;;  %v476_v34 = vpack.c.bf16 %v319_v32, %v318_v30 }
  0xb7   : > { %v292_v35 = vpop.f32.mrf.mxu2  ;;  %v297_v36 = vpop.f32.mrf.mxu3 }
  0xb8   : > { %472 = vst [vmem:[%s170_s11] sm:$0xff] %v471_v33   ;;  %v293_v39 = vadd.f32 %v523_v14, %v292_v35  ;;  %v298_v40 = vadd.f32 %v523_v14, %v297_v36 }
  0xb9   : > { %488 = vst [vmem:[%s170_s11 + $0x8] sm:$0xff] %v476_v34  }
  0xba   : > { %vm305_vm6 = vcmp.gt.f32.partialorder %v293_v39, 0.0  ;;  %v313_v41 = vmul.f32 0.1, %v293_v39  ;;  %vm307_vm7 = vcmp.gt.f32.partialorder %v298_v40, 0.0  ;;  %v315_v42 = vmul.f32 0.1, %v298_v40 }
  0xbc   : > { %v321_v45 = vsel %vm305_vm6, %v293_v39, %v313_v41  ;;  %v323_v46 = vsel %vm307_vm7, %v298_v40, %v315_v42 }
  0xbd   : > { %v481_v47 = vpack.c.bf16 %v321_v45, %v320_v43  ;;  %v486_v48 = vpack.c.bf16 %v323_v46, %v322_v44 }
  0xbf   : > { %489 = vst [vmem:[%s170_s11 + $0x10] sm:$0xff] %v481_v47  }
  0xc0   : > { %490 = vst [vmem:[%s170_s11 + $0x18] sm:$0xff] %v486_v48  }
  0xc1 PF: > { %s13_s12 = sadd.s32 1, %s530_s12  }
  0xc2   : > { %p10_p4 = scmp.ge.s32.totalorder %s13_s12, 4  }
  0xc4   :  { %12 = sbr.rel (!%p10_p4) target bundleno = 1 (0x1), region = 62 }

// kernel: custom_pan_forward.13
= control target key start
LH: loop header
LB: loop body
LE: loop exit
PB: predicated region body
PF: predicated region fallthrough
CT: control target
= control target key end

     0   :  { %s2768_s30 = smov 0   ;;  %s3251_s0 = inlined_call_operand.vmem [shape: bf16[2,9,9,128], index: 0, kind: input, shape index: {}]   ;;  %s3252_s1 = inlined_call_operand.vmem [shape: bf16[2,9,9,128], index: 1, kind: input, shape index: {}]   ;;  %s3253_s2 = inlined_call_operand.vmem [shape: bf16[2,9,9,128], index: 2, kind: input, shape index: {}]   ;;  %s3254_s3 = inlined_call_operand.vmem [shape: bf16[2,9,9,128], index: 3, kind: input, shape index: {}]   ;;  %s3255_s4 = inlined_call_operand.vmem [shape: bf16[4,128,128], index: 4, kind: input, shape index: {}]   ;;  %s3256_s5 = inlined_call_operand.vmem [shape: bf16[2,128,128], index: 5, kind: input, shape index: {}]   ;;  %s3257_s6 = inlined_call_operand.vmem [shape: bf16[2,128,128], index: 6, kind: input, shape index: {}]   ;;  %s3258_s7 = inlined_call_operand.vmem [shape: bf16[1,128,128], index: 7, kind: input, shape index: {}]   ;;  %s3259_s8 = inlined_call_operand.vmem [shape: f32[1,128], index: 8, kind: input, shape index: {}]   ;;  %s3260_s9 = inlined_call_operand.vmem [shape: bf16[2,8,8,128], index: 9, kind: output, shape index: {}]  }
   0x1 LB: > { %s2055_s10 = sadd.s32 4294967295, %s2716_s30   ;;  %p2059_p0 = scmp.ge.s32.totalorder %s2716_s30, 1  ;;  %s2716_s30 = sphi %s2768_s30, %s19_s30  }
   0x2   : > { %p317_p1 = scmp.lt.s32.totalorder %s2716_s30, 3 }
   0x4   : > { %p318_p2 = pnand %p2059_p0, %p317_p1 }
   0x5   : > { %p368_p3 = scmp.lt.s32.totalorder (!%p318_p2), %s2055_s10, 1 }
   0x6   : > { %321 = sbr.rel (%p318_p2) target bundleno = 337 (0x151), region = 56 }
   0xb   : > { %v2584_v0 = vld [vmem:[%s3255_s4 + $0x78] sm:$0xff]  ;;  %v2583_v2 = vld [vmem:[%s3255_s4 + $0x70] sm:$0xff]  ;;  %s3264_s10 = smov (!%p368_p3, %s2055_s10), 1  ;;  %v2582_v6 = vld [vmem:[%s3255_s4 + $0x68] sm:$0xff]  ;;  %vm425_vm0 = vsmask.f32 3328 }
   0xc   : > { %v2596_v1 = vld [vmem:[%s3255_s4 + $0xb8] sm:$0xff]  ;;  %2684 = vmatpush.bf16.msra.mxu1 %v2584_v0  ;;  %621 = vmatpush.bf16.msra.mxu0 %v2584_v0  ;;  %v2595_v3 = vld [vmem:[%s3255_s4 + $0xb0] sm:$0xff]  ;;  %s2794_s21 = smul.u32 72, %s3264_s10  ;;  %v2594_v7 = vld [vmem:[%s3255_s4 + $0xa8] sm:$0xff]  ;;  %vm426_vm1 = vsmask.f32 7440 }
   0xd   : > { %849 = vmatpush.bf16.msra.mxu2 %v2596_v1  ;;  %v2604_v4 = vld [vmem:[%s3255_s4 + $0xf8] sm:$0xff]  ;;  %v2603_v5 = vld [vmem:[%s3255_s4 + $0xf0] sm:$0xff]  ;;  %v2581_v11 = vld [vmem:[%s3255_s4 + $0x60] sm:$0xff] }
   0xe   : > { %1095 = vmatpush.bf16.msra.mxu3 %v2604_v4  ;;  %s2809_s11 = scalar_lea.vmem %s3251_s0, %s2794_s21  ;;  %v2593_v17 = vld [vmem:[%s3255_s4 + $0xa0] sm:$0xff]  ;;  %v2602_v18 = vld [vmem:[%s3255_s4 + $0xe8] sm:$0xff]  ;;  %v2580_v39 = vld [vmem:[%s3255_s4 + $0x58] sm:$0xff]  ;;  %s3024_s29 = scalar_lea.vmem %s3252_s1, %s2794_s21 }
   0xf   : > { %v397_v8 = vld [vmem:[%s2809_s11 + $0x20] sm:$0xf]  ;;  %v398_v9 = vld [vmem:[%s2809_s11 + $0x28] sm:$0xf]  ;;  %v421_v10 = vld [vmem:[%s2809_s11 + $0x24] sm:$0x1]  ;;  %s3098_s14 = scalar_lea.vmem %s3253_s2, %s2794_s21  ;;  %s3161_s15 = scalar_lea.vmem %s3254_s3, %s2794_s21 }
  0x10   : > { %2685 = vmatpush.bf16.msra.mxu1 %v2583_v2  ;;  %622 = vmatpush.bf16.msra.mxu0 %v2583_v2  ;;  %v422_v12 = vld [vmem:[%s2809_s11 + $0x2c] sm:$0x1]  ;;  %v485_v13 = vshrl.u32 %v397_v8, 16  ;;  %v488_v14 = vshll.u32 %v397_v8, 16  ;;  %v494_v15 = vshll.u32 %v421_v10, 16  ;;  %v499_v16 = vshrl.u32 %v398_v9, 16  ;;  %vm2836_vm2 = vmor %vm425_vm0, %vm426_vm1 }
  0x11   : > { %850 = vmatpush.bf16.msra.mxu2 %v2595_v3  ;;  %v502_v19 = vshll.u32 %v398_v9, 16  ;;  %v393_v20 = vld [vmem:[%s2809_s11] sm:$0xf]  ;;  %v508_v24 = vshll.u32 %v422_v12, 16  ;;  %v394_v25 = vld [vmem:[%s2809_s11 + $0x8] sm:$0xf] }
  0x12   : > { %1096 = vmatpush.bf16.msra.mxu3 %v2603_v5  ;;  %v487_v21 = vrot.slane %v485_v13, 4  ;;  %v490_v22 = vrot.slane %v488_v14, 5  ;;  %v501_v23 = vrot.slane %v499_v16, 4  ;;  %v496_v26 = vrot.slane %v494_v15, 5  ;;  %v417_v28 = vld [vmem:[%s2809_s11 + $0x4] sm:$0x1] }
  0x13   : > { %v504_v27 = vrot.slane %v502_v19, 5  ;;  %v418_v29 = vld [vmem:[%s2809_s11 + $0xc] sm:$0x1]  ;;  %v429_v31 = vshrl.u32 %v393_v20, 16  ;;  %v432_v32 = vshll.u32 %v393_v20, 16  ;;  %v438_v33 = vshll.u32 %v417_v28, 16 }
  0x14   : > { %2686 = vmatpush.bf16.msra.mxu1 %v2582_v6  ;;  %623 = vmatpush.bf16.msra.mxu0 %v2582_v6  ;;  %v491_v30 = vor.u32 %v490_v22, %v487_v21  ;;  %v2601_v35 = vld [vmem:[%s3255_s4 + $0xe0] sm:$0xff]  ;;  %v443_v36 = vshrl.u32 %v394_v25, 16  ;;  %v446_v37 = vshll.u32 %v394_v25, 16  ;;  %v452_v38 = vshll.u32 %v418_v29, 16  ;;  %v2592_v45 = vld [vmem:[%s3255_s4 + $0x98] sm:$0xff]  ;;  %v2579_v57 = vld [vmem:[%s3255_s4 + $0x50] sm:$0xff] }
  0x15   : > { %851 = vmatpush.bf16.msra.mxu2 %v2594_v7  ;;  %v505_v34 = vor.u32 %v504_v27, %v501_v23  ;;  %v510_v42 = vrot.slane %v508_v24, 5  ;;  %v431_v43 = vrot.slane %v429_v31, 4  ;;  %v434_v44 = vrot.slane %v432_v32, 5  ;;  %v399_v51 = vld [vmem:[%s2809_s11 + $0x30] sm:$0xf]  ;;  %v2600_v55 = vld [vmem:[%s3255_s4 + $0xd8] sm:$0xff] }
  0x16   : > { %1097 = vmatpush.bf16.msra.mxu3 %v2602_v18  ;;  %v492_v41 = vrot.slane %v491_v30, 4  ;;  %v445_v47 = vrot.slane %v443_v36, 4  ;;  %v448_v48 = vrot.slane %v446_v37, 5  ;;  %v440_v50 = vrot.slane %v438_v33, 5  ;;  %v400_v56 = vld [vmem:[%s2809_s11 + $0x38] sm:$0xf] }
  0x17   : > { %v506_v46 = vrot.slane %v505_v34, 4  ;;  %v435_v49 = vor.u32 %v434_v44, %v431_v43  ;;  %v454_v54 = vrot.slane %v452_v38, 5  ;;  %v513_v60 = vshrl.u32 %v399_v51, 16  ;;  %v2591_v62 = vld [vmem:[%s3255_s4 + $0x90] sm:$0xff]  ;;  %v396_v7 = vld [vmem:[%s2809_s11 + $0x18] sm:$0xf] }
  0x18   : > { %2687 = vmatpush.bf16.msra.mxu1 %v2581_v11  ;;  %624 = vmatpush.bf16.msra.mxu0 %v2581_v11  ;;  %v497_v52 = vsel %vm2836_vm2, %v492_v41, %v496_v26  ;;  %v449_v53 = vor.u32 %v448_v48, %v445_v47  ;;  %v516_v61 = vshll.u32 %v399_v51, 16  ;;  %v423_v0 = vld [vmem:[%s2809_s11 + $0x34] sm:$0x1]  ;;  %v527_v1 = vshrl.u32 %v400_v56, 16  ;;  %v395_v6 = vld [vmem:[%s2809_s11 + $0x10] sm:$0xf] }
  0x19   : > { %852 = vmatpush.bf16.msra.mxu2 %v2593_v17  ;;  %v511_v58 = vsel %vm2836_vm2, %v506_v46, %v510_v42  ;;  %v436_v59 = vrot.slane %v435_v49, 4  ;;  %v530_v2 = vshll.u32 %v400_v56, 16  ;;  %v515_v4 = vrot.slane %v513_v60, 4  ;;  %v2599_v11 = vld [vmem:[%s3255_s4 + $0xd0] sm:$0xff]  ;;  %v2578_v12 = vld [vmem:[%s3255_s4 + $0x48] sm:$0xff]  ;;  %v2577_v23 = vld [vmem:[%s3255_s4 + $0x40] sm:$0xff] }
  0x1a   : > { %1098 = vmatpush.bf16.msra.mxu3 %v2601_v35  ;;  %v450_v63 = vrot.slane %v449_v53, 4  ;;  %v518_v5 = vrot.slane %v516_v61, 5  ;;  %v2863_v8 = vunpack.c.l.b16 %v497_v52  ;;  %v2865_v9 = vunpack.c.l.b16 %v511_v58  ;;  %v2878_v14 = vld [vmem:[%s2809_s11 + $0x8] sm:$0xf]  ;;  %v2881_v15 = vld [vmem:[%s2809_s11 + $0xc] sm:$0xf0] }
  0x1b   : > { %v441_v3 = vsel %vm2836_vm2, %v436_v59, %v440_v50  ;;  %v522_v16 = vshll.u32 %v423_v0, 16  ;;  %v2590_v17 = vld [vmem:[%s3255_s4 + $0x88] sm:$0xff]  ;;  %v424_v19 = vld [vmem:[%s2809_s11 + $0x3c] sm:$0x1]  ;;  %v457_v20 = vshrl.u32 %v395_v6, 16  ;;  %v460_v21 = vshll.u32 %v395_v6, 16 }
  0x1c   : > { %2688 = vmatpush.bf16.msra.mxu1 %v2580_v39  ;;  %625 = vmatpush.bf16.msra.mxu0 %v2580_v39  ;;  %v455_v10 = vsel %vm2836_vm2, %v450_v63, %v454_v54  ;;  %v2875_v13 = vunpack.c.l.b16 %v441_v3  ;;  %v471_v22 = vshrl.u32 %v396_v7, 16  ;;  %v519_v24 = vor.u32 %v518_v5, %v515_v4  ;;  %v419_v27 = vld [vmem:[%s2809_s11 + $0x14] sm:$0x1]  ;;  %v2234_v28 = vld [vmem:[%s2809_s11 + $0x8] sm:$0xf]  ;;  %v2576_v30 = vld [vmem:[%s3255_s4 + $0x38] sm:$0xff] }
  0x1d   : > { %853 = vmatpush.bf16.msra.mxu2 %v2592_v45  ;;  %v2886_v18 = vunpack.c.l.b16 %v455_v10  ;;  %v529_v25 = vrot.slane %v527_v1, 4  ;;  %v532_v26 = vrot.slane %v530_v2, 5  ;;  %v567_v29 = vpack.c.b16 %v2865_v9, %v2863_v8  ;;  %v2589_v31 = vld [vmem:[%s3255_s4 + $0x80] sm:$0xff]  ;;  %v2598_v33 = vld [vmem:[%s3255_s4 + $0xc8] sm:$0xff]  ;;  %v420_v39 = vld [vmem:[%s2809_s11 + $0x1c] sm:$0x1] }
  0x1e   : > { %1099 = vmatpush.bf16.msra.mxu3 %v2600_v55  ;;  %v2189_v32 = vor.u32 %v2881_v15, %v2878_v14  ;;  %v459_v34 = vrot.slane %v457_v20, 4  ;;  %v462_v35 = vrot.slane %v460_v21, 5  ;;  %v2235_v36 = vld [vmem:[%s2809_s11 + $0xc] sm:$0x1]  ;;  %v2908_v37 = vrot.slane %v522_v16, 5  ;;  %v2616_v44 = vld [vmem:[%s3256_s5 + $0x38] sm:$0xff] }
  0x1f   : > { %v536_v38 = vshll.u32 %v424_v19, 16  ;;  %v473_v41 = vrot.slane %v471_v22, 4  ;;  %v474_v42 = vshll.u32 %v396_v7, 16  ;;  %v565_v43 = vpack.c.b16 %v2886_v18, %v2875_v13  ;;  %v2236_v46 = vld [vmem:[%s2809_s11 + $0x10] sm:$0xf]  ;;  %v2640_v51 = vld [vmem:[%s3257_s6 + $0x38] sm:$0xff] }
  0x20   : > { %2689 = vmatpush.bf16.msra.mxu1 %v2579_v57  ;;  %626 = vmatpush.bf16.msra.mxu0 %v2579_v57  ;;  %v466_v45 = vshll.u32 %v419_v27, 16  ;;  %v903_v47 = vshrl.u32 %v2234_v28, 16  ;;  %v906_v48 = vshll.u32 %v2234_v28, 16  ;;  %v2917_v49 = vrot.slane %v519_v24, 4  ;;  %v2237_v53 = vld [vmem:[%s2809_s11 + $0x14] sm:$0x1] }
  0x21   : > { %854 = vmatpush.bf16.msra.mxu2 %v2591_v62  ;;  %v533_v50 = vor.u32 %v532_v26, %v529_v25  ;;  %v476_v52 = vrot.slane %v474_v42, 5  ;;  %v912_v54 = vshll.u32 %v2235_v36, 16  ;;  %v463_v55 = vor.u32 %v462_v35, %v459_v34  ;;  %v2575_v59 = vld [vmem:[%s3255_s4 + $0x30] sm:$0xff]  ;;  %v2597_v62 = vld [vmem:[%s3255_s4 + $0xc0] sm:$0xff]  ;;  %v2648_v6 = vld [vmem:[%s3257_s6 + $0x78] sm:$0xff] }
  0x22   : > { %1100 = vmatpush.bf16.msra.mxu3 %v2599_v11  ;;  %v480_v56 = vshll.u32 %v420_v39, 16  ;;  %v905_v57 = vrot.slane %v903_v47, 4  ;;  %v908_v58 = vrot.slane %v906_v48, 5  ;;  %v2615_v60 = vld [vmem:[%s3256_s5 + $0x30] sm:$0xff]  ;;  %v538_v61 = vrot.slane %v536_v38, 5  ;;  %v2574_v21 = vld [vmem:[%s3255_s4 + $0x28] sm:$0xff] }
  0x23   : > { %v477_v63 = vor.u32 %v476_v52, %v473_v41  ;;  %v917_v0 = vshrl.u32 %v2236_v46, 16  ;;  %v920_v1 = vshll.u32 %v2236_v46, 16  ;;  %v468_v2 = vrot.slane %v466_v45, 5  ;;  %v2238_v7 = vld [vmem:[%s2809_s11 + $0x18] sm:$0xf]  ;;  %v2639_v11 = vld [vmem:[%s3257_s6 + $0x30] sm:$0xff] }
  0x24   : > { %2690 = vmatpush.bf16.msra.mxu1 %v2578_v12  ;;  %627 = vmatpush.bf16.msra.mxu0 %v2578_v12  ;;  %v909_v3 = vor.u32 %v908_v58, %v905_v57  ;;  %v914_v4 = vrot.slane %v912_v54, 5  ;;  %v926_v5 = vshll.u32 %v2237_v53, 16  ;;  %v534_v8 = vrot.slane %v533_v50, 4  ;;  %v2240_v12 = vld [vmem:[%s2809_s11 + $0x20] sm:$0xf]  ;;  %v2647_v24 = vld [vmem:[%s3257_s6 + $0x70] sm:$0xff] }
  0x25   : > { %855 = vmatpush.bf16.msra.mxu2 %v2590_v17  ;;  %v919_v9 = vrot.slane %v917_v0, 4  ;;  %v922_v10 = vrot.slane %v920_v1, 5  ;;  %v464_v13 = vrot.slane %v463_v55, 4  ;;  %v478_v14 = vrot.slane %v477_v63, 4  ;;  %v2614_v25 = vld [vmem:[%s3256_s5 + $0x28] sm:$0xff]  ;;  %v2573_v41 = vld [vmem:[%s3255_s4 + $0x20] sm:$0xff] }
  0x26   : > { %1101 = vmatpush.bf16.msra.mxu3 %v2598_v33  ;;  %v482_v15 = vrot.slane %v480_v56, 5  ;;  %v910_v16 = vrot.slane %v909_v3, 4  ;;  %v928_v18 = vrot.slane %v926_v5, 5  ;;  %v931_v19 = vshrl.u32 %v2238_v7, 16  ;;  %v2638_v28 = vld [vmem:[%s3257_s6 + $0x28] sm:$0xff]  ;;  %v2613_v46 = vld [vmem:[%s3256_s5 + $0x20] sm:$0xff] }
  0x27   : > { %v923_v17 = vor.u32 %v922_v10, %v919_v9  ;;  %v934_v20 = vshll.u32 %v2238_v7, 16  ;;  %v525_v26 = vsel %vm2836_vm2, %v2917_v49, %v2908_v37  ;;  %v2239_v33 = vld [vmem:[%s2809_s11 + $0x1c] sm:$0x1]  ;;  %v2241_v34 = vld [vmem:[%s2809_s11 + $0x24] sm:$0x1]  ;;  %v948_v36 = vshll.u32 %v2240_v12, 16 }
  0x28   : > { %2691 = vmatpush.bf16.msra.mxu1 %v2577_v23  ;;  %628 = vmatpush.bf16.msra.mxu0 %v2577_v23  ;;  %v915_v22 = vsel %vm2836_vm2, %v910_v16, %v914_v4  ;;  %v945_v23 = vshrl.u32 %v2240_v12, 16  ;;  %v469_v38 = vsel %vm2836_vm2, %v464_v13, %v468_v2  ;;  %v483_v37 = vsel %vm2836_vm2, %v478_v14, %v482_v15  ;;  %v2637_v50 = vld [vmem:[%s3257_s6 + $0x20] sm:$0xff]  ;;  %v2646_v55 = vld [vmem:[%s3257_s6 + $0x68] sm:$0xff]  ;;  %v2192_v56 = vld [vmem:[%s2809_s11 + $0x18] sm:$0xf] }
  0x29   : > { %856 = vmatpush.bf16.msra.mxu2 %v2589_v31  ;;  %v924_v27 = vrot.slane %v923_v17, 4  ;;  %v539_v31 = vsel %vm2836_vm2, %v534_v8, %v538_v61  ;;  %v563_v42 = vunpack.c.l.b16 %v525_v26  ;;  %v940_v48 = vshll.u32 %v2239_v33, 16  ;;  %v2586_v57 = vld [vmem:[%s2809_s11 + $0x1c] sm:$0xf0]  ;;  %v2572_v58 = vld [vmem:[%s3255_s4 + $0x18] sm:$0xff]  ;;  %v2571_v9 = vld [vmem:[%s3255_s4 + $0x10] sm:$0xff] }
  0x2a   : > { %1102 = vmatpush.bf16.msra.mxu3 %v2597_v62  ;;  %v947_v35 = vrot.slane %v945_v23, 4  ;;  %v564_v45 = vunpack.c.l.b16 %v539_v31  ;;  %v954_v49 = vshll.u32 %v2241_v34, 16  ;;  %v560_v52 = vunpack.c.l.b16 %v483_v37  ;;  %v2612_v61 = vld [vmem:[%s3256_s5 + $0x18] sm:$0xff]  ;;  %v2611_v10 = vld [vmem:[%s3256_s5 + $0x10] sm:$0xff]  ;;  %v2569_v31 = vld [vmem:[%s3255_s4] sm:$0xff] }
  0x2b   : > { %639 = vmatmul.bf16.vlgmr.msra.gmra.mxu1 %v567_v29  ;;  %629 = vmatmul.bf16.vlgmr.msra.gmra.mxu0 %v565_v43  ;;  %v933_v29 = vrot.slane %v931_v19, 4  ;;  %v929_v39 = vsel %vm2836_vm2, %v924_v27, %v928_v18  ;;  %v942_v63 = vrot.slane %v940_v48, 5  ;;  %v2193_v4 = vor.u32 %v2586_v57, %v2192_v56  ;;  %v2636_v13 = vld [vmem:[%s3257_s6 + $0x18] sm:$0xff]  ;;  %v2645_v18 = vld [vmem:[%s3257_s6 + $0x60] sm:$0xff]  ;;  %v2570_v19 = vld [vmem:[%s3255_s4 + $0x8] sm:$0xff] }
  0x2c   : > { %722 = vmatpush.bf16.msrb.mxu1 %v2576_v30  ;;  %1228 = vmatpush.bf16.msrb.mxu0 %v2616_v44  ;;  %v936_v30 = vrot.slane %v934_v20, 5  ;;  %v1032_v43 = vunpack.c.l.b16 %v929_v39  ;;  %v950_v44 = vrot.slane %v948_v36, 5  ;;  %v956_v1 = vrot.slane %v954_v49, 5  ;;  %v2245_v23 = vld [vmem:[%s2809_s11 + $0x34] sm:$0x1]  ;;  %v2644_v26 = vld [vmem:[%s3257_s6 + $0x58] sm:$0xff] }
  0x2d   : > { %1496 = vmatpush.bf16.msrb.mxu2 %v2640_v51  ;;  %v559_v51 = vunpack.c.l.b16 %v469_v38  ;;  %v568_v2 = vpack.c.b16 %v564_v45, %v563_v42  ;;  %v2116_v33 = vld [vmem:[%s2809_s11] sm:$0xf]  ;;  %v2628_v34 = vld [vmem:[%s3256_s5 + $0x78] sm:$0xff]  ;;  %v2565_v36 = vld [vmem:[%s2809_s11 + $0x4] sm:$0xf0] }
  0x2e   : > { %857 = vmatmul.bf16.vlgmr.msra.gmra.mxu2 %v2189_v32  ;;  %1742 = vmatpush.bf16.msrb.mxu3 %v2648_v6  ;;  %v1031_v32 = vunpack.c.l.b16 %v915_v22  ;;  %v937_v47 = vor.u32 %v936_v30, %v933_v29  ;;  %v951_v54 = vor.u32 %v950_v44, %v947_v35  ;;  %v2243_v22 = vld [vmem:[%s2809_s11 + $0x2c] sm:$0x1]  ;;  %v982_v30 = vshll.u32 %v2245_v23, 16  ;;  %v2609_v35 = vld [vmem:[%s3256_s5] sm:$0xff]  ;;  %v2660_v37 = vld [vmem:[%s3258_s7 + $0x38] sm:$0xff] }
  0x2f   : > { %v566_v3 = vpack.c.b16 %v560_v52, %v559_v51  ;;  %v2300_v38 = vld [vmem:[%s3024_s29] sm:$0xf]  ;;  %v2605_v39 = vld [vmem:[%s3024_s29 + $0x4] sm:$0xf0]  ;;  %v2246_v48 = vld [vmem:[%s2809_s11 + $0x38] sm:$0xf] }
  0x30   : > { %723 = vmatpush.bf16.msrb.mxu1 %v2575_v59  ;;  %1229 = vmatpush.bf16.msrb.mxu0 %v2615_v60  ;;  %v1039_v53 = vpack.c.b16 %v1032_v43, %v1031_v32  ;;  %v2242_v59 = vld [vmem:[%s2809_s11 + $0x28] sm:$0xf]  ;;  %v2244_v60 = vld [vmem:[%s2809_s11 + $0x30] sm:$0xf]  ;;  %v938_v62 = vrot.slane %v937_v47, 4  ;;  %v952_v0 = vrot.slane %v951_v54, 4  ;;  %v2301_v51 = vor.u32 %v2605_v39, %v2300_v38 }
  0x31   : > { %1497 = vmatpush.bf16.msrb.mxu2 %v2639_v11  ;;  %v959_v5 = vshrl.u32 %v2242_v59, 16  ;;  %v962_v6 = vshll.u32 %v2242_v59, 16  ;;  %v973_v7 = vshrl.u32 %v2244_v60, 16  ;;  %v976_v8 = vshll.u32 %v2244_v60, 16  ;;  %v2196_v45 = vld [vmem:[%s2809_s11 + $0x28] sm:$0xf] }
  0x32   : > { %1743 = vmatpush.bf16.msrb.mxu3 %v2647_v24  ;;  %v943_v11 = vsel %vm2836_vm2, %v938_v62, %v942_v63  ;;  %v957_v12 = vsel %vm2836_vm2, %v952_v0, %v956_v1  ;;  %v2610_v24 = vld [vmem:[%s3256_s5 + $0x8] sm:$0xff]  ;;  %v984_v44 = vrot.slane %v982_v30, 5  ;;  %v2627_v47 = vld [vmem:[%s3256_s5 + $0x70] sm:$0xff]  ;;  %v2248_v49 = vld [vmem:[%s2809_s11 + $0x40] sm:$0xf]  ;;  %v987_v56 = vshrl.u32 %v2246_v48, 16 }
  0x33   : > { %1103 = vmatmul.bf16.vlgmr.msra.gmra.mxu3 %v1039_v53  ;;  %v961_v14 = vrot.slane %v959_v5, 4  ;;  %v964_v15 = vrot.slane %v962_v6, 5  ;;  %v975_v16 = vrot.slane %v973_v7, 4  ;;  %v978_v17 = vrot.slane %v976_v8, 5  ;;  %v2626_v60 = vld [vmem:[%s3256_s5 + $0x68] sm:$0xff]  ;;  %v2643_v0 = vld [vmem:[%s3257_s6 + $0x50] sm:$0xff] }
  0x34   : > { %724 = vmatpush.bf16.msrb.mxu1 %v2574_v21  ;;  %1230 = vmatpush.bf16.msrb.mxu0 %v2614_v25  ;;  %v1033_v20 = vunpack.c.l.b16 %v943_v11  ;;  %v1034_v21 = vunpack.c.l.b16 %v957_v12  ;;  %v2635_v25 = vld [vmem:[%s3257_s6 + $0x10] sm:$0xff]  ;;  %v990_v57 = vshll.u32 %v2246_v48, 16  ;;  %v1004_v59 = vshll.u32 %v2248_v49, 16  ;;  %v2658_v1 = vld [vmem:[%s3258_s7 + $0x28] sm:$0xff]  ;;  %v2247_v8 = vld [vmem:[%s2809_s11 + $0x3c] sm:$0x1] }
  0x35   : > { %1498 = vmatpush.bf16.msrb.mxu2 %v2638_v28  ;;  %v965_v27 = vor.u32 %v964_v15, %v961_v14  ;;  %v968_v28 = vshll.u32 %v2243_v22, 16  ;;  %v979_v29 = vor.u32 %v978_v17, %v975_v16  ;;  %v2657_v12 = vld [vmem:[%s3258_s7 + $0x20] sm:$0xff]  ;;  %v996_v14 = vshll.u32 %v2247_v8, 16  ;;  %v2624_v17 = vld [vmem:[%s3256_s5 + $0x58] sm:$0xff] }
  0x36   : > { %1744 = vmatpush.bf16.msrb.mxu3 %v2646_v55  ;;  %v1040_v32 = vpack.c.b16 %v1034_v21, %v1033_v20  ;;  %v2659_v55 = vld [vmem:[%s3258_s7 + $0x30] sm:$0xff]  ;;  %v992_v5 = vrot.slane %v990_v57, 5  ;;  %v1006_v7 = vrot.slane %v1004_v59, 5  ;;  %v2606_v21 = vld [vmem:[%s3024_s29 + $0x14] sm:$0xf0]  ;;  %v2654_v59 = vld [vmem:[%s3258_s7 + $0x8] sm:$0xff] }
  0x37   : > { %v970_v42 = vrot.slane %v968_v28, 5  ;;  %v980_v43 = vrot.slane %v979_v29, 4  ;;  %v2304_v20 = vld [vmem:[%s3024_s29 + $0x10] sm:$0xf]  ;;  %v2200_v22 = vld [vmem:[%s2809_s11 + $0x38] sm:$0xf] }
  0x38   : > { %725 = vmatpush.bf16.msrb.mxu1 %v2573_v41  ;;  %1231 = vmatpush.bf16.msrb.mxu0 %v2613_v46  ;;  %v966_v41 = vrot.slane %v965_v27, 4  ;;  %v2587_v46 = vld [vmem:[%s2809_s11 + $0x2c] sm:$0xf0]  ;;  %v2588_v23 = vld [vmem:[%s2809_s11 + $0x3c] sm:$0xf0]  ;;  %v2305_v30 = vor.u32 %v2606_v21, %v2304_v20 }
  0x39   : > { %1499 = vmatpush.bf16.msrb.mxu2 %v2637_v50  ;;  %v2117_v50 = vor.u32 %v2565_v36, %v2116_v33  ;;  %v2197_v52 = vor.u32 %v2587_v46, %v2196_v45  ;;  %v985_v54 = vsel %vm2836_vm2, %v980_v43, %v984_v44  ;;  %v2623_v28 = vld [vmem:[%s3256_s5 + $0x50] sm:$0xff]  ;;  %v2201_v33 = vor.u32 %v2588_v23, %v2200_v22  ;;  %v2656_v43 = vld [vmem:[%s3258_s7 + $0x18] sm:$0xff] }
  0x3a   : > { %1745 = vmatpush.bf16.msrb.mxu3 %v2645_v18  ;;  %v971_v53 = vsel %vm2836_vm2, %v966_v41, %v970_v42  ;;  %v1036_v63 = vunpack.c.l.b16 %v985_v54  ;;  %v2120_v18 = vld [vmem:[%s2809_s11 + $0x10] sm:$0xf]  ;;  %v2622_v41 = vld [vmem:[%s3256_s5 + $0x48] sm:$0xff]  ;;  %v2641_v42 = vld [vmem:[%s3257_s6 + $0x40] sm:$0xff] }
  0x3b   : > { %644 = vmatmul.bf16.gmra.mxu1 %v568_v2  ;;  %634 = vmatmul.bf16.gmra.mxu0 %v566_v3  ;;  %v1035_v62 = vunpack.c.l.b16 %v971_v53  ;;  %v2625_v2 = vld [vmem:[%s3256_s5 + $0x60] sm:$0xff]  ;;  %v1536_v53 = vld [vmem:[%s3098_s14 + $0xc] sm:$0x1] }
  0x3c   : > { %726 = vmatpush.bf16.msrb.mxu1 %v2572_v58  ;;  %1232 = vmatpush.bf16.msrb.mxu0 %v2612_v61  ;;  %v1001_v58 = vshrl.u32 %v2248_v49, 16  ;;  %v2634_v61 = vld [vmem:[%s3257_s6 + $0x8] sm:$0xff]  ;;  %v2633_v3 = vld [vmem:[%s3257_s6] sm:$0xff] }
  0x3d   : > { %1500 = vmatpush.bf16.msrb.mxu2 %v2636_v13  ;;  %v1041_v11 = vpack.c.b16 %v1036_v63, %v1035_v62  ;;  %v2308_v62 = vld [vmem:[%s3024_s29 + $0x20] sm:$0xf]  ;;  %v2607_v63 = vld [vmem:[%s3024_s29 + $0x24] sm:$0xf0] }
  0x3e   : > { %862 = vmatmul.bf16.gmra.mxu2 %v2193_v4  ;;  %1746 = vmatpush.bf16.msrb.mxu3 %v2644_v26  ;;  %v989_v4 = vrot.slane %v987_v56, 4  ;;  %v1003_v6 = vrot.slane %v1001_v58, 4  ;;  %v1573_v58 = vshll.u32 %v1536_v53, 16 }
  0x40   : > { %727 = vmatpush.bf16.msrb.mxu1 %v2571_v9  ;;  %1233 = vmatpush.bf16.msrb.mxu0 %v2611_v10  ;;  %v2249_v9 = vld [vmem:[%s2809_s11 + $0x44] sm:$0x1]  ;;  %v2642_v10 = vld [vmem:[%s3257_s6 + $0x48] sm:$0xff]  ;;  %v993_v13 = vor.u32 %v992_v5, %v989_v4  ;;  %v1007_v15 = vor.u32 %v1006_v7, %v1003_v6  ;;  %v1575_v7 = vrot.slane %v1573_v58, 5 }
  0x41   : > { %1501 = vmatpush.bf16.msrb.mxu2 %v2635_v25  ;;  %v1010_v16 = vshll.u32 %v2249_v9, 16  ;;  %v998_v25 = vrot.slane %v996_v14, 5  ;;  %v2309_v9 = vor.u32 %v2607_v63, %v2308_v62 }
  0x42   : > { %1747 = vmatpush.bf16.msrb.mxu3 %v2643_v0  ;;  %v1008_v26 = vrot.slane %v1007_v15, 4  ;;  %v2420_v0 = vld [vmem:[%s3098_s14] sm:$0xf] }
  0x43   : > { %1108 = vmatmul.bf16.gmra.mxu3 %v1040_v32  ;;  %v1012_v27 = vrot.slane %v1010_v16, 5  ;;  %v1535_v32 = vld [vmem:[%s3098_s14 + $0x8] sm:$0xf] }
  0x44   : > { %728 = vmatpush.bf16.msrb.mxu1 %v2570_v19  ;;  %1234 = vmatpush.bf16.msrb.mxu0 %v2610_v24  ;;  %v2566_v19 = vld [vmem:[%s2809_s11 + $0x14] sm:$0xf0]  ;;  %v994_v24 = vrot.slane %v993_v13, 4  ;;  %v1567_v39 = vshll.u32 %v1535_v32, 16 }
  0x45   : > { %1502 = vmatpush.bf16.msrb.mxu2 %v2634_v61  ;;  %v2121_v29 = vor.u32 %v2566_v19, %v2120_v18  ;;  %v2567_v61 = vld [vmem:[%s2809_s11 + $0x24] sm:$0xf0] }
  0x46   : > { %1748 = vmatpush.bf16.msrb.mxu3 %v2642_v10  ;;  %v1569_v49 = vrot.slane %v1567_v39, 5  ;;  %v2424_v39 = vld [vmem:[%s3098_s14 + $0x10] sm:$0xf] }
  0x48   : > { %729 = vmatpush.bf16.msrb.mxu1 %v2569_v31  ;;  %1235 = vmatpush.bf16.msrb.mxu0 %v2609_v35  ;;  %v1533_v31 = vld [vmem:[%s3098_s14] sm:$0xf]  ;;  %v1013_v35 = vsel %vm2836_vm2, %v1008_v26, %v1012_v27 }
  0x49   : > { %1503 = vmatpush.bf16.msrb.mxu2 %v2633_v3  ;;  %v1550_v36 = vshrl.u32 %v1533_v31, 16  ;;  %v1553_v38 = vshll.u32 %v1533_v31, 16  ;;  %v1038_v45 = vunpack.c.l.b16 %v1013_v35  ;;  %v1539_v3 = vld [vmem:[%s3098_s14 + $0x18] sm:$0xf]  ;;  %v2128_v31 = vld [vmem:[%s2809_s11 + $0x30] sm:$0xf] }
  0x4a   : > { %1749 = vmatpush.bf16.msrb.mxu3 %v2641_v42  ;;  %v1592_v13 = vshrl.u32 %v1539_v3, 16  ;;  %v1595_v14 = vshll.u32 %v1539_v3, 16  ;;  %v1541_v42 = vld [vmem:[%s3098_s14 + $0x20] sm:$0xf]  ;;  %v2617_v3 = vld [vmem:[%s3024_s29 + $0xc] sm:$0xf0] }
  0x4b   : > { %730 = vmatmul.bf16.vlgmr.msrb.gmra.mxu1 %v2117_v50  ;;  %1236 = vmatmul.bf16.vlgmr.msrb.gmra.mxu0 %v2301_v51  ;;  %v1552_v46 = vrot.slane %v1550_v36, 4  ;;  %v2621_v50 = vld [vmem:[%s3256_s5 + $0x40] sm:$0xff]  ;;  %v2655_v51 = vld [vmem:[%s3258_s7 + $0x10] sm:$0xff] }
  0x4c   : > { %1363 = vmatpush.bf16.msra.mxu1 %v2628_v34  ;;  %1875 = vmatpush.bf16.msra.mxu0 %v2660_v37  ;;  %v999_v34 = vsel %vm2836_vm2, %v994_v24, %v998_v25  ;;  %v1594_v20 = vrot.slane %v1592_v13, 4  ;;  %v1597_v21 = vrot.slane %v1595_v14, 5  ;;  %v1538_v24 = vld [vmem:[%s3098_s14 + $0x14] sm:$0x1]  ;;  %v1540_v25 = vld [vmem:[%s3098_s14 + $0x1c] sm:$0x1] }
  0x4d   : > { %2692 = vmatpush.bf16.msra.mxu2 %v2660_v37  ;;  %v1564_v37 = vshrl.u32 %v1535_v32, 16  ;;  %v1037_v44 = vunpack.c.l.b16 %v999_v34  ;;  %v1587_v27 = vshll.u32 %v1538_v24, 16  ;;  %v2568_v32 = vld [vmem:[%s2809_s11 + $0x34] sm:$0xf0]  ;;  %v1545_v14 = vld [vmem:[%s3098_s14 + $0x30] sm:$0xf] }
  0x4e   : > { %867 = vmatmul.bf16.gmra.mxu2 %v2197_v52  ;;  %v1534_v52 = vld [vmem:[%s3098_s14 + $0x4] sm:$0x1]  ;;  %v2608_v34 = vld [vmem:[%s3024_s29 + $0x34] sm:$0xf0] }
  0x4f   : > { %v1566_v48 = vrot.slane %v1564_v37, 4  ;;  %v1042_v54 = vpack.c.b16 %v1038_v45, %v1037_v44  ;;  %v1559_v56 = vshll.u32 %v1534_v52, 16  ;;  %v1589_v36 = vrot.slane %v1587_v27, 5 }
  0x50   : > { %1364 = vmatpush.bf16.msra.mxu1 %v2627_v47  ;;  %1876 = vmatpush.bf16.msra.mxu0 %v2659_v55  ;;  %v1555_v47 = vrot.slane %v1553_v38, 5  ;;  %v2129_v44 = vor.u32 %v2568_v32, %v2128_v31 }
  0x51   : > { %2693 = vmatpush.bf16.msra.mxu2 %v2659_v55  ;;  %v1570_v57 = vor.u32 %v1569_v49, %v1566_v48  ;;  %v1561_v5 = vrot.slane %v1559_v56, 5  ;;  %v1606_v49 = vshrl.u32 %v1541_v42, 16 }
  0x52   : > { %v1556_v55 = vor.u32 %v1555_v47, %v1552_v46 }
  0x53   : > { %1113 = vmatmul.bf16.gmra.mxu3 %v1041_v11  ;;  %v1571_v6 = vrot.slane %v1570_v57, 4 }
  0x54   : > { %1365 = vmatpush.bf16.msra.mxu1 %v2626_v60  ;;  %1877 = vmatpush.bf16.msra.mxu0 %v2658_v1  ;;  %v2124_v60 = vld [vmem:[%s2809_s11 + $0x20] sm:$0xf]  ;;  %v1557_v4 = vrot.slane %v1556_v55, 4  ;;  %v1608_v55 = vrot.slane %v1606_v49, 4 }
  0x55   : > { %2694 = vmatpush.bf16.msra.mxu2 %v2658_v1  ;;  %v2629_v1 = vld [vmem:[%s3098_s14 + $0x4] sm:$0xf0]  ;;  %v2125_v8 = vor.u32 %v2567_v61, %v2124_v60  ;;  %v1576_v16 = vsel %vm2836_vm2, %v1571_v6, %v1575_v7  ;;  %v1544_v60 = vld [vmem:[%s3098_s14 + $0x2c] sm:$0x1]  ;;  %v2428_v6 = vld [vmem:[%s3098_s14 + $0x20] sm:$0xf] }
  0x56   : > { %v2421_v10 = vor.u32 %v2629_v1, %v2420_v0  ;;  %v1562_v15 = vsel %vm2836_vm2, %v1557_v4, %v1561_v5  ;;  %v1679_v23 = vunpack.c.l.b16 %v1576_v16  ;;  %v1629_v1 = vshll.u32 %v1544_v60, 16  ;;  %v2516_v4 = vld [vmem:[%s3161_s15] sm:$0xf]  ;;  %v2649_v5 = vld [vmem:[%s3161_s15 + $0x4] sm:$0xf0] }
  0x57   : > { %v1678_v22 = vunpack.c.l.b16 %v1562_v15  ;;  %v2631_v7 = vld [vmem:[%s3098_s14 + $0x24] sm:$0xf0]  ;;  %v2517_v13 = vor.u32 %v2649_v5, %v2516_v4  ;;  %v1547_v15 = vld [vmem:[%s3098_s14 + $0x38] sm:$0xf]  ;;  %v2620_v5 = vld [vmem:[%s3024_s29 + $0x3c] sm:$0xf0] }
  0x58   : > { %1366 = vmatpush.bf16.msra.mxu1 %v2625_v2  ;;  %1878 = vmatpush.bf16.msra.mxu0 %v2657_v12  ;;  %v1537_v2 = vld [vmem:[%s3098_s14 + $0x10] sm:$0xf]  ;;  %v2429_v16 = vor.u32 %v2631_v7, %v2428_v6  ;;  %v2652_v60 = vld [vmem:[%s3161_s15 + $0x34] sm:$0xf0] }
  0x59   : > { %2695 = vmatpush.bf16.msra.mxu2 %v2657_v12  ;;  %v1578_v11 = vshrl.u32 %v1537_v2, 16  ;;  %v1581_v12 = vshll.u32 %v1537_v2, 16  ;;  %v2372_v2 = vld [vmem:[%s3024_s29 + $0x8] sm:$0xf]  ;;  %v2384_v4 = vld [vmem:[%s3024_s29 + $0x38] sm:$0xf] }
  0x5a   : > { %v2385_v6 = vor.u32 %v2620_v5, %v2384_v4 }
  0x5b   : > { %735 = vmatmul.bf16.gmra.mxu1 %v2121_v29  ;;  %1241 = vmatmul.bf16.gmra.mxu0 %v2305_v30  ;;  %v1580_v18 = vrot.slane %v1578_v11, 4  ;;  %v1583_v19 = vrot.slane %v1581_v12, 5  ;;  %v1601_v29 = vshll.u32 %v1540_v25, 16  ;;  %v1686_v30 = vpack.c.b16 %v1679_v23, %v1678_v22 }
  0x5c   : > { %1367 = vmatpush.bf16.msra.mxu1 %v2624_v17  ;;  %1879 = vmatpush.bf16.msra.mxu0 %v2656_v43  ;;  %v2653_v17 = vld [vmem:[%s3258_s7] sm:$0xff]  ;;  %v1631_v11 = vrot.slane %v1629_v1, 5  ;;  %v2373_v12 = vor.u32 %v2617_v3, %v2372_v2  ;;  %v1651_v22 = vshll.u32 %v1547_v15, 16 }
  0x5d   : > { %2696 = vmatpush.bf16.msra.mxu2 %v2656_v43  ;;  %v1584_v26 = vor.u32 %v1583_v19, %v1580_v18  ;;  %v1603_v37 = vrot.slane %v1601_v29, 5  ;;  %v1543_v43 = vld [vmem:[%s3098_s14 + $0x28] sm:$0xf]  ;;  %v1634_v19 = vshrl.u32 %v1545_v14, 16  ;;  %v1546_v29 = vld [vmem:[%s3098_s14 + $0x34] sm:$0x1] }
  0x5e   : > { %872 = vmatmul.bf16.gmra.mxu2 %v2201_v33  ;;  %v2312_v33 = vld [vmem:[%s3024_s29 + $0x30] sm:$0xf]  ;;  %v1623_v52 = vshll.u32 %v1543_v43, 16 }
  0x5f   : > { %v1585_v35 = vrot.slane %v1584_v26, 4  ;;  %v2313_v45 = vor.u32 %v2608_v34, %v2312_v33  ;;  %v1636_v25 = vrot.slane %v1634_v19, 4  ;;  %v1643_v33 = vshll.u32 %v1546_v29, 16 }
  0x60   : > { %1368 = vmatpush.bf16.msra.mxu1 %v2623_v28  ;;  %1880 = vmatpush.bf16.msra.mxu0 %v2655_v51  ;;  %v1598_v28 = vor.u32 %v1597_v21, %v1594_v20  ;;  %v1625_v58 = vrot.slane %v1623_v52, 5  ;;  %v1637_v20 = vshll.u32 %v1545_v14, 16  ;;  %v1648_v21 = vshrl.u32 %v1547_v15, 16 }
  0x61   : > { %2697 = vmatpush.bf16.msra.mxu2 %v2655_v51  ;;  %v1590_v47 = vsel %vm2836_vm2, %v1585_v35, %v1589_v36  ;;  %v1620_v51 = vshrl.u32 %v1543_v43, 16  ;;  %v2376_v36 = vld [vmem:[%s3024_s29 + $0x18] sm:$0xf] }
  0x62   : > { %v1599_v38 = vrot.slane %v1598_v28, 4  ;;  %v1680_v53 = vunpack.c.l.b16 %v1590_v47  ;;  %v1639_v26 = vrot.slane %v1637_v20, 5  ;;  %v1650_v27 = vrot.slane %v1648_v21, 4 }
  0x63   : > { %1118 = vmatmul.bf16.gmra.mxu3 %v1042_v54  ;;  %v1622_v57 = vrot.slane %v1620_v51, 4  ;;  %v1653_v28 = vrot.slane %v1651_v22, 5 }
  0x64   : > { %1369 = vmatpush.bf16.msra.mxu1 %v2622_v41  ;;  %1881 = vmatpush.bf16.msra.mxu0 %v2654_v59  ;;  %v2630_v41 = vld [vmem:[%s3098_s14 + $0x14] sm:$0xf0]  ;;  %v1604_v48 = vsel %vm2836_vm2, %v1599_v38, %v1603_v37  ;;  %v1640_v32 = vor.u32 %v1639_v26, %v1636_v25  ;;  %v2618_v38 = vld [vmem:[%s3024_s29 + $0x1c] sm:$0xf0]  ;;  %v2520_v37 = vld [vmem:[%s3161_s15 + $0x10] sm:$0xf] }
  0x65   : > { %2698 = vmatpush.bf16.msra.mxu2 %v2654_v59  ;;  %v2425_v46 = vor.u32 %v2630_v41, %v2424_v39  ;;  %v1681_v54 = vunpack.c.l.b16 %v1604_v48  ;;  %v1542_v59 = vld [vmem:[%s3098_s14 + $0x24] sm:$0x1]  ;;  %v1626_v0 = vor.u32 %v1625_v58, %v1622_v57  ;;  %v1654_v34 = vor.u32 %v1653_v28, %v1650_v27  ;;  %v2650_v39 = vld [vmem:[%s3161_s15 + $0x14] sm:$0xf0]  ;;  %v2432_v41 = vld [vmem:[%s3098_s14 + $0x30] sm:$0xf] }
  0x66   : > { %v1615_v63 = vshll.u32 %v1542_v59, 16  ;;  %v1641_v43 = vrot.slane %v1640_v32, 4  ;;  %v2377_v47 = vor.u32 %v2618_v38, %v2376_v36  ;;  %v2521_v48 = vor.u32 %v2650_v39, %v2520_v37  ;;  %v2524_v57 = vld [vmem:[%s3161_s15 + $0x20] sm:$0xf]  ;;  %v2651_v58 = vld [vmem:[%s3161_s15 + $0x24] sm:$0xf0] }
  0x67   : > { %v1687_v61 = vpack.c.b16 %v1681_v54, %v1680_v53  ;;  %v2528_v59 = vld [vmem:[%s3161_s15 + $0x30] sm:$0xf] }
  0x68   : > { %1370 = vmatpush.bf16.msra.mxu1 %v2621_v50  ;;  %1882 = vmatpush.bf16.msra.mxu0 %v2653_v17  ;;  %v1609_v50 = vshll.u32 %v1541_v42, 16  ;;  %v2632_v42 = vld [vmem:[%s3098_s14 + $0x34] sm:$0xf0] }
  0x69   : > { %2699 = vmatpush.bf16.msra.mxu2 %v2653_v17  ;;  %v2433_v49 = vor.u32 %v2632_v42, %v2432_v41 }
  0x6a   : > { %v1611_v56 = vrot.slane %v1609_v50, 5 }
  0x6b   : > { %740 = vmatmul.bf16.gmra.mxu1 %v2125_v8  ;;  %1246 = vmatmul.bf16.gmra.mxu0 %v2309_v9  ;;  %v1617_v9 = vrot.slane %v1615_v63, 5 }
  0x6c   : > { %v1612_v62 = vor.u32 %v1611_v56, %v1608_v55  ;;  %v2380_v55 = vld [vmem:[%s3024_s29 + $0x28] sm:$0xf]  ;;  %v2619_v56 = vld [vmem:[%s3024_s29 + $0x2c] sm:$0xf0] }
  0x6e   : > { %1504 = vmatmul.bf16.vlgmr.msrb.gmra.mxu2 %v2421_v10  ;;  %v1613_v8 = vrot.slane %v1612_v62, 4  ;;  %v1627_v10 = vrot.slane %v1626_v0, 4  ;;  %v2525_v62 = vor.u32 %v2651_v58, %v2524_v57  ;;  %v2529_v0 = vor.u32 %v2652_v60, %v2528_v59 }
  0x70   : > { %v1618_v17 = vsel %vm2836_vm2, %v1613_v8, %v1617_v9  ;;  %v1632_v18 = vsel %vm2836_vm2, %v1627_v10, %v1631_v11 }
  0x71   : > { %v1682_v23 = vunpack.c.l.b16 %v1618_v17  ;;  %v1683_v24 = vunpack.c.l.b16 %v1632_v18 }
  0x73   : > { %1750 = vmatmul.bf16.vlgmr.msrb.gmra.mxu3 %v1686_v30  ;;  %v1548_v30 = vld [vmem:[%s3098_s14 + $0x3c] sm:$0x1]  ;;  %v1688_v31 = vpack.c.b16 %v1683_v24, %v1682_v23  ;;  %s2564_s14 = sshll.u32 %s3264_s10, 5 }
  0x74   : > { %v1657_v35 = vshll.u32 %v1548_v30, 16  ;;  %s3227_s18 = scalar_lea.vmem %s3260_s9, %s2564_s14 }
  0x7b   : > { %745 = vmatmul.bf16.gmra.mxu1 %v2129_v44  ;;  %1251 = vmatmul.bf16.gmra.mxu0 %v2313_v45  ;;  %v1645_v44 = vrot.slane %v1643_v33, 5  ;;  %v1655_v45 = vrot.slane %v1654_v34, 4 }
  0x7d   : > { %v1646_v50 = vsel %vm2836_vm2, %v1641_v43, %v1645_v44 }
  0x7e   : > { %1509 = vmatmul.bf16.gmra.mxu2 %v2425_v46  ;;  %v1659_v46 = vrot.slane %v1657_v35, 5  ;;  %v1684_v52 = vunpack.c.l.b16 %v1646_v50 }
  0x80   : > { %v1660_v51 = vsel %vm2836_vm2, %v1655_v45, %v1659_v46 }
  0x81   : > { %v1685_v53 = vunpack.c.l.b16 %v1660_v51 }
  0x83   : > { %1755 = vmatmul.bf16.gmra.mxu3 %v1687_v61  ;;  %v1689_v54 = vpack.c.b16 %v1685_v53, %v1684_v52  ;;  %v2381_v61 = vor.u32 %v2619_v56, %v2380_v55 }
  0x8b   : > { %1371 = vmatmul.bf16.vlgmr.msra.gmra.mxu1 %v2373_v12  ;;  %1883 = vmatmul.bf16.vlgmr.msra.gmra.mxu0 %v2517_v13 }
  0x8e   : > { %1514 = vmatmul.bf16.gmra.mxu2 %v2429_v16 }
  0x93   : > { %1760 = vmatmul.bf16.gmra.mxu3 %v1688_v31 }
  0x9b   : > { %1376 = vmatmul.bf16.gmra.mxu1 %v2377_v47  ;;  %1888 = vmatmul.bf16.gmra.mxu0 %v2521_v48 }
  0x9e   : > { %1519 = vmatmul.bf16.gmra.mxu2 %v2433_v49 }
  0xa3   : > { %1765 = vmatmul.bf16.gmra.mxu3 %v1689_v54 }
  0xa8   : > { %v640_v63 = vpop.f32.mrf.mxu1  ;;  %v630_v40 = vpop.f32.mrf.mxu0 }
  0xab   : > { %1381 = vmatmul.bf16.gmra.mxu1 %v2381_v61  ;;  %1893 = vmatmul.bf16.gmra.mxu0 %v2525_v62 }
  0xae   : > { %1898 = vmatmul.bf16.vlgmr.msra.gmra.mxu2 %v2529_v0 }
  0xb0   : > { %v642_v2 = vpop.f32.mrf.mxu1  ;;  %v632_v3 = vpop.f32.mrf.mxu0 }
  0xb1   : > { %v858_v1 = vpop.f32.mrf.mxu2 }
  0xb6   : > { %v1104_v10 = vpop.f32.mrf.mxu3 }
  0xb8   : > { %v645_v8 = vpop.f32.mrf.mxu1  ;;  %v635_v9 = vpop.f32.mrf.mxu0 }
  0xb9   : > { %v860_v7 = vpop.f32.mrf.mxu2 }
  0xbb   : > { %1386 = vmatmul.bf16.gmra.mxu1 %v2385_v6 }
  0xbe   : > { %v1106_v14 = vpop.f32.mrf.mxu3 }
  0xc0   : > { %v647_v12 = vpop.f32.mrf.mxu1  ;;  %v637_v13 = vpop.f32.mrf.mxu0 }
  0xc1   : > { %v863_v11 = vpop.f32.mrf.mxu2 }
  0xc6   : > { %v1109_v19 = vpop.f32.mrf.mxu3 }
  0xc8   : > { %v731_v16 = vpop.f32.mrf.mxu1  ;;  %v1237_v17 = vpop.f32.mrf.mxu0 }
  0xc9   : > { %v865_v15 = vpop.f32.mrf.mxu2  ;;  %v732_v18 = vadd.f32 %v731_v16, %v630_v40 }
  0xcb   : > { %v878_v20 = vadd.f32 %v858_v1, %v732_v18 }
  0xcd   : > { %v1124_v21 = vadd.f32 %v1104_v10, %v878_v20  ;;  %v3218_v20 = vld [vmem:[%s3259_s8] ss:$0 sm:$0xff] }
  0xce   : > { %v3195_v27 = vpop.f32.mrf.mxu3 }
  0xcf   : > { %v1257_v22 = vadd.f32 %v1237_v17, %v1124_v21 }
  0xd0   : > { %v733_v24 = vpop.f32.mrf.mxu1  ;;  %v1239_v25 = vpop.f32.mrf.mxu0 }
  0xd1   : > { %v868_v23 = vpop.f32.mrf.mxu2  ;;  %v734_v26 = vadd.f32 %v733_v24, %v632_v3 }
  0xd3   : > { %v879_v28 = vadd.f32 %v860_v7, %v734_v26 }
  0xd6   : > { %v1114_v33 = vpop.f32.mrf.mxu3 }
  0xd8   : > { %v736_v30 = vpop.f32.mrf.mxu1  ;;  %v1242_v31 = vpop.f32.mrf.mxu0 }
  0xd9   : > { %v870_v29 = vpop.f32.mrf.mxu2  ;;  %v737_v32 = vadd.f32 %v736_v30, %v635_v9 }
  0xdb   : > { %v880_v34 = vadd.f32 %v863_v11, %v737_v32 }
  0xdd   : > { %v1126_v35 = vadd.f32 %v1109_v19, %v880_v34 }
  0xde   : > { %v3199_v42 = vpop.f32.mrf.mxu3 }
  0xdf   : > { %v1259_v36 = vadd.f32 %v1242_v31, %v1126_v35 }
  0xe0   : > { %v738_v37 = vpop.f32.mrf.mxu1  ;;  %v3197_v39 = vpop.f32.mrf.mxu0 }
  0xe1   : > { %v873_v38 = vpop.f32.mrf.mxu2  ;;  %v739_v41 = vadd.f32 %v738_v37, %v637_v13  ;;  %v1125_v13 = vadd.f32 %v1106_v14, %v879_v28 }
  0xe3   : > { %v881_v43 = vadd.f32 %v865_v15, %v739_v41  ;;  %v1258_v16 = vadd.f32 %v1239_v25, %v1125_v13 }
  0xe5   : > { %v1127_v32 = vadd.f32 %v3195_v27, %v881_v43 }
  0xe6   : > { %v1119_v48 = vpop.f32.mrf.mxu3 }
  0xe8   : > { %v741_v45 = vpop.f32.mrf.mxu1  ;;  %v1247_v46 = vpop.f32.mrf.mxu0 }
  0xe9   : > { %v875_v44 = vpop.f32.mrf.mxu2  ;;  %v742_v47 = vadd.f32 %v741_v45, %v640_v63 }
  0xeb   : > { %v882_v49 = vadd.f32 %v868_v23, %v742_v47 }
  0xed   : > { %v1128_v50 = vadd.f32 %v1114_v33, %v882_v49 }
  0xee   : > { %v3207_v57 = vpop.f32.mrf.mxu3 }
  0xef   : > { %v3201_v51 = vadd.f32 %v1247_v46, %v1128_v50 }
  0xf0   : > { %v743_v53 = vpop.f32.mrf.mxu1  ;;  %v3203_v54 = vpop.f32.mrf.mxu0 }
  0xf1   : > { %v1505_v52 = vpop.f32.mrf.mxu2  ;;  %v744_v55 = vadd.f32 %v743_v53, %v642_v2 }
  0xf3   : > { %v3205_v56 = vadd.f32 %v870_v29, %v744_v55 }
  0xf6   : > { %v1751_v40 = vpop.f32.mrf.mxu3 }
  0xf8   : > { %v746_v59 = vpop.f32.mrf.mxu1  ;;  %v1252_v60 = vpop.f32.mrf.mxu0 }
  0xf9   : > { %v1507_v58 = vpop.f32.mrf.mxu2  ;;  %v747_v61 = vadd.f32 %v746_v59, %v645_v8 }
  0xfb   : > { %v884_v62 = vadd.f32 %v873_v38, %v747_v61 }
  0xfd   : > { %v1130_v63 = vadd.f32 %v1119_v48, %v884_v62  ;;  %v1129_v62 = vadd.f32 %v3199_v42, %v3205_v56 }
  0xfe   : > { %v1753_v2 = vpop.f32.mrf.mxu3 }
  0xff   : > { %v3209_v0 = vadd.f32 %v1252_v60, %v1130_v63 }
 0x100   : > { %v748_v3 = vpop.f32.mrf.mxu1  ;;  %v3211_v4 = vpop.f32.mrf.mxu0 }
 0x101   : > { %v1510_v1 = vpop.f32.mrf.mxu2  ;;  %v749_v5 = vadd.f32 %v748_v3, %v647_v12 }
 0x103   : > { %v3213_v6 = vadd.f32 %v875_v44, %v749_v5 }
 0x106   : > { %v1756_v21 = vpop.f32.mrf.mxu3 }
 0x108   : > { %v1372_v7 = vpop.f32.mrf.mxu1  ;;  %v1884_v9 = vpop.f32.mrf.mxu0 }
 0x109   : > { %v1392_v10 = vadd.f32 %v1372_v7, %v1257_v22  ;;  %v1512_v11 = vpop.f32.mrf.mxu2  ;;  %v1262_v7 = vadd.f32 %v3203_v54, %v1129_v62 }
 0x10b   : > { %v1525_v15 = vadd.f32 %v1505_v52, %v1392_v10 }
 0x10d   : > { %v1771_v8 = vadd.f32 %v1751_v40, %v1525_v15 }
 0x10e   : > { %v1758_v35 = vpop.f32.mrf.mxu3 }
 0x10f   : > { %v1904_v19 = vadd.f32 %v1884_v9, %v1771_v8 }
 0x110   : > { %v1374_v17 = vpop.f32.mrf.mxu1  ;;  %v1886_v18 = vpop.f32.mrf.mxu0 }
 0x111   : > { %v1393_v12 = vadd.f32 %v1374_v17, %v1258_v16  ;;  %v1515_v24 = vpop.f32.mrf.mxu2  ;;  %v1916_v22 = vadd.f32 %v3218_v20, %v1904_v19 }
 0x113   : > { %v1526_v23 = vadd.f32 %v1507_v58, %v1393_v12  ;;  %v1932_v25 = vmul.f32 0.1, %v1916_v22  ;;  %vm1924_vm3 = vcmp.gt.f32.partialorder %v1916_v22, 0.0 }
 0x115   : > { %v1772_v26 = vadd.f32 %v1753_v2, %v1526_v23  ;;  %v1940_v38 = vsel %vm1924_vm3, %v1916_v22, %v1932_v25 }
 0x116   : > { %v1761_v52 = vpop.f32.mrf.mxu3 }
 0x117   : > { %v1905_v14 = vadd.f32 %v1886_v18, %v1772_v26 }
 0x118   : > { %v1377_v28 = vpop.f32.mrf.mxu1  ;;  %v1889_v29 = vpop.f32.mrf.mxu0 }
 0x119   : > { %v1917_v30 = vadd.f32 %v3218_v20, %v1905_v14  ;;  %v1394_v31 = vadd.f32 %v1377_v28, %v1259_v36  ;;  %v1517_v45 = vpop.f32.mrf.mxu2  ;;  %v1260_v36 = vadd.f32 %v3197_v39, %v1127_v32 }
 0x11b   : > { %vm1925_vm4 = vcmp.gt.f32.partialorder %v1917_v30, 0.0  ;;  %v1933_v33 = vmul.f32 0.1, %v1917_v30  ;;  %v1527_v34 = vadd.f32 %v1510_v1, %v1394_v31 }
 0x11d   : > { %v1941_v37 = vsel %vm1925_vm4, %v1917_v30, %v1933_v33  ;;  %v1773_v41 = vadd.f32 %v1756_v21, %v1527_v34  ;;  %v1131_v21 = vadd.f32 %v3207_v57, %v3213_v6 }
 0x11e   : > { %v2664_v44 = vpack.c.bf16 %v1941_v37, %v1940_v38  ;;  %v1763_v9 = vpop.f32.mrf.mxu3 }
 0x11f   : > { %v1906_v43 = vadd.f32 %v1889_v29, %v1773_v41  ;;  %v1264_v25 = vadd.f32 %v3211_v4, %v1131_v21 }
 0x120   : > { %2665 = vst [vmem:[%s3227_s18] sm:$0xff] %v2664_v44   ;;  %v1379_v46 = vpop.f32.mrf.mxu1  ;;  %v1891_v27 = vpop.f32.mrf.mxu0 }
 0x121   : > { %v1395_v47 = vadd.f32 %v1379_v46, %v1260_v36  ;;  %v1918_v49 = vadd.f32 %v3218_v20, %v1906_v43  ;;  %v1520_v55 = vpop.f32.mrf.mxu2 }
 0x123   : > { %v1528_v48 = vadd.f32 %v1512_v11, %v1395_v47  ;;  %v1934_v59 = vmul.f32 0.1, %v1918_v49  ;;  %vm1926_vm5 = vcmp.gt.f32.partialorder %v1918_v49, 0.0 }
 0x125   : > { %v1774_v50 = vadd.f32 %v1758_v35, %v1528_v48  ;;  %v1942_v1 = vsel %vm1926_vm5, %v1918_v49, %v1934_v59 }
 0x126   : > { %v1766_v54 = vpop.f32.mrf.mxu3 }
 0x127   : > { %v1907_v53 = vadd.f32 %v1891_v27, %v1774_v50 }
 0x128   : > { %v1382_v58 = vpop.f32.mrf.mxu1  ;;  %v1894_v39 = vpop.f32.mrf.mxu0 }
 0x129   : > { %v1919_v60 = vadd.f32 %v3218_v20, %v1907_v53  ;;  %v1396_v61 = vadd.f32 %v1382_v58, %v3201_v51  ;;  %v1522_v51 = vpop.f32.mrf.mxu2 }
 0x12b   : > { %vm1927_vm6 = vcmp.gt.f32.partialorder %v1919_v60, 0.0  ;;  %v1935_v63 = vmul.f32 0.1, %v1919_v60  ;;  %v1529_v40 = vadd.f32 %v1515_v24, %v1396_v61 }
 0x12d   : > { %v1943_v3 = vsel %vm1927_vm6, %v1919_v60, %v1935_v63  ;;  %v1775_v5 = vadd.f32 %v1761_v52, %v1529_v40 }
 0x12e   : > { %v2669_v2 = vpack.c.bf16 %v1943_v3, %v1942_v1  ;;  %v1768_v33 = vpop.f32.mrf.mxu3 }
 0x12f   : > { %v1908_v11 = vadd.f32 %v1894_v39, %v1775_v5 }
 0x130   : > { %2681 = vst [vmem:[%s3227_s18 + $0x8] sm:$0xff] %v2669_v2   ;;  %v1384_v10 = vpop.f32.mrf.mxu1  ;;  %v1896_v8 = vpop.f32.mrf.mxu0 }
 0x131   : > { %v1397_v13 = vadd.f32 %v1384_v10, %v1262_v7  ;;  %v1920_v16 = vadd.f32 %v3218_v20, %v1908_v11  ;;  %v1899_v22 = vpop.f32.mrf.mxu2 }
 0x133   : > { %v1530_v15 = vadd.f32 %v1517_v45, %v1397_v13  ;;  %v1936_v18 = vmul.f32 0.1, %v1920_v16  ;;  %vm1928_vm7 = vcmp.gt.f32.partialorder %v1920_v16, 0.0 }
 0x135   : > { %v1776_v42 = vadd.f32 %v1763_v9, %v1530_v15  ;;  %v1944_v26 = vsel %vm1928_vm7, %v1920_v16, %v1936_v18 }
 0x137   : > { %v1909_v56 = vadd.f32 %v1896_v8, %v1776_v42 }
 0x138   : > { %v1387_v17 = vpop.f32.mrf.mxu1 }
 0x139   : > { %v1921_v19 = vadd.f32 %v3218_v20, %v1909_v56  ;;  %v1398_v12 = vadd.f32 %v1387_v17, %v3209_v0  ;;  %v1901_v6 = vpop.f32.mrf.mxu2 }
 0x13b   : > { %vm1929_vm8 = vcmp.gt.f32.partialorder %v1921_v19, 0.0  ;;  %v1937_v23 = vmul.f32 0.1, %v1921_v19  ;;  %v1531_v24 = vadd.f32 %v1520_v55, %v1398_v12 }
 0x13d   : > { %v1945_v14 = vsel %vm1929_vm8, %v1921_v19, %v1937_v23  ;;  %v1777_v28 = vadd.f32 %v1766_v54, %v1531_v24 }
 0x13e   : > { %v2674_v29 = vpack.c.bf16 %v1945_v14, %v1944_v26 }
 0x13f   : > { %v1910_v31 = vadd.f32 %v1899_v22, %v1777_v28 }
 0x140   : > { %2682 = vst [vmem:[%s3227_s18 + $0x10] sm:$0xff] %v2674_v29   ;;  %v1389_v30 = vpop.f32.mrf.mxu1 }
 0x141   : > { %v1399_v0 = vadd.f32 %v1389_v30, %v1264_v25  ;;  %v1922_v34 = vadd.f32 %v3218_v20, %v1910_v31 }
 0x143   : > { %v1532_v32 = vadd.f32 %v1522_v51, %v1399_v0  ;;  %v1938_v38 = vmul.f32 0.1, %v1922_v34  ;;  %vm1930_vm9 = vcmp.gt.f32.partialorder %v1922_v34, 0.0 }
 0x145   : > { %v1778_v57 = vadd.f32 %v1768_v33, %v1532_v32  ;;  %v1946_v44 = vsel %vm1930_vm9, %v1922_v34, %v1938_v38 }
 0x147   : > { %v1911_v35 = vadd.f32 %v1901_v6, %v1778_v57 }
 0x149   : > { %v1923_v37 = vadd.f32 %v3218_v20, %v1911_v35 }
 0x14b   : > { %vm1931_vm10 = vcmp.gt.f32.partialorder %v1923_v37, 0.0  ;;  %v1939_v41 = vmul.f32 0.1, %v1923_v37 }
 0x14d   : > { %v1947_v4 = vsel %vm1931_vm10, %v1923_v37, %v1939_v41 }
 0x14e   : > { %v2679_v45 = vpack.c.bf16 %v1947_v4, %v1946_v44 }
 0x150   : > { %2683 = vst [vmem:[%s3227_s18 + $0x18] sm:$0xff] %v2679_v45  }
 0x151 PF: > { %s19_s30 = sadd.s32 1, %s2716_s30  }
 0x152   : > { %p16_p4 = scmp.ge.s32.totalorder %s19_s30, 4  }
 0x154   :  { %18 = sbr.rel (!%p16_p4) target bundleno = 1 (0x1), region = 102 }

// kernel: custom_pan_forward.15
= control target key start
LH: loop header
LB: loop body
LE: loop exit
PB: predicated region body
PF: predicated region fallthrough
CT: control target
= control target key end

     0   :  { %s313_s6 = smov 0   ;;  %s334_s0 = inlined_call_operand.vmem [shape: bf16[2,4,2,4,256], index: 0, kind: input, shape index: {}]   ;;  %s335_s1 = inlined_call_operand.vmem [shape: bf16[2,4,4,128], index: 1, kind: output, shape index: {}]  }
   0x1 LB: > { %s255_s7 = sadd.s32 4294967295, %s301_s6   ;;  %p259_p0 = scmp.ge.s32.totalorder %s301_s6, 1  ;;  %s301_s6 = sphi %s313_s6, %s11_s6  }
   0x2   : > { %p87_p1 = scmp.lt.s32.totalorder %s301_s6, 3 }
   0x4   : > { %p88_p2 = pnand %p259_p0, %p87_p1 }
   0x5   : > { %p107_p3 = scmp.lt.s32.totalorder (!%p88_p2), %s255_s7, 1 }
   0x6   : > { %91 = sbr.rel (%p88_p2) target bundleno = 42 (0x2a), region = 24 }
   0xb   : > { %s337_s7 = smov (!%p107_p3, %s255_s7), 1 }
   0xc   : > { %s266_s8 = sshll.u32 %s337_s7, 5  ;;  %s267_s12 = sshll.u32 %s337_s7, 3 }
   0xd   : > { %s111_s11 = scalar_lea.vmem %s334_s0, %s266_s8  ;;  %s116_s15 = scalar_lea.vmem %s335_s1, %s267_s12 }
   0xe   : > { %v269_v0 = vld [vmem:[%s111_s11] sm:$0xff]   ;;  %v284_v1 = vld [vmem:[%s111_s11 + $0x8] sm:$0xff]   ;;  %v285_v2 = vld [vmem:[%s111_s11 + $0x10] sm:$0xff]  }
   0xf   : > { %v270_v3 = vunpack.c.l.bf16 %v269_v0  ;;  %v271_v4 = vunpack.c.h.bf16 %v269_v0  ;;  %v274_v5 = vunpack.c.l.bf16 %v284_v1  ;;  %v275_v6 = vunpack.c.h.bf16 %v284_v1  ;;  %v286_v7 = vld [vmem:[%s111_s11 + $0x18] sm:$0xff]  }
  0x10   : > { %v278_v8 = vunpack.c.l.bf16 %v285_v2  ;;  %v279_v9 = vunpack.c.h.bf16 %v285_v2  ;;  %v282_v10 = vunpack.c.l.bf16 %v286_v7  ;;  %v283_v11 = vunpack.c.h.bf16 %v286_v7 }
  0x11   : > { %v133_v12 = vmax.f32 %v270_v3, %v271_v4  ;;  %v134_v13 = vmax.f32 %v274_v5, %v275_v6 }
  0x12   : > { %v135_v14 = vmax.f32 %v278_v8, %v279_v9  ;;  %v136_v15 = vmax.f32 %v282_v10, %v283_v11 }
  0x13   : > { %141 = vst [vmem:[#allocation1] ss:$2 sm:$0xff] %v133_v12 }
  0x14   : > { %145 = vst [vmem:[#allocation1 + $0x10] ss:$2 sm:$0xff] %v134_v13 }
  0x15   : > { %149 = vst [vmem:[#allocation1 + $0x20] ss:$2 sm:$0xff] %v135_v14 }
  0x16   : > { %153 = vst [vmem:[#allocation1 + $0x30] ss:$2 sm:$0xff] %v136_v15 }
  0x1a   : > { %v142_v16 = vld.sshfl [vmem:[#allocation1] sm:$0xff pattern:$0x75316420]  ;;  %v143_v17 = vld.sshfl [vmem:[#allocation1 + $0x8] sm:$0xff pattern:$0x75316420] }
  0x1b   : > { %v164_v18 = vpack.c.bf16 %v143_v17, %v142_v16  ;;  %v146_v19 = vld.sshfl [vmem:[#allocation1 + $0x10] sm:$0xff pattern:$0x75316420]  ;;  %v147_v20 = vld.sshfl [vmem:[#allocation1 + $0x18] sm:$0xff pattern:$0x75316420] }
  0x1c   : > { %v165_v21 = vpack.c.bf16 %v147_v20, %v146_v19  ;;  %v150_v22 = vld.sshfl [vmem:[#allocation1 + $0x20] sm:$0xff pattern:$0x75316420]  ;;  %v151_v23 = vld.sshfl [vmem:[#allocation1 + $0x28] sm:$0xff pattern:$0x75316420] }
  0x1d   : > { %v176_v24 = vrot.slane %v164_v18, 4  ;;  %v166_v25 = vpack.c.bf16 %v151_v23, %v150_v22  ;;  %v154_v26 = vld.sshfl [vmem:[#allocation1 + $0x30] sm:$0xff pattern:$0x75316420] }
  0x1e   : > { %v177_v27 = vrot.slane %v165_v21, 4  ;;  %v155_v28 = vld.sshfl [vmem:[#allocation1 + $0x38] sm:$0xff pattern:$0x75316420] }
  0x1f   : > { %v184_v29 = vunpack.c.l.bf16 %v176_v24  ;;  %v178_v30 = vrot.slane %v166_v25, 4  ;;  %v167_v31 = vpack.c.bf16 %v155_v28, %v154_v26 }
  0x20   : > { %v185_v32 = vunpack.c.l.bf16 %v177_v27 }
  0x21   : > { %v188_v33 = vmax.f32 %v142_v16, %v184_v29  ;;  %v186_v34 = vunpack.c.l.bf16 %v178_v30  ;;  %v179_v35 = vrot.slane %v167_v31, 4 }
  0x22   : > { %v189_v36 = vmax.f32 %v146_v19, %v185_v32 }
  0x23   : > { %v192_v37 = vpack.c.bf16 %v188_v33, %v188_v33  ;;  %v190_v38 = vmax.f32 %v150_v22, %v186_v34  ;;  %v187_v39 = vunpack.c.l.bf16 %v179_v35 }
  0x24   : > { %v193_v40 = vpack.c.bf16 %v189_v36, %v189_v36 }
  0x25   : > { %196 = vst [vmem:[%s116_s15] sm:$0x3] %v192_v37  ;;  %v194_v41 = vpack.c.bf16 %v190_v38, %v190_v38  ;;  %v191_v42 = vmax.f32 %v154_v26, %v187_v39 }
  0x26   : > { %197 = vst [vmem:[%s116_s15 + $0x2] sm:$0x3] %v193_v40 }
  0x27   : > { %198 = vst [vmem:[%s116_s15 + $0x4] sm:$0x3] %v194_v41  ;;  %v195_v43 = vpack.c.bf16 %v191_v42, %v191_v42 }
  0x29   : > { %199 = vst [vmem:[%s116_s15 + $0x6] sm:$0x3] %v195_v43 }
  0x2a PF: > { %s11_s6 = sadd.s32 1, %s301_s6  }
  0x2b   : > { %p8_p4 = scmp.ge.s32.totalorder %s11_s6, 4  }
  0x2d   :  { %10 = sbr.rel (!%p8_p4) target bundleno = 1 (0x1), region = 57 }

// kernel: custom_pan_forward.16
= control target key start
LH: loop header
LB: loop body
LE: loop exit
PB: predicated region body
PF: predicated region fallthrough
CT: control target
= control target key end

     0   :  { %s435_s12 = smov 0   ;;  %s486_s0 = inlined_call_operand.vmem [shape: bf16[2,4,4,128], index: 0, kind: input, shape index: {}]   ;;  %s487_s1 = inlined_call_operand.vmem [shape: bf16[1,128,128], index: 1, kind: input, shape index: {}]   ;;  %s488_s2 = inlined_call_operand.vmem [shape: f32[1,128], index: 2, kind: input, shape index: {}]   ;;  %s489_s3 = inlined_call_operand.vmem [shape: bf16[2,4,4,128], index: 3, kind: output, shape index: {}]  }
   0x1 LB: > { %s345_s13 = sadd.s32 4294967295, %s413_s12   ;;  %p349_p0 = scmp.ge.s32.totalorder %s413_s12, 1  ;;  %s413_s12 = sphi %s435_s12, %s13_s12  }
   0x2   : > { %p137_p1 = scmp.lt.s32.totalorder %s413_s12, 3 }
   0x4   : > { %p138_p2 = pnand %p349_p0, %p137_p1 }
   0x5   : > { %p161_p3 = scmp.lt.s32.totalorder (!%p138_p2), %s345_s13, 1 }
   0x6   : > { %141 = sbr.rel (%p138_p2) target bundleno = 187 (0xbb), region = 32 }
   0xb   : > { %v397_v0 = vld [vmem:[%s487_s1 + $0x38] sm:$0xff]  ;;  %v396_v1 = vld [vmem:[%s487_s1 + $0x30] sm:$0xff]  ;;  %s491_s13 = smov (!%p161_p3, %s345_s13), 1  ;;  %v395_v2 = vld [vmem:[%s487_s1 + $0x28] sm:$0xff] }
   0xc   : > { %256 = vmatpush.bf16.msra.mxu0 %v397_v0  ;;  %s388_s18 = sshll.u32 %s491_s13, 3  ;;  %v394_v7 = vld [vmem:[%s487_s1 + $0x20] sm:$0xff]  ;;  %v393_v8 = vld [vmem:[%s487_s1 + $0x18] sm:$0xff]  ;;  %v392_v9 = vld [vmem:[%s487_s1 + $0x10] sm:$0xff] }
   0xd   : > { %s165_s23 = scalar_lea.vmem %s486_s0, %s388_s18  ;;  %v391_v10 = vld [vmem:[%s487_s1 + $0x8] sm:$0xff]  ;;  %v390_v11 = vld [vmem:[%s487_s1] sm:$0xff]  ;;  %s170_s11 = scalar_lea.vmem %s489_s3, %s388_s18 }
   0xe   : > { %v171_v3 = vld [vmem:[%s165_s23] sm:$0x3]  ;;  %v172_v4 = vld [vmem:[%s165_s23 + $0x2] sm:$0x3]  ;;  %v173_v5 = vld [vmem:[%s165_s23 + $0x4] sm:$0x3] }
   0xf   : > { %v174_v6 = vld [vmem:[%s165_s23 + $0x6] sm:$0x3]  ;;  %196 = vst [vmem:[#allocation1] ss:$4 sm:$0xff] %v171_v3  ;;  %v406_v13 = vld [vmem:[%s488_s2] ss:$0 sm:$0xff] }
  0x10   : > { %257 = vmatpush.bf16.msra.mxu0 %v396_v1  ;;  %199 = vst [vmem:[#allocation1 + $0x1] ss:$4 sm:$0xff] %v172_v4 }
  0x11   : > { %202 = vst [vmem:[#allocation1 + $0x2] ss:$4 sm:$0xff] %v173_v5 }
  0x12   : > { %205 = vst [vmem:[#allocation1 + $0x3] ss:$4 sm:$0xff] %v174_v6 }
  0x14   : > { %258 = vmatpush.bf16.msra.mxu0 %v395_v2 }
  0x18   : > { %259 = vmatpush.bf16.msra.mxu0 %v394_v7 }
  0x19   : > { %v206_v12 = vld.sshfl [vmem:[#allocation1] sm:$0xff pattern:$0x73625140] }
  0x1c   : > { %260 = vmatpush.bf16.msra.mxu0 %v393_v8 }
  0x20   : > { %261 = vmatpush.bf16.msra.mxu0 %v392_v9 }
  0x24   : > { %262 = vmatpush.bf16.msra.mxu0 %v391_v10 }
  0x28   : > { %263 = vmatpush.bf16.msra.mxu0 %v390_v11 }
  0x2b   : > { %264 = vmatmul.bf16.vlgmr.msra.gmra.mxu0 %v206_v12 }
  0xa8   : > { %v265_v14 = vpop.f32.mrf.mxu0 }
  0xa9   : > { %v266_v15 = vadd.f32 %v406_v13, %v265_v14 }
  0xab   : > { %vm270_vm0 = vcmp.gt.f32.partialorder %v266_v15, 0.0  ;;  %v272_v16 = vmul.f32 0.1, %v266_v15 }
  0xad   : > { %v274_v17 = vsel %vm270_vm0, %v266_v15, %v272_v16 }
  0xae   : > { %v278_v18 = vrot.slane %v274_v17, 4  ;;  %v282_v19 = vpack.c.bf16 %v274_v17, %v274_v17 }
  0xb0   : > { %v283_v20 = vpack.c.bf16 %v278_v18, %v278_v18  ;;  %286 = vst [vmem:[%s170_s11] sm:$0x3] %v282_v19  ;;  %v267_v21 = vpop.f32.mrf.mxu0 }
  0xb1   : > { %v268_v22 = vadd.f32 %v406_v13, %v267_v21 }
  0xb2   : > { %287 = vst [vmem:[%s170_s11 + $0x2] sm:$0x3] %v283_v20 }
  0xb3   : > { %vm271_vm1 = vcmp.gt.f32.partialorder %v268_v22, 0.0  ;;  %v273_v23 = vmul.f32 0.1, %v268_v22 }
  0xb5   : > { %v275_v24 = vsel %vm271_vm1, %v268_v22, %v273_v23 }
  0xb6   : > { %v279_v25 = vrot.slane %v275_v24, 4  ;;  %v284_v26 = vpack.c.bf16 %v275_v24, %v275_v24 }
  0xb8   : > { %v285_v27 = vpack.c.bf16 %v279_v25, %v279_v25  ;;  %288 = vst [vmem:[%s170_s11 + $0x4] sm:$0x3] %v284_v26 }
  0xba   : > { %289 = vst [vmem:[%s170_s11 + $0x6] sm:$0x3] %v285_v27 }
  0xbb PF: > { %s13_s12 = sadd.s32 1, %s413_s12  }
  0xbc   : > { %p10_p4 = scmp.ge.s32.totalorder %s13_s12, 4  }
  0xbe   :  { %12 = sbr.rel (!%p10_p4) target bundleno = 1 (0x1), region = 65 }

// kernel: custom_pan_forward.18
= control target key start
LH: loop header
LB: loop body
LE: loop exit
PB: predicated region body
PF: predicated region fallthrough
CT: control target
= control target key end

     0   :  { %s2181_s30 = smov 0   ;;  %s2536_s0 = inlined_call_operand.vmem [shape: bf16[2,5,5,128], index: 0, kind: input, shape index: {}]   ;;  %s2537_s1 = inlined_call_operand.vmem [shape: bf16[2,5,5,128], index: 1, kind: input, shape index: {}]   ;;  %s2538_s2 = inlined_call_operand.vmem [shape: bf16[2,5,5,128], index: 2, kind: input, shape index: {}]   ;;  %s2539_s3 = inlined_call_operand.vmem [shape: bf16[2,5,5,128], index: 3, kind: input, shape index: {}]   ;;  %s2540_s4 = inlined_call_operand.vmem [shape: bf16[4,128,128], index: 4, kind: input, shape index: {}]   ;;  %s2541_s5 = inlined_call_operand.vmem [shape: bf16[2,128,128], index: 5, kind: input, shape index: {}]   ;;  %s2542_s6 = inlined_call_operand.vmem [shape: bf16[2,128,128], index: 6, kind: input, shape index: {}]   ;;  %s2543_s7 = inlined_call_operand.vmem [shape: bf16[1,128,128], index: 7, kind: input, shape index: {}]   ;;  %s2544_s8 = inlined_call_operand.vmem [shape: f32[1,128], index: 8, kind: input, shape index: {}]   ;;  %s2545_s9 = inlined_call_operand.vmem [shape: bf16[2,4,4,128], index: 9, kind: output, shape index: {}]  }
   0x1 LB: > { %s1647_s10 = sadd.s32 4294967295, %s2129_s30   ;;  %p1651_p0 = scmp.ge.s32.totalorder %s2129_s30, 1  ;;  %s2129_s30 = sphi %s2181_s30, %s19_s30  }
   0x2   : > { %p317_p1 = scmp.lt.s32.totalorder %s2129_s30, 3 }
   0x4   : > { %p318_p2 = pnand %p1651_p0, %p317_p1 }
   0x5   : > { %p368_p3 = scmp.lt.s32.totalorder (!%p318_p2), %s1647_s10, 1 }
   0x6   : > { %321 = sbr.rel (%p318_p2) target bundleno = 277 (0x115), region = 56 }
   0xb   : > { %v2056_v0 = vld [vmem:[%s2540_s4 + $0x78] sm:$0xff]  ;;  %v2055_v2 = vld [vmem:[%s2540_s4 + $0x70] sm:$0xff]  ;;  %s2551_s10 = smov (!%p368_p3, %s1647_s10), 1  ;;  %v2054_v8 = vld [vmem:[%s2540_s4 + $0x68] sm:$0xff]  ;;  %vm425_vm0 = vcmask 1041408   ;;  %vm429_vm1 = vcmask 1043458  }
   0xc   : > { %v2048_v1 = vld [vmem:[%s2540_s4 + $0x38] sm:$0xff]  ;;  %588 = vmatpush.bf16.msra.mxu0 %v2056_v0  ;;  %v2047_v3 = vld [vmem:[%s2540_s4 + $0x30] sm:$0xff]  ;;  %v2046_v9 = vld [vmem:[%s2540_s4 + $0x28] sm:$0xff]  ;;  %s2222_s12 = smul.u32 20, %s2551_s10  ;;  %vm451_vm2 = vsmask.f32 1280 }
   0xd   : > { %663 = vmatpush.bf16.msra.mxu1 %v2048_v1  ;;  %v2064_v4 = vld [vmem:[%s2540_s4 + $0xb8] sm:$0xff]  ;;  %v2063_v6 = vld [vmem:[%s2540_s4 + $0xb0] sm:$0xff]  ;;  %v2062_v10 = vld [vmem:[%s2540_s4 + $0xa8] sm:$0xff]  ;;  %vm452_vm3 = vsmask.f32 3336  ;;  %s2040_s28 = sshll.u32 %s2551_s10, 3 }
   0xe   : > { %v2072_v5 = vld [vmem:[%s2540_s4 + $0xf8] sm:$0xff]  ;;  %760 = vmatpush.bf16.msra.mxu2 %v2064_v4  ;;  %v2071_v7 = vld [vmem:[%s2540_s4 + $0xf0] sm:$0xff]  ;;  %v2070_v11 = vld [vmem:[%s2540_s4 + $0xe8] sm:$0xff]  ;;  %s2240_s23 = scalar_lea.vmem %s2536_s0, %s2222_s12  ;;  %vm454_vm4 = vsmask.f32 5392  ;;  %s2435_s11 = scalar_lea.vmem %s2538_s2, %s2222_s12 }
   0xf   : > { %942 = vmatpush.bf16.msra.mxu3 %v2072_v5  ;;  %v2053_v12 = vld [vmem:[%s2540_s4 + $0x60] sm:$0xff]  ;;  %v2052_v14 = vld [vmem:[%s2540_s4 + $0x58] sm:$0xff]  ;;  %v415_v19 = vld [vmem:[%s2240_s23 + $0x8] sm:$0x7]  ;;  %vm456_vm7 = vsmask.f32 7448  ;;  %s2469_s27 = scalar_lea.vmem %s2537_s1, %s2222_s12  ;;  %s392_s14 = scalar_lea.vmem %s2545_s9, %s2040_s28 }
  0x10   : > { %589 = vmatpush.bf16.msra.mxu0 %v2055_v2  ;;  %v2045_v13 = vld [vmem:[%s2540_s4 + $0x20] sm:$0xff]  ;;  %v2044_v20 = vld [vmem:[%s2540_s4 + $0x18] sm:$0xff]  ;;  %v416_v21 = vld [vmem:[%s2240_s23 + $0xc] sm:$0x7]  ;;  %v423_v24 = vrot.slane %v415_v19, 2 }
  0x11   : > { %664 = vmatpush.bf16.msra.mxu1 %v2047_v3  ;;  %v2061_v15 = vld [vmem:[%s2540_s4 + $0xa0] sm:$0xff]  ;;  %v424_v25 = vrot.slane %v416_v21, 2  ;;  %v2060_v26 = vld [vmem:[%s2540_s4 + $0x98] sm:$0xff]  ;;  %v2051_v36 = vld [vmem:[%s2540_s4 + $0x50] sm:$0xff] }
  0x12   : > { %761 = vmatpush.bf16.msra.mxu2 %v2063_v6  ;;  %v2069_v16 = vld [vmem:[%s2540_s4 + $0xe0] sm:$0xff]  ;;  %v2068_v31 = vld [vmem:[%s2540_s4 + $0xd8] sm:$0xff]  ;;  %v441_v34 = vsel %vm425_vm0, %v415_v19, %v423_v24  ;;  %v442_v35 = vsel %vm429_vm1, %v415_v19, %v423_v24  ;;  %v2043_v37 = vld [vmem:[%s2540_s4 + $0x10] sm:$0xff] }
  0x13   : > { %943 = vmatpush.bf16.msra.mxu3 %v2071_v7  ;;  %v413_v17 = vld [vmem:[%s2240_s23] sm:$0x7]  ;;  %v414_v18 = vld [vmem:[%s2240_s23 + $0x4] sm:$0x7]  ;;  %v444_v38 = vrot.slane %v442_v35, 2  ;;  %v447_v39 = vsel %vm425_vm0, %v416_v21, %v424_v25  ;;  %v448_v40 = vsel %vm429_vm1, %v416_v21, %v424_v25  ;;  %vm453_vm5 = vmor %vm451_vm2, %vm452_vm3  ;;  %v484_v50 = vshrl.u32 %v441_v34, 16 }
  0x14   : > { %590 = vmatpush.bf16.msra.mxu0 %v2054_v8  ;;  %v421_v22 = vrot.slane %v413_v17, 2  ;;  %v422_v23 = vrot.slane %v414_v18, 2  ;;  %v450_v42 = vrot.slane %v448_v40, 2  ;;  %v2059_v46 = vld [vmem:[%s2540_s4 + $0x90] sm:$0xff]  ;;  %vm2287_vm6 = vmor %vm453_vm5, %vm454_vm4  ;;  %v487_v55 = vshll.u32 %v441_v34, 16  ;;  %v2050_v56 = vld [vmem:[%s2540_s4 + $0x48] sm:$0xff] }
  0x15   : > { %665 = vmatpush.bf16.msra.mxu1 %v2046_v9  ;;  %v2067_v51 = vld [vmem:[%s2540_s4 + $0xd0] sm:$0xff]  ;;  %v2042_v57 = vld [vmem:[%s2540_s4 + $0x8] sm:$0xff]  ;;  %v486_v60 = vrot.slane %v484_v50, 6  ;;  %v493_v61 = vshll.u32 %v444_v38, 16  ;;  %v497_v0 = vshrl.u32 %v447_v39, 16  ;;  %v500_v1 = vshll.u32 %v447_v39, 16  ;;  %vm2303_vm8 = vmor %vm2287_vm6, %vm456_vm7 }
  0x16   : > { %762 = vmatpush.bf16.msra.mxu2 %v2062_v10  ;;  %v428_v27 = vsel %vm425_vm0, %v413_v17, %v421_v22  ;;  %v430_v28 = vsel %vm429_vm1, %v413_v17, %v421_v22  ;;  %v435_v29 = vsel %vm425_vm0, %v414_v18, %v422_v23  ;;  %v436_v30 = vsel %vm429_vm1, %v414_v18, %v422_v23  ;;  %v2058_v2 = vld [vmem:[%s2540_s4 + $0x88] sm:$0xff]  ;;  %v2088_v17 = vld [vmem:[%s2541_s5 + $0x78] sm:$0xff]  ;;  %v2057_v22 = vld [vmem:[%s2540_s4 + $0x80] sm:$0xff] }
  0x17   : > { %944 = vmatpush.bf16.msra.mxu3 %v2070_v11  ;;  %v432_v32 = vrot.slane %v430_v28, 2  ;;  %v438_v33 = vrot.slane %v436_v30, 2  ;;  %v458_v41 = vshrl.u32 %v428_v27, 16  ;;  %v461_v43 = vshll.u32 %v428_v27, 16  ;;  %v2066_v8 = vld [vmem:[%s2540_s4 + $0xc8] sm:$0xff]  ;;  %v2096_v24 = vld [vmem:[%s2542_s6 + $0x38] sm:$0xff] }
  0x18   : > { %591 = vmatpush.bf16.msra.mxu0 %v2053_v12  ;;  %v471_v45 = vshrl.u32 %v435_v29, 16  ;;  %v474_v48 = vshll.u32 %v435_v29, 16  ;;  %v489_v63 = vrot.slane %v487_v55, 7  ;;  %v495_v6 = vrot.slane %v493_v61, 7  ;;  %v2065_v27 = vld [vmem:[%s2540_s4 + $0xc0] sm:$0xff]  ;;  %v2079_v28 = vld [vmem:[%s2541_s5 + $0x30] sm:$0xff] }
  0x19   : > { %666 = vmatpush.bf16.msra.mxu1 %v2045_v13  ;;  %v467_v44 = vshll.u32 %v432_v32, 16  ;;  %v460_v47 = vrot.slane %v458_v41, 6  ;;  %v480_v49 = vshll.u32 %v438_v33, 16  ;;  %v463_v53 = vrot.slane %v461_v43, 7  ;;  %v2049_v13 = vld [vmem:[%s2540_s4 + $0x40] sm:$0xff]  ;;  %v2087_v29 = vld [vmem:[%s2541_s5 + $0x70] sm:$0xff] }
  0x1a   : > { %763 = vmatpush.bf16.msra.mxu2 %v2061_v15  ;;  %v473_v54 = vrot.slane %v471_v45, 6  ;;  %v476_v59 = vrot.slane %v474_v48, 7  ;;  %v506_v7 = vshll.u32 %v450_v42, 16  ;;  %v490_v10 = vor.u32 %v489_v63, %v486_v60  ;;  %v1790_v32 = vld [vmem:[%s2240_s23 + $0x4] sm:$0x7]  ;;  %v2078_v34 = vld [vmem:[%s2541_s5 + $0x28] sm:$0xff] }
  0x1b   : > { %945 = vmatpush.bf16.msra.mxu3 %v2069_v16  ;;  %v469_v58 = vrot.slane %v467_v44, 7  ;;  %v464_v62 = vor.u32 %v463_v53, %v460_v47  ;;  %v482_v5 = vrot.slane %v480_v49, 7  ;;  %v499_v11 = vrot.slane %v497_v0, 6  ;;  %v2080_v16 = vld [vmem:[%s2541_s5 + $0x38] sm:$0xff]  ;;  %v1791_v33 = vld [vmem:[%s2240_s23 + $0x8] sm:$0x7] }
  0x1c   : > { %592 = vmatpush.bf16.msra.mxu0 %v2052_v14  ;;  %v477_v4 = vor.u32 %v476_v59, %v473_v54  ;;  %v502_v12 = vrot.slane %v500_v1, 7  ;;  %v2041_v14 = vld [vmem:[%s2540_s4] sm:$0xff]  ;;  %v491_v19 = vrot.slane %v490_v10, 2  ;;  %v508_v21 = vrot.slane %v506_v7, 7  ;;  %v2086_v35 = vld [vmem:[%s2541_s5 + $0x68] sm:$0xff]  ;;  %v2103_v55 = vld [vmem:[%s2542_s6 + $0x70] sm:$0xff] }
  0x1d   : > { %667 = vmatpush.bf16.msra.mxu1 %v2044_v20  ;;  %v465_v9 = vrot.slane %v464_v62, 2  ;;  %v784_v38 = vrot.slane %v1790_v32, 2  ;;  %v393_v39 = vld [vmem:[%s2240_s23] sm:$0x3]  ;;  %v785_v40 = vrot.slane %v1791_v33, 2  ;;  %v2094_v50 = vld [vmem:[%s2542_s6 + $0x28] sm:$0xff] }
  0x1e   : > { %764 = vmatpush.bf16.msra.mxu2 %v2060_v26  ;;  %v478_v15 = vrot.slane %v477_v4, 2  ;;  %v503_v20 = vor.u32 %v502_v12, %v499_v11  ;;  %v496_v25 = vsel %vm2303_vm8, %v491_v19, %v495_v6  ;;  %v394_v41 = vld [vmem:[%s2240_s23 + $0x4] sm:$0x3]  ;;  %v395_v42 = vld [vmem:[%s2240_s23 + $0x8] sm:$0x3]  ;;  %v2084_v60 = vld [vmem:[%s2541_s5 + $0x58] sm:$0xff] }
  0x1f   : > { %946 = vmatpush.bf16.msra.mxu3 %v2068_v31  ;;  %v470_v18 = vsel %vm2303_vm8, %v465_v9, %v469_v58  ;;  %534 = vst [vmem:[#allocation1 + $0x2] ss:$4 sm:$0xff] %v496_v25  ;;  %v2095_v31 = vld [vmem:[%s2542_s6 + $0x30] sm:$0xff]  ;;  %v2077_v44 = vld [vmem:[%s2541_s5 + $0x20] sm:$0xff]  ;;  %v396_v48 = vld [vmem:[%s2240_s23 + $0xc] sm:$0x3]  ;;  %v790_v49 = vsel %vm425_vm0, %v1790_v32, %v784_v38  ;;  %v796_v52 = vsel %vm425_vm0, %v1791_v33, %v785_v40 }
  0x20   : > { %593 = vmatpush.bf16.msra.mxu0 %v2051_v36  ;;  %v483_v23 = vsel %vm2303_vm8, %v478_v15, %v482_v5  ;;  %528 = vst [vmem:[#allocation1] ss:$4 sm:$0xff] %v470_v18  ;;  %v504_v26 = vrot.slane %v503_v20, 2  ;;  %v1792_v36 = vld [vmem:[%s2240_s23 + $0xc] sm:$0x7]  ;;  %v2093_v54 = vld [vmem:[%s2542_s6 + $0x20] sm:$0xff]  ;;  %v791_v61 = vsel %vm429_vm1, %v1790_v32, %v784_v38  ;;  %v797_v0 = vsel %vm429_vm1, %v1791_v33, %v785_v40 }
  0x21   : > { %668 = vmatpush.bf16.msra.mxu1 %v2043_v37  ;;  %531 = vst [vmem:[#allocation1 + $0x1] ss:$4 sm:$0xff] %v483_v23  ;;  %v1793_v37 = vld [vmem:[%s2240_s23 + $0x10] sm:$0x7]  ;;  %v786_v43 = vrot.slane %v1792_v36, 2  ;;  %v812_v58 = vshrl.u32 %v790_v49, 16 }
  0x22   : > { %765 = vmatpush.bf16.msra.mxu2 %v2059_v46  ;;  %v509_v30 = vsel %vm2303_vm8, %v504_v26, %v508_v21  ;;  %v2085_v46 = vld [vmem:[%s2541_s5 + $0x60] sm:$0xff]  ;;  %v787_v47 = vrot.slane %v1793_v37, 2  ;;  %v815_v59 = vshll.u32 %v790_v49, 16  ;;  %v825_v62 = vshrl.u32 %v796_v52, 16  ;;  %v2092_v7 = vld [vmem:[%s2542_s6 + $0x18] sm:$0xff]  ;;  %v2083_v19 = vld [vmem:[%s2541_s5 + $0x50] sm:$0xff] }
  0x23   : > { %947 = vmatpush.bf16.msra.mxu3 %v2067_v51  ;;  %537 = vst [vmem:[#allocation1 + $0x3] ss:$4 sm:$0xff] %v509_v30  ;;  %v2104_v51 = vld [vmem:[%s2542_s6 + $0x78] sm:$0xff]  ;;  %v802_v53 = vsel %vm425_vm0, %v1792_v36, %v786_v43  ;;  %v828_v63 = vshll.u32 %v796_v52, 16  ;;  %v803_v4 = vsel %vm429_vm1, %v1792_v36, %v786_v43  ;;  %v1738_v9 = vld [vmem:[%s2240_s23 + $0x4] sm:$0x3] }
  0x24   : > { %594 = vmatpush.bf16.msra.mxu0 %v2050_v56  ;;  %v2076_v56 = vld [vmem:[%s2541_s5 + $0x18] sm:$0xff]  ;;  %v838_v1 = vshrl.u32 %v802_v53, 16  ;;  %v793_v10 = vrot.slane %v791_v61, 2  ;;  %v809_v11 = vsel %vm429_vm1, %v1793_v37, %v787_v47  ;;  %v814_v12 = vrot.slane %v812_v58, 6  ;;  %v1739_v15 = vld [vmem:[%s2240_s23 + $0x8] sm:$0x3] }
  0x25   : > { %669 = vmatpush.bf16.msra.mxu1 %v2042_v57  ;;  %v808_v57 = vsel %vm425_vm0, %v1793_v37, %v787_v47  ;;  %v830_v18 = vrot.slane %v828_v63, 7  ;;  %v1740_v20 = vld [vmem:[%s2240_s23 + $0xc] sm:$0x3]  ;;  %v805_v21 = vrot.slane %v803_v4, 2  ;;  %v811_v25 = vrot.slane %v809_v11, 2  ;;  %v2101_v36 = vld [vmem:[%s2542_s6 + $0x60] sm:$0xff] }
  0x26   : > { %766 = vmatpush.bf16.msra.mxu2 %v2058_v2  ;;  %v841_v2 = vshll.u32 %v802_v53, 16  ;;  %v851_v5 = vshrl.u32 %v808_v57, 16  ;;  %v854_v6 = vshll.u32 %v808_v57, 16  ;;  %v821_v30 = vshll.u32 %v793_v10, 16  ;;  %v2073_v43 = vld [vmem:[%s2541_s5] sm:$0xff] }
  0x27   : > { %948 = vmatpush.bf16.msra.mxu3 %v2066_v8  ;;  %v2102_v8 = vld [vmem:[%s2542_s6 + $0x68] sm:$0xff]  ;;  %v847_v38 = vshll.u32 %v805_v21, 16  ;;  %v860_v40 = vshll.u32 %v811_v25, 16  ;;  %v2081_v47 = vld [vmem:[%s2541_s5 + $0x40] sm:$0xff] }
  0x28   : > { %595 = vmatpush.bf16.msra.mxu0 %v2049_v13  ;;  %v817_v13 = vrot.slane %v815_v59, 7  ;;  %v843_v23 = vrot.slane %v841_v2, 7  ;;  %v853_v26 = vrot.slane %v851_v5, 6  ;;  %v1251_v57 = vld [vmem:[%s2435_s11] sm:$0x7]  ;;  %v2090_v59 = vld [vmem:[%s2542_s6 + $0x8] sm:$0xff] }
  0x29   : > { %670 = vmatpush.bf16.msra.mxu1 %v2041_v14  ;;  %v2075_v14 = vld [vmem:[%s2541_s5 + $0x10] sm:$0xff]  ;;  %v849_v49 = vrot.slane %v847_v38, 7  ;;  %v1259_v61 = vrot.slane %v1251_v57, 2  ;;  %v2089_v63 = vld [vmem:[%s2542_s6] sm:$0xff]  ;;  %v1253_v4 = vld [vmem:[%s2435_s11 + $0x8] sm:$0x7] }
  0x2a   : > { %767 = vmatpush.bf16.msra.mxu2 %v2057_v22  ;;  %v538_v45 = vld.sshfl [vmem:[#allocation1] sm:$0xff pattern:$0x73625140]  ;;  %v840_v22 = vrot.slane %v838_v1, 6  ;;  %v2099_v1 = vld [vmem:[%s2542_s6 + $0x50] sm:$0xff] }
  0x2b   : > { %949 = vmatpush.bf16.msra.mxu3 %v2065_v27  ;;  %596 = vmatmul.bf16.vlgmr.msra.gmra.mxu0 %v538_v45  ;;  %603 = vst [vmem:[#allocation1] ss:$4 sm:$0xff] %v393_v39  ;;  %v856_v27 = vrot.slane %v854_v6, 7  ;;  %v1252_v2 = vld [vmem:[%s2435_s11 + $0x4] sm:$0x7]  ;;  %v1266_v6 = vsel %vm429_vm1, %v1251_v57, %v1259_v61 }
  0x2c   : > { %1039 = vmatpush.bf16.msrb.mxu0 %v2080_v16  ;;  %606 = vst [vmem:[#allocation1 + $0x1] ss:$4 sm:$0xff] %v394_v41  ;;  %v799_v16 = vrot.slane %v797_v0, 2  ;;  %v844_v37 = vor.u32 %v843_v23, %v840_v22  ;;  %v1265_v0 = vsel %vm425_vm0, %v1251_v57, %v1259_v61  ;;  %v1254_v5 = vld [vmem:[%s2435_s11 + $0xc] sm:$0x7]  ;;  %v1268_v10 = vrot.slane %v1266_v6, 2 }
  0x2d   : > { %1138 = vmatpush.bf16.msrb.mxu1 %v2088_v17  ;;  %609 = vst [vmem:[#allocation1 + $0x2] ss:$4 sm:$0xff] %v395_v42  ;;  %v827_v17 = vrot.slane %v825_v62, 6  ;;  %v857_v39 = vor.u32 %v856_v27, %v853_v26  ;;  %v823_v42 = vrot.slane %v821_v30, 7  ;;  %v2110_v62 = vld [vmem:[%s2543_s7 + $0x28] sm:$0xff]  ;;  %v2109_v11 = vld [vmem:[%s2543_s7 + $0x20] sm:$0xff] }
  0x2e   : > { %1235 = vmatpush.bf16.msrb.mxu2 %v2096_v24  ;;  %612 = vst [vmem:[#allocation1 + $0x3] ss:$4 sm:$0xff] %v396_v48  ;;  %v834_v33 = vshll.u32 %v799_v16, 16  ;;  %v845_v48 = vrot.slane %v844_v37, 2  ;;  %v961_v25 = vld [vmem:[%s2469_s27 + $0xc] sm:$0x3] }
  0x2f   : > { %1417 = vmatpush.bf16.msrb.mxu3 %v2104_v51  ;;  %v831_v32 = vor.u32 %v830_v18, %v827_v17  ;;  %v862_v51 = vrot.slane %v860_v40, 7  ;;  %v1877_v6 = vld [vmem:[%s2469_s27 + $0x10] sm:$0x3]  ;;  %v1157_v3 = vld [vmem:[%s2435_s11 + $0xc] sm:$0x3] }
  0x30   : > { %1040 = vmatpush.bf16.msrb.mxu0 %v2079_v28  ;;  %v1741_v28 = vld [vmem:[%s2240_s23 + $0x10] sm:$0x3]  ;;  %v836_v45 = vrot.slane %v834_v33, 7 }
  0x31   : > { %1139 = vmatpush.bf16.msrb.mxu1 %v2087_v29  ;;  %v818_v29 = vor.u32 %v817_v13, %v814_v12  ;;  %v1287_v12 = vshrl.u32 %v1265_v0, 16  ;;  %v1290_v13 = vshll.u32 %v1265_v0, 16  ;;  %v1875_v0 = vld [vmem:[%s2469_s27 + $0x8] sm:$0x3] }
  0x32   : > { %1236 = vmatpush.bf16.msrb.mxu2 %v2095_v31  ;;  %v2074_v31 = vld [vmem:[%s2541_s5 + $0x8] sm:$0xff] }
  0x33   : > { %1418 = vmatpush.bf16.msrb.mxu3 %v2103_v55  ;;  %v819_v41 = vrot.slane %v818_v29, 2  ;;  %v1289_v27 = vrot.slane %v1287_v12, 6  ;;  %v1296_v29 = vshll.u32 %v1268_v10, 16  ;;  %v1154_v10 = vld [vmem:[%s2435_s11] sm:$0x3] }
  0x34   : > { %1041 = vmatpush.bf16.msrb.mxu0 %v2078_v34  ;;  %v2082_v34 = vld [vmem:[%s2541_s5 + $0x48] sm:$0xff] }
  0x35   : > { %1140 = vmatpush.bf16.msrb.mxu1 %v2086_v35  ;;  %v613_v24 = vld.sshfl [vmem:[#allocation1] sm:$0xff pattern:$0x73625140]  ;;  %v2091_v35 = vld [vmem:[%s2542_s6 + $0x10] sm:$0xff]  ;;  %v824_v52 = vsel %vm2303_vm8, %v819_v41, %v823_v42  ;;  %v1298_v37 = vrot.slane %v1296_v29, 7 }
  0x36   : > { %1237 = vmatpush.bf16.msrb.mxu2 %v2094_v50  ;;  %700 = vst [vmem:[#allocation1] ss:$4 sm:$0xff] %v1738_v9  ;;  %671 = vmatmul.bf16.vlgmr.msra.gmra.mxu1 %v613_v24  ;;  %v858_v50 = vrot.slane %v857_v39, 2  ;;  %v1262_v9 = vrot.slane %v1254_v5, 2  ;;  %v2097_v39 = vld [vmem:[%s2542_s6 + $0x40] sm:$0xff] }
  0x37   : > { %1419 = vmatpush.bf16.msrb.mxu3 %v2102_v8  ;;  %703 = vst [vmem:[#allocation1 + $0x1] ss:$4 sm:$0xff] %v1739_v15  ;;  %v1261_v8 = vrot.slane %v1253_v4, 2 }
  0x38   : > { %1042 = vmatpush.bf16.msrb.mxu0 %v2077_v44  ;;  %706 = vst [vmem:[#allocation1 + $0x2] ss:$4 sm:$0xff] %v1740_v20  ;;  %v832_v44 = vrot.slane %v831_v32, 2  ;;  %v863_v58 = vsel %vm2303_vm8, %v858_v50, %v862_v51  ;;  %v960_v20 = vld [vmem:[%s2469_s27 + $0x8] sm:$0x3]  ;;  %v1283_v23 = vsel %vm425_vm0, %v1254_v5, %v1262_v9  ;;  %v1284_v24 = vsel %vm429_vm1, %v1254_v5, %v1262_v9  ;;  %v2105_v9 = vld [vmem:[%s2543_s7] sm:$0xff] }
  0x39   : > { %1141 = vmatpush.bf16.msrb.mxu1 %v2085_v46  ;;  %709 = vst [vmem:[#allocation1 + $0x3] ss:$4 sm:$0xff] %v1741_v28  ;;  %v2112_v46 = vld [vmem:[%s2543_s7 + $0x38] sm:$0xff]  ;;  %v1277_v17 = vsel %vm425_vm0, %v1253_v4, %v1261_v8  ;;  %v1278_v18 = vsel %vm429_vm1, %v1253_v4, %v1261_v8  ;;  %v1286_v26 = vrot.slane %v1284_v24, 2  ;;  %v1292_v28 = vrot.slane %v1290_v13, 7  ;;  %v2106_v8 = vld [vmem:[%s2543_s7 + $0x8] sm:$0xff] }
  0x3a   : > { %1238 = vmatpush.bf16.msrb.mxu2 %v2093_v54  ;;  %v837_v53 = vsel %vm2303_vm8, %v832_v44, %v836_v45  ;;  %v2111_v54 = vld [vmem:[%s2543_s7 + $0x30] sm:$0xff]  ;;  %v1280_v22 = vrot.slane %v1278_v18, 2  ;;  %v1313_v38 = vshrl.u32 %v1277_v17, 16  ;;  %v1316_v45 = vshll.u32 %v1277_v17, 16  ;;  %v1876_v4 = vld [vmem:[%s2469_s27 + $0xc] sm:$0x3] }
  0x3b   : > { %1420 = vmatpush.bf16.msrb.mxu3 %v2101_v36  ;;  %v1293_v36 = vor.u32 %v1292_v28, %v1289_v27  ;;  %v1329_v50 = vshll.u32 %v1283_v23, 16  ;;  %v1156_v13 = vld [vmem:[%s2435_s11 + $0x8] sm:$0x3] }
  0x3c   : > { %1043 = vmatpush.bf16.msrb.mxu0 %v2076_v56  ;;  %v850_v56 = vsel %vm2303_vm8, %v845_v48, %v849_v49  ;;  %v1315_v44 = vrot.slane %v1313_v38, 6  ;;  %v1322_v48 = vshll.u32 %v1280_v22, 16  ;;  %v1326_v49 = vshrl.u32 %v1283_v23, 16 }
  0x3d   : > { %1142 = vmatpush.bf16.msrb.mxu1 %v2084_v60  ;;  %v2100_v60 = vld [vmem:[%s2542_s6 + $0x58] sm:$0xff]  ;;  %v1294_v42 = vrot.slane %v1293_v36, 2 }
  0x3e   : > { %1239 = vmatpush.bf16.msrb.mxu2 %v2092_v7  ;;  %v1260_v7 = vrot.slane %v1252_v2, 2 }
  0x3f   : > { %1421 = vmatpush.bf16.msrb.mxu3 %v2100_v60  ;;  %v1299_v51 = vsel %vm2303_vm8, %v1294_v42, %v1298_v37 }
  0x40   : > { %1044 = vmatpush.bf16.msrb.mxu0 %v2075_v14  ;;  %v710_v55 = vld.sshfl [vmem:[#allocation1] sm:$0xff pattern:$0x73625140]  ;;  %v1271_v15 = vsel %vm425_vm0, %v1252_v2, %v1260_v7  ;;  %v1272_v16 = vsel %vm429_vm1, %v1252_v2, %v1260_v7 }
  0x41   : > { %1143 = vmatpush.bf16.msrb.mxu1 %v2083_v19  ;;  %768 = vmatmul.bf16.vlgmr.msra.gmra.mxu2 %v710_v55  ;;  %882 = vst [vmem:[#allocation1] ss:$4 sm:$0xff] %v824_v52  ;;  %v958_v14 = vld [vmem:[%s2469_s27] sm:$0x3]  ;;  %v959_v19 = vld [vmem:[%s2469_s27 + $0x4] sm:$0x3] }
  0x42   : > { %1240 = vmatpush.bf16.msrb.mxu2 %v2091_v35  ;;  %885 = vst [vmem:[#allocation1 + $0x1] ss:$4 sm:$0xff] %v837_v53  ;;  %v1274_v21 = vrot.slane %v1272_v16, 2  ;;  %v1303_v32 = vshll.u32 %v1271_v15, 16  ;;  %v2108_v35 = vld [vmem:[%s2543_s7 + $0x18] sm:$0xff]  ;;  %v1318_v52 = vrot.slane %v1316_v45, 7 }
  0x43   : > { %888 = vst [vmem:[#allocation1 + $0x2] ss:$4 sm:$0xff] %v850_v56  ;;  %1422 = vmatpush.bf16.msrb.mxu3 %v2099_v1  ;;  %v1335_v53 = vshll.u32 %v1286_v26, 16  ;;  %v1328_v55 = vrot.slane %v1326_v49, 6  ;;  %v1331_v56 = vrot.slane %v1329_v50, 7 }
  0x44   : > { %1045 = vmatpush.bf16.msrb.mxu0 %v2074_v31  ;;  %891 = vst [vmem:[#allocation1 + $0x3] ss:$4 sm:$0xff] %v863_v58  ;;  %v1300_v31 = vshrl.u32 %v1271_v15, 16  ;;  %v1309_v33 = vshll.u32 %v1274_v21, 16  ;;  %v1305_v41 = vrot.slane %v1303_v32, 7  ;;  %v1319_v57 = vor.u32 %v1318_v52, %v1315_v44 }
  0x45   : > { %1144 = vmatpush.bf16.msrb.mxu1 %v2082_v34  ;;  %v2098_v34 = vld [vmem:[%s2542_s6 + $0x48] sm:$0xff]  ;;  %v1324_v58 = vrot.slane %v1322_v48, 7  ;;  %v1332_v60 = vor.u32 %v1331_v56, %v1328_v55  ;;  %v1337_v61 = vrot.slane %v1335_v53, 7 }
  0x46   : > { %1241 = vmatpush.bf16.msrb.mxu2 %v2090_v59  ;;  %v1302_v40 = vrot.slane %v1300_v31, 6 }
  0x47   : > { %1423 = vmatpush.bf16.msrb.mxu3 %v2098_v34  ;;  %v1333_v1 = vrot.slane %v1332_v60, 2 }
  0x48   : > { %1046 = vmatpush.bf16.msrb.mxu0 %v2073_v43  ;;  %v1311_v43 = vrot.slane %v1309_v33, 7 }
  0x49   : > { %1145 = vmatpush.bf16.msrb.mxu1 %v2081_v47  ;;  %v1306_v47 = vor.u32 %v1305_v41, %v1302_v40  ;;  %v1338_v7 = vsel %vm2303_vm8, %v1333_v1, %v1337_v61 }
  0x4a   : > { %1242 = vmatpush.bf16.msrb.mxu2 %v2089_v63  ;;  %v1320_v63 = vrot.slane %v1319_v57, 2 }
  0x4b   : > { %v892_v30 = vld.sshfl [vmem:[#allocation1] sm:$0xff pattern:$0x73625140]  ;;  %1424 = vmatpush.bf16.msrb.mxu3 %v2097_v39 }
  0x4c   : > { %1514 = vmatpush.bf16.msra.mxu0 %v2112_v46  ;;  %950 = vmatmul.bf16.vlgmr.msra.gmra.mxu3 %v892_v30  ;;  %979 = vst [vmem:[#allocation1] ss:$4 sm:$0xff] %v958_v14  ;;  %v2107_v46 = vld [vmem:[%s2543_s7 + $0x10] sm:$0xff]  ;;  %v1325_v5 = vsel %vm2303_vm8, %v1320_v63, %v1324_v58 }
  0x4d   : > { %982 = vst [vmem:[#allocation1 + $0x1] ss:$4 sm:$0xff] %v959_v19 }
  0x4e   : > { %985 = vst [vmem:[#allocation1 + $0x2] ss:$4 sm:$0xff] %v960_v20 }
  0x4f   : > { %988 = vst [vmem:[#allocation1 + $0x3] ss:$4 sm:$0xff] %v961_v25 }
  0x50   : > { %1515 = vmatpush.bf16.msra.mxu0 %v2111_v54  ;;  %v1307_v54 = vrot.slane %v1306_v47, 2 }
  0x52   : > { %v1312_v59 = vsel %vm2303_vm8, %v1307_v54, %v1311_v43 }
  0x54   : > { %1516 = vmatpush.bf16.msra.mxu0 %v2110_v62  ;;  %v1874_v62 = vld [vmem:[%s2469_s27 + $0x4] sm:$0x3]  ;;  %s387_s27 = scalar_lea.vmem %s2539_s3, %s2222_s12 }
  0x55   : > { %v1433_v15 = vld [vmem:[%s387_s27] sm:$0x3]  ;;  %v1434_v16 = vld [vmem:[%s387_s27 + $0x4] sm:$0x3]  ;;  %v1435_v18 = vld [vmem:[%s387_s27 + $0x8] sm:$0x3] }
  0x56   : > { %v989_v2 = vld.sshfl [vmem:[#allocation1] sm:$0xff pattern:$0x73625140]  ;;  %v1436_v19 = vld [vmem:[%s387_s27 + $0xc] sm:$0x3] }
  0x57   : > { %1047 = vmatmul.bf16.vlgmr.msrb.gmra.mxu0 %v989_v2  ;;  %1078 = vst [vmem:[#allocation1] ss:$4 sm:$0xff] %v1874_v62 }
  0x58   : > { %1517 = vmatpush.bf16.msra.mxu0 %v2109_v11  ;;  %1081 = vst [vmem:[#allocation1 + $0x1] ss:$4 sm:$0xff] %v1875_v0  ;;  %v1155_v11 = vld [vmem:[%s2435_s11 + $0x4] sm:$0x3] }
  0x59   : > { %1084 = vst [vmem:[#allocation1 + $0x2] ss:$4 sm:$0xff] %v1876_v4 }
  0x5a   : > { %1087 = vst [vmem:[#allocation1 + $0x3] ss:$4 sm:$0xff] %v1877_v6 }
  0x5c   : > { %1518 = vmatpush.bf16.msra.mxu0 %v2108_v35 }
  0x60   : > { %1519 = vmatpush.bf16.msra.mxu0 %v2107_v46  ;;  %v2122_v46 = vld [vmem:[%s2544_s8] ss:$0 sm:$0xff] }
  0x61   : > { %v1088_v12 = vld.sshfl [vmem:[#allocation1] sm:$0xff pattern:$0x73625140] }
  0x62   : > { %1146 = vmatmul.bf16.vlgmr.msrb.gmra.mxu1 %v1088_v12  ;;  %1175 = vst [vmem:[#allocation1] ss:$4 sm:$0xff] %v1154_v10 }
  0x63   : > { %1178 = vst [vmem:[#allocation1 + $0x1] ss:$4 sm:$0xff] %v1155_v11 }
  0x64   : > { %1520 = vmatpush.bf16.msra.mxu0 %v2106_v8  ;;  %1181 = vst [vmem:[#allocation1 + $0x2] ss:$4 sm:$0xff] %v1156_v13 }
  0x65   : > { %1184 = vst [vmem:[#allocation1 + $0x3] ss:$4 sm:$0xff] %v1157_v3 }
  0x68   : > { %1521 = vmatpush.bf16.msra.mxu0 %v2105_v9 }
  0x6c   : > { %v1185_v14 = vld.sshfl [vmem:[#allocation1] sm:$0xff pattern:$0x73625140] }
  0x6d   : > { %1243 = vmatmul.bf16.vlgmr.msrb.gmra.mxu2 %v1185_v14  ;;  %1357 = vst [vmem:[#allocation1] ss:$4 sm:$0xff] %v1299_v51 }
  0x6e   : > { %1360 = vst [vmem:[#allocation1 + $0x1] ss:$4 sm:$0xff] %v1312_v59 }
  0x6f   : > { %1363 = vst [vmem:[#allocation1 + $0x2] ss:$4 sm:$0xff] %v1325_v5 }
  0x70   : > { %1366 = vst [vmem:[#allocation1 + $0x3] ss:$4 sm:$0xff] %v1338_v7 }
  0x77   : > { %v1367_v17 = vld.sshfl [vmem:[#allocation1] sm:$0xff pattern:$0x73625140] }
  0x78   : > { %1425 = vmatmul.bf16.vlgmr.msrb.gmra.mxu3 %v1367_v17  ;;  %1454 = vst [vmem:[#allocation1] ss:$4 sm:$0xff] %v1433_v15 }
  0x79   : > { %1457 = vst [vmem:[#allocation1 + $0x1] ss:$4 sm:$0xff] %v1434_v16 }
  0x7a   : > { %1460 = vst [vmem:[#allocation1 + $0x2] ss:$4 sm:$0xff] %v1435_v18 }
  0x7b   : > { %1463 = vst [vmem:[#allocation1 + $0x3] ss:$4 sm:$0xff] %v1436_v19 }
  0x82   : > { %v1464_v20 = vld.sshfl [vmem:[#allocation1] sm:$0xff pattern:$0x73625140] }
  0x83   : > { %1522 = vmatmul.bf16.vlgmr.msra.gmra.mxu0 %v1464_v20 }
  0xa8   : > { %v597_v21 = vpop.f32.mrf.mxu0 }
  0xb0   : > { %v599_v24 = vpop.f32.mrf.mxu0 }
  0xb3   : > { %v672_v22 = vpop.f32.mrf.mxu1 }
  0xb4   : > { %v673_v25 = vadd.f32 %v672_v22, %v597_v21 }
  0xbb   : > { %v674_v27 = vpop.f32.mrf.mxu1 }
  0xbc   : > { %v675_v36 = vadd.f32 %v674_v27, %v599_v24 }
  0xc4   : > { %v769_v23 = vpop.f32.mrf.mxu2 }
  0xc5   : > { %v774_v28 = vadd.f32 %v769_v23, %v673_v25 }
  0xcc   : > { %v771_v29 = vpop.f32.mrf.mxu2 }
  0xcd   : > { %v775_v39 = vadd.f32 %v771_v29, %v675_v36 }
  0xcf   : > { %v951_v26 = vpop.f32.mrf.mxu3 }
  0xd0   : > { %v956_v31 = vadd.f32 %v951_v26, %v774_v28 }
  0xd4   : > { %v1048_v30 = vpop.f32.mrf.mxu0 }
  0xd5   : > { %v1053_v34 = vadd.f32 %v1048_v30, %v956_v31 }
  0xd7   : > { %v953_v32 = vpop.f32.mrf.mxu3 }
  0xd8   : > { %v957_v42 = vadd.f32 %v953_v32, %v775_v39 }
  0xdc   : > { %v1050_v37 = vpop.f32.mrf.mxu0 }
  0xdd   : > { %v1054_v45 = vadd.f32 %v1050_v37, %v957_v42 }
  0xdf   : > { %v1147_v33 = vpop.f32.mrf.mxu1 }
  0xe0   : > { %v1152_v38 = vadd.f32 %v1147_v33, %v1053_v34 }
  0xe7   : > { %v1149_v44 = vpop.f32.mrf.mxu1 }
  0xe8   : > { %v1153_v49 = vadd.f32 %v1149_v44, %v1054_v45 }
  0xf0   : > { %v1244_v35 = vpop.f32.mrf.mxu2 }
  0xf1   : > { %v1249_v40 = vadd.f32 %v1244_v35, %v1152_v38 }
  0xf8   : > { %v1246_v47 = vpop.f32.mrf.mxu2 }
  0xf9   : > { %v1250_v51 = vadd.f32 %v1246_v47, %v1153_v49 }
  0xfb   : > { %v1426_v41 = vpop.f32.mrf.mxu3 }
  0xfc   : > { %v1431_v43 = vadd.f32 %v1426_v41, %v1249_v40 }
 0x100   : > { %v1523_v48 = vpop.f32.mrf.mxu0 }
 0x101   : > { %v1528_v50 = vadd.f32 %v1523_v48, %v1431_v43 }
 0x103   : > { %v1534_v52 = vadd.f32 %v2122_v46, %v1528_v50  ;;  %v1428_v53 = vpop.f32.mrf.mxu3 }
 0x104   : > { %v1432_v55 = vadd.f32 %v1428_v53, %v1250_v51 }
 0x105   : > { %vm1536_vm9 = vcmp.gt.f32.partialorder %v1534_v52, 0.0  ;;  %v1538_v54 = vmul.f32 0.1, %v1534_v52 }
 0x107   : > { %v1540_v56 = vsel %vm1536_vm9, %v1534_v52, %v1538_v54 }
 0x108   : > { %v1544_v57 = vrot.slane %v1540_v56, 4  ;;  %v1548_v58 = vpack.c.bf16 %v1540_v56, %v1540_v56  ;;  %v1525_v59 = vpop.f32.mrf.mxu0 }
 0x109   : > { %v1529_v60 = vadd.f32 %v1525_v59, %v1432_v55 }
 0x10a   : > { %v1549_v61 = vpack.c.bf16 %v1544_v57, %v1544_v57  ;;  %1552 = vst [vmem:[%s392_s14] sm:$0x3] %v1548_v58 }
 0x10b   : > { %v1535_v62 = vadd.f32 %v2122_v46, %v1529_v60 }
 0x10c   : > { %1553 = vst [vmem:[%s392_s14 + $0x2] sm:$0x3] %v1549_v61 }
 0x10d   : > { %vm1537_vm10 = vcmp.gt.f32.partialorder %v1535_v62, 0.0  ;;  %v1539_v63 = vmul.f32 0.1, %v1535_v62 }
 0x10f   : > { %v1541_v0 = vsel %vm1537_vm10, %v1535_v62, %v1539_v63 }
 0x110   : > { %v1545_v1 = vrot.slane %v1541_v0, 4  ;;  %v1550_v2 = vpack.c.bf16 %v1541_v0, %v1541_v0 }
 0x112   : > { %v1551_v4 = vpack.c.bf16 %v1545_v1, %v1545_v1  ;;  %1554 = vst [vmem:[%s392_s14 + $0x4] sm:$0x3] %v1550_v2 }
 0x114   : > { %1555 = vst [vmem:[%s392_s14 + $0x6] sm:$0x3] %v1551_v4 }
 0x115 PF: > { %s19_s30 = sadd.s32 1, %s2129_s30  }
 0x116   : > { %p16_p4 = scmp.ge.s32.totalorder %s19_s30, 4  }
 0x118   :  { %18 = sbr.rel (!%p16_p4) target bundleno = 1 (0x1), region = 129 }

// kernel: custom_pan_forward.14
= control target key start
LH: loop header
LB: loop body
LE: loop exit
PB: predicated region body
PF: predicated region fallthrough
CT: control target
= control target key end

     0   :  { %s7423_s24 = smov 0   ;;  %s9240_s0 = inlined_call_operand.vmem [shape: bf16[2,10,10,128], index: 0, kind: input, shape index: {}]   ;;  %s9241_s1 = inlined_call_operand.vmem [shape: bf16[2,10,10,128], index: 1, kind: input, shape index: {}]   ;;  %s9242_s2 = inlined_call_operand.vmem [shape: bf16[2,10,10,128], index: 2, kind: input, shape index: {}]   ;;  %s9243_s3 = inlined_call_operand.vmem [shape: bf16[9,128,128], index: 3, kind: input, shape index: {}]   ;;  %s9244_s4 = inlined_call_operand.vmem [shape: bf16[9,128,128], index: 4, kind: input, shape index: {}]   ;;  %s9245_s5 = inlined_call_operand.vmem [shape: bf16[9,128,128], index: 5, kind: input, shape index: {}]   ;;  %s9246_s6 = inlined_call_operand.vmem [shape: f32[1,128], index: 6, kind: input, shape index: {}]   ;;  %s9247_s7 = inlined_call_operand.vmem [shape: bf16[2,8,8,128], index: 7, kind: output, shape index: {}]  }
   0x1 LB: > { %s5397_s25 = sadd.s32 4294967295, %s7381_s24   ;;  %p5401_p0 = scmp.ge.s32.totalorder %s7381_s24, 1  ;;  %s7381_s24 = sphi %s7423_s24, %s17_s24  }
   0x2   : > { %p257_p1 = scmp.lt.s32.totalorder %s7381_s24, 3 }
   0x4   : > { %p258_p2 = pnand %p5401_p0, %p257_p1 }
   0x5   : > { %p299_p3 = scmp.lt.s32.totalorder (!%p258_p2), %s5397_s25, 1 }
   0x6   : > { %261 = sbr.rel (%p258_p2) target bundleno = 608 (0x260), region = 48 }
   0xb   : > { %v7085_v0 = vld [vmem:[%s9243_s3 + $0x78] sm:$0xff]  ;;  %v7084_v3 = vld [vmem:[%s9243_s3 + $0x70] sm:$0xff]  ;;  %s9253_s25 = smov (!%p299_p3, %s5397_s25), 1  ;;  %v7083_v6 = vld [vmem:[%s9243_s3 + $0x68] sm:$0xff]  ;;  %vm351_vm0 = vsmask.f32 3328 }
   0xc   : > { %v7077_v1 = vld [vmem:[%s9243_s3 + $0x38] sm:$0xff]  ;;  %547 = vmatpush.bf16.msra.mxu0 %v7085_v0  ;;  %7341 = vmatpush.bf16.msra.mxu3 %v7085_v0  ;;  %v7076_v4 = vld [vmem:[%s9243_s3 + $0x30] sm:$0xff]  ;;  %s7452_s15 = smul.u32 80, %s9253_s25  ;;  %v7075_v7 = vld [vmem:[%s9243_s3 + $0x28] sm:$0xff]  ;;  %vm352_vm1 = vsmask.f32 7440 }
   0xd   : > { %v7093_v2 = vld [vmem:[%s9243_s3 + $0xb8] sm:$0xff]  ;;  %648 = vmatpush.bf16.msra.mxu1 %v7077_v1  ;;  %v7092_v5 = vld [vmem:[%s9243_s3 + $0xb0] sm:$0xff]  ;;  %v7091_v8 = vld [vmem:[%s9243_s3 + $0xa8] sm:$0xff]  ;;  %vm701_vm2 = vcmask 1042432   ;;  %vm702_vm3 = vcmask 1046532   ;;  %s7065_s27 = sshll.u32 %s9253_s25, 5 }
   0xe   : > { %817 = vmatpush.bf16.msra.mxu2 %v7093_v2  ;;  %s7461_s20 = scalar_lea.vmem %s9240_s0, %s7452_s15  ;;  %v7082_v9 = vld [vmem:[%s9243_s3 + $0x60] sm:$0xff]  ;;  %v7081_v36 = vld [vmem:[%s9243_s3 + $0x58] sm:$0xff]  ;;  %vm7511_vm4 = vmor %vm351_vm0, %vm352_vm1  ;;  %s7966_s9 = scalar_lea.vmem %s9241_s1, %s7452_s15 }
   0xf   : > { %v319_v10 = vld [vmem:[%s7461_s20] sm:$0xf]  ;;  %v320_v11 = vld [vmem:[%s7461_s20 + $0x8] sm:$0xf]  ;;  %v7475_v12 = vld [vmem:[%s7461_s20 + $0x4] sm:$0x1]  ;;  %s8596_s13 = scalar_lea.vmem %s9242_s2, %s7452_s15  ;;  %s9229_s30 = scalar_lea.vmem %s9247_s7, %s7065_s27 }
  0x10   : > { %548 = vmatpush.bf16.msra.mxu0 %v7084_v3  ;;  %7342 = vmatpush.bf16.msra.mxu3 %v7084_v3  ;;  %v7074_v13 = vld [vmem:[%s9243_s3 + $0x20] sm:$0xff]  ;;  %v7481_v14 = vld [vmem:[%s7461_s20 + $0xc] sm:$0x1]  ;;  %v355_v15 = vshrl.u32 %v319_v10, 16  ;;  %v358_v16 = vshll.u32 %v319_v10, 16  ;;  %v369_v17 = vshrl.u32 %v320_v11, 16  ;;  %vm7527_vm5 = vmor %vm701_vm2, %vm702_vm3 }
  0x11   : > { %649 = vmatpush.bf16.msra.mxu1 %v7076_v4  ;;  %v7090_v18 = vld [vmem:[%s9243_s3 + $0xa0] sm:$0xff]  ;;  %v372_v19 = vshll.u32 %v320_v11, 16  ;;  %v324_v21 = vld [vmem:[%s7461_s20 + $0x28] sm:$0xf]  ;;  %v364_v24 = vshll.u32 %v7475_v12, 16  ;;  %v378_v28 = vshll.u32 %v7481_v14, 16 }
  0x12   : > { %818 = vmatpush.bf16.msra.mxu2 %v7092_v5  ;;  %v323_v20 = vld [vmem:[%s7461_s20 + $0x20] sm:$0xf]  ;;  %v357_v22 = vrot.slane %v355_v15, 4  ;;  %v360_v23 = vrot.slane %v358_v16, 5  ;;  %v371_v25 = vrot.slane %v369_v17, 4  ;;  %v425_v34 = vshrl.u32 %v324_v21, 16 }
  0x13   : > { %v7490_v26 = vld [vmem:[%s7461_s20 + $0x24] sm:$0x1]  ;;  %v374_v27 = vrot.slane %v372_v19, 5  ;;  %v7494_v29 = vld [vmem:[%s7461_s20 + $0x2c] sm:$0x1]  ;;  %v411_v30 = vshrl.u32 %v323_v20, 16 }
  0x14   : > { %549 = vmatpush.bf16.msra.mxu0 %v7083_v6  ;;  %7343 = vmatpush.bf16.msra.mxu3 %v7083_v6  ;;  %v414_v31 = vshll.u32 %v323_v20, 16  ;;  %v361_v32 = vor.u32 %v360_v23, %v357_v22  ;;  %v420_v33 = vshll.u32 %v7490_v26, 16  ;;  %v428_v35 = vshll.u32 %v324_v21, 16  ;;  %v7073_v37 = vld [vmem:[%s9243_s3 + $0x18] sm:$0xff]  ;;  %v677_v46 = vld [vmem:[%s7461_s20] sm:$0xe] }
  0x15   : > { %650 = vmatpush.bf16.msra.mxu1 %v7075_v7  ;;  %v375_v38 = vor.u32 %v374_v27, %v371_v25  ;;  %v413_v39 = vrot.slane %v411_v30, 4  ;;  %v434_v41 = vshll.u32 %v7494_v29, 16  ;;  %v7089_v42 = vld [vmem:[%s9243_s3 + $0x98] sm:$0xff]  ;;  %v366_v43 = vrot.slane %v364_v24, 5  ;;  %v678_v51 = vld [vmem:[%s7461_s20 + $0x8] sm:$0xe] }
  0x16   : > { %819 = vmatpush.bf16.msra.mxu2 %v7091_v8  ;;  %v416_v40 = vrot.slane %v414_v31, 5  ;;  %v427_v44 = vrot.slane %v425_v34, 4  ;;  %v430_v45 = vrot.slane %v428_v35, 5  ;;  %v362_v47 = vrot.slane %v361_v32, 4  ;;  %v7080_v56 = vld [vmem:[%s9243_s3 + $0x50] sm:$0xff]  ;;  %v7079_v10 = vld [vmem:[%s9243_s3 + $0x48] sm:$0xff] }
  0x17   : > { %v376_v48 = vrot.slane %v375_v38, 4  ;;  %v380_v49 = vrot.slane %v378_v28, 5  ;;  %v422_v53 = vrot.slane %v420_v33, 5  ;;  %v436_v55 = vrot.slane %v434_v41, 5  ;;  %v7072_v57 = vld [vmem:[%s9243_s3 + $0x10] sm:$0xff]  ;;  %v7071_v15 = vld [vmem:[%s9243_s3 + $0x8] sm:$0xff] }
  0x18   : > { %550 = vmatpush.bf16.msra.mxu0 %v7082_v9  ;;  %7344 = vmatpush.bf16.msra.mxu3 %v7082_v9  ;;  %v417_v50 = vor.u32 %v416_v40, %v413_v39  ;;  %v431_v54 = vor.u32 %v430_v45, %v427_v44  ;;  %v5503_v59 = vrot.slane %v677_v46, 9  ;;  %v706_v60 = vrot.slane %v7475_v12, 5  ;;  %v7088_v62 = vld [vmem:[%s9243_s3 + $0x90] sm:$0xff]  ;;  %v322_v5 = vld [vmem:[%s7461_s20 + $0x18] sm:$0xf]  ;;  %v7087_v16 = vld [vmem:[%s9243_s3 + $0x88] sm:$0xff] }
  0x19   : > { %651 = vmatpush.bf16.msra.mxu1 %v7074_v13  ;;  %v5504_v61 = vrot.slane %v678_v51, 9  ;;  %v710_v1 = vrot.slane %v7481_v14, 5  ;;  %v321_v2 = vld [vmem:[%s7461_s20 + $0x10] sm:$0xf]  ;;  %v367_v3 = vsel %vm7511_vm4, %v362_v47, %v366_v43  ;;  %v381_v4 = vsel %vm7511_vm4, %v376_v48, %v380_v49  ;;  %v7543_v8 = vld [vmem:[%s7461_s20] sm:$0xf] }
  0x1a   : > { %820 = vmatpush.bf16.msra.mxu2 %v7090_v18  ;;  %v418_v58 = vrot.slane %v417_v50, 4  ;;  %v432_v63 = vrot.slane %v431_v54, 4  ;;  %v7546_v9 = vld [vmem:[%s7461_s20 + $0x4] sm:$0xf0]  ;;  %v707_v11 = vsel %vm7527_vm5, %v5503_v59, %v706_v60  ;;  %v383_v13 = vshrl.u32 %v321_v2, 16  ;;  %v7078_v28 = vld [vmem:[%s9243_s3 + $0x40] sm:$0xff] }
  0x1b   : > { %v711_v12 = vsel %vm7527_vm5, %v5504_v61, %v710_v1  ;;  %v386_v14 = vshll.u32 %v321_v2, 16  ;;  %v483_v17 = vunpack.c.l.b16 %v367_v3  ;;  %v484_v18 = vunpack.c.l.b16 %v381_v4  ;;  %v325_v21 = vld [vmem:[%s7461_s20 + $0x30] sm:$0xf]  ;;  %v7565_v25 = vld [vmem:[%s7461_s20 + $0x14] sm:$0x1]  ;;  %v7070_v30 = vld [vmem:[%s9243_s3] sm:$0xff] }
  0x1c   : > { %551 = vmatpush.bf16.msra.mxu0 %v7081_v36  ;;  %7345 = vmatpush.bf16.msra.mxu3 %v7081_v36  ;;  %v423_v6 = vsel %vm7511_vm4, %v418_v58, %v422_v53  ;;  %v437_v7 = vsel %vm7511_vm4, %v432_v63, %v436_v55  ;;  %v397_v19 = vshrl.u32 %v322_v5, 16  ;;  %v400_v20 = vshll.u32 %v322_v5, 16  ;;  %v326_v27 = vld [vmem:[%s7461_s20 + $0x38] sm:$0xf]  ;;  %v7575_v33 = vld [vmem:[%s7461_s20 + $0x1c] sm:$0x1] }
  0x1d   : > { %652 = vmatpush.bf16.msra.mxu1 %v7073_v37  ;;  %v487_v22 = vunpack.c.l.b16 %v423_v6  ;;  %v488_v23 = vunpack.c.l.b16 %v437_v7  ;;  %v5458_v24 = vor.u32 %v7546_v9, %v7543_v8  ;;  %v753_v31 = vunpack.c.l.b16 %v707_v11  ;;  %v7578_v38 = vld [vmem:[%s7461_s20 + $0x34] sm:$0x1]  ;;  %v7086_v41 = vld [vmem:[%s9243_s3 + $0x80] sm:$0xff]  ;;  %v7585_v44 = vld [vmem:[%s7461_s20 + $0x3c] sm:$0x1] }
  0x1e   : > { %821 = vmatpush.bf16.msra.mxu2 %v7089_v42  ;;  %v754_v32 = vunpack.c.l.b16 %v711_v12  ;;  %v385_v34 = vrot.slane %v383_v13, 4  ;;  %v388_v35 = vrot.slane %v386_v14, 5  ;;  %v399_v36 = vrot.slane %v397_v19, 4  ;;  %v7105_v48 = vld [vmem:[%s9243_s3 + $0xf8] sm:$0xff]  ;;  %v7104_v63 = vld [vmem:[%s9243_s3 + $0xf0] sm:$0xff] }
  0x1f   : > { %v402_v37 = vrot.slane %v400_v20, 5  ;;  %v439_v39 = vshrl.u32 %v325_v21, 16  ;;  %v442_v40 = vshll.u32 %v325_v21, 16  ;;  %v491_v42 = vpack.c.b16 %v484_v18, %v483_v17  ;;  %v7133_v49 = vld [vmem:[%s9243_s3 + $0x1b8] sm:$0xff]  ;;  %v7132_v3 = vld [vmem:[%s9243_s3 + $0x1b0] sm:$0xff]  ;;  %v7103_v20 = vld [vmem:[%s9243_s3 + $0xe8] sm:$0xff] }
  0x20   : > { %552 = vmatpush.bf16.msra.mxu0 %v7080_v56  ;;  %7346 = vmatpush.bf16.msra.mxu3 %v7080_v56  ;;  %v392_v43 = vshll.u32 %v7565_v25, 16  ;;  %v453_v45 = vshrl.u32 %v326_v27, 16  ;;  %v456_v46 = vshll.u32 %v326_v27, 16  ;;  %v493_v47 = vpack.c.b16 %v488_v23, %v487_v22  ;;  %v7121_v1 = vld [vmem:[%s9243_s3 + $0x178] sm:$0xff]  ;;  %v679_v4 = vld [vmem:[%s7461_s20 + $0x10] sm:$0xe] }
  0x21   : > { %653 = vmatpush.bf16.msra.mxu1 %v7072_v57  ;;  %v406_v50 = vshll.u32 %v7575_v33, 16  ;;  %v441_v51 = vrot.slane %v439_v39, 4  ;;  %v444_v53 = vrot.slane %v442_v40, 5  ;;  %v389_v54 = vor.u32 %v388_v35, %v385_v34  ;;  %v680_v5 = vld [vmem:[%s7461_s20 + $0x18] sm:$0xe]  ;;  %v7112_v14 = vld [vmem:[%s9243_s3 + $0x130] sm:$0xff] }
  0x22   : > { %822 = vmatpush.bf16.msra.mxu2 %v7088_v62  ;;  %v448_v55 = vshll.u32 %v7578_v38, 16  ;;  %v455_v56 = vrot.slane %v453_v45, 4  ;;  %v458_v57 = vrot.slane %v456_v46, 5  ;;  %v761_v58 = vpack.c.b16 %v754_v32, %v753_v31  ;;  %v7113_v62 = vld [vmem:[%s9243_s3 + $0x138] sm:$0xff]  ;;  %v7131_v21 = vld [vmem:[%s9243_s3 + $0x1a8] sm:$0xff]  ;;  %v7102_v31 = vld [vmem:[%s9243_s3 + $0xe0] sm:$0xff] }
  0x23   : > { %v403_v59 = vor.u32 %v402_v37, %v399_v36  ;;  %v445_v60 = vor.u32 %v444_v53, %v441_v51  ;;  %v462_v61 = vshll.u32 %v7585_v44, 16  ;;  %v390_v6 = vrot.slane %v389_v54, 4  ;;  %v5631_v22 = vld [vmem:[%s7461_s20 + $0x8] sm:$0xf]  ;;  %v5633_v23 = vld [vmem:[%s7461_s20 + $0x10] sm:$0xf] }
  0x24   : > { %553 = vmatpush.bf16.msra.mxu0 %v7079_v10  ;;  %7347 = vmatpush.bf16.msra.mxu3 %v7079_v10  ;;  %v459_v2 = vor.u32 %v458_v57, %v455_v56  ;;  %v394_v7 = vrot.slane %v392_v43, 5  ;;  %v408_v8 = vrot.slane %v406_v50, 5  ;;  %v450_v9 = vrot.slane %v448_v55, 5  ;;  %v7119_v34 = vld [vmem:[%s9243_s3 + $0x168] sm:$0xff]  ;;  %v7130_v35 = vld [vmem:[%s9243_s3 + $0x1a0] sm:$0xff]  ;;  %v7101_v53 = vld [vmem:[%s9243_s3 + $0xd8] sm:$0xff] }
  0x25   : > { %654 = vmatpush.bf16.msra.mxu1 %v7071_v15  ;;  %v404_v10 = vrot.slane %v403_v59, 4  ;;  %v446_v11 = vrot.slane %v445_v60, 4  ;;  %v464_v13 = vrot.slane %v462_v61, 5  ;;  %v7120_v15 = vld [vmem:[%s9243_s3 + $0x170] sm:$0xff]  ;;  %v714_v17 = vrot.slane %v7565_v25, 5  ;;  %v7110_v46 = vld [vmem:[%s9243_s3 + $0x120] sm:$0xff] }
  0x26   : > { %823 = vmatpush.bf16.msra.mxu2 %v7087_v16  ;;  %v460_v12 = vrot.slane %v459_v2, 4  ;;  %v5505_v16 = vrot.slane %v679_v4, 9  ;;  %v5506_v18 = vrot.slane %v680_v5, 9  ;;  %v718_v19 = vrot.slane %v7575_v33, 5  ;;  %v7067_v50 = vld [vmem:[%s7461_s20 + $0x14] sm:$0xf0] }
  0x27   : > { %v395_v25 = vsel %vm7511_vm4, %v390_v6, %v394_v7  ;;  %v409_v27 = vsel %vm7511_vm4, %v404_v10, %v408_v8  ;;  %v1006_v36 = vshrl.u32 %v5631_v22, 16  ;;  %v1009_v37 = vshll.u32 %v5631_v22, 16  ;;  %v7118_v51 = vld [vmem:[%s9243_s3 + $0x160] sm:$0xff]  ;;  %v7665_v61 = vld [vmem:[%s7461_s20 + $0xc] sm:$0x1]  ;;  %v7109_v2 = vld [vmem:[%s9243_s3 + $0x118] sm:$0xff] }
  0x28   : > { %554 = vmatpush.bf16.msra.mxu0 %v7078_v28  ;;  %7348 = vmatpush.bf16.msra.mxu3 %v7078_v28  ;;  %v451_v28 = vsel %vm7511_vm4, %v446_v11, %v450_v9  ;;  %v715_v32 = vsel %vm7527_vm5, %v5505_v16, %v714_v17  ;;  %v719_v33 = vsel %vm7527_vm5, %v5506_v18, %v718_v19  ;;  %v1020_v39 = vshrl.u32 %v5633_v23, 16  ;;  %v7117_v4 = vld [vmem:[%s9243_s3 + $0x158] sm:$0xff]  ;;  %v7100_v5 = vld [vmem:[%s9243_s3 + $0xd0] sm:$0xff]  ;;  %v682_v6 = vld [vmem:[%s7461_s20 + $0x28] sm:$0xe] }
  0x29   : > { %655 = vmatpush.bf16.msra.mxu1 %v7070_v30  ;;  %v465_v30 = vsel %vm7511_vm4, %v460_v12, %v464_v13  ;;  %v1023_v40 = vshll.u32 %v5633_v23, 16  ;;  %v489_v43 = vunpack.c.l.b16 %v451_v28  ;;  %v1008_v54 = vrot.slane %v1006_v36, 4  ;;  %v7128_v11 = vld [vmem:[%s9243_s3 + $0x190] sm:$0xff]  ;;  %v5635_v18 = vld [vmem:[%s7461_s20 + $0x18] sm:$0xf]  ;;  %v7099_v19 = vld [vmem:[%s9243_s3 + $0xc8] sm:$0xff] }
  0x2a   : > { %824 = vmatpush.bf16.msra.mxu2 %v7086_v41  ;;  %v485_v41 = vunpack.c.l.b16 %v395_v25  ;;  %v490_v45 = vunpack.c.l.b16 %v465_v30  ;;  %v1011_v55 = vrot.slane %v1009_v37, 5  ;;  %v1022_v56 = vrot.slane %v1020_v39, 4  ;;  %v7108_v12 = vld [vmem:[%s9243_s3 + $0x110] sm:$0xff]  ;;  %v7126_v37 = vld [vmem:[%s9243_s3 + $0x180] sm:$0xff]  ;;  %v7141_v39 = vld [vmem:[%s9243_s3 + $0x1f8] sm:$0xff] }
  0x2b   : > { %555 = vmatmul.bf16.vlgmr.msra.gmra.mxu0 %v491_v42  ;;  %565 = vmatmul.bf16.vlgmr.msra.gmra.mxu3 %v493_v47  ;;  %v486_v42 = vunpack.c.l.b16 %v409_v27  ;;  %v755_v47 = vunpack.c.l.b16 %v715_v32  ;;  %v1025_v57 = vrot.slane %v1023_v40, 5  ;;  %v1015_v8 = vshll.u32 %v7665_v61, 16  ;;  %v7116_v17 = vld [vmem:[%s9243_s3 + $0x150] sm:$0xff]  ;;  %v7098_v32 = vld [vmem:[%s9243_s3 + $0xc0] sm:$0xff] }
  0x2c   : > { %952 = vmatpush.bf16.msrb.mxu3 %v7105_v48  ;;  %656 = vmatmul.bf16.vlgmr.msra.gmra.mxu1 %v5458_v24  ;;  %v7111_v24 = vld [vmem:[%s9243_s3 + $0x128] sm:$0xff]  ;;  %v756_v48 = vunpack.c.l.b16 %v719_v33  ;;  %v494_v60 = vpack.c.b16 %v490_v45, %v489_v43  ;;  %v1012_v7 = vor.u32 %v1011_v55, %v1008_v54  ;;  %v726_v16 = vrot.slane %v7494_v29, 5  ;;  %v5637_v29 = vld [vmem:[%s7461_s20 + $0x20] sm:$0xf]  ;;  %v7094_v45 = vld [vmem:[%s7461_s20 + $0xc] sm:$0xf0] }
  0x2d   : > { %825 = vmatmul.bf16.vlgmr.msra.gmra.mxu2 %v761_v58  ;;  %1198 = vmatpush.bf16.msrb.mxu0 %v7113_v62  ;;  %v7129_v58 = vld [vmem:[%s9243_s3 + $0x198] sm:$0xff]  ;;  %v492_v59 = vpack.c.b16 %v486_v42, %v485_v41  ;;  %v7668_v62 = vld [vmem:[%s7461_s20 + $0x14] sm:$0x1]  ;;  %v1026_v9 = vor.u32 %v1025_v57, %v1022_v56  ;;  %v1034_v28 = vshrl.u32 %v5635_v18, 16  ;;  %v1037_v30 = vshll.u32 %v5635_v18, 16 }
  0x2e   : > { %1507 = vmatpush.bf16.msrb.mxu2 %v7133_v49  ;;  %1372 = vmatpush.bf16.msrb.mxu1 %v7121_v1  ;;  %v5461_v49 = vld [vmem:[%s7461_s20 + $0x10] sm:$0xf]  ;;  %v762_v1 = vpack.c.b16 %v756_v48, %v755_v47  ;;  %v1029_v10 = vshll.u32 %v7668_v62, 16  ;;  %v1051_v36 = vshll.u32 %v5637_v29, 16  ;;  %v5465_v40 = vld [vmem:[%s7461_s20 + $0x20] sm:$0xf] }
  0x2f   : > { %v1027_v22 = vrot.slane %v1026_v9, 4  ;;  %v5585_v43 = vld [vmem:[%s7461_s20 + $0x8] sm:$0xf]  ;;  %v7149_v54 = vld [vmem:[%s9243_s3 + $0x238] sm:$0xff] }
  0x30   : > { %953 = vmatpush.bf16.msrb.mxu3 %v7104_v63  ;;  %v5462_v63 = vor.u32 %v7067_v50, %v5461_v49  ;;  %v1031_v23 = vrot.slane %v1029_v10, 5  ;;  %v7068_v47 = vld [vmem:[%s7461_s20 + $0x24] sm:$0xf0]  ;;  %v1036_v50 = vrot.slane %v1034_v28, 4  ;;  %v7739_v55 = vld [vmem:[%s7461_s20 + $0x1c] sm:$0x1] }
  0x31   : > { %1199 = vmatpush.bf16.msrb.mxu0 %v7112_v14  ;;  %v722_v14 = vrot.slane %v7490_v26, 5  ;;  %v7127_v26 = vld [vmem:[%s9243_s3 + $0x188] sm:$0xff]  ;;  %v1053_v57 = vrot.slane %v1051_v36, 5  ;;  %v7169_v18 = vld [vmem:[%s9244_s4 + $0x78] sm:$0xff] }
  0x32   : > { %1508 = vmatpush.bf16.msrb.mxu2 %v7132_v3  ;;  %1373 = vmatpush.bf16.msrb.mxu1 %v7120_v15  ;;  %v681_v3 = vld [vmem:[%s7461_s20 + $0x20] sm:$0xe]  ;;  %v5508_v15 = vrot.slane %v682_v6, 9  ;;  %v1043_v6 = vshll.u32 %v7739_v55, 16 }
  0x33   : > { %v5507_v13 = vrot.slane %v681_v3, 9  ;;  %v683_v3 = vld [vmem:[%s7461_s20 + $0x30] sm:$0xe] }
  0x34   : > { %954 = vmatpush.bf16.msrb.mxu3 %v7103_v20  ;;  %v1013_v20 = vrot.slane %v1012_v7, 4  ;;  %v727_v27 = vsel %vm7527_vm5, %v5508_v15, %v726_v16  ;;  %v7148_v7 = vld [vmem:[%s9243_s3 + $0x230] sm:$0xff]  ;;  %v5509_v10 = vrot.slane %v683_v3, 9  ;;  %v1045_v15 = vrot.slane %v1043_v6, 5  ;;  %v7139_v16 = vld [vmem:[%s9243_s3 + $0x1e8] sm:$0xff] }
  0x35   : > { %1200 = vmatpush.bf16.msrb.mxu0 %v7111_v24  ;;  %v7107_v24 = vld [vmem:[%s9243_s3 + $0x108] sm:$0xff]  ;;  %v723_v25 = vsel %vm7527_vm5, %v5507_v13, %v722_v14  ;;  %v758_v42 = vunpack.c.l.b16 %v727_v27  ;;  %v734_v13 = vrot.slane %v7585_v44, 5  ;;  %v5641_v44 = vld [vmem:[%s7461_s20 + $0x30] sm:$0xf]  ;;  %v7138_v27 = vld [vmem:[%s9243_s3 + $0x1e0] sm:$0xff] }
  0x36   : > { %1509 = vmatpush.bf16.msrb.mxu2 %v7131_v21  ;;  %1374 = vmatpush.bf16.msrb.mxu1 %v7119_v34  ;;  %v1017_v21 = vrot.slane %v1015_v8, 5  ;;  %v1032_v34 = vsel %vm7511_vm4, %v1027_v22, %v1031_v23  ;;  %v757_v41 = vunpack.c.l.b16 %v723_v25  ;;  %v7168_v22 = vld [vmem:[%s9244_s4 + $0x70] sm:$0xff]  ;;  %v1076_v28 = vshrl.u32 %v5641_v44, 16 }
  0x37   : > { %v1135_v49 = vunpack.c.l.b16 %v1032_v34  ;;  %v5469_v34 = vld [vmem:[%s7461_s20 + $0x30] sm:$0xf] }
  0x38   : > { %955 = vmatpush.bf16.msrb.mxu3 %v7102_v31  ;;  %v7115_v31 = vld [vmem:[%s9243_s3 + $0x148] sm:$0xff]  ;;  %v1018_v33 = vsel %vm7511_vm4, %v1013_v20, %v1017_v21  ;;  %v7161_v21 = vld [vmem:[%s9244_s4 + $0x38] sm:$0xff]  ;;  %v7136_v3 = vld [vmem:[%s9243_s3 + $0x1d0] sm:$0xff] }
  0x39   : > { %1201 = vmatpush.bf16.msrb.mxu0 %v7110_v46  ;;  %v7106_v46 = vld [vmem:[%s9243_s3 + $0x100] sm:$0xff]  ;;  %v1134_v48 = vunpack.c.l.b16 %v1018_v33 }
  0x3a   : > { %1510 = vmatpush.bf16.msrb.mxu2 %v7130_v35  ;;  %1375 = vmatpush.bf16.msrb.mxu1 %v7118_v51  ;;  %v1048_v35 = vshrl.u32 %v5637_v29, 16  ;;  %v1039_v51 = vrot.slane %v1037_v30, 5  ;;  %v7160_v29 = vld [vmem:[%s9244_s4 + $0x30] sm:$0xff]  ;;  %v1079_v30 = vshll.u32 %v5641_v44, 16  ;;  %v7146_v33 = vld [vmem:[%s9243_s3 + $0x220] sm:$0xff] }
  0x3b   : > { %560 = vmatmul.bf16.gmra.mxu0 %v492_v59  ;;  %570 = vmatmul.bf16.gmra.mxu3 %v494_v60  ;;  %v7742_v59 = vld [vmem:[%s7461_s20 + $0x24] sm:$0x1]  ;;  %v5466_v60 = vor.u32 %v7068_v47, %v5465_v40  ;;  %v7095_v40 = vld [vmem:[%s7461_s20 + $0x1c] sm:$0xf0]  ;;  %v1078_v47 = vrot.slane %v1076_v28, 4 }
  0x3c   : > { %956 = vmatpush.bf16.msrb.mxu3 %v7101_v53  ;;  %661 = vmatmul.bf16.gmra.mxu1 %v5462_v63  ;;  %v7114_v53 = vld [vmem:[%s9243_s3 + $0x140] sm:$0xff]  ;;  %v1050_v56 = vrot.slane %v1048_v35, 4  ;;  %v763_v63 = vpack.c.b16 %v758_v42, %v757_v41  ;;  %v1057_v9 = vshll.u32 %v7742_v59, 16  ;;  %v7069_v35 = vld [vmem:[%s7461_s20 + $0x34] sm:$0xf0] }
  0x3d   : > { %830 = vmatmul.bf16.gmra.mxu2 %v762_v1  ;;  %1202 = vmatpush.bf16.msrb.mxu0 %v7109_v2  ;;  %v1142_v1 = vpack.c.b16 %v1135_v49, %v1134_v48  ;;  %v7140_v2 = vld [vmem:[%s9243_s3 + $0x1f0] sm:$0xff]  ;;  %v1081_v48 = vrot.slane %v1079_v30, 5  ;;  %v7137_v49 = vld [vmem:[%s9243_s3 + $0x1d8] sm:$0xff] }
  0x3e   : > { %1511 = vmatpush.bf16.msrb.mxu2 %v7129_v58  ;;  %1376 = vmatpush.bf16.msrb.mxu1 %v7117_v4  ;;  %v5586_v58 = vor.u32 %v7094_v45, %v5585_v43  ;;  %v684_v4 = vld [vmem:[%s7461_s20 + $0x38] sm:$0xe]  ;;  %v1054_v8 = vor.u32 %v1053_v57, %v1050_v56  ;;  %v1059_v20 = vrot.slane %v1057_v9, 5  ;;  %v1261_v9 = vrot.slane %v7665_v61, 5  ;;  %v7143_v61 = vld [vmem:[%s9243_s3 + $0x208] sm:$0xff] }
  0x3f   : > { %v7096_v28 = vld [vmem:[%s7461_s20 + $0x2c] sm:$0xf0] }
  0x40   : > { %957 = vmatpush.bf16.msrb.mxu3 %v7100_v5  ;;  %v1040_v5 = vor.u32 %v1039_v51, %v1036_v50  ;;  %v7801_v50 = vld [vmem:[%s7461_s20 + $0x34] sm:$0x1]  ;;  %v7145_v51 = vld [vmem:[%s9243_s3 + $0x218] sm:$0xff] }
  0x41   : > { %1203 = vmatpush.bf16.msrb.mxu0 %v7108_v12  ;;  %v5510_v12 = vrot.slane %v684_v4, 9  ;;  %v5696_v4 = vld [vmem:[%s7461_s20 + $0x10] sm:$0xe] }
  0x42   : > { %1512 = vmatpush.bf16.msrb.mxu2 %v7128_v11  ;;  %1377 = vmatpush.bf16.msrb.mxu1 %v7116_v17  ;;  %v730_v11 = vrot.slane %v7578_v38, 5  ;;  %v1041_v14 = vrot.slane %v1040_v5, 4  ;;  %v5639_v17 = vld [vmem:[%s7461_s20 + $0x28] sm:$0xf]  ;;  %v7144_v5 = vld [vmem:[%s9243_s3 + $0x210] sm:$0xff] }
  0x43   : > { %v7147_v38 = vld [vmem:[%s9243_s3 + $0x228] sm:$0xff]  ;;  %v1062_v23 = vshrl.u32 %v5639_v17, 16  ;;  %v735_v25 = vsel %vm7527_vm5, %v5510_v12, %v734_v13  ;;  %v5704_v12 = vrot.slane %v5696_v4, 9  ;;  %v1265_v13 = vrot.slane %v7668_v62, 5  ;;  %v5645_v62 = vld [vmem:[%s7461_s20 + $0x40] sm:$0xf] }
  0x44   : > { %958 = vmatpush.bf16.msrb.mxu3 %v7099_v19  ;;  %v1055_v19 = vrot.slane %v1054_v8, 4  ;;  %v7165_v4 = vld [vmem:[%s9244_s4 + $0x58] sm:$0xff] }
  0x45   : > { %1204 = vmatpush.bf16.msrb.mxu0 %v7107_v24  ;;  %v731_v24 = vsel %vm7527_vm5, %v5509_v10, %v730_v11  ;;  %v1064_v41 = vrot.slane %v1062_v23, 4 }
  0x46   : > { %1513 = vmatpush.bf16.msrb.mxu2 %v7127_v26  ;;  %1378 = vmatpush.bf16.msrb.mxu1 %v7115_v31  ;;  %v1065_v26 = vshll.u32 %v5639_v17, 16  ;;  %v1046_v31 = vsel %vm7511_vm4, %v1041_v14, %v1045_v15  ;;  %v759_v36 = vunpack.c.l.b16 %v731_v24  ;;  %v7135_v14 = vld [vmem:[%s9243_s3 + $0x1c8] sm:$0xff]  ;;  %v5643_v17 = vld [vmem:[%s7461_s20 + $0x38] sm:$0xf]  ;;  %v1107_v24 = vshll.u32 %v5645_v62, 16 }
  0x47   : > { %v1136_v43 = vunpack.c.l.b16 %v1046_v31  ;;  %v7167_v15 = vld [vmem:[%s9244_s4 + $0x68] sm:$0xff]  ;;  %v1090_v23 = vshrl.u32 %v5643_v17, 16 }
  0x48   : > { %959 = vmatpush.bf16.msrb.mxu3 %v7098_v32  ;;  %v1060_v32 = vsel %vm7511_vm4, %v1055_v19, %v1059_v20  ;;  %v1067_v42 = vrot.slane %v1065_v26, 5  ;;  %v7158_v19 = vld [vmem:[%s9244_s4 + $0x20] sm:$0xff]  ;;  %v1093_v26 = vshll.u32 %v5643_v17, 16 }
  0x49   : > { %1205 = vmatpush.bf16.msrb.mxu0 %v7106_v46  ;;  %v1137_v45 = vunpack.c.l.b16 %v1060_v32  ;;  %v7795_v46 = vld [vmem:[%s7461_s20 + $0x2c] sm:$0x1] }
  0x4a   : > { %1514 = vmatpush.bf16.msrb.mxu2 %v7126_v37  ;;  %1379 = vmatpush.bf16.msrb.mxu1 %v7114_v53  ;;  %v760_v37 = vunpack.c.l.b16 %v735_v25  ;;  %v1068_v57 = vor.u32 %v1067_v42, %v1064_v41  ;;  %v7142_v25 = vld [vmem:[%s9243_s3 + $0x200] sm:$0xff]  ;;  %v7857_v42 = vld [vmem:[%s7461_s20 + $0x3c] sm:$0x1] }
  0x4b   : > { %960 = vmatmul.bf16.vlgmr.msrb.gmra.mxu3 %v5586_v58  ;;  %v1071_v58 = vshll.u32 %v7795_v46, 16 }
  0x4c   : > { %1753 = vmatpush.bf16.msra.mxu3 %v7141_v39  ;;  %666 = vmatmul.bf16.gmra.mxu1 %v5466_v60  ;;  %v5589_v39 = vld [vmem:[%s7461_s20 + $0x18] sm:$0xf]  ;;  %v764_v56 = vpack.c.b16 %v760_v37, %v759_v36  ;;  %v1143_v60 = vpack.c.b16 %v1137_v45, %v1136_v43  ;;  %v1069_v6 = vrot.slane %v1068_v57, 4  ;;  %v1092_v36 = vrot.slane %v1090_v23, 4  ;;  %v7860_v43 = vld [vmem:[%s7461_s20 + $0x44] sm:$0x1] }
  0x4d   : > { %1927 = vmatpush.bf16.msra.mxu0 %v7149_v54  ;;  %835 = vmatmul.bf16.gmra.mxu2 %v763_v63  ;;  %v5590_v53 = vor.u32 %v7095_v40, %v5589_v39  ;;  %v5470_v54 = vor.u32 %v7069_v35, %v5469_v34  ;;  %v1082_v63 = vor.u32 %v1081_v48, %v1078_v47  ;;  %v5785_v34 = vld [vmem:[%s7461_s20 + $0x10] sm:$0xf]  ;;  %v7122_v35 = vld [vmem:[%s7461_s20 + $0x14] sm:$0xf0]  ;;  %v1095_v37 = vrot.slane %v1093_v26, 5 }
  0x4e   : > { %1206 = vmatmul.bf16.vlgmr.msrb.gmra.mxu0 %v1142_v1  ;;  %2306 = vmatpush.bf16.msra.mxu2 %v7169_v18  ;;  %v1085_v1 = vshll.u32 %v7801_v50, 16  ;;  %v7166_v18 = vld [vmem:[%s9244_s4 + $0x60] sm:$0xff]  ;;  %v1109_v40 = vrot.slane %v1107_v24, 5  ;;  %v5786_v47 = vor.u32 %v7122_v35, %v5785_v34  ;;  %v5832_v24 = vld [vmem:[%s7461_s20 + $0x14] sm:$0x1] }
  0x4f   : > { %2060 = vmatpush.bf16.msra.mxu1 %v7161_v21  ;;  %v1083_v10 = vrot.slane %v1082_v63, 4  ;;  %v1266_v21 = vsel %vm7527_vm5, %v5704_v12, %v1265_v13  ;;  %v5698_v57 = vld [vmem:[%s7461_s20 + $0x20] sm:$0xe]  ;;  %v5833_v63 = vld [vmem:[%s7461_s20 + $0x18] sm:$0xf] }
  0x50   : > { %1754 = vmatpush.bf16.msra.mxu3 %v7140_v2  ;;  %v5695_v2 = vld [vmem:[%s7461_s20 + $0x8] sm:$0xe]  ;;  %v1087_v11 = vrot.slane %v1085_v1, 5  ;;  %v1309_v31 = vunpack.c.l.b16 %v1266_v21  ;;  %v1269_v1 = vrot.slane %v7739_v55, 5  ;;  %v7189_v55 = vld [vmem:[%s9244_s4 + $0xf8] sm:$0xff]  ;;  %v1575_v12 = vshrl.u32 %v5833_v63, 16 }
  0x51   : > { %1928 = vmatpush.bf16.msra.mxu0 %v7148_v7  ;;  %v1073_v7 = vrot.slane %v1071_v58, 5  ;;  %v5703_v8 = vrot.slane %v5695_v2, 9  ;;  %v5706_v2 = vrot.slane %v5698_v57, 9  ;;  %v1578_v13 = vshll.u32 %v5833_v63, 16  ;;  %v5700_v34 = vld [vmem:[%s7461_s20 + $0x30] sm:$0xe] }
  0x52   : > { %2307 = vmatpush.bf16.msra.mxu2 %v7168_v22  ;;  %v7134_v22 = vld [vmem:[%s9243_s3 + $0x1c0] sm:$0xff] }
  0x53   : > { %2061 = vmatpush.bf16.msra.mxu1 %v7160_v29  ;;  %v1074_v20 = vsel %vm7511_vm4, %v1069_v6, %v1073_v7  ;;  %v1262_v44 = vsel %vm7527_vm5, %v5703_v8, %v1261_v9  ;;  %v1104_v29 = vshrl.u32 %v5645_v62, 16  ;;  %v7157_v6 = vld [vmem:[%s9244_s4 + $0x18] sm:$0xff]  ;;  %v1580_v23 = vrot.slane %v1578_v13, 5  ;;  %v5835_v63 = vld [vmem:[%s7461_s20 + $0x20] sm:$0xf] }
  0x54   : > { %1755 = vmatpush.bf16.msra.mxu3 %v7139_v16  ;;  %v7159_v16 = vld [vmem:[%s9244_s4 + $0x28] sm:$0xff]  ;;  %v1308_v30 = vunpack.c.l.b16 %v1262_v44  ;;  %v1138_v32 = vunpack.c.l.b16 %v1074_v20  ;;  %v1592_v13 = vshll.u32 %v5835_v63, 16 }
  0x55   : > { %1929 = vmatpush.bf16.msra.mxu0 %v7147_v38  ;;  %v1088_v38 = vsel %vm7511_vm4, %v1083_v10, %v1087_v11  ;;  %v1106_v39 = vrot.slane %v1104_v29, 4 }
  0x56   : > { %2308 = vmatpush.bf16.msra.mxu2 %v7167_v15  ;;  %v1316_v45 = vpack.c.b16 %v1309_v31, %v1308_v30  ;;  %v7176_v15 = vld [vmem:[%s9244_s4 + $0xb0] sm:$0xff]  ;;  %v5789_v30 = vld [vmem:[%s7461_s20 + $0x20] sm:$0xf]  ;;  %v7123_v31 = vld [vmem:[%s7461_s20 + $0x24] sm:$0xf0] }
  0x57   : > { %2062 = vmatpush.bf16.msra.mxu1 %v7159_v16  ;;  %v7188_v16 = vld [vmem:[%s9244_s4 + $0xf0] sm:$0xff] }
  0x58   : > { %1756 = vmatpush.bf16.msra.mxu3 %v7138_v27  ;;  %v5593_v27 = vld [vmem:[%s7461_s20 + $0x28] sm:$0xf] }
  0x59   : > { %1930 = vmatpush.bf16.msra.mxu0 %v7146_v33  ;;  %v1139_v33 = vunpack.c.l.b16 %v1088_v38  ;;  %v5594_v41 = vor.u32 %v7096_v28, %v5593_v27  ;;  %v7097_v38 = vld [vmem:[%s7461_s20 + $0x3c] sm:$0xf0] }
  0x5a   : > { %2309 = vmatpush.bf16.msra.mxu2 %v7166_v18  ;;  %v5597_v18 = vld [vmem:[%s7461_s20 + $0x38] sm:$0xf] }
  0x5b   : > { %965 = vmatmul.bf16.gmra.mxu3 %v5590_v53  ;;  %2063 = vmatpush.bf16.msra.mxu1 %v7158_v19  ;;  %v1144_v48 = vpack.c.b16 %v1139_v33, %v1138_v32  ;;  %v1099_v53 = vshll.u32 %v7857_v42, 16  ;;  %v5598_v32 = vor.u32 %v7097_v38, %v5597_v18  ;;  %v5699_v33 = vld [vmem:[%s7461_s20 + $0x28] sm:$0xe] }
  0x5c   : > { %1757 = vmatpush.bf16.msra.mxu3 %v7137_v49  ;;  %671 = vmatmul.bf16.gmra.mxu1 %v5470_v54  ;;  %v5697_v49 = vld [vmem:[%s7461_s20 + $0x18] sm:$0xe]  ;;  %v1110_v54 = vor.u32 %v1109_v40, %v1106_v39 }
  0x5d   : > { %1931 = vmatpush.bf16.msra.mxu0 %v7145_v51  ;;  %840 = vmatmul.bf16.gmra.mxu2 %v764_v56  ;;  %v1096_v51 = vor.u32 %v1095_v37, %v1092_v36  ;;  %v1113_v56 = vshll.u32 %v7860_v43, 16  ;;  %v5705_v58 = vrot.slane %v5697_v49, 9  ;;  %v1101_v8 = vrot.slane %v1099_v53, 5  ;;  %v5895_v53 = vld [vmem:[%s7461_s20 + $0x10] sm:$0xe] }
  0x5e   : > { %1211 = vmatmul.bf16.gmra.mxu0 %v1143_v60  ;;  %v5831_v60 = vld [vmem:[%s7461_s20 + $0x10] sm:$0xf]  ;;  %v1111_v9 = vrot.slane %v1110_v54, 4  ;;  %2310 = vmatpush.bf16.msra.mxu2 %v7165_v4  ;;  %v1570_v36 = vshll.u32 %v5832_v24, 16  ;;  %v5708_v49 = vrot.slane %v5700_v34, 9  ;;  %v5903_v4 = vrot.slane %v5895_v53, 9 }
  0x5f   : > { %v1097_v7 = vrot.slane %v1096_v51, 4  ;;  %v1115_v10 = vrot.slane %v1113_v56, 5  ;;  %v1564_v11 = vshll.u32 %v5831_v60, 16  ;;  %2064 = vmatpush.bf16.msra.mxu1 %v7157_v6  ;;  %v1270_v17 = vsel %vm7527_vm5, %v5705_v58, %v1269_v1  ;;  %v5837_v1 = vld [vmem:[%s7461_s20 + $0x28] sm:$0xf] }
  0x60   : > { %1758 = vmatpush.bf16.msra.mxu3 %v7136_v3  ;;  %v1273_v3 = vrot.slane %v7742_v59, 5  ;;  %v1561_v59 = vshrl.u32 %v5831_v60, 16  ;;  %v1310_v26 = vunpack.c.l.b16 %v1270_v17  ;;  %v1281_v51 = vrot.slane %v7801_v50, 5  ;;  %v5896_v60 = vld [vmem:[%s7461_s20 + $0x18] sm:$0xe]  ;;  %v7175_v50 = vld [vmem:[%s9244_s4 + $0xa8] sm:$0xff] }
  0x61   : > { %1932 = vmatpush.bf16.msra.mxu0 %v7144_v5  ;;  %v7177_v5 = vld [vmem:[%s9244_s4 + $0xb8] sm:$0xff]  ;;  %v1102_v19 = vsel %vm7511_vm4, %v1097_v7, %v1101_v8  ;;  %v1116_v20 = vsel %vm7511_vm4, %v1111_v9, %v1115_v10  ;;  %v1566_v21 = vrot.slane %v1564_v11, 5  ;;  %v1572_v56 = vrot.slane %v1570_v36, 5  ;;  %v7187_v8 = vld [vmem:[%s9244_s4 + $0xe8] sm:$0xff]  ;;  %v7174_v11 = vld [vmem:[%s9244_s4 + $0xa0] sm:$0xff] }
  0x62   : > { %v1274_v62 = vsel %vm7527_vm5, %v5706_v2, %v1273_v3  ;;  %v1563_v44 = vrot.slane %v1561_v59, 4  ;;  %v1140_v27 = vunpack.c.l.b16 %v1102_v19  ;;  %v1141_v28 = vunpack.c.l.b16 %v1116_v20  ;;  %v7155_v3 = vld [vmem:[%s9244_s4 + $0x8] sm:$0xff]  ;;  %v7162_v59 = vld [vmem:[%s9244_s4 + $0x40] sm:$0xff] }
  0x63   : > { %v1311_v29 = vunpack.c.l.b16 %v1274_v62  ;;  %v5904_v6 = vrot.slane %v5896_v60, 9  ;;  %v1282_v9 = vsel %vm7527_vm5, %v5708_v49, %v1281_v51  ;;  %v1289_v49 = vrot.slane %v7860_v43, 5  ;;  %v5898_v51 = vld [vmem:[%s7461_s20 + $0x28] sm:$0xe]  ;;  %v7173_v43 = vld [vmem:[%s9244_s4 + $0x98] sm:$0xff] }
  0x64   : > { %1759 = vmatpush.bf16.msra.mxu3 %v7135_v14  ;;  %v7164_v14 = vld [vmem:[%s9244_s4 + $0x50] sm:$0xff]  ;;  %v1567_v35 = vor.u32 %v1566_v21, %v1563_v44  ;;  %v1313_v19 = vunpack.c.l.b16 %v1282_v9  ;;  %v7953_v44 = vld [vmem:[%s7461_s20 + $0x24] sm:$0x1] }
  0x65   : > { %1933 = vmatpush.bf16.msra.mxu0 %v7143_v61  ;;  %v7156_v61 = vld [vmem:[%s9244_s4 + $0x10] sm:$0xff]  ;;  %2311 = vmatpush.bf16.msra.mxu2 %v7164_v14  ;;  %v1317_v40 = vpack.c.b16 %v1311_v29, %v1310_v26  ;;  %v1603_v14 = vshrl.u32 %v5837_v1, 16  ;;  %v1598_v34 = vshll.u32 %v7953_v44, 16 }
  0x66   : > { %2065 = vmatpush.bf16.msra.mxu1 %v7156_v61  ;;  %v1568_v54 = vrot.slane %v1567_v35, 4  ;;  %v7154_v61 = vld [vmem:[%s9244_s4] sm:$0xff]  ;;  %v5793_v29 = vld [vmem:[%s7461_s20 + $0x30] sm:$0xf] }
  0x67   : > { %v1600_v53 = vrot.slane %v1598_v34, 5 }
  0x68   : > { %1760 = vmatpush.bf16.msra.mxu3 %v7134_v22  ;;  %v1577_v22 = vrot.slane %v1575_v12, 4  ;;  %v1573_v10 = vsel %vm7511_vm4, %v1568_v54, %v1572_v56  ;;  %v1589_v12 = vshrl.u32 %v5835_v63, 16  ;;  %v5839_v56 = vld [vmem:[%s7461_s20 + $0x30] sm:$0xf] }
  0x69   : > { %1934 = vmatpush.bf16.msra.mxu0 %v7142_v25  ;;  %v5834_v25 = vld [vmem:[%s7461_s20 + $0x1c] sm:$0x1]  ;;  %v1689_v20 = vunpack.c.l.b16 %v1573_v10 }
  0x6a   : > { %v1581_v37 = vor.u32 %v1580_v23, %v1577_v22  ;;  %v1584_v39 = vshll.u32 %v5834_v25, 16  ;;  %v1820_v7 = vrot.slane %v5834_v25, 5  ;;  %2066 = vmatpush.bf16.msra.mxu1 %v7155_v3  ;;  %v1591_v21 = vrot.slane %v1589_v12, 4  ;;  %v7205_v3 = vld [vmem:[%s9244_s4 + $0x178] sm:$0xff] }
  0x6b   : > { %970 = vmatmul.bf16.gmra.mxu3 %v5594_v41  ;;  %v5790_v41 = vor.u32 %v7123_v31, %v5789_v30  ;;  %v1594_v22 = vrot.slane %v1592_v13, 5  ;;  %v1605_v23 = vrot.slane %v1603_v14, 4  ;;  %v7185_v12 = vld [vmem:[%s9244_s4 + $0xd8] sm:$0xff] }
  0x6c   : > { %1380 = vmatmul.bf16.vlgmr.msrb.gmra.mxu1 %v1316_v45  ;;  %2480 = vmatpush.bf16.msrb.mxu3 %v7177_v5  ;;  %v1145_v45 = vpack.c.b16 %v1141_v28, %v1140_v27  ;;  %v1582_v57 = vrot.slane %v1581_v37, 4  ;;  %v1586_v58 = vrot.slane %v1584_v39, 5  ;;  %v1816_v5 = vrot.slane %v5832_v24, 5  ;;  %v7124_v24 = vld [vmem:[%s7461_s20 + $0x34] sm:$0xf0] }
  0x6d   : > { %1515 = vmatmul.bf16.vlgmr.msrb.gmra.mxu2 %v5786_v47  ;;  %2615 = vmatpush.bf16.msrb.mxu0 %v7189_v55  ;;  %v5707_v47 = vrot.slane %v5699_v33, 9  ;;  %v1821_v62 = vsel %vm7527_vm5, %v5904_v6, %v1820_v7  ;;  %v5838_v28 = vld [vmem:[%s7461_s20 + $0x2c] sm:$0x1]  ;;  %v5702_v33 = vld [vmem:[%s7461_s20 + $0x40] sm:$0xe]  ;;  %v5794_v35 = vor.u32 %v7124_v24, %v5793_v29  ;;  %v1595_v36 = vor.u32 %v1594_v22, %v1591_v21  ;;  %v7197_v13 = vld [vmem:[%s9244_s4 + $0x138] sm:$0xff] }
  0x6e   : > { %1216 = vmatmul.bf16.gmra.mxu0 %v1144_v48  ;;  %v1277_v48 = vrot.slane %v7795_v46, 5  ;;  %v7163_v46 = vld [vmem:[%s9244_s4 + $0x48] sm:$0xff]  ;;  %v1587_v55 = vsel %vm7511_vm4, %v1582_v57, %v1586_v58  ;;  %v1817_v17 = vsel %vm7527_vm5, %v5903_v4, %v1816_v5  ;;  %2067 = vmatpush.bf16.msra.mxu1 %v7154_v61  ;;  %v1864_v27 = vunpack.c.l.b16 %v1821_v62  ;;  %v5841_v57 = vld [vmem:[%s7461_s20 + $0x38] sm:$0xf]  ;;  %v8007_v22 = vld [vmem:[%s7461_s20 + $0x34] sm:$0x1] }
  0x6f   : > { %2312 = vmatpush.bf16.msra.mxu2 %v7163_v46  ;;  %v1690_v38 = vunpack.c.l.b16 %v1587_v55  ;;  %v1863_v25 = vunpack.c.l.b16 %v1817_v17  ;;  %v1612_v39 = vshll.u32 %v5838_v28, 16  ;;  %v1596_v58 = vrot.slane %v1595_v36, 4 }
  0x70   : > { %2481 = vmatpush.bf16.msrb.mxu3 %v7176_v15  ;;  %v1278_v2 = vsel %vm7527_vm5, %v5707_v47, %v1277_v48  ;;  %v1606_v15 = vshll.u32 %v5837_v1, 16  ;;  %v1285_v47 = vrot.slane %v7857_v42, 5  ;;  %v5710_v48 = vrot.slane %v5702_v33, 9 }
  0x71   : > { %2616 = vmatpush.bf16.msrb.mxu0 %v7188_v16  ;;  %v7186_v16 = vld [vmem:[%s9244_s4 + $0xe0] sm:$0xff]  ;;  %v1312_v18 = vunpack.c.l.b16 %v1278_v2  ;;  %v1697_v31 = vpack.c.b16 %v1690_v38, %v1689_v20  ;;  %v1614_v63 = vrot.slane %v1612_v39, 5  ;;  %v1824_v1 = vrot.slane %v7953_v44, 5  ;;  %v7172_v20 = vld [vmem:[%s9244_s4 + $0x90] sm:$0xff] }
  0x72   : > { %v1608_v26 = vrot.slane %v1606_v15, 5  ;;  %v2097_v2 = vld [vmem:[%s7966_s9] sm:$0xf]  ;;  %v5906_v42 = vrot.slane %v5898_v51, 9  ;;  %v1828_v46 = vrot.slane %v5838_v28, 5  ;;  %v1617_v4 = vshrl.u32 %v5839_v56, 16  ;;  %2861 = vmatpush.bf16.msrb.mxu1 %v7197_v13 }
  0x73   : > { %2313 = vmatpush.bf16.msra.mxu2 %v7162_v59  ;;  %v1318_v30 = vpack.c.b16 %v1313_v19, %v1312_v18  ;;  %v1620_v5 = vshll.u32 %v5839_v56, 16  ;;  %v1631_v6 = vshrl.u32 %v5841_v57, 16  ;;  %v1634_v7 = vshll.u32 %v5841_v57, 16  ;;  %v7204_v38 = vld [vmem:[%s9244_s4 + $0x170] sm:$0xff]  ;;  %v2103_v13 = vld [vmem:[%s7966_s9 + $0x18] sm:$0xf] }
  0x74   : > { %2482 = vmatpush.bf16.msrb.mxu3 %v7175_v50  ;;  %v1609_v37 = vor.u32 %v1608_v26, %v1605_v23  ;;  %v2099_v50 = vld [vmem:[%s7966_s9 + $0x8] sm:$0xf]  ;;  %v2117_v9 = vshll.u32 %v2097_v2, 16  ;;  %v1601_v10 = vsel %vm7511_vm4, %v1596_v58, %v1600_v53  ;;  %v1290_v15 = vsel %vm7527_vm5, %v5710_v48, %v1289_v49  ;;  %v8010_v23 = vld [vmem:[%s7461_s20 + $0x3c] sm:$0x1]  ;;  %v7196_v56 = vld [vmem:[%s9244_s4 + $0x130] sm:$0xff] }
  0x75   : > { %2617 = vmatpush.bf16.msrb.mxu0 %v7187_v8  ;;  %v2114_v8 = vshrl.u32 %v2097_v2, 16  ;;  %v2128_v59 = vshrl.u32 %v2099_v50, 16  ;;  %v1619_v17 = vrot.slane %v1617_v4, 4  ;;  %v1622_v62 = vrot.slane %v1620_v5, 5  ;;  %v5899_v2 = vld [vmem:[%s7461_s20 + $0x30] sm:$0xe] }
  0x76   : > { %v1610_v60 = vrot.slane %v1609_v37, 4  ;;  %v1633_v18 = vrot.slane %v1631_v6, 4  ;;  %v1636_v19 = vrot.slane %v1634_v7, 5  ;;  %v1691_v44 = vunpack.c.l.b16 %v1601_v10  ;;  %2862 = vmatpush.bf16.msrb.mxu1 %v7196_v56  ;;  %v5843_v4 = vld [vmem:[%s7461_s20 + $0x40] sm:$0xf]  ;;  %v7203_v10 = vld [vmem:[%s9244_s4 + $0x168] sm:$0xff] }
  0x77   : > { %3035 = vmatpush.bf16.msrb.mxu2 %v7205_v3  ;;  %v2116_v26 = vrot.slane %v2114_v8, 4  ;;  %v2119_v29 = vrot.slane %v2117_v9, 5  ;;  %v2130_v28 = vrot.slane %v2128_v59, 4  ;;  %v1623_v36 = vor.u32 %v1622_v62, %v1619_v17  ;;  %v5845_v5 = vld [vmem:[%s7461_s20 + $0x48] sm:$0xf] }
  0x78   : > { %2483 = vmatpush.bf16.msrb.mxu3 %v7174_v11  ;;  %v1615_v55 = vsel %vm7511_vm4, %v1610_v60, %v1614_v63  ;;  %v2131_v11 = vshll.u32 %v2099_v50, 16  ;;  %v1626_v37 = vshll.u32 %v8007_v22, 16  ;;  %v1637_v39 = vor.u32 %v1636_v19, %v1633_v18  ;;  %v2101_v8 = vld [vmem:[%s7966_s9 + $0x10] sm:$0xf]  ;;  %v7171_v9 = vld [vmem:[%s9244_s4 + $0x88] sm:$0xff] }
  0x79   : > { %2618 = vmatpush.bf16.msrb.mxu0 %v7186_v16  ;;  %v1829_v16 = vsel %vm7527_vm5, %v5906_v42, %v1828_v46  ;;  %v1692_v21 = vunpack.c.l.b16 %v1615_v55  ;;  %v1624_v58 = vrot.slane %v1623_v36, 4  ;;  %v5900_v42 = vld [vmem:[%s7461_s20 + $0x38] sm:$0xe]  ;;  %v5907_v6 = vrot.slane %v5899_v2, 9  ;;  %v8071_v36 = vld [vmem:[%s7461_s20 + $0x44] sm:$0x1] }
  0x7a   : > { %v1866_v34 = vunpack.c.l.b16 %v1829_v16  ;;  %v1628_v60 = vrot.slane %v1626_v37, 5  ;;  %v1638_v63 = vrot.slane %v1637_v39, 4  ;;  %v1832_v7 = vrot.slane %v8007_v22, 5  ;;  %v8080_v56 = vld [vmem:[%s7966_s9 + $0x1c] sm:$0x1] }
  0x7b   : > { %975 = vmatmul.bf16.gmra.mxu3 %v5598_v32  ;;  %v5701_v32 = vld [vmem:[%s7461_s20 + $0x38] sm:$0xe]  ;;  %3036 = vmatpush.bf16.msrb.mxu2 %v7204_v38  ;;  %v1659_v16 = vshrl.u32 %v5845_v5, 16  ;;  %v1662_v62 = vshll.u32 %v5845_v5, 16  ;;  %v2142_v18 = vshrl.u32 %v2101_v8, 16  ;;  %v2145_v19 = vshll.u32 %v2101_v8, 16 }
  0x7c   : > { %1385 = vmatmul.bf16.gmra.mxu1 %v1317_v40  ;;  %v5897_v40 = vld [vmem:[%s7461_s20 + $0x20] sm:$0xe]  ;;  %2484 = vmatpush.bf16.msrb.mxu3 %v7173_v43  ;;  %v1629_v55 = vsel %vm7511_vm4, %v1624_v58, %v1628_v60  ;;  %v7195_v38 = vld [vmem:[%s9244_s4 + $0x128] sm:$0xff] }
  0x7d   : > { %1520 = vmatmul.bf16.gmra.mxu2 %v5790_v41  ;;  %v1871_v41 = vpack.c.b16 %v1864_v27, %v1863_v25  ;;  %v5905_v54 = vrot.slane %v5897_v40, 9  ;;  %2619 = vmatpush.bf16.msrb.mxu0 %v7185_v12  ;;  %v1315_v25 = vunpack.c.l.b16 %v1290_v15  ;;  %v8013_v27 = vld [vmem:[%s7966_s9 + $0x4] sm:$0x1]  ;;  %v1640_v40 = vshll.u32 %v8010_v23, 16 }
  0x7e   : > { %1221 = vmatmul.bf16.gmra.mxu0 %v1145_v45  ;;  %v5709_v45 = vrot.slane %v5701_v32, 9  ;;  %v7125_v32 = vld [vmem:[%s7461_s20 + $0x44] sm:$0xf0]  ;;  %v1836_v12 = vrot.slane %v8010_v23, 5  ;;  %v1645_v15 = vshrl.u32 %v5843_v4, 16  ;;  %v1693_v22 = vunpack.c.l.b16 %v1629_v55  ;;  %2863 = vmatpush.bf16.msrb.mxu1 %v7195_v38 }
  0x7f   : > { %v1825_v61 = vsel %vm7527_vm5, %v5905_v54, %v1824_v1  ;;  %v7184_v54 = vld [vmem:[%s9244_s4 + $0xd0] sm:$0xff]  ;;  %v1642_v1 = vrot.slane %v1640_v40, 5  ;;  %3037 = vmatpush.bf16.msrb.mxu2 %v7203_v10  ;;  %v1661_v37 = vrot.slane %v1659_v16, 4  ;;  %v1664_v39 = vrot.slane %v1662_v62, 5  ;;  %v5901_v55 = vld [vmem:[%s7461_s20 + $0x40] sm:$0xe] }
  0x80   : > { %v1286_v14 = vsel %vm7527_vm5, %v5709_v45, %v1285_v47  ;;  %2485 = vmatpush.bf16.msrb.mxu3 %v7172_v20  ;;  %v1865_v33 = vunpack.c.l.b16 %v1825_v61  ;;  %v2120_v45 = vor.u32 %v2119_v29, %v2116_v26  ;;  %v2123_v47 = vshll.u32 %v8013_v27, 16  ;;  %v7183_v20 = vld [vmem:[%s9244_s4 + $0xc8] sm:$0xff]  ;;  %v2105_v16 = vld [vmem:[%s7966_s9 + $0x20] sm:$0xf]  ;;  %v7217_v62 = vld [vmem:[%s9244_s4 + $0x1b8] sm:$0xff] }
  0x81   : > { %v1314_v24 = vunpack.c.l.b16 %v1286_v14  ;;  %2620 = vmatpush.bf16.msrb.mxu0 %v7184_v54  ;;  %v1643_v59 = vsel %vm7511_vm4, %v1638_v63, %v1642_v1  ;;  %v1648_v61 = vshll.u32 %v5843_v4, 16  ;;  %v1833_v26 = vsel %vm7527_vm5, %v5907_v6, %v1832_v7 }
  0x82   : > { %v1872_v57 = vpack.c.b16 %v1866_v34, %v1865_v33  ;;  %v2121_v46 = vrot.slane %v2120_v45, 4  ;;  %v2125_v50 = vrot.slane %v2123_v47, 5  ;;  %v1694_v23 = vunpack.c.l.b16 %v1643_v59  ;;  %v5902_v59 = vld [vmem:[%s7461_s20 + $0x48] sm:$0xe] }
  0x83   : > { %v1319_v48 = vpack.c.b16 %v1315_v25, %v1314_v24  ;;  %v7170_v24 = vld [vmem:[%s9244_s4 + $0x80] sm:$0xff]  ;;  %v1647_v33 = vrot.slane %v1645_v15, 4  ;;  %v1650_v34 = vrot.slane %v1648_v61, 5  ;;  %v2144_v40 = vrot.slane %v2142_v18, 4 }
  0x84   : > { %v2126_v14 = vsel %vm7511_vm4, %v2121_v46, %v2125_v50  ;;  %2486 = vmatpush.bf16.msrb.mxu3 %v7171_v9  ;;  %v7202_v25 = vld [vmem:[%s9244_s4 + $0x160] sm:$0xff]  ;;  %v1867_v45 = vunpack.c.l.b16 %v1833_v26  ;;  %v1654_v63 = vshll.u32 %v8071_v36, 16  ;;  %v1665_v2 = vor.u32 %v1664_v39, %v1661_v37 }
  0x85   : > { %2621 = vmatpush.bf16.msrb.mxu0 %v7183_v20  ;;  %3038 = vmatpush.bf16.msrb.mxu2 %v7202_v25  ;;  %v1651_v60 = vor.u32 %v1650_v34, %v1647_v33  ;;  %v2165_v7 = vshll.u32 %v8080_v56, 16  ;;  %v1840_v20 = vrot.slane %v8071_v36, 5  ;;  %v5910_v38 = vrot.slane %v5902_v59, 9  ;;  %v2343_v59 = vld [vmem:[%s7966_s9] sm:$0xe] }
  0x86   : > { %v1656_v10 = vrot.slane %v1654_v63, 5  ;;  %v2170_v25 = vshrl.u32 %v2105_v16, 16 }
  0x87   : > { %v1652_v9 = vrot.slane %v1651_v60, 4  ;;  %v2167_v61 = vrot.slane %v2165_v7, 5 }
  0x88   : > { %2487 = vmatpush.bf16.msrb.mxu3 %v7170_v24  ;;  %v2172_v60 = vrot.slane %v2170_v25, 4  ;;  %v7215_v25 = vld [vmem:[%s9244_s4 + $0x1a8] sm:$0xff] }
  0x8b   : > { %1761 = vmatmul.bf16.vlgmr.msra.gmra.mxu3 %v1697_v31  ;;  %v5797_v31 = vld [vmem:[%s7461_s20 + $0x40] sm:$0xf] }
  0x8c   : > { %1390 = vmatmul.bf16.gmra.mxu1 %v1318_v30  ;;  %v2133_v30 = vrot.slane %v2131_v11, 5  ;;  %v5798_v49 = vor.u32 %v7125_v32, %v5797_v31  ;;  %v5908_v11 = vrot.slane %v5900_v42, 9  ;;  %v2242_v31 = vunpack.c.l.b16 %v2126_v14  ;;  %3170 = vmatpush.bf16.msra.mxu3 %v7217_v62 }
  0x8d   : > { %1525 = vmatmul.bf16.gmra.mxu2 %v5794_v35  ;;  %v8018_v35 = vld [vmem:[%s7966_s9 + $0xc] sm:$0x1]  ;;  %v6055_v62 = vrot.slane %v2343_v59, 9 }
  0x8e   : > { %1935 = vmatmul.bf16.vlgmr.msra.gmra.mxu0 %v1871_v41  ;;  %v1698_v41 = vpack.c.b16 %v1692_v21, %v1691_v44  ;;  %v2134_v51 = vor.u32 %v2133_v30, %v2130_v28  ;;  %v2137_v53 = vshll.u32 %v8018_v35, 16  ;;  %v2156_v44 = vshrl.u32 %v2103_v13, 16  ;;  %v5961_v28 = vld [vmem:[%s7966_s9] sm:$0xf]  ;;  %v7150_v30 = vld [vmem:[%s7966_s9 + $0x4] sm:$0xf0] }
  0x8f   : > { %v2159_v21 = vshll.u32 %v2103_v13, 16  ;;  %v1837_v29 = vsel %vm7527_vm5, %v5908_v11, %v1836_v12  ;;  %v5962_v54 = vor.u32 %v7150_v30, %v5961_v28  ;;  %v1666_v11 = vrot.slane %v1665_v2, 4  ;;  %v7193_v30 = vld [vmem:[%s9244_s4 + $0x118] sm:$0xff] }
  0x90   : > { %v2135_v43 = vrot.slane %v2134_v51, 4  ;;  %v2139_v3 = vrot.slane %v2137_v53, 5  ;;  %v1868_v47 = vunpack.c.l.b16 %v1837_v29  ;;  %v2158_v51 = vrot.slane %v2156_v44, 4 }
  0x91   : > { %v2161_v53 = vrot.slane %v2159_v21, 5  ;;  %v2107_v21 = vld [vmem:[%s7966_s9 + $0x28] sm:$0xf]  ;;  %v2173_v28 = vshll.u32 %v2105_v16, 16 }
  0x92   : > { %v2140_v17 = vsel %vm7511_vm4, %v2135_v43, %v2139_v3  ;;  %v7182_v43 = vld [vmem:[%s9244_s4 + $0xc0] sm:$0xff]  ;;  %v1873_v5 = vpack.c.b16 %v1868_v47, %v1867_v45  ;;  %v2184_v36 = vshrl.u32 %v2107_v21, 16  ;;  %v2187_v37 = vshll.u32 %v2107_v21, 16  ;;  %v7200_v45 = vld [vmem:[%s9244_s4 + $0x150] sm:$0xff]  ;;  %v2344_v16 = vld [vmem:[%s7966_s9 + $0x8] sm:$0xe] }
  0x93   : > { %v2243_v32 = vunpack.c.l.b16 %v2140_v17  ;;  %v7194_v3 = vld [vmem:[%s9244_s4 + $0x120] sm:$0xff]  ;;  %v2162_v6 = vor.u32 %v2161_v53, %v2158_v51  ;;  %2622 = vmatpush.bf16.msrb.mxu0 %v7182_v43  ;;  %v7201_v17 = vld [vmem:[%s9244_s4 + $0x158] sm:$0xff]  ;;  %v7216_v47 = vld [vmem:[%s9244_s4 + $0x1b0] sm:$0xff]  ;;  %v2175_v63 = vrot.slane %v2173_v28, 5  ;;  %v2373_v21 = vrot.slane %v8018_v35, 5 }
  0x94   : > { %2864 = vmatpush.bf16.msrb.mxu1 %v7194_v3  ;;  %3039 = vmatpush.bf16.msrb.mxu2 %v7201_v17  ;;  %v5965_v53 = vld [vmem:[%s7966_s9 + $0x10] sm:$0xf]  ;;  %v8140_v3 = vld [vmem:[%s7966_s9 + $0x2c] sm:$0x1]  ;;  %v2111_v28 = vld [vmem:[%s7966_s9 + $0x38] sm:$0xf] }
  0x95   : > { %v2250_v58 = vpack.c.b16 %v2243_v32, %v2242_v31  ;;  %v2163_v15 = vrot.slane %v2162_v6, 4  ;;  %v7225_v31 = vld [vmem:[%s9244_s4 + $0x1f8] sm:$0xff]  ;;  %3171 = vmatpush.bf16.msra.mxu3 %v7216_v47  ;;  %v2212_v47 = vshrl.u32 %v2111_v28, 16 }
  0x97   : > { %v2168_v34 = vsel %vm7511_vm4, %v2163_v15, %v2167_v61  ;;  %3416 = vmatpush.bf16.msra.mxu0 %v7225_v31  ;;  %v2193_v61 = vshll.u32 %v8140_v3, 16 }
  0x98   : > { %2865 = vmatpush.bf16.msrb.mxu1 %v7193_v30  ;;  %3040 = vmatpush.bf16.msrb.mxu2 %v7200_v45 }
  0x99   : > { %3172 = vmatpush.bf16.msra.mxu3 %v7215_v25 }
  0x9b   : > { %1766 = vmatmul.bf16.gmra.mxu3 %v1698_v41  ;;  %v2147_v41 = vrot.slane %v2145_v19, 5  ;;  %v5909_v19 = vrot.slane %v5901_v55, 9 }
  0x9c   : > { %1395 = vmatmul.bf16.gmra.mxu1 %v1319_v48  ;;  %v8074_v48 = vld [vmem:[%s7461_s20 + $0x4c] sm:$0x1] }
  0x9d   : > { %1530 = vmatmul.bf16.gmra.mxu2 %v5798_v49  ;;  %v8077_v49 = vld [vmem:[%s7966_s9 + $0x14] sm:$0x1]  ;;  %v1668_v42 = vshll.u32 %v8074_v48, 16  ;;  %v2148_v46 = vor.u32 %v2147_v41, %v2144_v40  ;;  %v1844_v44 = vrot.slane %v8074_v48, 5  ;;  %v1841_v40 = vsel %vm7527_vm5, %v5909_v19, %v1840_v20 }
  0x9e   : > { %1940 = vmatmul.bf16.gmra.mxu0 %v1872_v57  ;;  %v1699_v57 = vpack.c.b16 %v1694_v23, %v1693_v22  ;;  %v2151_v50 = vshll.u32 %v8077_v49, 16  ;;  %v1657_v23 = vsel %vm7511_vm4, %v1652_v9, %v1656_v10  ;;  %v2176_v10 = vor.u32 %v2175_v63, %v2172_v60  ;;  %v5969_v60 = vld [vmem:[%s7966_s9 + $0x20] sm:$0xf]  ;;  %v7152_v63 = vld [vmem:[%s7966_s9 + $0x24] sm:$0xf0] }
  0x9f   : > { %v1670_v12 = vrot.slane %v1668_v42, 5  ;;  %v2149_v13 = vrot.slane %v2148_v46, 4  ;;  %v1845_v41 = vsel %vm7527_vm5, %v5910_v38, %v1844_v44  ;;  %v1695_v48 = vunpack.c.l.b16 %v1657_v23  ;;  %v8135_v42 = vld [vmem:[%s7966_s9 + $0x24] sm:$0x1] }
  0xa0   : > { %v2153_v14 = vrot.slane %v2151_v50, 5  ;;  %v1870_v2 = vunpack.c.l.b16 %v1845_v41  ;;  %v2186_v46 = vrot.slane %v2184_v36, 4  ;;  %v2189_v50 = vrot.slane %v2187_v37, 5  ;;  %v7191_v37 = vld [vmem:[%s9244_s4 + $0x108] sm:$0xff] }
  0xa1   : > { %v1671_v24 = vsel %vm7511_vm4, %v1666_v11, %v1670_v12  ;;  %v2179_v55 = vshll.u32 %v8135_v42, 16  ;;  %v7192_v11 = vld [vmem:[%s9244_s4 + $0x110] sm:$0xff]  ;;  %v2369_v19 = vrot.slane %v8013_v27, 5  ;;  %v2177_v20 = vrot.slane %v2176_v10, 4 }
  0xa2   : > { %v2154_v33 = vsel %vm7511_vm4, %v2149_v13, %v2153_v14  ;;  %v1696_v51 = vunpack.c.l.b16 %v1671_v24  ;;  %v7224_v12 = vld [vmem:[%s9244_s4 + $0x1f0] sm:$0xff]  ;;  %v2190_v15 = vor.u32 %v2189_v50, %v2186_v46  ;;  %2866 = vmatpush.bf16.msrb.mxu1 %v7192_v11  ;;  %v6056_v44 = vrot.slane %v2344_v16, 9  ;;  %v7199_v24 = vld [vmem:[%s9244_s4 + $0x148] sm:$0xff] }
  0xa3   : > { %3417 = vmatpush.bf16.msra.mxu0 %v7224_v12  ;;  %v2181_v38 = vrot.slane %v2179_v55, 5  ;;  %v2195_v23 = vrot.slane %v2193_v61, 5  ;;  %v2370_v31 = vsel %vm7527_vm5, %v6055_v62, %v2369_v19  ;;  %3041 = vmatpush.bf16.msrb.mxu2 %v7199_v24  ;;  %v7178_v10 = vld [vmem:[%s7966_s9 + $0xc] sm:$0xf0]  ;;  %v8198_v55 = vld [vmem:[%s7966_s9 + $0x3c] sm:$0x1]  ;;  %v5970_v11 = vor.u32 %v7152_v63, %v5969_v60 }
  0xa4   : > { %v2345_v16 = vld [vmem:[%s7966_s9 + $0x10] sm:$0xe]  ;;  %v7222_v62 = vld [vmem:[%s9244_s4 + $0x1e0] sm:$0xff]  ;;  %v2377_v24 = vrot.slane %v8077_v49, 5  ;;  %v7245_v49 = vld [vmem:[%s9245_s5 + $0x38] sm:$0xff] }
  0xa5   : > { %v2182_v41 = vsel %vm7511_vm4, %v2177_v20, %v2181_v38 }
  0xa6   : > { %2867 = vmatpush.bf16.msrb.mxu1 %v7191_v37 }
  0xa8   : > { %v556_v1 = vpop.f32.mrf.mxu0 }
  0xa9   : > { %v657_v4 = vpop.f32.mrf.mxu1 }
  0xaa   : > { %v658_v8 = vadd.f32 %v657_v4, %v556_v1  ;;  %v1869_v1 = vunpack.c.l.b16 %v1841_v40 }
  0xab   : > { %1771 = vmatmul.bf16.gmra.mxu3 %v1699_v57  ;;  %v2244_v57 = vunpack.c.l.b16 %v2154_v33  ;;  %v2374_v33 = vsel %vm7527_vm5, %v6056_v44, %v2373_v21  ;;  %v2221_v44 = vshll.u32 %v8198_v55, 16  ;;  %v2346_v21 = vld [vmem:[%s7966_s9 + $0x18] sm:$0xe] }
  0xac   : > { %2068 = vmatmul.bf16.vlgmr.msra.gmra.mxu1 %v5962_v54  ;;  %v7151_v54 = vld [vmem:[%s7966_s9 + $0x14] sm:$0xf0]  ;;  %v1874_v14 = vpack.c.b16 %v1870_v2, %v1869_v1  ;;  %v2246_v1 = vunpack.c.l.b16 %v2182_v41 }
  0xad   : > { %2314 = vmatmul.bf16.vlgmr.msra.gmra.mxu2 %v2250_v58  ;;  %v2245_v58 = vunpack.c.l.b16 %v2168_v34  ;;  %v5966_v6 = vor.u32 %v7151_v54, %v5965_v53  ;;  %v7198_v53 = vld [vmem:[%s9244_s4 + $0x140] sm:$0xff] }
  0xae   : > { %1945 = vmatmul.bf16.gmra.mxu0 %v1873_v5  ;;  %v8101_v18 = vpop.f32.mrf.mxu3  ;;  %v1700_v5 = vpack.c.b16 %v1696_v51, %v1695_v48  ;;  %v2215_v48 = vshll.u32 %v2111_v28, 16  ;;  %v7214_v54 = vld [vmem:[%s9244_s4 + $0x1a0] sm:$0xff]  ;;  %3042 = vmatpush.bf16.msrb.mxu2 %v7198_v53 }
  0xaf   : > { %v2251_v9 = vpack.c.b16 %v2245_v58, %v2244_v57  ;;  %v2416_v57 = vunpack.c.l.b16 %v2370_v31  ;;  %v2417_v58 = vunpack.c.l.b16 %v2374_v33  ;;  %3173 = vmatpush.bf16.msra.mxu3 %v7214_v54  ;;  %v2381_v31 = vrot.slane %v8080_v56, 5  ;;  %v7233_v54 = vld [vmem:[%s9244_s4 + $0x238] sm:$0xff] }
  0xb0   : > { %v826_v22 = vpop.f32.mrf.mxu2  ;;  %v558_v29 = vpop.f32.mrf.mxu0 }
  0xb1   : > { %v8108_v26 = vadd.f32 %v826_v22, %v658_v8  ;;  %v659_v32 = vpop.f32.mrf.mxu1  ;;  %v2191_v22 = vrot.slane %v2190_v15, 4  ;;  %v2424_v12 = vpack.c.b16 %v2417_v58, %v2416_v57 }
  0xb2   : > { %v660_v39 = vadd.f32 %v659_v32, %v558_v29  ;;  %v2109_v29 = vld [vmem:[%s7966_s9 + $0x30] sm:$0xf]  ;;  %3723 = vmatpush.bf16.msra.mxu2 %v7245_v49 }
  0xb3   : > { %v2198_v34 = vshrl.u32 %v2109_v29, 16  ;;  %v2201_v36 = vshll.u32 %v2109_v29, 16  ;;  %v2196_v45 = vsel %vm7511_vm4, %v2191_v22, %v2195_v23  ;;  %v6057_v29 = vrot.slane %v2345_v16, 9  ;;  %v8255_v16 = vld [vmem:[%s7966_s9 + $0x14] sm:$0x1] }
  0xb4   : > { %v2247_v2 = vunpack.c.l.b16 %v2196_v45 }
  0xb5   : > { %v2200_v46 = vrot.slane %v2198_v34, 4  ;;  %v2203_v50 = vrot.slane %v2201_v36, 5  ;;  %v2223_v34 = vrot.slane %v2221_v44, 5  ;;  %v7213_v36 = vld [vmem:[%s9244_s4 + $0x198] sm:$0xff]  ;;  %v2378_v56 = vsel %vm7527_vm5, %v6057_v29, %v2377_v24 }
  0xb6   : > { %v8137_v43 = vpop.f32.mrf.mxu3  ;;  %3174 = vmatpush.bf16.msra.mxu3 %v7213_v36 }
  0xb7   : > { %v2204_v15 = vor.u32 %v2203_v50, %v2200_v46  ;;  %v7212_v46 = vld [vmem:[%s9244_s4 + $0x190] sm:$0xff] }
  0xb8   : > { %v828_v4 = vpop.f32.mrf.mxu2  ;;  %v561_v8 = vpop.f32.mrf.mxu0  ;;  %v7244_v50 = vld [vmem:[%s9245_s5 + $0x30] sm:$0xff] }
  0xb9   : > { %v8142_v7 = vadd.f32 %v828_v4, %v660_v39  ;;  %v662_v13 = vpop.f32.mrf.mxu1  ;;  %v7223_v39 = vld [vmem:[%s9244_s4 + $0x1e8] sm:$0xff]  ;;  %v8191_v4 = vld [vmem:[%s7966_s9 + $0x34] sm:$0x1]  ;;  %v2205_v25 = vrot.slane %v2204_v15, 4  ;;  %3724 = vmatpush.bf16.msra.mxu2 %v7244_v50 }
  0xba   : > { %v663_v17 = vadd.f32 %v662_v13, %v561_v8  ;;  %3418 = vmatpush.bf16.msra.mxu0 %v7223_v39  ;;  %v2207_v61 = vshll.u32 %v8191_v4, 16  ;;  %3175 = vmatpush.bf16.msra.mxu3 %v7212_v46  ;;  %v7243_v46 = vld [vmem:[%s9245_s5 + $0x28] sm:$0xff] }
  0xbb   : > { %1776 = vmatmul.bf16.gmra.mxu3 %v1700_v5  ;;  %v2214_v5 = vrot.slane %v2212_v47, 4 }
  0xbc   : > { %2073 = vmatmul.bf16.gmra.mxu1 %v5966_v6  ;;  %v2217_v6 = vrot.slane %v2215_v48, 5  ;;  %v2209_v28 = vrot.slane %v2207_v61, 5 }
  0xbd   : > { %2319 = vmatmul.bf16.gmra.mxu2 %v2251_v9  ;;  %v6137_v9 = vld [vmem:[%s7966_s9 + $0x8] sm:$0xf] }
  0xbe   : > { %1950 = vmatmul.bf16.gmra.mxu0 %v1874_v14  ;;  %v8163_v27 = vpop.f32.mrf.mxu3  ;;  %v2252_v14 = vpack.c.b16 %v2247_v2, %v2246_v1  ;;  %v6138_v20 = vor.u32 %v7178_v10, %v6137_v9  ;;  %v2218_v38 = vor.u32 %v2217_v6, %v2214_v5  ;;  %v2210_v58 = vsel %vm7511_vm4, %v2205_v25, %v2209_v28  ;;  %v5973_v5 = vld [vmem:[%s7966_s9 + $0x30] sm:$0xf]  ;;  %v7153_v6 = vld [vmem:[%s7966_s9 + $0x34] sm:$0xf0]  ;;  %v2348_v28 = vld [vmem:[%s7966_s9 + $0x28] sm:$0xe] }
  0xbf   : > { %3419 = vmatpush.bf16.msra.mxu0 %v7222_v62  ;;  %v2418_v9 = vunpack.c.l.b16 %v2378_v56  ;;  %v5974_v62 = vor.u32 %v7153_v6, %v5973_v5  ;;  %v6248_v56 = vld [vmem:[%s7966_s9 + $0x10] sm:$0xe]  ;;  %3725 = vmatpush.bf16.msra.mxu2 %v7243_v46 }
  0xc0   : > { %v831_v30 = vpop.f32.mrf.mxu2  ;;  %v563_v32 = vpop.f32.mrf.mxu0  ;;  %v2219_v33 = vrot.slane %v2218_v38, 4 }
  0xc1   : > { %v8168_v35 = vadd.f32 %v831_v30, %v663_v17  ;;  %v664_v40 = vpop.f32.mrf.mxu1  ;;  %v7190_v17 = vld [vmem:[%s9244_s4 + $0x100] sm:$0xff]  ;;  %v6058_v30 = vrot.slane %v2346_v21, 9 }
  0xc2   : > { %v665_v51 = vadd.f32 %v664_v40, %v563_v32  ;;  %2868 = vmatpush.bf16.msrb.mxu1 %v7190_v17  ;;  %v6183_v32 = vld [vmem:[%s7966_s9 + $0x8] sm:$0xf]  ;;  %v2224_v60 = vsel %vm7511_vm4, %v2219_v33, %v2223_v34 }
  0xc3   : > { %v2669_v41 = vshrl.u32 %v6183_v32, 16  ;;  %v2672_v45 = vshll.u32 %v6183_v32, 16  ;;  %v2382_v48 = vsel %vm7527_vm5, %v6058_v30, %v2381_v31  ;;  %v2692_v31 = vshll.u32 %v8255_v16, 16  ;;  %v7220_v32 = vld [vmem:[%s9244_s4 + $0x1d0] sm:$0xff] }
  0xc4   : > { %v2419_v10 = vunpack.c.l.b16 %v2382_v48  ;;  %v2389_v48 = vrot.slane %v8140_v3, 5  ;;  %v7211_v3 = vld [vmem:[%s9244_s4 + $0x188] sm:$0xff] }
  0xc5   : > { %3176 = vmatpush.bf16.msra.mxu3 %v7211_v3 }
  0xc6   : > { %v8193_v8 = vpop.f32.mrf.mxu3  ;;  %3590 = vmatpush.bf16.msra.mxu1 %v7233_v54  ;;  %v2425_v21 = vpack.c.b16 %v2419_v10, %v2418_v9 }
  0xc8   : > { %v833_v59 = vpop.f32.mrf.mxu2 }
  0xc9   : > { %v8200_v13 = vadd.f32 %v833_v59, %v665_v51  ;;  %v667_v19 = vpop.f32.mrf.mxu1  ;;  %v2671_v59 = vrot.slane %v2669_v41, 4  ;;  %v6187_v41 = vld [vmem:[%s7966_s9 + $0x18] sm:$0xf] }
  0xca   : > { %v668_v22 = vadd.f32 %v667_v19, %v8101_v18  ;;  %v6185_v18 = vld [vmem:[%s7966_s9 + $0x10] sm:$0xf]  ;;  %v6141_v19 = vld [vmem:[%s7966_s9 + $0x18] sm:$0xf] }
  0xcb   : > { %v1207_v23 = vpop.f32.mrf.mxu0  ;;  %2488 = vmatmul.bf16.vlgmr.msrb.gmra.mxu3 %v2424_v12  ;;  %v2683_v51 = vshrl.u32 %v6185_v18, 16  ;;  %v2686_v53 = vshll.u32 %v6185_v18, 16  ;;  %v2249_v12 = vunpack.c.l.b16 %v2224_v60  ;;  %v6247_v18 = vld [vmem:[%s7966_s9 + $0x8] sm:$0xe]  ;;  %v2928_v60 = vrot.slane %v8255_v16, 5 }
  0xcc   : > { %2078 = vmatmul.bf16.gmra.mxu1 %v5970_v11  ;;  %v2248_v11 = vunpack.c.l.b16 %v2210_v58 }
  0xcd   : > { %2324 = vmatmul.bf16.gmra.mxu2 %v2252_v14  ;;  %v8252_v14 = vld [vmem:[%s7966_s9 + $0xc] sm:$0x1]  ;;  %v2685_v15 = vrot.slane %v2683_v51, 4  ;;  %v2688_v61 = vrot.slane %v2686_v53, 5 }
  0xce   : > { %2623 = vmatmul.bf16.vlgmr.msrb.gmra.mxu0 %v6138_v20  ;;  %v961_v37 = vpop.f32.mrf.mxu3  ;;  %v7179_v20 = vld [vmem:[%s7966_s9 + $0x1c] sm:$0xf0]  ;;  %v2678_v29 = vshll.u32 %v8252_v14, 16  ;;  %v2253_v25 = vpack.c.b16 %v2249_v12, %v2248_v11  ;;  %v2924_v58 = vrot.slane %v8252_v14, 5 }
  0xcf   : > { %v981_v40 = vadd.f32 %v961_v37, %v8108_v26  ;;  %v7221_v26 = vld [vmem:[%s9244_s4 + $0x1d8] sm:$0xff]  ;;  %v2689_v30 = vor.u32 %v2688_v61, %v2685_v15  ;;  %v6142_v34 = vor.u32 %v7179_v20, %v6141_v19  ;;  %v7231_v61 = vld [vmem:[%s9244_s4 + $0x228] sm:$0xff] }
  0xd0   : > { %v836_v39 = vpop.f32.mrf.mxu2  ;;  %3420 = vmatpush.bf16.msra.mxu0 %v7221_v26  ;;  %v2680_v53 = vrot.slane %v2678_v29, 5  ;;  %v6189_v26 = vld [vmem:[%s7966_s9 + $0x20] sm:$0xf] }
  0xd1   : > { %v8226_v47 = vadd.f32 %v836_v39, %v668_v22  ;;  %v669_v57 = vpop.f32.mrf.mxu1  ;;  %v8240_v63 = vadd.f32 %v1207_v23, %v981_v40  ;;  %v2347_v22 = vld [vmem:[%s7966_s9 + $0x20] sm:$0xe]  ;;  %v2385_v40 = vrot.slane %v8135_v42, 5  ;;  %v2690_v54 = vrot.slane %v2689_v30, 4 }
  0xd2   : > { %v670_v1 = vadd.f32 %v669_v57, %v8137_v43  ;;  %v2674_v43 = vrot.slane %v2672_v45, 5  ;;  %v6059_v39 = vrot.slane %v2347_v22, 9  ;;  %v6060_v45 = vrot.slane %v2348_v28, 9  ;;  %v7242_v29 = vld [vmem:[%s9245_s5 + $0x20] sm:$0xff] }
  0xd3   : > { %v1209_v2 = vpop.f32.mrf.mxu0  ;;  %v2694_v57 = vrot.slane %v2692_v31, 5  ;;  %v6256_v42 = vrot.slane %v6248_v56, 9  ;;  %v2711_v5 = vshrl.u32 %v6189_v26, 16  ;;  %v2714_v6 = vshll.u32 %v6189_v26, 16  ;;  %3726 = vmatpush.bf16.msra.mxu2 %v7242_v29 }
  0xd4   : > { %v2675_v23 = vor.u32 %v2674_v43, %v2671_v59  ;;  %3421 = vmatpush.bf16.msra.mxu0 %v7220_v32  ;;  %v2386_v59 = vsel %vm7527_vm5, %v6059_v39, %v2385_v40  ;;  %v2390_v43 = vsel %vm7527_vm5, %v6060_v45, %v2389_v48  ;;  %v8323_v32 = vld [vmem:[%s7966_s9 + $0x24] sm:$0x1]  ;;  %v2350_v40 = vld [vmem:[%s7966_s9 + $0x38] sm:$0xe] }
  0xd5   : > { %v2695_v14 = vsel %vm7511_vm4, %v2690_v54, %v2694_v57  ;;  %v2716_v22 = vrot.slane %v2714_v6, 5  ;;  %v2421_v28 = vunpack.c.l.b16 %v2390_v43  ;;  %v2720_v45 = vshll.u32 %v8323_v32, 16  ;;  %v6249_v57 = vld [vmem:[%s7966_s9 + $0x18] sm:$0xe] }
  0xd6   : > { %v963_v17 = vpop.f32.mrf.mxu3  ;;  %v2676_v51 = vrot.slane %v2675_v23, 4  ;;  %v7210_v23 = vld [vmem:[%s9244_s4 + $0x180] sm:$0xff]  ;;  %v2798_v31 = vunpack.c.l.b16 %v2695_v14  ;;  %v6062_v46 = vrot.slane %v2350_v40, 9  ;;  %v6257_v14 = vrot.slane %v6249_v57, 9 }
  0xd7   : > { %v982_v44 = vadd.f32 %v963_v17, %v8142_v7  ;;  %v7232_v7 = vld [vmem:[%s9244_s4 + $0x230] sm:$0xff]  ;;  %v2929_v17 = vsel %vm7527_vm5, %v6256_v42, %v2928_v60  ;;  %3177 = vmatpush.bf16.msra.mxu3 %v7210_v23  ;;  %v2393_v60 = vrot.slane %v8191_v4, 5 }
  0xd8   : > { %v838_v38 = vpop.f32.mrf.mxu2  ;;  %3591 = vmatpush.bf16.msra.mxu1 %v7232_v7  ;;  %v2681_v12 = vsel %vm7511_vm4, %v2676_v51, %v2680_v53  ;;  %v6145_v7 = vld [vmem:[%s7966_s9 + $0x28] sm:$0xf] }
  0xd9   : > { %v8262_v24 = vadd.f32 %v838_v38, %v670_v1  ;;  %v672_v33 = vpop.f32.mrf.mxu1  ;;  %v8273_v36 = vadd.f32 %v1209_v2, %v982_v44  ;;  %v2697_v1 = vshrl.u32 %v6187_v41, 16  ;;  %v2700_v2 = vshll.u32 %v6187_v41, 16 }
  0xda   : > { %v673_v49 = vadd.f32 %v672_v33, %v8163_v27  ;;  %v6255_v27 = vrot.slane %v6247_v18, 9  ;;  %v2797_v30 = vunpack.c.l.b16 %v2681_v12  ;;  %v7180_v33 = vld [vmem:[%s7966_s9 + $0x2c] sm:$0xf0]  ;;  %v2972_v18 = vunpack.c.l.b16 %v2929_v17 }
  0xdb   : > { %v1212_v37 = vpop.f32.mrf.mxu0  ;;  %2493 = vmatmul.bf16.gmra.mxu3 %v2425_v21  ;;  %v2699_v19 = vrot.slane %v2697_v1, 4  ;;  %v2702_v20 = vrot.slane %v2700_v2, 5  ;;  %v2713_v21 = vrot.slane %v2711_v5, 4  ;;  %v6146_v26 = vor.u32 %v7180_v33, %v6145_v7  ;;  %v6250_v1 = vld [vmem:[%s7966_s9 + $0x20] sm:$0xe] }
  0xdc   : > { %2083 = vmatmul.bf16.gmra.mxu1 %v5974_v62  ;;  %v2925_v15 = vsel %vm7527_vm5, %v6255_v27, %v2924_v58  ;;  %v2805_v54 = vpack.c.b16 %v2798_v31, %v2797_v30  ;;  %v7218_v2 = vld [vmem:[%s9244_s4 + $0x1c0] sm:$0xff]  ;;  %v2722_v12 = vrot.slane %v2720_v45, 5 }
  0xdd   : > { %2329 = vmatmul.bf16.gmra.mxu2 %v2253_v25  ;;  %3592 = vmatpush.bf16.msra.mxu1 %v7231_v61  ;;  %v2420_v25 = vunpack.c.l.b16 %v2386_v59  ;;  %v2717_v41 = vor.u32 %v2716_v22, %v2713_v21  ;;  %v6193_v61 = vld [vmem:[%s7966_s9 + $0x30] sm:$0xf] }
  0xde   : > { %2628 = vmatmul.bf16.gmra.mxu0 %v6142_v34  ;;  %v966_v50 = vpop.f32.mrf.mxu3  ;;  %v2971_v34 = vunpack.c.l.b16 %v2925_v15  ;;  %v2739_v29 = vshrl.u32 %v6193_v61, 16 }
  0xdf   : > { %v983_v10 = vadd.f32 %v966_v50, %v8168_v35  ;;  %v7219_v35 = vld [vmem:[%s9244_s4 + $0x1c8] sm:$0xff]  ;;  %v2426_v53 = vpack.c.b16 %v2421_v28, %v2420_v25  ;;  %v2397_v50 = vrot.slane %v8198_v55, 5  ;;  %v2718_v43 = vrot.slane %v2717_v41, 4  ;;  %v6385_v28 = vld [vmem:[%s7966_s9 + $0x18] sm:$0xf] }
  0xe0   : > { %v841_v9 = vpop.f32.mrf.mxu2  ;;  %3422 = vmatpush.bf16.msra.mxu0 %v7219_v35  ;;  %v2979_v58 = vpack.c.b16 %v2972_v18, %v2971_v34  ;;  %v6258_v35 = vrot.slane %v6250_v1, 9  ;;  %v2936_v55 = vrot.slane %v8323_v32, 5  ;;  %v2742_v25 = vshll.u32 %v6193_v61, 16  ;;  %v8393_v1 = vld [vmem:[%s7966_s9 + $0x2c] sm:$0x1] }
  0xe1   : > { %v8294_v11 = vadd.f32 %v841_v9, %v673_v49  ;;  %v674_v16 = vpop.f32.mrf.mxu1  ;;  %v8310_v62 = vadd.f32 %v1212_v37, %v983_v10  ;;  %v2349_v49 = vld [vmem:[%s7966_s9 + $0x30] sm:$0xe]  ;;  %v2703_v37 = vor.u32 %v2702_v20, %v2699_v19  ;;  %v6191_v9 = vld [vmem:[%s7966_s9 + $0x28] sm:$0xf]  ;;  %v2398_v17 = vsel %vm7527_vm5, %v6062_v46, %v2397_v50 }
  0xe2   : > { %v675_v38 = vadd.f32 %v674_v16, %v8193_v8  ;;  %v8320_v8 = vld [vmem:[%s7966_s9 + $0x1c] sm:$0x1]  ;;  %v6061_v42 = vrot.slane %v2349_v49, 9  ;;  %v2725_v16 = vshrl.u32 %v6191_v9, 16  ;;  %v2728_v19 = vshll.u32 %v6191_v9, 16 }
  0xe3   : > { %v1214_v44 = vpop.f32.mrf.mxu0  ;;  %v2706_v56 = vshll.u32 %v8320_v8, 16  ;;  %v2704_v5 = vrot.slane %v2703_v37, 4  ;;  %v2932_v15 = vrot.slane %v8320_v8, 5  ;;  %v6383_v20 = vld [vmem:[%s7966_s9 + $0x10] sm:$0xf]  ;;  %v2723_v23 = vsel %vm7511_vm4, %v2718_v43, %v2722_v12  ;;  %v7229_v49 = vld [vmem:[%s9244_s4 + $0x218] sm:$0xff] }
  0xe4   : > { %3423 = vmatpush.bf16.msra.mxu0 %v7218_v2  ;;  %v2937_v32 = vsel %vm7527_vm5, %v6258_v35, %v2936_v55  ;;  %v2727_v33 = vrot.slane %v2725_v16, 4  ;;  %v3224_v34 = vshrl.u32 %v6383_v20, 16  ;;  %v3227_v18 = vshll.u32 %v6383_v20, 16  ;;  %v6149_v2 = vld [vmem:[%s7966_s9 + $0x38] sm:$0xf] }
  0xe5   : > { %v2708_v59 = vrot.slane %v2706_v56, 5  ;;  %v2933_v8 = vsel %vm7527_vm5, %v6257_v14, %v2932_v15  ;;  %v2730_v40 = vrot.slane %v2728_v19, 5  ;;  %v3238_v56 = vshrl.u32 %v6385_v28, 16  ;;  %v8406_v35 = vld [vmem:[%s7966_s9 + $0x1c] sm:$0x1] }
  0xe6   : > { %v968_v39 = vpop.f32.mrf.mxu3  ;;  %v3241_v41 = vshll.u32 %v6385_v28, 16  ;;  %v2974_v46 = vunpack.c.l.b16 %v2937_v32  ;;  %v3226_v50 = vrot.slane %v3224_v34, 4  ;;  %v2734_v12 = vshll.u32 %v8393_v1, 16 }
  0xe7   : > { %v984_v51 = vadd.f32 %v968_v39, %v8200_v13  ;;  %v7230_v13 = vld [vmem:[%s9244_s4 + $0x220] sm:$0xff]  ;;  %v2709_v22 = vsel %vm7511_vm4, %v2704_v5, %v2708_v59  ;;  %v3229_v5 = vrot.slane %v3227_v18, 5  ;;  %v2731_v9 = vor.u32 %v2730_v40, %v2727_v33 }
  0xe8   : > { %v843_v48 = vpop.f32.mrf.mxu2  ;;  %3593 = vmatpush.bf16.msra.mxu1 %v7230_v13  ;;  %v7181_v13 = vld [vmem:[%s7966_s9 + $0x3c] sm:$0xf0]  ;;  %v3243_v59 = vrot.slane %v3241_v41, 5  ;;  %v2736_v33 = vrot.slane %v2734_v12, 5  ;;  %v7206_v12 = vld [vmem:[%s7966_s9 + $0x14] sm:$0xf0] }
  0xe9   : > { %v8333_v27 = vadd.f32 %v843_v48, %v675_v38  ;;  %v1381_v3 = vpop.f32.mrf.mxu1  ;;  %v8344_v6 = vadd.f32 %v1214_v44, %v984_v51  ;;  %v7241_v38 = vld [vmem:[%s9245_s5 + $0x18] sm:$0xff]  ;;  %v2741_v51 = vrot.slane %v2739_v29, 4  ;;  %v2732_v29 = vrot.slane %v2731_v9, 4 }
  0xea   : > { %v1401_v4 = vadd.f32 %v1381_v3, %v8240_v63  ;;  %v8353_v63 = vsel %vm7527_vm5, %v6061_v42, %v2393_v60  ;;  %v7253_v44 = vld [vmem:[%s9245_s5 + $0x78] sm:$0xff]  ;;  %3727 = vmatpush.bf16.msra.mxu2 %v7241_v38  ;;  %v2799_v42 = vunpack.c.l.b16 %v2709_v22  ;;  %v2800_v60 = vunpack.c.l.b16 %v2723_v23  ;;  %v6251_v38 = vld [vmem:[%s7966_s9 + $0x28] sm:$0xe]  ;;  %v7228_v22 = vld [vmem:[%s9244_s4 + $0x210] sm:$0xff] }
  0xeb   : > { %v1217_v10 = vpop.f32.mrf.mxu0  ;;  %2498 = vmatmul.bf16.gmra.mxu3 %v2426_v53  ;;  %v2744_v53 = vrot.slane %v2742_v25, 5  ;;  %v2422_v57 = vunpack.c.l.b16 %v8353_v63  ;;  %v2973_v3 = vunpack.c.l.b16 %v2933_v8  ;;  %v6150_v63 = vor.u32 %v7181_v13, %v6149_v2  ;;  %v7260_v23 = vld [vmem:[%s9245_s5 + $0xb0] sm:$0xff] }
  0xec   : > { %2869 = vmatmul.bf16.vlgmr.msrb.gmra.mxu1 %v2805_v54  ;;  %3969 = vmatpush.bf16.msrb.mxu3 %v7253_v44  ;;  %v7252_v54 = vld [vmem:[%s9245_s5 + $0x70] sm:$0xff]  ;;  %v3230_v44 = vor.u32 %v3229_v5, %v3226_v50 }
  0xed   : > { %3043 = vmatmul.bf16.vlgmr.msrb.gmra.mxu2 %v2979_v58  ;;  %3594 = vmatpush.bf16.msra.mxu1 %v7229_v49  ;;  %v2423_v58 = vunpack.c.l.b16 %v2398_v17  ;;  %v2745_v14 = vor.u32 %v2744_v53, %v2741_v51  ;;  %v2806_v17 = vpack.c.b16 %v2800_v60, %v2799_v42  ;;  %v2980_v20 = vpack.c.b16 %v2974_v46, %v2973_v3  ;;  %v6252_v25 = vld [vmem:[%s7966_s9 + $0x30] sm:$0xe]  ;;  %v6197_v51 = vld [vmem:[%s7966_s9 + $0x40] sm:$0xf]  ;;  %v7239_v53 = vld [vmem:[%s9245_s5 + $0x8] sm:$0xff] }
  0xee   : > { %2633 = vmatmul.bf16.gmra.mxu0 %v6146_v26  ;;  %v971_v21 = vpop.f32.mrf.mxu3  ;;  %v7240_v26 = vld [vmem:[%s9245_s5 + $0x10] sm:$0xff]  ;;  %v6259_v49 = vrot.slane %v6251_v38, 9  ;;  %v6387_v42 = vld [vmem:[%s7966_s9 + $0x20] sm:$0xf]  ;;  %v6389_v3 = vld [vmem:[%s7966_s9 + $0x28] sm:$0xf] }
  0xef   : > { %v985_v30 = vadd.f32 %v971_v21, %v8226_v47  ;;  %v7261_v47 = vld [vmem:[%s9245_s5 + $0xb8] sm:$0xff]  ;;  %3728 = vmatpush.bf16.msra.mxu2 %v7240_v26  ;;  %v2427_v16 = vpack.c.b16 %v2423_v58, %v2422_v57  ;;  %v2746_v34 = vrot.slane %v2745_v14, 4  ;;  %v7251_v26 = vld [vmem:[%s9245_s5 + $0x68] sm:$0xff]  ;;  %v2737_v57 = vsel %vm7511_vm4, %v2732_v29, %v2736_v33 }
  0xf0   : > { %v1516_v31 = vpop.f32.mrf.mxu2  ;;  %4143 = vmatpush.bf16.msrb.mxu0 %v7261_v47  ;;  %3970 = vmatpush.bf16.msrb.mxu3 %v7252_v54  ;;  %v2940_v47 = vrot.slane %v8393_v1, 5  ;;  %v2767_v5 = vshrl.u32 %v6197_v51, 16  ;;  %v2770_v9 = vshll.u32 %v6197_v51, 16  ;;  %v3269_v38 = vshll.u32 %v6389_v3, 16 }
  0xf1   : > { %v8374_v7 = vadd.f32 %v1516_v31, %v1401_v4  ;;  %v1383_v37 = vpop.f32.mrf.mxu1  ;;  %v8382_v39 = vadd.f32 %v1217_v10, %v985_v30  ;;  %v8401_v10 = vld [vmem:[%s7966_s9 + $0x14] sm:$0x1]  ;;  %v3240_v4 = vrot.slane %v3238_v56, 4  ;;  %v3247_v30 = vshll.u32 %v8406_v35, 16  ;;  %3595 = vmatpush.bf16.msra.mxu1 %v7228_v22 }
  0xf2   : > { %v1402_v48 = vadd.f32 %v1383_v37, %v8273_v36  ;;  %v8396_v36 = vld [vmem:[%s7966_s9 + $0x34] sm:$0x1]  ;;  %v3233_v21 = vshll.u32 %v8401_v10, 16  ;;  %v6260_v37 = vrot.slane %v6252_v25, 9  ;;  %v3231_v56 = vrot.slane %v3230_v44, 4  ;;  %v7238_v44 = vld [vmem:[%s9245_s5] sm:$0xff] }
  0xf3   : > { %v1219_v45 = vpop.f32.mrf.mxu0  ;;  %v2748_v15 = vshll.u32 %v8396_v36, 16  ;;  %v3244_v28 = vor.u32 %v3243_v59, %v3240_v4  ;;  %v2944_v40 = vrot.slane %v8396_v36, 5  ;;  %v2941_v36 = vsel %vm7527_vm5, %v6259_v49, %v2940_v47  ;;  %3729 = vmatpush.bf16.msra.mxu2 %v7239_v53  ;;  %v7259_v4 = vld [vmem:[%s9245_s5 + $0xa8] sm:$0xff]  ;;  %v8475_v47 = vld [vmem:[%s7966_s9 + $0x24] sm:$0x1] }
  0xf4   : > { %4144 = vmatpush.bf16.msrb.mxu0 %v7260_v23  ;;  %v3235_v41 = vrot.slane %v3233_v21, 5  ;;  %3971 = vmatpush.bf16.msrb.mxu3 %v7251_v26  ;;  %v7250_v21 = vld [vmem:[%s9245_s5 + $0x60] sm:$0xff]  ;;  %v2801_v22 = vunpack.c.l.b16 %v2737_v57  ;;  %v8480_v26 = vld [vmem:[%s7966_s9 + $0x2c] sm:$0x1] }
  0xf5   : > { %v2750_v18 = vrot.slane %v2748_v15, 5  ;;  %v2945_v50 = vsel %vm7527_vm5, %v6260_v37, %v2944_v40 }
  0xf6   : > { %v973_v43 = vpop.f32.mrf.mxu3  ;;  %v3236_v14 = vsel %vm7511_vm4, %v3231_v56, %v3235_v41  ;;  %v2976_v25 = vunpack.c.l.b16 %v2945_v50  ;;  %v3271_v41 = vrot.slane %v3269_v38, 5  ;;  %v7281_v38 = vld [vmem:[%s9245_s5 + $0x138] sm:$0xff] }
  0xf7   : > { %v986_v55 = vadd.f32 %v973_v43, %v8262_v24  ;;  %v2751_v58 = vsel %vm7511_vm4, %v2746_v34, %v2750_v18  ;;  %v6337_v43 = vld [vmem:[%s7966_s9 + $0x10] sm:$0xf]  ;;  %3730 = vmatpush.bf16.msra.mxu2 %v7238_v44  ;;  %v3352_v33 = vunpack.c.l.b16 %v3236_v14  ;;  %v8472_v18 = vld [vmem:[%s7966_s9 + $0x44] sm:$0x1] }
  0xf8   : > { %v1518_v61 = vpop.f32.mrf.mxu2  ;;  %4145 = vmatpush.bf16.msrb.mxu0 %v7259_v4  ;;  %v2802_v23 = vunpack.c.l.b16 %v2751_v58  ;;  %3972 = vmatpush.bf16.msrb.mxu3 %v7250_v21 }
  0xf9   : > { %v8409_v19 = vadd.f32 %v1518_v61, %v1402_v48  ;;  %v1386_v24 = vpop.f32.mrf.mxu1  ;;  %v8421_v31 = vadd.f32 %v1219_v45, %v986_v55  ;;  %v6195_v45 = vld [vmem:[%s7966_s9 + $0x38] sm:$0xf]  ;;  %v3249_v48 = vrot.slane %v3247_v30, 5  ;;  %v3252_v61 = vshrl.u32 %v6387_v42, 16 }
  0xfa   : > { %v1403_v32 = vadd.f32 %v1386_v24, %v8310_v62  ;;  %v3245_v62 = vrot.slane %v3244_v28, 4  ;;  %v2753_v2 = vshrl.u32 %v6195_v45, 16  ;;  %v2756_v13 = vshll.u32 %v6195_v45, 16  ;;  %v8469_v28 = vld [vmem:[%s7966_s9 + $0x3c] sm:$0x1] }
  0xfb   : > { %v1222_v8 = vpop.f32.mrf.mxu0  ;;  %2503 = vmatmul.bf16.gmra.mxu3 %v2427_v16  ;;  %v2769_v30 = vrot.slane %v2767_v5, 4  ;;  %v3254_v37 = vrot.slane %v3252_v61, 4  ;;  %v2762_v53 = vshll.u32 %v8469_v28, 16  ;;  %4524 = vmatpush.bf16.msrb.mxu2 %v7281_v38 }
  0xfc   : > { %2874 = vmatmul.bf16.gmra.mxu1 %v2806_v17  ;;  %v3250_v15 = vsel %vm7511_vm4, %v3245_v62, %v3249_v48  ;;  %v3255_v17 = vshll.u32 %v6387_v42, 16  ;;  %v2755_v24 = vrot.slane %v2753_v2, 4  ;;  %v2758_v29 = vrot.slane %v2756_v13, 5  ;;  %v6253_v2 = vld [vmem:[%s7966_s9 + $0x38] sm:$0xe] }
  0xfd   : > { %3048 = vmatmul.bf16.gmra.mxu2 %v2980_v20  ;;  %v3266_v20 = vshrl.u32 %v6389_v3, 16  ;;  %v3353_v34 = vunpack.c.l.b16 %v3250_v15  ;;  %v2807_v48 = vpack.c.b16 %v2802_v23, %v2801_v22  ;;  %v2776_v42 = vshll.u32 %v8472_v18, 16 }
  0xfe   : > { %2638 = vmatmul.bf16.gmra.mxu0 %v6150_v63  ;;  %v976_v54 = vpop.f32.mrf.mxu3  ;;  %v3257_v40 = vrot.slane %v3255_v17, 5  ;;  %v2759_v51 = vor.u32 %v2758_v29, %v2755_v24  ;;  %v3261_v13 = vshll.u32 %v8475_v47, 16  ;;  %v6261_v61 = vrot.slane %v6253_v2, 9  ;;  %v6391_v17 = vld [vmem:[%s7966_s9 + $0x30] sm:$0xf] }
  0xff   : > { %v987_v60 = vadd.f32 %v976_v54, %v8294_v11  ;;  %v7227_v11 = vld [vmem:[%s9244_s4 + $0x208] sm:$0xff]  ;;  %v3268_v56 = vrot.slane %v3266_v20, 4  ;;  %v2778_v15 = vrot.slane %v2776_v42, 5  ;;  %v7249_v20 = vld [vmem:[%s9245_s5 + $0x58] sm:$0xff] }
 0x100   : > { %v1521_v1 = vpop.f32.mrf.mxu2  ;;  %3596 = vmatpush.bf16.msra.mxu1 %v7227_v11  ;;  %v3258_v11 = vor.u32 %v3257_v40, %v3254_v37  ;;  %v3263_v22 = vrot.slane %v3261_v13, 5  ;;  %v6393_v29 = vld [vmem:[%s7966_s9 + $0x38] sm:$0xf]  ;;  %3973 = vmatpush.bf16.msrb.mxu3 %v7249_v20  ;;  %v7272_v20 = vld [vmem:[%s9245_s5 + $0xf0] sm:$0xff] }
 0x101   : > { %v8443_v46 = vadd.f32 %v1521_v1, %v1403_v32  ;;  %v1388_v59 = vpop.f32.mrf.mxu1  ;;  %v8459_v55 = vadd.f32 %v1222_v8, %v987_v60  ;;  %v2772_v8 = vrot.slane %v2770_v9, 5  ;;  %v6338_v32 = vor.u32 %v7206_v12, %v6337_v43  ;;  %v7226_v60 = vld [vmem:[%s9244_s4 + $0x200] sm:$0xff] }
 0x102   : > { %v1404_v63 = vadd.f32 %v1388_v59, %v8344_v6  ;;  %v2975_v6 = vunpack.c.l.b16 %v2941_v36  ;;  %v3360_v36 = vpack.c.b16 %v3353_v34, %v3352_v33  ;;  %v6254_v9 = vld [vmem:[%s7966_s9 + $0x40] sm:$0xe]  ;;  %v3272_v4 = vor.u32 %v3271_v41, %v3268_v56  ;;  %v7257_v34 = vld [vmem:[%s9245_s5 + $0x98] sm:$0xff] }
 0x103   : > { %v1224_v16 = vpop.f32.mrf.mxu0  ;;  %v2773_v58 = vor.u32 %v2772_v8, %v2769_v30  ;;  %v3275_v59 = vshll.u32 %v8480_v26, 16  ;;  %v2760_v43 = vrot.slane %v2759_v51, 4  ;;  %v2764_v12 = vrot.slane %v2762_v53, 5  ;;  %v7248_v53 = vld [vmem:[%s9245_s5 + $0x50] sm:$0xff] }
 0x104   : > { %v2981_v57 = vpack.c.b16 %v2976_v25, %v2975_v6  ;;  %3597 = vmatpush.bf16.msra.mxu1 %v7226_v60  ;;  %v3259_v21 = vrot.slane %v3258_v11, 4  ;;  %v3273_v23 = vrot.slane %v3272_v4, 4  ;;  %v3283_v33 = vshll.u32 %v6391_v17, 16  ;;  %3974 = vmatpush.bf16.msrb.mxu3 %v7248_v53 }
 0x105   : > { %v2774_v14 = vrot.slane %v2773_v58, 4  ;;  %v3277_v24 = vrot.slane %v3275_v59, 5  ;;  %v3294_v56 = vshrl.u32 %v6393_v29, 16  ;;  %v3297_v51 = vshll.u32 %v6393_v29, 16 }
 0x106   : > { %v978_v49 = vpop.f32.mrf.mxu3  ;;  %v3285_v2 = vrot.slane %v3283_v33, 5 }
 0x107   : > { %v988_v45 = vadd.f32 %v978_v49, %v8333_v27  ;;  %v7258_v27 = vld [vmem:[%s9245_s5 + $0xa0] sm:$0xff]  ;;  %v2779_v8 = vsel %vm7511_vm4, %v2774_v14, %v2778_v15  ;;  %v3296_v11 = vrot.slane %v3294_v56, 4  ;;  %v3299_v4 = vrot.slane %v3297_v51, 5  ;;  %v8545_v15 = vld [vmem:[%s7966_s9 + $0x3c] sm:$0x1]  ;;  %v7255_v51 = vld [vmem:[%s9245_s5 + $0x88] sm:$0xff] }
 0x108   : > { %v1523_v62 = vpop.f32.mrf.mxu2  ;;  %4146 = vmatpush.bf16.msrb.mxu0 %v7258_v27  ;;  %v2804_v58 = vunpack.c.l.b16 %v2779_v8  ;;  %v6341_v27 = vld [vmem:[%s7966_s9 + $0x20] sm:$0xf]  ;;  %v3303_v29 = vshll.u32 %v8545_v15, 16 }
 0x109   : > { %v8482_v54 = vadd.f32 %v1523_v62, %v1404_v63  ;;  %v1391_v1 = vpop.f32.mrf.mxu1  ;;  %v8493_v3 = vadd.f32 %v1224_v16, %v988_v45  ;;  %v6262_v16 = vrot.slane %v6254_v9, 9  ;;  %v2952_v63 = vrot.slane %v8472_v18, 5  ;;  %v6395_v56 = vld [vmem:[%s7966_s9 + $0x40] sm:$0xf] }
 0x10a   : > { %v1405_v50 = vadd.f32 %v1391_v1, %v8382_v39  ;;  %v2948_v39 = vrot.slane %v8469_v28, 5  ;;  %v2765_v28 = vsel %vm7511_vm4, %v2760_v43, %v2764_v12  ;;  %v3264_v62 = vsel %vm7511_vm4, %v3259_v21, %v3263_v22  ;;  %v7207_v1 = vld [vmem:[%s7966_s9 + $0x24] sm:$0xf0] }
 0x10b   : > { %v1936_v5 = vpop.f32.mrf.mxu0  ;;  %3178 = vmatmul.bf16.vlgmr.msra.gmra.mxu3 %v6338_v32  ;;  %v3280_v32 = vshrl.u32 %v6391_v17, 16  ;;  %v2953_v37 = vsel %vm7527_vm5, %v6262_v16, %v2952_v63  ;;  %v3354_v13 = vunpack.c.l.b16 %v3264_v62  ;;  %v6342_v14 = vor.u32 %v7207_v1, %v6341_v27  ;;  %v7256_v17 = vld [vmem:[%s9245_s5 + $0x90] sm:$0xff] }
 0x10c   : > { %2879 = vmatmul.bf16.gmra.mxu1 %v2807_v48  ;;  %v2949_v49 = vsel %vm7527_vm5, %v6261_v61, %v2948_v39  ;;  %v3278_v48 = vsel %vm7511_vm4, %v3273_v23, %v3277_v24  ;;  %4147 = vmatpush.bf16.msrb.mxu0 %v7257_v34  ;;  %v2978_v60 = vunpack.c.l.b16 %v2953_v37  ;;  %v3300_v24 = vor.u32 %v3299_v4, %v3296_v11  ;;  %v7247_v34 = vld [vmem:[%s9245_s5 + $0x48] sm:$0xff] }
 0x10d   : > { %3053 = vmatmul.bf16.gmra.mxu2 %v2981_v57  ;;  %v7280_v57 = vld [vmem:[%s9245_s5 + $0x130] sm:$0xff]  ;;  %v2977_v42 = vunpack.c.l.b16 %v2949_v49  ;;  %v3305_v37 = vrot.slane %v3303_v29, 5  ;;  %3975 = vmatpush.bf16.msrb.mxu3 %v7247_v34 }
 0x10e   : > { %3424 = vmatmul.bf16.vlgmr.msra.gmra.mxu0 %v3360_v36  ;;  %v1762_v44 = vpop.f32.mrf.mxu3  ;;  %v3282_v36 = vrot.slane %v3280_v32, 4  ;;  %4525 = vmatpush.bf16.msrb.mxu2 %v7280_v57  ;;  %v3479_v32 = vrot.slane %v8401_v10, 5  ;;  %v3301_v49 = vrot.slane %v3300_v24, 4  ;;  %v6397_v10 = vld [vmem:[%s7966_s9 + $0x48] sm:$0xf] }
 0x10f   : > { %v1782_v25 = vadd.f32 %v1762_v44, %v8374_v7  ;;  %v7273_v7 = vld [vmem:[%s9245_s5 + $0xf8] sm:$0xff]  ;;  %v2982_v39 = vpack.c.b16 %v2978_v60, %v2977_v42  ;;  %v6447_v44 = vld [vmem:[%s7966_s9 + $0x10] sm:$0xe]  ;;  %v3311_v42 = vshll.u32 %v6395_v56, 16 }
 0x110   : > { %v1526_v6 = vpop.f32.mrf.mxu2  ;;  %4278 = vmatpush.bf16.msrb.mxu1 %v7273_v7  ;;  %v3286_v16 = vor.u32 %v3285_v2, %v3282_v36  ;;  %4148 = vmatpush.bf16.msrb.mxu0 %v7256_v17  ;;  %v6455_v8 = vrot.slane %v6447_v44, 9  ;;  %v7279_v7 = vld [vmem:[%s9245_s5 + $0x128] sm:$0xff]  ;;  %v3306_v1 = vsel %vm7511_vm4, %v3301_v49, %v3305_v37  ;;  %v3322_v36 = vshrl.u32 %v6397_v10, 16 }
 0x111   : > { %v8511_v30 = vadd.f32 %v1526_v6, %v1405_v50  ;;  %v1393_v18 = vpop.f32.mrf.mxu1  ;;  %v8525_v40 = vadd.f32 %v1936_v5, %v1782_v25  ;;  %v3355_v50 = vunpack.c.l.b16 %v3278_v48  ;;  %v8541_v5 = vld [vmem:[%s7966_s9 + $0x34] sm:$0x1]  ;;  %v6448_v6 = vld [vmem:[%s7966_s9 + $0x18] sm:$0xe]  ;;  %v3325_v2 = vshll.u32 %v6397_v10, 16 }
 0x112   : > { %v1406_v41 = vadd.f32 %v1393_v18, %v8421_v31  ;;  %v2803_v31 = vunpack.c.l.b16 %v2765_v28  ;;  %v3289_v63 = vshll.u32 %v8541_v5, 16  ;;  %v3287_v25 = vrot.slane %v3286_v16, 4  ;;  %4526 = vmatpush.bf16.msrb.mxu2 %v7279_v7  ;;  %v3760_v10 = vld [vmem:[%s8596_s13] sm:$0xf] }
 0x113   : > { %v1938_v45 = vpop.f32.mrf.mxu0  ;;  %v3361_v38 = vpack.c.b16 %v3355_v50, %v3354_v13  ;;  %v6456_v33 = vrot.slane %v6448_v6, 9  ;;  %v3480_v48 = vsel %vm7527_vm5, %v6455_v8, %v3479_v32  ;;  %v7246_v13 = vld [vmem:[%s9245_s5 + $0x40] sm:$0xff]  ;;  %v6345_v50 = vld [vmem:[%s7966_s9 + $0x30] sm:$0xf]  ;;  %v3313_v16 = vrot.slane %v3311_v42, 5 }
 0x114   : > { %v2808_v12 = vpack.c.b16 %v2804_v58, %v2803_v31  ;;  %4279 = vmatpush.bf16.msrb.mxu1 %v7272_v20  ;;  %v3291_v28 = vrot.slane %v3289_v63, 5  ;;  %v3308_v58 = vshrl.u32 %v6395_v56, 16  ;;  %4149 = vmatpush.bf16.msrb.mxu0 %v7255_v51  ;;  %v3526_v11 = vunpack.c.l.b16 %v3480_v48  ;;  %v6450_v56 = vld [vmem:[%s7966_s9 + $0x28] sm:$0xe]  ;;  %v7277_v51 = vld [vmem:[%s9245_s5 + $0x118] sm:$0xff] }
 0x115   : > { %3976 = vmatpush.bf16.msrb.mxu3 %v7246_v13  ;;  %v3324_v17 = vrot.slane %v3322_v36, 4  ;;  %v3327_v20 = vrot.slane %v3325_v2, 5  ;;  %v3762_v48 = vld [vmem:[%s8596_s13 + $0x8] sm:$0xf] }
 0x116   : > { %v1764_v9 = vpop.f32.mrf.mxu3  ;;  %v3292_v62 = vsel %vm7511_vm4, %v3287_v25, %v3291_v28  ;;  %v7254_v25 = vld [vmem:[%s9245_s5 + $0x80] sm:$0xff]  ;;  %v3791_v2 = vshrl.u32 %v3762_v48, 16  ;;  %v3794_v13 = vshll.u32 %v3762_v48, 16 }
 0x117   : > { %v1783_v43 = vadd.f32 %v1764_v9, %v8409_v19  ;;  %v7208_v9 = vld [vmem:[%s7966_s9 + $0x34] sm:$0xf0]  ;;  %v7270_v28 = vld [vmem:[%s9245_s5 + $0xe0] sm:$0xff]  ;;  %v3328_v49 = vor.u32 %v3327_v20, %v3324_v17  ;;  %v7209_v17 = vld [vmem:[%s7966_s9 + $0x44] sm:$0xf0] }
 0x118   : > { %v1528_v59 = vpop.f32.mrf.mxu2  ;;  %v6346_v44 = vor.u32 %v7208_v9, %v6345_v50  ;;  %4150 = vmatpush.bf16.msrb.mxu0 %v7254_v25  ;;  %v3793_v25 = vrot.slane %v3791_v2, 4  ;;  %v4007_v2 = vld [vmem:[%s8596_s13 + $0x8] sm:$0xe] }
 0x119   : > { %v8547_v61 = vadd.f32 %v1528_v59, %v1406_v41  ;;  %v1396_v19 = vpop.f32.mrf.mxu1  ;;  %v8557_v21 = vadd.f32 %v1938_v45, %v1783_v43  ;;  %v3356_v59 = vunpack.c.l.b16 %v3292_v62  ;;  %v3357_v43 = vunpack.c.l.b16 %v3306_v1 }
 0x11a   : > { %v1407_v22 = vadd.f32 %v1396_v19, %v8459_v55  ;;  %v3483_v55 = vrot.slane %v8406_v35, 5  ;;  %v6458_v62 = vrot.slane %v6450_v56, 9  ;;  %v3329_v42 = vrot.slane %v3328_v49, 4 }
 0x11b   : > { %v1941_v23 = vpop.f32.mrf.mxu0  ;;  %3183 = vmatmul.bf16.gmra.mxu3 %v6342_v14  ;;  %v7234_v14 = vld [vmem:[%s8596_s13 + $0x4] sm:$0xf0]  ;;  %v3777_v1 = vshrl.u32 %v3760_v10, 16 }
 0x11c   : > { %2884 = vmatmul.bf16.gmra.mxu1 %v2808_v12  ;;  %v3484_v57 = vsel %vm7527_vm5, %v6456_v33, %v3483_v55  ;;  %v6513_v12 = vld [vmem:[%s8596_s13] sm:$0xf] }
 0x11d   : > { %3058 = vmatmul.bf16.gmra.mxu2 %v2982_v39  ;;  %v3527_v4 = vunpack.c.l.b16 %v3484_v57  ;;  %v3310_v39 = vrot.slane %v3308_v58, 4  ;;  %v6514_v6 = vor.u32 %v7234_v14, %v6513_v12  ;;  %v6449_v33 = vld [vmem:[%s7966_s9 + $0x20] sm:$0xe]  ;;  %v3779_v20 = vrot.slane %v3777_v1, 4 }
 0x11e   : > { %3429 = vmatmul.bf16.gmra.mxu0 %v3361_v38  ;;  %v1767_v18 = vpop.f32.mrf.mxu3  ;;  %v6349_v12 = vld [vmem:[%s7966_s9 + $0x40] sm:$0xf] }
 0x11f   : > { %v1784_v45 = vadd.f32 %v1767_v18, %v8443_v46  ;;  %v7271_v46 = vld [vmem:[%s9245_s5 + $0xe8] sm:$0xff]  ;;  %v3534_v29 = vpack.c.b16 %v3527_v4, %v3526_v11  ;;  %v3314_v32 = vor.u32 %v3313_v16, %v3310_v39  ;;  %v7276_v16 = vld [vmem:[%s9245_s5 + $0x110] sm:$0xff] }
 0x120   : > { %v1531_v41 = vpop.f32.mrf.mxu2  ;;  %4280 = vmatpush.bf16.msrb.mxu1 %v7271_v46  ;;  %v7289_v46 = vld [vmem:[%s9245_s5 + $0x178] sm:$0xff] }
 0x121   : > { %v8573_v35 = vadd.f32 %v1531_v41, %v1407_v22  ;;  %v1398_v53 = vpop.f32.mrf.mxu1  ;;  %v8587_v31 = vadd.f32 %v1941_v23, %v1784_v45  ;;  %v8610_v22 = vld [vmem:[%s7966_s9 + $0x44] sm:$0x1]  ;;  %v8613_v23 = vld [vmem:[%s7966_s9 + $0x4c] sm:$0x1]  ;;  %v6457_v41 = vrot.slane %v6449_v33, 9  ;;  %v3487_v45 = vrot.slane %v8475_v47, 5  ;;  %4698 = vmatpush.bf16.msra.mxu3 %v7289_v46 }
 0x122   : > { %v1408_v60 = vadd.f32 %v1398_v53, %v8493_v3  ;;  %v7278_v3 = vld [vmem:[%s9245_s5 + $0x120] sm:$0xff]  ;;  %v3317_v18 = vshll.u32 %v8610_v22, 16  ;;  %v3331_v37 = vshll.u32 %v8613_v23, 16  ;;  %v3315_v57 = vrot.slane %v3314_v32, 4  ;;  %v8674_v32 = vld [vmem:[%s8596_s13 + $0xc] sm:$0x1] }
 0x123   : > { %v1943_v27 = vpop.f32.mrf.mxu0  ;;  %4527 = vmatpush.bf16.msrb.mxu2 %v7278_v3  ;;  %v7269_v3 = vld [vmem:[%s9245_s5 + $0xd8] sm:$0xff]  ;;  %v3488_v9 = vsel %vm7527_vm5, %v6457_v41, %v3487_v45  ;;  %v3764_v45 = vld [vmem:[%s8596_s13 + $0x10] sm:$0xf] }
 0x124   : > { %4281 = vmatpush.bf16.msrb.mxu1 %v7270_v28  ;;  %v3319_v58 = vrot.slane %v3317_v18, 5  ;;  %v3796_v28 = vrot.slane %v3794_v13, 5  ;;  %v7300_v46 = vld [vmem:[%s9245_s5 + $0x1b0] sm:$0xff]  ;;  %v3805_v13 = vshrl.u32 %v3764_v45, 16 }
 0x126   : > { %v1769_v63 = vpop.f32.mrf.mxu3  ;;  %v3320_v14 = vsel %vm7511_vm4, %v3315_v57, %v3319_v58  ;;  %v3797_v48 = vor.u32 %v3796_v28, %v3793_v25  ;;  %v8714_v25 = vld [vmem:[%s8596_s13 + $0x14] sm:$0x1] }
 0x127   : > { %v1785_v38 = vadd.f32 %v1769_v63, %v8482_v54  ;;  %v3362_v54 = vpack.c.b16 %v3357_v43, %v3356_v59  ;;  %4528 = vmatpush.bf16.msrb.mxu2 %v7277_v51  ;;  %v7288_v63 = vld [vmem:[%s9245_s5 + $0x170] sm:$0xff]  ;;  %v3800_v51 = vshll.u32 %v8674_v32, 16 }
 0x128   : > { %v1533_v19 = vpop.f32.mrf.mxu2  ;;  %4282 = vmatpush.bf16.msrb.mxu1 %v7269_v3  ;;  %4699 = vmatpush.bf16.msra.mxu3 %v7288_v63  ;;  %v3808_v3 = vshll.u32 %v3764_v45, 16  ;;  %v7287_v63 = vld [vmem:[%s9245_s5 + $0x168] sm:$0xff] }
 0x129   : > { %v8615_v24 = vadd.f32 %v1533_v19, %v1408_v60  ;;  %v2069_v8 = vpop.f32.mrf.mxu1  ;;  %v8624_v55 = vadd.f32 %v1943_v27, %v1785_v38  ;;  %v3333_v60 = vrot.slane %v3331_v37, 5  ;;  %v3528_v38 = vunpack.c.l.b16 %v3488_v9 }
 0x12a   : > { %v2089_v7 = vadd.f32 %v2069_v8, %v8525_v40  ;;  %v3491_v40 = vrot.slane %v8480_v26, 5  ;;  %v3780_v26 = vshll.u32 %v3760_v10, 16  ;;  %v3358_v8 = vunpack.c.l.b16 %v3320_v14 }
 0x12b   : > { %v1946_v34 = vpop.f32.mrf.mxu0  ;;  %3188 = vmatmul.bf16.gmra.mxu3 %v6346_v44  ;;  %v3334_v39 = vsel %vm7511_vm4, %v3329_v42, %v3333_v60  ;;  %4529 = vmatpush.bf16.msrb.mxu2 %v7276_v16  ;;  %v4006_v42 = vld [vmem:[%s8596_s13] sm:$0xe]  ;;  %v4036_v16 = vrot.slane %v8674_v32, 5  ;;  %v7267_v32 = vld [vmem:[%s9245_s5 + $0xc8] sm:$0xff] }
 0x12c   : > { %3598 = vmatmul.bf16.vlgmr.msra.gmra.mxu1 %v3534_v29  ;;  %v3492_v11 = vsel %vm7527_vm5, %v6458_v62, %v3491_v40  ;;  %v3782_v19 = vrot.slane %v3780_v26, 5  ;;  %v7235_v29 = vld [vmem:[%s8596_s13 + $0x14] sm:$0xf0]  ;;  %v3495_v26 = vrot.slane %v8541_v5, 5  ;;  %v6607_v5 = vrot.slane %v4006_v42, 9  ;;  %4700 = vmatpush.bf16.msra.mxu3 %v7287_v63 }
 0x12d   : > { %3731 = vmatmul.bf16.vlgmr.msra.gmra.mxu2 %v6514_v6  ;;  %v3529_v44 = vunpack.c.l.b16 %v3492_v11  ;;  %v8671_v6 = vld [vmem:[%s8596_s13 + $0x4] sm:$0x1]  ;;  %v6452_v40 = vld [vmem:[%s7966_s9 + $0x38] sm:$0xe] }
 0x12e   : > { %3434 = vmatmul.bf16.gmra.mxu0 %v3362_v54  ;;  %v1772_v53 = vpop.f32.mrf.mxu3  ;;  %v3359_v54 = vunpack.c.l.b16 %v3334_v39  ;;  %v3783_v56 = vor.u32 %v3782_v19, %v3779_v20  ;;  %v3786_v41 = vshll.u32 %v8671_v6, 16  ;;  %v6608_v39 = vrot.slane %v4007_v2, 9 }
 0x12f   : > { %v1786_v47 = vadd.f32 %v1772_v53, %v8511_v30  ;;  %v7301_v30 = vld [vmem:[%s9245_s5 + $0x1b8] sm:$0xff]  ;;  %v3535_v62 = vpack.c.b16 %v3529_v44, %v3528_v38  ;;  %v3807_v20 = vrot.slane %v3805_v13, 4  ;;  %v3810_v19 = vrot.slane %v3808_v3, 5 }
 0x130   : > { %v2315_v27 = vpop.f32.mrf.mxu2  ;;  %4833 = vmatpush.bf16.msra.mxu0 %v7301_v30  ;;  %v3363_v57 = vpack.c.b16 %v3359_v54, %v3358_v8  ;;  %v6460_v30 = vrot.slane %v6452_v40, 9  ;;  %v3784_v9 = vrot.slane %v3783_v56, 4  ;;  %v3788_v11 = vrot.slane %v3786_v41, 5  ;;  %v8734_v56 = vld [vmem:[%s8596_s13 + $0x1c] sm:$0x1] }
 0x131   : > { %v8641_v36 = vadd.f32 %v2315_v27, %v2089_v7  ;;  %v2071_v50 = vpop.f32.mrf.mxu1  ;;  %v8653_v4 = vadd.f32 %v1946_v34, %v1786_v47  ;;  %v6350_v34 = vor.u32 %v7209_v17, %v6349_v12  ;;  %v6451_v7 = vld [vmem:[%s7966_s9 + $0x30] sm:$0xe]  ;;  %v3766_v47 = vld [vmem:[%s8596_s13 + $0x18] sm:$0xf]  ;;  %v3811_v40 = vor.u32 %v3810_v19, %v3807_v20 }
 0x132   : > { %v2090_v43 = vadd.f32 %v2071_v50, %v8557_v21  ;;  %v6517_v21 = vld [vmem:[%s8596_s13 + $0x10] sm:$0xf]  ;;  %v6459_v58 = vrot.slane %v6451_v7, 9  ;;  %v3499_v50 = vrot.slane %v8545_v15, 5  ;;  %v3819_v12 = vshrl.u32 %v3766_v47, 16  ;;  %v7275_v15 = vld [vmem:[%s9245_s5 + $0x108] sm:$0xff] }
 0x133   : > { %v1948_v59 = vpop.f32.mrf.mxu0  ;;  %v6518_v37 = vor.u32 %v7235_v29, %v6517_v21  ;;  %v3822_v14 = vshll.u32 %v3766_v47, 16  ;;  %4530 = vmatpush.bf16.msrb.mxu2 %v7275_v15  ;;  %v3503_v13 = vrot.slane %v8610_v22, 5  ;;  %v7266_v22 = vld [vmem:[%s9245_s5 + $0xc0] sm:$0xff] }
 0x134   : > { %4834 = vmatpush.bf16.msra.mxu0 %v7300_v46  ;;  %v3496_v21 = vsel %vm7527_vm5, %v6459_v58, %v3495_v26  ;;  %v3500_v29 = vsel %vm7527_vm5, %v6460_v30, %v3499_v50  ;;  %v7236_v26 = vld [vmem:[%s8596_s13 + $0x24] sm:$0xf0]  ;;  %v3507_v30 = vrot.slane %v8613_v23, 5  ;;  %v7298_v23 = vld [vmem:[%s9245_s5 + $0x1a0] sm:$0xff] }
 0x135   : > { %v3824_v54 = vrot.slane %v3822_v14, 5  ;;  %v3530_v46 = vunpack.c.l.b16 %v3496_v21 }
 0x136   : > { %v1774_v33 = vpop.f32.mrf.mxu3 }
 0x137   : > { %v1787_v18 = vadd.f32 %v1774_v33, %v8547_v61  ;;  %v7268_v61 = vld [vmem:[%s9245_s5 + $0xd0] sm:$0xff]  ;;  %v7299_v33 = vld [vmem:[%s9245_s5 + $0x1a8] sm:$0xff] }
 0x138   : > { %v2317_v49 = vpop.f32.mrf.mxu2  ;;  %4283 = vmatpush.bf16.msrb.mxu1 %v7268_v61  ;;  %4835 = vmatpush.bf16.msra.mxu0 %v7299_v33  ;;  %v7286_v61 = vld [vmem:[%s9245_s5 + $0x160] sm:$0xff]  ;;  %v4044_v33 = vrot.slane %v8734_v56, 5 }
 0x139   : > { %v8680_v10 = vadd.f32 %v2317_v49, %v2090_v43  ;;  %v2074_v53 = vpop.f32.mrf.mxu1  ;;  %v8691_v60 = vadd.f32 %v1948_v59, %v1787_v18  ;;  %v3798_v59 = vrot.slane %v3797_v48, 4  ;;  %v3802_v43 = vrot.slane %v3800_v51, 5  ;;  %v7274_v51 = vld [vmem:[%s9245_s5 + $0x100] sm:$0xff]  ;;  %4701 = vmatpush.bf16.msra.mxu3 %v7286_v61 }
 0x13a   : > { %v2091_v1 = vadd.f32 %v2074_v53, %v8587_v31  ;;  %v4032_v31 = vrot.slane %v8671_v6, 5  ;;  %v3789_v6 = vsel %vm7511_vm4, %v3784_v9, %v3788_v11  ;;  %v4037_v18 = vsel %vm7527_vm5, %v6608_v39, %v4036_v16  ;;  %4531 = vmatpush.bf16.msrb.mxu2 %v7274_v51 }
 0x13b   : > { %v1951_v27 = vpop.f32.mrf.mxu0  ;;  %3193 = vmatmul.bf16.gmra.mxu3 %v6350_v34  ;;  %v3803_v8 = vsel %vm7511_vm4, %v3798_v59, %v3802_v43  ;;  %v3814_v48 = vshll.u32 %v8714_v25, 16  ;;  %v3531_v53 = vunpack.c.l.b16 %v3500_v29  ;;  %v4080_v47 = vunpack.c.l.b16 %v4037_v18  ;;  %v6735_v18 = vld [vmem:[%s8596_s13 + $0x8] sm:$0xf] }
 0x13c   : > { %3603 = vmatmul.bf16.gmra.mxu1 %v3535_v62  ;;  %v4033_v7 = vsel %vm7527_vm5, %v6607_v5, %v4032_v31  ;;  %v6454_v62 = vld [vmem:[%s7966_s9 + $0x48] sm:$0xe]  ;;  %v3906_v58 = vunpack.c.l.b16 %v3803_v8  ;;  %v3812_v9 = vrot.slane %v3811_v40, 4  ;;  %v4008_v5 = vld [vmem:[%s8596_s13 + $0x10] sm:$0xe]  ;;  %4836 = vmatpush.bf16.msra.mxu0 %v7298_v23  ;;  %v8790_v40 = vld [vmem:[%s9245_s5 + $0x238] sm:$0xff] }
 0x13d   : > { %3736 = vmatmul.bf16.gmra.mxu2 %v6518_v37  ;;  %v6453_v37 = vld [vmem:[%s7966_s9 + $0x40] sm:$0xe]  ;;  %4284 = vmatpush.bf16.msrb.mxu1 %v7267_v32  ;;  %v4079_v42 = vunpack.c.l.b16 %v4033_v7  ;;  %v6462_v3 = vrot.slane %v6454_v62, 9  ;;  %v3816_v11 = vrot.slane %v3814_v48, 5  ;;  %v4009_v31 = vld [vmem:[%s8596_s13 + $0x18] sm:$0xe] }
 0x13e   : > { %3439 = vmatmul.bf16.gmra.mxu0 %v3363_v57  ;;  %v1777_v17 = vpop.f32.mrf.mxu3  ;;  %v3905_v57 = vunpack.c.l.b16 %v3789_v6  ;;  %v6461_v2 = vrot.slane %v6453_v37, 9  ;;  %v6609_v8 = vrot.slane %v4008_v5, 9  ;;  %v6610_v32 = vrot.slane %v4009_v31, 9  ;;  %v6737_v62 = vld [vmem:[%s8596_s13 + $0x10] sm:$0xf]  ;;  %5253 = vmatpush.bf16.msra.mxu2 %v8790_v40 }
 0x13f   : > { %v1788_v38 = vadd.f32 %v1777_v17, %v8573_v35  ;;  %v3821_v35 = vrot.slane %v3819_v12, 4  ;;  %v3536_v12 = vpack.c.b16 %v3531_v53, %v3530_v46  ;;  %v4087_v15 = vpack.c.b16 %v4080_v47, %v4079_v42  ;;  %v8800_v42 = vld [vmem:[%s8596_s13 + $0x24] sm:$0x1]  ;;  %v7237_v31 = vld [vmem:[%s8596_s13 + $0x34] sm:$0xf0]  ;;  %v8830_v23 = vld [vmem:[%s9245_s5 + $0x230] sm:$0xff] }
 0x140   : > { %v2320_v44 = vpop.f32.mrf.mxu2  ;;  %v3913_v14 = vpack.c.b16 %v3906_v58, %v3905_v57  ;;  %v8764_v21 = vsel %vm7527_vm5, %v6461_v2, %v3503_v13  ;;  %v8768_v20 = vsel %vm7527_vm5, %v6462_v3, %v3507_v30  ;;  %v3817_v6 = vsel %vm7511_vm4, %v3812_v9, %v3816_v11  ;;  %v8808_v2 = vld [vmem:[%s8596_s13 + $0x2c] sm:$0x1]  ;;  %v8816_v30 = vld [vmem:[%s9245_s5 + $0x1f8] sm:$0xff]  ;;  %v6525_v9 = vld [vmem:[%s8596_s13 + $0x30] sm:$0xf] }
 0x141   : > { %v8716_v28 = vadd.f32 %v2320_v44, %v2091_v1  ;;  %v2076_v34 = vpop.f32.mrf.mxu1  ;;  %v8730_v49 = vadd.f32 %v1951_v27, %v1788_v38  ;;  %v3825_v27 = vor.u32 %v3824_v54, %v3821_v35  ;;  %v3828_v1 = vshll.u32 %v8734_v56, 16  ;;  %4285 = vmatpush.bf16.msrb.mxu1 %v7266_v22  ;;  %v3770_v54 = vld [vmem:[%s8596_s13 + $0x28] sm:$0xf]  ;;  %v7285_v56 = vld [vmem:[%s9245_s5 + $0x158] sm:$0xff]  ;;  %v7284_v22 = vld [vmem:[%s9245_s5 + $0x150] sm:$0xff] }
 0x142   : > { %v2092_v45 = vadd.f32 %v2076_v34, %v8624_v55  ;;  %v6521_v55 = vld [vmem:[%s8596_s13 + $0x20] sm:$0xf]  ;;  %v4040_v35 = vrot.slane %v8714_v25, 5  ;;  %v3533_v37 = vunpack.c.l.b16 %v8768_v20  ;;  %v8792_v51 = vunpack.c.l.b16 %v3817_v6  ;;  %4702 = vmatpush.bf16.msra.mxu3 %v7285_v56  ;;  %5254 = vmatpush.bf16.msra.mxu2 %v8830_v23 }
 0x143   : > { %v1953_v41 = vpop.f32.mrf.mxu0  ;;  %v6522_v16 = vor.u32 %v7236_v26, %v6521_v55  ;;  %v3826_v63 = vrot.slane %v3825_v27, 4  ;;  %v3830_v19 = vrot.slane %v3828_v1, 5  ;;  %v4332_v46 = vshrl.u32 %v6735_v18, 16 }
 0x144   : > { %v4041_v61 = vsel %vm7527_vm5, %v6609_v8, %v4040_v35  ;;  %v4335_v53 = vshll.u32 %v6735_v18, 16  ;;  %v4045_v55 = vsel %vm7527_vm5, %v6610_v32, %v4044_v33  ;;  %v4346_v13 = vshrl.u32 %v6737_v62, 16  ;;  %v4010_v8 = vld [vmem:[%s8596_s13 + $0x20] sm:$0xe]  ;;  %v8840_v35 = vld [vmem:[%s8596_s13 + $0x14] sm:$0x1] }
 0x145   : > { %v3831_v25 = vsel %vm7511_vm4, %v3826_v63, %v3830_v19  ;;  %v4349_v3 = vshll.u32 %v6737_v62, 16  ;;  %v4081_v11 = vunpack.c.l.b16 %v4041_v61  ;;  %7349 = vmatpush.bf16.msra.mxu1 %v8816_v30  ;;  %v6611_v56 = vrot.slane %v4010_v8, 9  ;;  %v7295_v8 = vld [vmem:[%s9245_s5 + $0x188] sm:$0xff] }
 0x146   : > { %v1779_v50 = vpop.f32.mrf.mxu3  ;;  %v8805_v26 = vunpack.c.l.b16 %v3831_v25  ;;  %v4337_v63 = vrot.slane %v4335_v53, 5  ;;  %v4348_v20 = vrot.slane %v4346_v13, 4  ;;  %4703 = vmatpush.bf16.msra.mxu3 %v7284_v22  ;;  %v4355_v61 = vshll.u32 %v8840_v35, 16 }
 0x147   : > { %v1789_v59 = vadd.f32 %v1779_v50, %v8615_v24  ;;  %v3768_v24 = vld [vmem:[%s8596_s13 + $0x20] sm:$0xf]  ;;  %v4351_v19 = vrot.slane %v4349_v3, 5 }
 0x148   : > { %v2322_v43 = vpop.f32.mrf.mxu2  ;;  %v3833_v34 = vshrl.u32 %v3768_v24, 16  ;;  %v3836_v7 = vshll.u32 %v3768_v24, 16  ;;  %v3842_v24 = vshll.u32 %v8800_v42, 16  ;;  %v3914_v32 = vpack.c.b16 %v8805_v26, %v8792_v51  ;;  %v7296_v51 = vld [vmem:[%s9245_s5 + $0x190] sm:$0xff] }
 0x149   : > { %v8753_v39 = vadd.f32 %v2322_v43, %v2092_v45  ;;  %v2079_v17 = vpop.f32.mrf.mxu1  ;;  %v8770_v38 = vadd.f32 %v1953_v41, %v1789_v59  ;;  %v3847_v41 = vshrl.u32 %v3770_v54, 16  ;;  %v3850_v45 = vshll.u32 %v3770_v54, 16 }
 0x14a   : > { %v2093_v44 = vadd.f32 %v2079_v17, %v8653_v4  ;;  %v3532_v4 = vunpack.c.l.b16 %v8764_v21  ;;  %v3835_v47 = vrot.slane %v3833_v34, 4  ;;  %v3838_v27 = vrot.slane %v3836_v7, 5  ;;  %v8835_v21 = vld [vmem:[%s8596_s13 + $0xc] sm:$0x1]  ;;  %v4011_v34 = vld [vmem:[%s8596_s13 + $0x28] sm:$0xe] }
 0x14b   : > { %v2624_v29 = vpop.f32.mrf.mxu0  ;;  %3977 = vmatmul.bf16.vlgmr.msrb.gmra.mxu3 %v3913_v14  ;;  %v3849_v43 = vrot.slane %v3847_v41, 4  ;;  %v3856_v17 = vshll.u32 %v8808_v2, 16  ;;  %v4341_v18 = vshll.u32 %v8835_v21, 16  ;;  %v3844_v62 = vrot.slane %v3842_v24, 5 }
 0x14c   : > { %3608 = vmatmul.bf16.gmra.mxu1 %v3536_v12  ;;  %v3852_v12 = vrot.slane %v3850_v45, 5  ;;  %v4052_v26 = vrot.slane %v8808_v2, 5 }
 0x14d   : > { %3741 = vmatmul.bf16.gmra.mxu2 %v6522_v16  ;;  %v4082_v16 = vunpack.c.l.b16 %v4045_v55  ;;  %v4343_v3 = vrot.slane %v4341_v18, 5 }
 0x14e   : > { %4151 = vmatmul.bf16.vlgmr.msrb.gmra.mxu0 %v4087_v15  ;;  %v2489_v48 = vpop.f32.mrf.mxu3  ;;  %v4334_v15 = vrot.slane %v4332_v46, 4  ;;  %v3853_v6 = vor.u32 %v3852_v12, %v3849_v43  ;;  %v8856_v46 = vld [vmem:[%s9245_s5 + $0x1f0] sm:$0xff]  ;;  %v7283_v43 = vld [vmem:[%s9245_s5 + $0x148] sm:$0xff] }
 0x14f   : > { %v2509_v58 = vadd.f32 %v2489_v48, %v8641_v36  ;;  %v7297_v36 = vld [vmem:[%s9245_s5 + $0x198] sm:$0xff]  ;;  %v4088_v33 = vpack.c.b16 %v4082_v16, %v4081_v11  ;;  %v4352_v48 = vor.u32 %v4351_v19, %v4348_v20  ;;  %7350 = vmatpush.bf16.msra.mxu1 %v8856_v46  ;;  %v8877_v12 = vld [vmem:[%s9245_s5 + $0x228] sm:$0xff]  ;;  %4704 = vmatpush.bf16.msra.mxu3 %v7283_v43 }
 0x150   : > { %v2325_v57 = vpop.f32.mrf.mxu2  ;;  %4837 = vmatpush.bf16.msra.mxu0 %v7297_v36  ;;  %v4338_v7 = vor.u32 %v4337_v63, %v4334_v15  ;;  %v6739_v11 = vld [vmem:[%s8596_s13 + $0x18] sm:$0xf]  ;;  %v6741_v63 = vld [vmem:[%s8596_s13 + $0x20] sm:$0xf]  ;;  %5255 = vmatpush.bf16.msra.mxu2 %v8877_v12 }
 0x151   : > { %v8803_v1 = vadd.f32 %v2325_v57, %v2093_v44  ;;  %v2081_v50 = vpop.f32.mrf.mxu1  ;;  %v8819_v59 = vadd.f32 %v2624_v29, %v2509_v58  ;;  %v3537_v44 = vpack.c.b16 %v3533_v37, %v3532_v4  ;;  %v6526_v29 = vor.u32 %v7237_v31, %v6525_v9  ;;  %v3772_v9 = vld [vmem:[%s8596_s13 + $0x30] sm:$0xf] }
 0x152   : > { %v2094_v14 = vadd.f32 %v2081_v50, %v8691_v60  ;;  %v3839_v60 = vor.u32 %v3838_v27, %v3835_v47  ;;  %v3858_v4 = vrot.slane %v3856_v17, 5  ;;  %v4048_v57 = vrot.slane %v8800_v42, 5 }
 0x153   : > { %v2626_v5 = vpop.f32.mrf.mxu0  ;;  %v6612_v58 = vrot.slane %v4011_v34, 9  ;;  %v4339_v13 = vrot.slane %v4338_v7, 4  ;;  %v4353_v36 = vrot.slane %v4352_v48, 4  ;;  %v4357_v50 = vrot.slane %v4355_v61, 5  ;;  %v6689_v48 = vld [vmem:[%s8596_s13 + $0x8] sm:$0xf] }
 0x154   : > { %v3840_v45 = vrot.slane %v3839_v60, 4  ;;  %4838 = vmatpush.bf16.msra.mxu0 %v7296_v51  ;;  %v4049_v31 = vsel %vm7527_vm5, %v6611_v56, %v4048_v57  ;;  %v3861_v24 = vshrl.u32 %v3772_v9, 16  ;;  %v3864_v17 = vshll.u32 %v3772_v9, 16  ;;  %v8912_v56 = vld [vmem:[%s9245_s5 + $0x220] sm:$0xff]  ;;  %v8917_v57 = vld [vmem:[%s8596_s13 + $0x34] sm:$0x1] }
 0x155   : > { %v4053_v16 = vsel %vm7527_vm5, %v6612_v58, %v4052_v26  ;;  %v4344_v15 = vsel %vm7511_vm4, %v4339_v13, %v4343_v3  ;;  %v4374_v34 = vshrl.u32 %v6741_v63, 16  ;;  %v4377_v7 = vshll.u32 %v6741_v63, 16  ;;  %v8920_v58 = vld [vmem:[%s8596_s13 + $0x3c] sm:$0x1]  ;;  %5256 = vmatpush.bf16.msra.mxu2 %v8912_v56 }
 0x156   : > { %v2491_v54 = vpop.f32.mrf.mxu3  ;;  %v3845_v42 = vsel %vm7511_vm4, %v3840_v45, %v3844_v62  ;;  %v4083_v45 = vunpack.c.l.b16 %v4049_v31  ;;  %v4084_v62 = vunpack.c.l.b16 %v4053_v16  ;;  %v3863_v61 = vrot.slane %v3861_v24, 4  ;;  %v8924_v26 = vld [vmem:[%s8596_s13 + $0x1c] sm:$0x1] }
 0x157   : > { %v2510_v41 = vadd.f32 %v2491_v54, %v8680_v10  ;;  %v3854_v10 = vrot.slane %v3853_v6, 4  ;;  %v4360_v6 = vshrl.u32 %v6739_v11, 16  ;;  %v3866_v51 = vrot.slane %v3864_v17, 5 }
 0x158   : > { %v2327_v25 = vpop.f32.mrf.mxu2  ;;  %4839 = vmatpush.bf16.msra.mxu0 %v7295_v8  ;;  %v3870_v16 = vshll.u32 %v8917_v57, 16 }
 0x159   : > { %v8847_v37 = vadd.f32 %v2327_v25, %v2094_v14  ;;  %v2084_v53 = vpop.f32.mrf.mxu1  ;;  %v8859_v55 = vadd.f32 %v2626_v5, %v2510_v41  ;;  %v3859_v2 = vsel %vm7511_vm4, %v3854_v10, %v3858_v4  ;;  %v8879_v5 = vunpack.c.l.b16 %v3845_v42  ;;  %v7282_v4 = vld [vmem:[%s9245_s5 + $0x140] sm:$0xff] }
 0x15a   : > { %v2095_v47 = vadd.f32 %v2084_v53, %v8730_v49  ;;  %v3774_v49 = vld [vmem:[%s8596_s13 + $0x38] sm:$0xf]  ;;  %v3910_v41 = vunpack.c.l.b16 %v3859_v2  ;;  %v4460_v53 = vunpack.c.l.b16 %v4344_v15  ;;  %4705 = vmatpush.bf16.msra.mxu3 %v7282_v4  ;;  %v4362_v13 = vrot.slane %v4360_v6, 4  ;;  %v6745_v4 = vld [vmem:[%s8596_s13 + $0x30] sm:$0xf] }
 0x15b   : > { %v2629_v27 = vpop.f32.mrf.mxu0  ;;  %3982 = vmatmul.bf16.gmra.mxu3 %v3914_v32  ;;  %v3875_v20 = vshrl.u32 %v3774_v49, 16  ;;  %v4376_v42 = vrot.slane %v4374_v34, 4  ;;  %v3867_v31 = vor.u32 %v3866_v51, %v3863_v61  ;;  %v3884_v15 = vshll.u32 %v8920_v58, 16  ;;  %v4012_v34 = vld [vmem:[%s8596_s13 + $0x30] sm:$0xe] }
 0x15c   : > { %3613 = vmatmul.bf16.gmra.mxu1 %v3537_v44  ;;  %v4358_v44 = vsel %vm7511_vm4, %v4353_v36, %v4357_v50  ;;  %v4379_v36 = vrot.slane %v4377_v7, 5  ;;  %v3915_v9 = vpack.c.b16 %v3910_v41, %v8879_v5  ;;  %v7294_v5 = vld [vmem:[%s9245_s5 + $0x180] sm:$0xff]  ;;  %v4013_v7 = vld [vmem:[%s8596_s13 + $0x38] sm:$0xe]  ;;  %v6743_v41 = vld [vmem:[%s8596_s13 + $0x28] sm:$0xf] }
 0x15d   : > { %3746 = vmatmul.bf16.gmra.mxu2 %v6526_v29  ;;  %v3878_v29 = vshll.u32 %v3774_v49, 16  ;;  %v4461_v10 = vunpack.c.l.b16 %v4358_v44  ;;  %v4089_v49 = vpack.c.b16 %v4084_v62, %v4083_v45  ;;  %4840 = vmatpush.bf16.msra.mxu0 %v7294_v5  ;;  %v6613_v61 = vrot.slane %v4012_v34, 9 }
 0x15e   : > { %4156 = vmatmul.bf16.gmra.mxu0 %v4088_v33  ;;  %v2494_v14 = vpop.f32.mrf.mxu3  ;;  %v4363_v33 = vshll.u32 %v6739_v11, 16  ;;  %7357 = vmatpush.bf16.msrb.mxu3 %v8790_v40  ;;  %v8929_v11 = vld [vmem:[%s8596_s13 + $0x24] sm:$0x1]  ;;  %v4369_v40 = vshll.u32 %v8924_v26, 16  ;;  %v6614_v51 = vrot.slane %v4013_v7, 9 }
 0x15f   : > { %v2511_v60 = vadd.f32 %v2494_v14, %v8716_v28  ;;  %v8900_v28 = vld [vmem:[%s9245_s5 + $0x1e8] sm:$0xff]  ;;  %v4383_v44 = vshll.u32 %v8929_v11, 16 }
 0x160   : > { %v2330_v22 = vpop.f32.mrf.mxu2  ;;  %7351 = vmatpush.bf16.msra.mxu1 %v8900_v28  ;;  %v4365_v3 = vrot.slane %v4363_v33, 5  ;;  %v3872_v33 = vrot.slane %v3870_v16, 5 }
 0x161   : > { %v8890_v19 = vadd.f32 %v2330_v22, %v2095_v47  ;;  %v2086_v54 = vpop.f32.mrf.mxu1  ;;  %v8902_v32 = vadd.f32 %v2629_v27, %v2511_v60  ;;  %v3877_v47 = vrot.slane %v3875_v20, 4  ;;  %v3880_v27 = vrot.slane %v3878_v29, 5  ;;  %5079 = vmatpush.bf16.msrb.mxu0 %v8816_v30 }
 0x162   : > { %v2096_v18 = vadd.f32 %v2086_v54, %v8770_v38  ;;  %v7262_v38 = vld [vmem:[%s8596_s13 + $0xc] sm:$0xf0]  ;;  %v4468_v22 = vpack.c.b16 %v4461_v10, %v4460_v53  ;;  %v4366_v17 = vor.u32 %v4365_v3, %v4362_v13  ;;  %v4380_v20 = vor.u32 %v4379_v36, %v4376_v42  ;;  %7358 = vmatpush.bf16.msrb.mxu3 %v8830_v23 }
 0x163   : > { %v2631_v25 = vpop.f32.mrf.mxu0  ;;  %v6690_v2 = vor.u32 %v7262_v38, %v6689_v48  ;;  %v3881_v60 = vor.u32 %v3880_v27, %v3877_v47  ;;  %v3868_v54 = vrot.slane %v3867_v31, 4  ;;  %v4371_v23 = vrot.slane %v4369_v40, 5  ;;  %v7313_v48 = vld [vmem:[%s9245_s5 + $0x218] sm:$0xff]  ;;  %v7312_v31 = vld [vmem:[%s9245_s5 + $0x210] sm:$0xff] }
 0x164   : > { %v4367_v45 = vrot.slane %v4366_v17, 4  ;;  %v4385_v62 = vrot.slane %v4383_v44, 5  ;;  %v4056_v30 = vrot.slane %v8917_v57, 5  ;;  %v4060_v53 = vrot.slane %v8920_v58, 5  ;;  %5257 = vmatpush.bf16.msra.mxu2 %v7313_v48 }
 0x165   : > { %v3873_v27 = vsel %vm7511_vm4, %v3868_v54, %v3872_v33  ;;  %v4388_v13 = vshrl.u32 %v6743_v41, 16  ;;  %v4391_v3 = vshll.u32 %v6743_v41, 16  ;;  %5080 = vmatpush.bf16.msrb.mxu0 %v8856_v46  ;;  %v4402_v57 = vshrl.u32 %v6745_v4, 16 }
 0x166   : > { %v2496_v50 = vpop.f32.mrf.mxu3  ;;  %7359 = vmatpush.bf16.msrb.mxu3 %v8877_v12  ;;  %v4405_v36 = vshll.u32 %v6745_v4, 16  ;;  %v3911_v16 = vunpack.c.l.b16 %v3873_v27 }
 0x167   : > { %v2512_v14 = vadd.f32 %v2496_v50, %v8753_v39  ;;  %v8943_v39 = vld [vmem:[%s9245_s5 + $0x1e0] sm:$0xff]  ;;  %v4372_v50 = vsel %vm7511_vm4, %v4367_v45, %v4371_v23  ;;  %v4393_v40 = vrot.slane %v4391_v3, 5  ;;  %v4404_v17 = vrot.slane %v4402_v57, 4 }
 0x168   : > { %v2332_v43 = vpop.f32.mrf.mxu2  ;;  %7352 = vmatpush.bf16.msra.mxu1 %v8943_v39  ;;  %5258 = vmatpush.bf16.msra.mxu2 %v7312_v31 }
 0x169   : > { %v8934_v63 = vadd.f32 %v2332_v43, %v2096_v18  ;;  %v2870_v24 = vpop.f32.mrf.mxu1  ;;  %v8946_v29 = vadd.f32 %v2631_v25, %v2512_v14  ;;  %v3882_v18 = vrot.slane %v3881_v60, 4  ;;  %v3886_v25 = vrot.slane %v3884_v15, 5  ;;  %5081 = vmatpush.bf16.msrb.mxu0 %v8900_v28 }
 0x16a   : > { %v2890_v8 = vadd.f32 %v2870_v24, %v8819_v59  ;;  %v4381_v59 = vrot.slane %v4380_v20, 4  ;;  %7360 = vmatpush.bf16.msrb.mxu3 %v8912_v56  ;;  %v4057_v43 = vsel %vm7527_vm5, %v6613_v61, %v4056_v30  ;;  %v4061_v14 = vsel %vm7527_vm5, %v6614_v51, %v4060_v53  ;;  %v7263_v56 = vld [vmem:[%s8596_s13 + $0x1c] sm:$0xf0]  ;;  %v8992_v24 = vld [vmem:[%s8596_s13 + $0x2c] sm:$0x1] }
 0x16b   : > { %v2634_v6 = vpop.f32.mrf.mxu0  ;;  %3987 = vmatmul.bf16.gmra.mxu3 %v3915_v9  ;;  %v3887_v12 = vsel %vm7511_vm4, %v3882_v18, %v3886_v25  ;;  %v4390_v60 = vrot.slane %v4388_v13, 4  ;;  %v4407_v20 = vrot.slane %v4405_v36, 5  ;;  %v4085_v44 = vunpack.c.l.b16 %v4057_v43  ;;  %v6747_v51 = vld [vmem:[%s8596_s13 + $0x38] sm:$0xf]  ;;  %v6749_v53 = vld [vmem:[%s8596_s13 + $0x40] sm:$0xf] }
 0x16c   : > { %4286 = vmatmul.bf16.vlgmr.msrb.gmra.mxu1 %v6690_v2  ;;  %v4386_v46 = vsel %vm7511_vm4, %v4381_v59, %v4385_v62  ;;  %v3912_v15 = vunpack.c.l.b16 %v3887_v12  ;;  %v4397_v25 = vshll.u32 %v8992_v24, 16  ;;  %v6799_v62 = vld [vmem:[%s8596_s13 + $0x8] sm:$0xe]  ;;  %v4587_v13 = vrot.slane %v8835_v21, 5 }
 0x16d   : > { %4532 = vmatmul.bf16.vlgmr.msrb.gmra.mxu2 %v4468_v22  ;;  %v6693_v22 = vld [vmem:[%s8596_s13 + $0x18] sm:$0xf]  ;;  %v4463_v5 = vunpack.c.l.b16 %v4386_v46  ;;  %v4394_v18 = vor.u32 %v4393_v40, %v4390_v60  ;;  %5082 = vmatpush.bf16.msrb.mxu0 %v8943_v39  ;;  %v4408_v45 = vor.u32 %v4407_v20, %v4404_v17  ;;  %v6807_v27 = vrot.slane %v6799_v62, 9  ;;  %v7311_v46 = vld [vmem:[%s9245_s5 + $0x208] sm:$0xff]  ;;  %v9036_v17 = vld [vmem:[%s8596_s13 + $0x3c] sm:$0x1] }
 0x16e   : > { %4161 = vmatmul.bf16.gmra.mxu0 %v4089_v49  ;;  %v2499_v38 = vpop.f32.mrf.mxu3  ;;  %7361 = vmatpush.bf16.msrb.mxu3 %v7313_v48  ;;  %v6694_v33 = vor.u32 %v7263_v56, %v6693_v22  ;;  %v3916_v28 = vpack.c.b16 %v3912_v15, %v3911_v16  ;;  %v4591_v36 = vrot.slane %v8840_v35, 5  ;;  %v9039_v20 = vld [vmem:[%s8596_s13 + $0x44] sm:$0x1] }
 0x16f   : > { %v2513_v10 = vadd.f32 %v2499_v38, %v8803_v1  ;;  %v7305_v1 = vld [vmem:[%s9245_s5 + $0x1d8] sm:$0xff]  ;;  %v6800_v38 = vld [vmem:[%s8596_s13 + $0x10] sm:$0xe]  ;;  %v4409_v3 = vrot.slane %v4408_v45, 4  ;;  %v4588_v43 = vsel %vm7527_vm5, %v6807_v27, %v4587_v13  ;;  %5259 = vmatpush.bf16.msra.mxu2 %v7311_v46  ;;  %v4425_v45 = vshll.u32 %v9036_v17, 16  ;;  %v7302_v27 = vld [vmem:[%s9245_s5 + $0x1c0] sm:$0xff] }
 0x170   : > { %v3044_v47 = vpop.f32.mrf.mxu2  ;;  %7353 = vmatpush.bf16.msra.mxu1 %v7305_v1  ;;  %v6808_v57 = vrot.slane %v6800_v38, 9 }
 0x171   : > { %v8966_v42 = vadd.f32 %v3044_v47, %v2890_v8  ;;  %v2872_v58 = vpop.f32.mrf.mxu1  ;;  %v8977_v9 = vadd.f32 %v2634_v6, %v2513_v10  ;;  %v4086_v6 = vunpack.c.l.b16 %v4061_v14  ;;  %v8995_v8 = vld [vmem:[%s8596_s13 + $0x34] sm:$0x1]  ;;  %v4395_v10 = vrot.slane %v4394_v18, 4  ;;  %5083 = vmatpush.bf16.msrb.mxu0 %v7305_v1 }
 0x172   : > { %v2891_v2 = vadd.f32 %v2872_v58, %v8859_v55  ;;  %v4462_v55 = vunpack.c.l.b16 %v4372_v50  ;;  %v4411_v59 = vshll.u32 %v8995_v8, 16  ;;  %7362 = vmatpush.bf16.msrb.mxu3 %v7312_v31  ;;  %v4399_v47 = vrot.slane %v4397_v25, 5  ;;  %v7290_v25 = vld [vmem:[%s8596_s13 + $0x14] sm:$0xf0] }
 0x173   : > { %v2636_v49 = vpop.f32.mrf.mxu0  ;;  %v4090_v48 = vpack.c.b16 %v4086_v6, %v4085_v44  ;;  %v4416_v58 = vshrl.u32 %v6747_v51, 16  ;;  %v4430_v50 = vshrl.u32 %v6749_v53, 16  ;;  %v4592_v16 = vsel %vm7527_vm5, %v6808_v57, %v4591_v36  ;;  %v7310_v6 = vld [vmem:[%s9245_s5 + $0x200] sm:$0xff] }
 0x174   : > { %v4469_v41 = vpack.c.b16 %v4463_v5, %v4462_v55  ;;  %v4413_v12 = vrot.slane %v4411_v59, 5  ;;  %v4400_v14 = vsel %vm7511_vm4, %v4395_v10, %v4399_v47  ;;  %5260 = vmatpush.bf16.msra.mxu2 %v7310_v6  ;;  %v4439_v59 = vshll.u32 %v9039_v20, 16  ;;  %v6802_v47 = vld [vmem:[%s8596_s13 + $0x20] sm:$0xe] }
 0x175   : > { %v4418_v56 = vrot.slane %v4416_v58, 4  ;;  %v4432_v40 = vrot.slane %v4430_v50, 4 }
 0x176   : > { %v2501_v54 = vpop.f32.mrf.mxu3  ;;  %v4414_v31 = vsel %vm7511_vm4, %v4409_v3, %v4413_v12  ;;  %7363 = vmatpush.bf16.msrb.mxu3 %v7311_v46  ;;  %v4427_v12 = vrot.slane %v4425_v45, 5  ;;  %v4441_v57 = vrot.slane %v4439_v59, 5  ;;  %v4595_v46 = vrot.slane %v8924_v26, 5 }
 0x177   : > { %v2514_v34 = vadd.f32 %v2501_v54, %v8847_v37  ;;  %v7304_v37 = vld [vmem:[%s9245_s5 + $0x1d0] sm:$0xff]  ;;  %v4634_v54 = vunpack.c.l.b16 %v4588_v43  ;;  %v4465_v18 = vunpack.c.l.b16 %v4414_v31 }
 0x178   : > { %v3046_v7 = vpop.f32.mrf.mxu2  ;;  %7354 = vmatpush.bf16.msra.mxu1 %v7304_v37  ;;  %5084 = vmatpush.bf16.msrb.mxu0 %v7304_v37 }
 0x179   : > { %v9000_v23 = vadd.f32 %v3046_v7, %v2891_v2  ;;  %v2875_v4 = vpop.f32.mrf.mxu1  ;;  %v9008_v61 = vadd.f32 %v2636_v49, %v2514_v34  ;;  %v4433_v2 = vshll.u32 %v6749_v53, 16  ;;  %v6697_v34 = vld [vmem:[%s8596_s13 + $0x28] sm:$0xf]  ;;  %v7264_v7 = vld [vmem:[%s8596_s13 + $0x2c] sm:$0xf0] }
 0x17a   : > { %v2892_v39 = vadd.f32 %v2875_v4, %v8902_v32  ;;  %v4419_v32 = vshll.u32 %v6747_v51, 16  ;;  %7364 = vmatpush.bf16.msrb.mxu3 %v7310_v6  ;;  %v6698_v51 = vor.u32 %v7264_v7, %v6697_v34  ;;  %v6701_v7 = vld [vmem:[%s8596_s13 + $0x38] sm:$0xf] }
 0x17b   : > { %v2639_v30 = vpop.f32.mrf.mxu0  ;;  %3992 = vmatmul.bf16.gmra.mxu3 %v3916_v28  ;;  %v4435_v44 = vrot.slane %v4433_v2, 5  ;;  %v4464_v28 = vunpack.c.l.b16 %v4400_v14  ;;  %v4599_v2 = vrot.slane %v8929_v11, 5 }
 0x17c   : > { %4291 = vmatmul.bf16.gmra.mxu1 %v6694_v33  ;;  %v4421_v60 = vrot.slane %v4419_v32, 5  ;;  %v4635_v33 = vunpack.c.l.b16 %v4592_v16 }
 0x17d   : > { %4537 = vmatmul.bf16.gmra.mxu2 %v4469_v41  ;;  %v4436_v37 = vor.u32 %v4435_v44, %v4432_v40  ;;  %v4470_v53 = vpack.c.b16 %v4465_v18, %v4464_v28  ;;  %v7265_v28 = vld [vmem:[%s8596_s13 + $0x3c] sm:$0xf0] }
 0x17e   : > { %4166 = vmatmul.bf16.gmra.mxu0 %v4090_v48  ;;  %v2504_v49 = vpop.f32.mrf.mxu3  ;;  %v4422_v41 = vor.u32 %v4421_v60, %v4418_v56  ;;  %v4642_v38 = vpack.c.b16 %v4635_v33, %v4634_v54 }
 0x17f   : > { %v2515_v21 = vadd.f32 %v2504_v49, %v8890_v19  ;;  %v7303_v19 = vld [vmem:[%s9245_s5 + $0x1c8] sm:$0xff]  ;;  %v4437_v32 = vrot.slane %v4436_v37, 4  ;;  %v6810_v49 = vrot.slane %v6802_v47, 9 }
 0x180   : > { %v3049_v1 = vpop.f32.mrf.mxu2  ;;  %7355 = vmatpush.bf16.msra.mxu1 %v7303_v19  ;;  %5085 = vmatpush.bf16.msrb.mxu0 %v7303_v19  ;;  %v4423_v3 = vrot.slane %v4422_v41, 4  ;;  %v9085_v41 = vld [vmem:[%s8596_s13 + $0x2c] sm:$0x1] }
 0x181   : > { %v9021_v35 = vadd.f32 %v3049_v1, %v2892_v39  ;;  %v2877_v15 = vpop.f32.mrf.mxu1  ;;  %v9032_v22 = vadd.f32 %v2639_v30, %v2515_v21  ;;  %v6801_v30 = vld [vmem:[%s8596_s13 + $0x18] sm:$0xe]  ;;  %v6939_v21 = vld [vmem:[%s8596_s13 + $0x20] sm:$0xf]  ;;  %v6941_v1 = vld [vmem:[%s8596_s13 + $0x28] sm:$0xf]  ;;  %v4442_v14 = vsel %vm7511_vm4, %v4437_v32, %v4441_v57  ;;  %v4600_v11 = vsel %vm7527_vm5, %v6810_v49, %v4599_v2 }
 0x182   : > { %v2893_v5 = vadd.f32 %v2877_v15, %v8946_v29  ;;  %v6889_v29 = vld [vmem:[%s8596_s13 + $0x10] sm:$0xf]  ;;  %v6809_v50 = vrot.slane %v6801_v30, 9  ;;  %v4915_v19 = vshrl.u32 %v6939_v21, 16  ;;  %v4918_v15 = vshll.u32 %v6939_v21, 16 }
 0x183   : > { %v2641_v55 = vpop.f32.mrf.mxu0  ;;  %v6890_v10 = vor.u32 %v7290_v25, %v6889_v29  ;;  %v4929_v60 = vshrl.u32 %v6941_v1, 16  ;;  %v4932_v40 = vshll.u32 %v6941_v1, 16  ;;  %v4467_v54 = vunpack.c.l.b16 %v4442_v14  ;;  %v9082_v25 = vld [vmem:[%s8596_s13 + $0x24] sm:$0x1]  ;;  %v7291_v30 = vld [vmem:[%s8596_s13 + $0x24] sm:$0xf0] }
 0x184   : > { %7356 = vmatpush.bf16.msra.mxu1 %v7302_v27  ;;  %5086 = vmatpush.bf16.msrb.mxu0 %v7302_v27  ;;  %v4596_v26 = vsel %vm7527_vm5, %v6809_v50, %v4595_v46  ;;  %v4637_v34 = vunpack.c.l.b16 %v4600_v11  ;;  %v4917_v18 = vrot.slane %v4915_v19, 4  ;;  %v4920_v29 = vrot.slane %v4918_v15, 5  ;;  %v9098_v50 = vld [vmem:[%s8596_s13 + $0x14] sm:$0x1]  ;;  %v9104_v2 = vld [vmem:[%s8596_s13 + $0x1c] sm:$0x1] }
 0x185   : > { %v4636_v33 = vunpack.c.l.b16 %v4596_v26  ;;  %v4931_v45 = vrot.slane %v4929_v60, 4  ;;  %v4934_v59 = vrot.slane %v4932_v40, 5  ;;  %v4924_v47 = vshll.u32 %v9082_v25, 16  ;;  %v6999_v21 = vld [vmem:[%s8596_s13 + $0x10] sm:$0xe] }
 0x186   : > { %v2506_v62 = vpop.f32.mrf.mxu3  ;;  %v4938_v27 = vshll.u32 %v9085_v41, 16  ;;  %v4603_v57 = vrot.slane %v8992_v24, 5  ;;  %v7000_v1 = vld [vmem:[%s8596_s13 + $0x18] sm:$0xe]  ;;  %v6943_v14 = vld [vmem:[%s8596_s13 + $0x30] sm:$0xf] }
 0x187   : > { %v2516_v4 = vadd.f32 %v2506_v62, %v8934_v63  ;;  %v6803_v62 = vld [vmem:[%s8596_s13 + $0x28] sm:$0xe]  ;;  %v6945_v11 = vld [vmem:[%s8596_s13 + $0x38] sm:$0xf]  ;;  %v7007_v19 = vrot.slane %v6999_v21, 9  ;;  %v5142_v15 = vrot.slane %v9098_v50, 5 }
 0x188   : > { %v3051_v48 = vpop.f32.mrf.mxu2  ;;  %v7008_v60 = vrot.slane %v7000_v1, 9  ;;  %v5146_v40 = vrot.slane %v9104_v2, 5 }
 0x189   : > { %v9052_v39 = vadd.f32 %v3051_v48, %v2893_v5  ;;  %v2880_v13 = vpop.f32.mrf.mxu1  ;;  %v9058_v63 = vadd.f32 %v2641_v55, %v2516_v4  ;;  %v4643_v48 = vpack.c.b16 %v4637_v34, %v4636_v33  ;;  %v4957_v33 = vshrl.u32 %v6945_v11, 16 }
 0x18a   : > { %v2894_v36 = vadd.f32 %v2880_v13, %v8977_v9  ;;  %v4428_v9 = vsel %vm7511_vm4, %v4423_v3, %v4427_v12  ;;  %v6804_v3 = vld [vmem:[%s8596_s13 + $0x30] sm:$0xe]  ;;  %v6811_v12 = vrot.slane %v6803_v62, 9  ;;  %v4960_v34 = vshll.u32 %v6945_v11, 16 }
 0x18b   : > { %v3425_v58 = vpop.f32.mrf.mxu0  ;;  %4706 = vmatmul.bf16.vlgmr.msra.gmra.mxu3 %v4642_v38  ;;  %v4466_v5 = vunpack.c.l.b16 %v4428_v9  ;;  %v6893_v38 = vld [vmem:[%s8596_s13 + $0x20] sm:$0xf]  ;;  %v4607_v9 = vrot.slane %v8995_v8, 5  ;;  %v4943_v8 = vshrl.u32 %v6943_v14, 16 }
 0x18c   : > { %4296 = vmatmul.bf16.gmra.mxu1 %v6698_v51  ;;  %v6894_v32 = vor.u32 %v7291_v30, %v6893_v38  ;;  %v4604_v26 = vsel %vm7527_vm5, %v6811_v12, %v4603_v57  ;;  %v9132_v30 = vld [vmem:[%s8596_s13 + $0x34] sm:$0x1]  ;;  %v6805_v57 = vld [vmem:[%s8596_s13 + $0x38] sm:$0xe] }
 0x18d   : > { %4542 = vmatmul.bf16.gmra.mxu2 %v4470_v53  ;;  %v4471_v4 = vpack.c.b16 %v4467_v54, %v4466_v5  ;;  %v4946_v5 = vshll.u32 %v6943_v14, 16  ;;  %v4952_v21 = vshll.u32 %v9132_v30, 16  ;;  %v4611_v14 = vrot.slane %v9036_v17, 5 }
 0x18e   : > { %4841 = vmatmul.bf16.vlgmr.msra.gmra.mxu0 %v6890_v10  ;;  %v3179_v43 = vpop.f32.mrf.mxu3  ;;  %v4921_v10 = vor.u32 %v4920_v29, %v4917_v18 }
 0x18f   : > { %v3199_v16 = vadd.f32 %v3179_v43, %v8966_v42  ;;  %v6812_v43 = vrot.slane %v6804_v3, 9  ;;  %v4948_v38 = vrot.slane %v4946_v5, 5 }
 0x190   : > { %v3054_v31 = vpop.f32.mrf.mxu2  ;;  %v4922_v24 = vrot.slane %v4921_v10, 4  ;;  %v4962_v10 = vrot.slane %v4960_v34, 5 }
 0x191   : > { %v9074_v56 = vadd.f32 %v3054_v31, %v2894_v36  ;;  %v2882_v55 = vpop.f32.mrf.mxu1  ;;  %v9076_v44 = vadd.f32 %v3425_v58, %v3199_v16  ;;  %v4935_v36 = vor.u32 %v4934_v59, %v4931_v45  ;;  %v4926_v31 = vrot.slane %v4924_v47, 5 }
 0x192   : > { %v2895_v6 = vadd.f32 %v2882_v55, %v9008_v61  ;;  %v6702_v61 = vor.u32 %v7265_v28, %v6701_v7  ;;  %v4608_v54 = vsel %vm7527_vm5, %v6812_v43, %v4607_v9  ;;  %v4638_v28 = vunpack.c.l.b16 %v4604_v26 }
 0x193   : > { %v3427_v42 = vpop.f32.mrf.mxu0  ;;  %v4936_v16 = vrot.slane %v4935_v36, 4  ;;  %v4927_v18 = vsel %vm7511_vm4, %v4922_v24, %v4926_v31  ;;  %v5147_v59 = vsel %vm7527_vm5, %v7008_v60, %v5146_v40  ;;  %v6897_v36 = vld [vmem:[%s8596_s13 + $0x30] sm:$0xf]  ;;  %v6813_v24 = vrot.slane %v6805_v57, 9  ;;  %v7001_v60 = vld [vmem:[%s8596_s13 + $0x20] sm:$0xe] }
 0x194   : > { %v5017_v47 = vunpack.c.l.b16 %v4927_v18  ;;  %v5190_v12 = vunpack.c.l.b16 %v5147_v59  ;;  %v7002_v40 = vld [vmem:[%s8596_s13 + $0x28] sm:$0xe]  ;;  %v7009_v34 = vrot.slane %v7001_v60, 9 }
 0x195   : > { %v7010_v18 = vrot.slane %v7002_v40, 9 }
 0x196   : > { %v3181_v37 = vpop.f32.mrf.mxu3 }
 0x197   : > { %v3200_v53 = vadd.f32 %v3181_v37, %v9000_v23 }
 0x198   : > { %v3056_v51 = vpop.f32.mrf.mxu2 }
 0x199   : > { %v9093_v13 = vadd.f32 %v3056_v51, %v2895_v6  ;;  %v2885_v58 = vpop.f32.mrf.mxu1  ;;  %v9100_v23 = vadd.f32 %v3427_v42, %v3200_v53  ;;  %v9135_v51 = vld [vmem:[%s8596_s13 + $0x3c] sm:$0x1]  ;;  %v4959_v53 = vrot.slane %v4957_v33, 4 }
 0x19a   : > { %v2896_v46 = vadd.f32 %v2885_v58, %v9032_v22  ;;  %v4940_v22 = vrot.slane %v4938_v27, 5  ;;  %v4966_v1 = vshll.u32 %v9135_v51, 16 }
 0x19b   : > { %v3430_v49 = vpop.f32.mrf.mxu0  ;;  %4711 = vmatmul.bf16.gmra.mxu3 %v4643_v48  ;;  %v4945_v48 = vrot.slane %v4943_v8, 4  ;;  %v4963_v26 = vor.u32 %v4962_v10, %v4959_v53 }
 0x19c   : > { %4301 = vmatmul.bf16.gmra.mxu1 %v6702_v61  ;;  %v4941_v45 = vsel %vm7511_vm4, %v4936_v16, %v4940_v22  ;;  %v4968_v33 = vrot.slane %v4966_v1, 5 }
 0x19d   : > { %4547 = vmatmul.bf16.gmra.mxu2 %v4471_v4  ;;  %v4639_v4 = vunpack.c.l.b16 %v4608_v54  ;;  %v5018_v27 = vunpack.c.l.b16 %v4941_v45  ;;  %v4964_v54 = vrot.slane %v4963_v26, 4 }
 0x19e   : > { %4846 = vmatmul.bf16.gmra.mxu0 %v6894_v32  ;;  %v3184_v55 = vpop.f32.mrf.mxu3  ;;  %v7292_v32 = vld [vmem:[%s8596_s13 + $0x34] sm:$0xf0] }
 0x19f   : > { %v3201_v42 = vadd.f32 %v3184_v55, %v9021_v35  ;;  %v5143_v35 = vsel %vm7527_vm5, %v7007_v19, %v5142_v15  ;;  %v5024_v16 = vpack.c.b16 %v5018_v27, %v5017_v47  ;;  %v6898_v19 = vor.u32 %v7292_v32, %v6897_v36 }
 0x1a0   : > { %v3059_v6 = vpop.f32.mrf.mxu2  ;;  %v5189_v3 = vunpack.c.l.b16 %v5143_v35 }
 0x1a1   : > { %v9118_v7 = vadd.f32 %v3059_v6, %v2896_v46  ;;  %v2887_v29 = vpop.f32.mrf.mxu1  ;;  %v9128_v62 = vadd.f32 %v3430_v49, %v3201_v42  ;;  %v6806_v46 = vld [vmem:[%s8596_s13 + $0x40] sm:$0xe]  ;;  %v4949_v49 = vor.u32 %v4948_v38, %v4945_v48  ;;  %v4954_v6 = vrot.slane %v4952_v21, 5  ;;  %v6937_v38 = vld [vmem:[%s8596_s13 + $0x18] sm:$0xf] }
 0x1a2   : > { %v2897_v37 = vadd.f32 %v2887_v29, %v9058_v63  ;;  %v4644_v63 = vpack.c.b16 %v4639_v4, %v4638_v28  ;;  %v5197_v22 = vpack.c.b16 %v5190_v12, %v5189_v3  ;;  %v6814_v15 = vrot.slane %v6806_v46, 9  ;;  %v6947_v29 = vld [vmem:[%s8596_s13 + $0x40] sm:$0xf] }
 0x1a3   : > { %v3432_v61 = vpop.f32.mrf.mxu0  ;;  %v4950_v17 = vrot.slane %v4949_v49, 4  ;;  %v4612_v42 = vsel %vm7527_vm5, %v6813_v24, %v4611_v14  ;;  %v5150_v28 = vrot.slane %v9082_v25, 5  ;;  %v4969_v25 = vsel %vm7511_vm4, %v4964_v54, %v4968_v33 }
 0x1a4   : > { %v4640_v59 = vunpack.c.l.b16 %v4612_v42  ;;  %v4974_v53 = vshll.u32 %v6947_v29, 16  ;;  %v4901_v49 = vshrl.u32 %v6937_v38, 16  ;;  %v4904_v21 = vshll.u32 %v6937_v38, 16 }
 0x1a5   : > { %v5151_v47 = vsel %vm7527_vm5, %v7009_v34, %v5150_v28  ;;  %v5020_v24 = vunpack.c.l.b16 %v4969_v25  ;;  %v4896_v25 = vshll.u32 %v9098_v50, 16 }
 0x1a6   : > { %v3186_v58 = vpop.f32.mrf.mxu3  ;;  %v5191_v14 = vunpack.c.l.b16 %v5151_v47 }
 0x1a7   : > { %v3202_v9 = vadd.f32 %v3186_v58, %v9052_v39  ;;  %v4615_v39 = vrot.slane %v9039_v20, 5  ;;  %v6935_v20 = vld [vmem:[%s8596_s13 + $0x10] sm:$0xf] }
 0x1a8   : > { %v3061_v43 = vpop.f32.mrf.mxu2  ;;  %v4887_v3 = vshrl.u32 %v6935_v20, 16 }
 0x1a9   : > { %v9145_v31 = vadd.f32 %v3061_v43, %v2897_v37  ;;  %v3599_v11 = vpop.f32.mrf.mxu1  ;;  %v9149_v55 = vadd.f32 %v3432_v61, %v3202_v9  ;;  %v4616_v35 = vsel %vm7527_vm5, %v6814_v15, %v4615_v39  ;;  %v4955_v37 = vsel %vm7511_vm4, %v4950_v17, %v4954_v6  ;;  %v6949_v61 = vld [vmem:[%s8596_s13 + $0x48] sm:$0xf] }
 0x1aa   : > { %v3619_v5 = vadd.f32 %v3599_v11, %v9076_v44  ;;  %v5154_v44 = vrot.slane %v9085_v41, 5  ;;  %v4971_v41 = vshrl.u32 %v6947_v29, 16  ;;  %v4985_v36 = vshrl.u32 %v6949_v61, 16 }
 0x1ab   : > { %v3435_v8 = vpop.f32.mrf.mxu0  ;;  %4716 = vmatmul.bf16.gmra.mxu3 %v4644_v63  ;;  %v4988_v58 = vshll.u32 %v6949_v61, 16  ;;  %v4641_v46 = vunpack.c.l.b16 %v4616_v35  ;;  %v4976_v43 = vrot.slane %v4974_v53, 5  ;;  %v5019_v9 = vunpack.c.l.b16 %v4955_v37  ;;  %v7005_v37 = vld [vmem:[%s8596_s13 + $0x40] sm:$0xe]  ;;  %v7006_v61 = vld [vmem:[%s8596_s13 + $0x48] sm:$0xe] }
 0x1ac   : > { %5092 = vmatmul.bf16.vlgmr.msra.gmra.mxu1 %v5024_v16  ;;  %v5155_v27 = vsel %vm7527_vm5, %v7010_v18, %v5154_v44  ;;  %v4973_v1 = vrot.slane %v4971_v41, 4  ;;  %v6948_v16 = vld [vmem:[%s8596_s13 + $0x44] sm:$0x1]  ;;  %v4889_v11 = vrot.slane %v4887_v3, 4  ;;  %v4987_v15 = vrot.slane %v4985_v36, 4 }
 0x1ad   : > { %5261 = vmatmul.bf16.vlgmr.msra.gmra.mxu2 %v5197_v22  ;;  %v5192_v26 = vunpack.c.l.b16 %v5155_v27  ;;  %v6950_v22 = vld [vmem:[%s8596_s13 + $0x4c] sm:$0x1]  ;;  %v4990_v60 = vrot.slane %v4988_v58, 5  ;;  %v4903_v39 = vrot.slane %v4901_v49, 4  ;;  %v4906_v17 = vrot.slane %v4904_v21, 5 }
 0x1ae   : > { %4851 = vmatmul.bf16.gmra.mxu0 %v6898_v19  ;;  %v3189_v45 = vpop.f32.mrf.mxu3  ;;  %v4977_v54 = vor.u32 %v4976_v43, %v4973_v1  ;;  %v4980_v33 = vshll.u32 %v6948_v16, 16  ;;  %v4994_v34 = vshll.u32 %v6950_v22, 16  ;;  %v5025_v18 = vpack.c.b16 %v5020_v24, %v5019_v9  ;;  %v7004_v53 = vld [vmem:[%s8596_s13 + $0x38] sm:$0xe] }
 0x1af   : > { %v3203_v4 = vadd.f32 %v3189_v45, %v9074_v56  ;;  %v4890_v56 = vshll.u32 %v6935_v20, 16  ;;  %v5198_v44 = vpack.c.b16 %v5192_v26, %v5191_v14  ;;  %v4991_v35 = vor.u32 %v4990_v60, %v4987_v15 }
 0x1b0   : > { %v3732_v48 = vpop.f32.mrf.mxu2  ;;  %v4907_v38 = vor.u32 %v4906_v17, %v4903_v39  ;;  %v4910_v41 = vshll.u32 %v9104_v2, 16  ;;  %v4978_v47 = vrot.slane %v4977_v54, 4  ;;  %v4982_v27 = vrot.slane %v4980_v33, 5 }
 0x1b1   : > { %v9168_v10 = vadd.f32 %v3732_v48, %v3619_v5  ;;  %v3601_v12 = vpop.f32.mrf.mxu1  ;;  %v9174_v57 = vadd.f32 %v3435_v8, %v3203_v4  ;;  %v4892_v19 = vrot.slane %v4890_v56, 5  ;;  %v4645_v8 = vpack.c.b16 %v4641_v46, %v4640_v59  ;;  %v7293_v5 = vld [vmem:[%s8596_s13 + $0x44] sm:$0xf0]  ;;  %v7003_v59 = vld [vmem:[%s8596_s13 + $0x30] sm:$0xe] }
 0x1b2   : > { %v3620_v32 = vadd.f32 %v3601_v12, %v9100_v23  ;;  %v6901_v23 = vld [vmem:[%s8596_s13 + $0x40] sm:$0xf]  ;;  %v4996_v3 = vrot.slane %v4994_v34, 5  ;;  %v5166_v12 = vrot.slane %v6948_v16, 5  ;;  %v5170_v56 = vrot.slane %v6950_v22, 5 }
 0x1b3   : > { %v3437_v63 = vpop.f32.mrf.mxu0  ;;  %v6902_v20 = vor.u32 %v7293_v5, %v6901_v23  ;;  %v4893_v45 = vor.u32 %v4892_v19, %v4889_v11  ;;  %v7011_v36 = vrot.slane %v7003_v59, 9  ;;  %v7013_v58 = vrot.slane %v7005_v37, 9 }
 0x1b4   : > { %v7012_v50 = vrot.slane %v7004_v53, 9  ;;  %v5162_v46 = vrot.slane %v9135_v51, 5  ;;  %v4898_v21 = vrot.slane %v4896_v25, 5  ;;  %v4908_v1 = vrot.slane %v4907_v38, 4 }
 0x1b5   : > { %v4894_v49 = vrot.slane %v4893_v45, 4  ;;  %v4912_v43 = vrot.slane %v4910_v41, 5  ;;  %v4983_v26 = vsel %vm7511_vm4, %v4978_v47, %v4982_v27  ;;  %v5167_v16 = vsel %vm7527_vm5, %v7013_v58, %v5166_v12 }
 0x1b6   : > { %v3191_v40 = vpop.f32.mrf.mxu3  ;;  %v5195_v23 = vunpack.c.l.b16 %v5167_v16  ;;  %v5021_v39 = vunpack.c.l.b16 %v4983_v26 }
 0x1b7   : > { %v3204_v6 = vadd.f32 %v3191_v40, %v9093_v13  ;;  %v4899_v40 = vsel %vm7511_vm4, %v4894_v49, %v4898_v21 }
 0x1b8   : > { %v3734_v42 = vpop.f32.mrf.mxu2  ;;  %v5015_v54 = vunpack.c.l.b16 %v4899_v40 }
 0x1b9   : > { %v9182_v28 = vadd.f32 %v3734_v42, %v3620_v32  ;;  %v3604_v29 = vpop.f32.mrf.mxu1  ;;  %v9187_v4 = vadd.f32 %v3437_v63, %v3204_v6  ;;  %v7014_v63 = vrot.slane %v7006_v61, 9  ;;  %v4992_v32 = vrot.slane %v4991_v35, 4 }
 0x1ba   : > { %v3621_v13 = vadd.f32 %v3604_v29, %v9128_v62  ;;  %v5158_v62 = vrot.slane %v9132_v30, 5 }
 0x1bb   : > { %v3440_v48 = vpop.f32.mrf.mxu0  ;;  %4721 = vmatmul.bf16.gmra.mxu3 %v4645_v8  ;;  %v5171_v30 = vsel %vm7527_vm5, %v7014_v63, %v5170_v56  ;;  %v4997_v51 = vsel %vm7511_vm4, %v4992_v32, %v4996_v3  ;;  %v4913_v8 = vsel %vm7511_vm4, %v4908_v1, %v4912_v43 }
 0x1bc   : > { %5097 = vmatmul.bf16.gmra.mxu1 %v5025_v18  ;;  %v5159_v11 = vsel %vm7527_vm5, %v7011_v36, %v5158_v62  ;;  %v5196_v5 = vunpack.c.l.b16 %v5171_v30  ;;  %v5022_v17 = vunpack.c.l.b16 %v4997_v51  ;;  %v5016_v33 = vunpack.c.l.b16 %v4913_v8 }
 0x1bd   : > { %5266 = vmatmul.bf16.gmra.mxu2 %v5198_v44  ;;  %v5193_v6 = vunpack.c.l.b16 %v5159_v11 }
 0x1be   : > { %4856 = vmatmul.bf16.gmra.mxu0 %v6902_v20  ;;  %v3194_v2 = vpop.f32.mrf.mxu3  ;;  %v5200_v44 = vpack.c.b16 %v5196_v5, %v5195_v23  ;;  %v5026_v29 = vpack.c.b16 %v5022_v17, %v5021_v39  ;;  %v5023_v35 = vpack.c.b16 %v5016_v33, %v5015_v54 }
 0x1bf   : > { %v3205_v9 = vadd.f32 %v3194_v2, %v9118_v7  ;;  %v5163_v7 = vsel %vm7527_vm5, %v7012_v50, %v5162_v46 }
 0x1c0   : > { %v3737_v24 = vpop.f32.mrf.mxu2  ;;  %v5194_v42 = vunpack.c.l.b16 %v5163_v7 }
 0x1c1   : > { %v3754_v14 = vadd.f32 %v3737_v24, %v3621_v13  ;;  %v3606_v22 = vpop.f32.mrf.mxu1  ;;  %v3451_v19 = vadd.f32 %v3440_v48, %v3205_v9 }
 0x1c2   : > { %v3622_v60 = vadd.f32 %v3606_v22, %v9149_v55  ;;  %v5199_v20 = vpack.c.b16 %v5194_v42, %v5193_v6 }
 0x1c3   : > { %v3442_v15 = vpop.f32.mrf.mxu0 }
 0x1c6   : > { %v3196_v0 = vpop.f32.mrf.mxu3 }
 0x1c7   : > { %v3206_v34 = vadd.f32 %v3196_v0, %v9145_v31 }
 0x1c8   : > { %v3739_v18 = vpop.f32.mrf.mxu2 }
 0x1c9   : > { %v3755_v55 = vadd.f32 %v3739_v18, %v3622_v60  ;;  %v3609_v45 = vpop.f32.mrf.mxu1  ;;  %v3452_v52 = vadd.f32 %v3442_v15, %v3206_v34 }
 0x1ca   : > { %v3623_v59 = vadd.f32 %v3609_v45, %v9174_v57 }
 0x1cb   : > { %v4152_v37 = vpop.f32.mrf.mxu0  ;;  %5276 = vmatmul.bf16.vlgmr.msrb.gmra.mxu3 %v5200_v44 }
 0x1cc   : > { %5102 = vmatmul.bf16.gmra.mxu1 %v5026_v29 }
 0x1cd   : > { %5271 = vmatmul.bf16.gmra.mxu2 %v5199_v20 }
 0x1ce   : > { %5087 = vmatmul.bf16.vlgmr.msrb.gmra.mxu0 %v5023_v35  ;;  %v3978_v61 = vpop.f32.mrf.mxu3 }
 0x1cf   : > { %v3998_v13 = vadd.f32 %v3978_v61, %v9168_v10 }
 0x1d0   : > { %v3742_v48 = vpop.f32.mrf.mxu2 }
 0x1d1   : > { %v3756_v31 = vadd.f32 %v3742_v48, %v3623_v59  ;;  %v3611_v25 = vpop.f32.mrf.mxu1  ;;  %v4172_v38 = vadd.f32 %v4152_v37, %v3998_v13 }
 0x1d2   : > { %v3624_v41 = vadd.f32 %v3611_v25, %v9187_v4 }
 0x1d3   : > { %v4154_v53 = vpop.f32.mrf.mxu0 }
 0x1d6   : > { %v3980_v47 = vpop.f32.mrf.mxu3 }
 0x1d7   : > { %v3999_v3 = vadd.f32 %v3980_v47, %v9182_v28 }
 0x1d8   : > { %v3744_v27 = vpop.f32.mrf.mxu2 }
 0x1d9   : > { %v3757_v57 = vadd.f32 %v3744_v27, %v3624_v41  ;;  %v3614_v12 = vpop.f32.mrf.mxu1  ;;  %v4173_v56 = vadd.f32 %v4154_v53, %v3999_v3 }
 0x1da   : > { %v3625_v36 = vadd.f32 %v3614_v12, %v3451_v19 }
 0x1db   : > { %v4157_v58 = vpop.f32.mrf.mxu0 }
 0x1de   : > { %v3983_v63 = vpop.f32.mrf.mxu3 }
 0x1df   : > { %v4000_v62 = vadd.f32 %v3983_v63, %v3754_v14 }
 0x1e0   : > { %v3747_v32 = vpop.f32.mrf.mxu2 }
 0x1e1   : > { %v3758_v50 = vadd.f32 %v3747_v32, %v3625_v36  ;;  %v3616_v10 = vpop.f32.mrf.mxu1  ;;  %v4174_v46 = vadd.f32 %v4157_v58, %v4000_v62 }
 0x1e2   : > { %v3626_v2 = vadd.f32 %v3616_v10, %v3452_v52 }
 0x1e3   : > { %v4159_v49 = vpop.f32.mrf.mxu0 }
 0x1e6   : > { %v3985_v21 = vpop.f32.mrf.mxu3 }
 0x1e7   : > { %v4001_v1 = vadd.f32 %v3985_v21, %v3755_v55 }
 0x1e8   : > { %v3749_v4 = vpop.f32.mrf.mxu2 }
 0x1e9   : > { %v3759_v43 = vadd.f32 %v3749_v4, %v3626_v2  ;;  %v4287_v9 = vpop.f32.mrf.mxu1  ;;  %v4175_v24 = vadd.f32 %v4159_v49, %v4001_v1 }
 0x1ea   : > { %v4307_v26 = vadd.f32 %v4287_v9, %v4172_v38 }
 0x1eb   : > { %v4162_v28 = vpop.f32.mrf.mxu0 }
 0x1ee   : > { %v3988_v16 = vpop.f32.mrf.mxu3 }
 0x1ef   : > { %v4002_v30 = vadd.f32 %v3988_v16, %v3756_v31 }
 0x1f0   : > { %v4533_v22 = vpop.f32.mrf.mxu2 }
 0x1f1   : > { %v4553_v51 = vadd.f32 %v4533_v22, %v4307_v26  ;;  %v4289_v11 = vpop.f32.mrf.mxu1  ;;  %v4176_v7 = vadd.f32 %v4162_v28, %v4002_v30 }
 0x1f2   : > { %v4308_v19 = vadd.f32 %v4289_v11, %v4173_v56 }
 0x1f3   : > { %v4164_v14 = vpop.f32.mrf.mxu0 }
 0x1f6   : > { %v3990_v15 = vpop.f32.mrf.mxu3 }
 0x1f7   : > { %v4003_v60 = vadd.f32 %v3990_v15, %v3757_v57 }
 0x1f8   : > { %v4535_v40 = vpop.f32.mrf.mxu2 }
 0x1f9   : > { %v9218_v8 = vadd.f32 %v4535_v40, %v4308_v19  ;;  %v4292_v23 = vpop.f32.mrf.mxu1  ;;  %v9220_v5 = vadd.f32 %v4164_v14, %v4003_v60  ;;  %v7374_v19 = vld [vmem:[%s9246_s6] ss:$0 sm:$0xff] }
 0x1fa   : > { %v4309_v17 = vadd.f32 %v4292_v23, %v4174_v46 }
 0x1fb   : > { %v4167_v39 = vpop.f32.mrf.mxu0 }
 0x1fe   : > { %v3993_v6 = vpop.f32.mrf.mxu3 }
 0x1ff   : > { %v4004_v42 = vadd.f32 %v3993_v6, %v3758_v50 }
 0x200   : > { %v4538_v54 = vpop.f32.mrf.mxu2 }
 0x201   : > { %v4555_v33 = vadd.f32 %v4538_v54, %v4309_v17  ;;  %v4294_v0 = vpop.f32.mrf.mxu1  ;;  %v4178_v34 = vadd.f32 %v4167_v39, %v4004_v42 }
 0x202   : > { %v4310_v4 = vadd.f32 %v4294_v0, %v4175_v24 }
 0x203   : > { %v4169_v18 = vpop.f32.mrf.mxu0 }
 0x206   : > { %v3995_v44 = vpop.f32.mrf.mxu3 }
 0x207   : > { %v4005_v55 = vadd.f32 %v3995_v44, %v3759_v43 }
 0x208   : > { %v4540_v29 = vpop.f32.mrf.mxu2 }
 0x209   : > { %v4297_v20 = vpop.f32.mrf.mxu1  ;;  %v4179_v45 = vadd.f32 %v4169_v18, %v4005_v55  ;;  %v4556_v1 = vadd.f32 %v4540_v29, %v4310_v4 }
 0x20a   : > { %v4311_v35 = vadd.f32 %v4297_v20, %v4176_v7 }
 0x20b   : > { %v4842_v52 = vpop.f32.mrf.mxu0 }
 0x20e   : > { %v4707_v59 = vpop.f32.mrf.mxu3 }
 0x20f   : > { %v4727_v61 = vadd.f32 %v4707_v59, %v4553_v51 }
 0x210   : > { %v4543_v37 = vpop.f32.mrf.mxu2 }
 0x211   : > { %v4557_v48 = vadd.f32 %v4543_v37, %v4311_v35  ;;  %v4299_v13 = vpop.f32.mrf.mxu1  ;;  %v4862_v31 = vadd.f32 %v4842_v52, %v4727_v61 }
 0x213   : > { %v4844_v25 = vpop.f32.mrf.mxu0 }
 0x216   : > { %v4709_v38 = vpop.f32.mrf.mxu3 }
 0x217   : > { %v4728_v18 = vadd.f32 %v4709_v38, %v9218_v8 }
 0x218   : > { %v4545_v41 = vpop.f32.mrf.mxu2 }
 0x219   : > { %v4302_v53 = vpop.f32.mrf.mxu1  ;;  %v4863_v61 = vadd.f32 %v4844_v25, %v4728_v18 }
 0x21a   : > { %v4313_v40 = vadd.f32 %v4302_v53, %v4178_v34 }
 0x21b   : > { %v4847_v47 = vpop.f32.mrf.mxu0 }
 0x21e   : > { %v4712_v27 = vpop.f32.mrf.mxu3 }
 0x21f   : > { %v4729_v43 = vadd.f32 %v4712_v27, %v4555_v33  ;;  %v4312_v33 = vadd.f32 %v4299_v13, %v9220_v5 }
 0x220   : > { %v4548_v3 = vpop.f32.mrf.mxu2 }
 0x221   : > { %v4304_v57 = vpop.f32.mrf.mxu1  ;;  %v4864_v30 = vadd.f32 %v4847_v47, %v4729_v43  ;;  %v4559_v42 = vadd.f32 %v4548_v3, %v4313_v40  ;;  %v4558_v34 = vadd.f32 %v4545_v41, %v4312_v33 }
 0x222   : > { %v4314_v54 = vadd.f32 %v4304_v57, %v4179_v45 }
 0x223   : > { %v4849_v12 = vpop.f32.mrf.mxu0 }
 0x226   : > { %v4714_v56 = vpop.f32.mrf.mxu3 }
 0x227   : > { %v4730_v26 = vadd.f32 %v4714_v56, %v4556_v1 }
 0x228   : > { %v4550_v36 = vpop.f32.mrf.mxu2 }
 0x229   : > { %v5093_v58 = vpop.f32.mrf.mxu1  ;;  %v4865_v11 = vadd.f32 %v4849_v12, %v4730_v26  ;;  %v4560_v44 = vadd.f32 %v4550_v36, %v4314_v54 }
 0x22a   : > { %v5110_v51 = vadd.f32 %v5093_v58, %v4864_v30 }
 0x22b   : > { %v4852_v63 = vpop.f32.mrf.mxu0 }
 0x22e   : > { %v4717_v32 = vpop.f32.mrf.mxu3 }
 0x22f   : > { %v4731_v29 = vadd.f32 %v4717_v32, %v4557_v48 }
 0x230   : > { %v5262_v62 = vpop.f32.mrf.mxu2 }
 0x231   : > { %v5095_v50 = vpop.f32.mrf.mxu1  ;;  %v4866_v53 = vadd.f32 %v4852_v63, %v4731_v29 }
 0x232   : > { %v5111_v7 = vadd.f32 %v5095_v50, %v4865_v11 }
 0x233   : > { %v4854_v10 = vpop.f32.mrf.mxu0 }
 0x236   : > { %v4719_v46 = vpop.f32.mrf.mxu3 }
 0x237   : > { %v4732_v59 = vadd.f32 %v4719_v46, %v4558_v34 }
 0x238   : > { %v5264_v2 = vpop.f32.mrf.mxu2 }
 0x239   : > { %v5098_v49 = vpop.f32.mrf.mxu1  ;;  %v4867_v38 = vadd.f32 %v4854_v10, %v4732_v59 }
 0x23a   : > { %v5112_v8 = vadd.f32 %v5098_v49, %v4866_v53 }
 0x23b   : > { %v4857_v21 = vpop.f32.mrf.mxu0 }
 0x23e   : > { %v4722_v9 = vpop.f32.mrf.mxu3 }
 0x23f   : > { %v4733_v55 = vadd.f32 %v4722_v9, %v4559_v42 }
 0x240   : > { %v5267_v28 = vpop.f32.mrf.mxu2 }
 0x241   : > { %v5100_v16 = vpop.f32.mrf.mxu1  ;;  %v5284_v14 = vadd.f32 %v5267_v28, %v5110_v51  ;;  %v4868_v37 = vadd.f32 %v4857_v21, %v4733_v55 }
 0x242   : > { %v5113_v56 = vadd.f32 %v5100_v16, %v4867_v38 }
 0x243   : > { %v4859_v22 = vpop.f32.mrf.mxu0  ;;  %v5296_v39 = vadd.f32 %v7374_v19, %v5284_v14 }
 0x246   : > { %v4724_v15 = vpop.f32.mrf.mxu3 }
 0x247   : > { %v4734_v35 = vadd.f32 %v4724_v15, %v4560_v44 }
 0x248   : > { %v5269_v60 = vpop.f32.mrf.mxu2 }
 0x249   : > { %v5285_v24 = vadd.f32 %v5269_v60, %v5111_v7  ;;  %v5103_v23 = vpop.f32.mrf.mxu1  ;;  %v4869_v57 = vadd.f32 %v4859_v22, %v4734_v35 }
 0x24a   : > { %v5114_v5 = vadd.f32 %v5103_v23, %v4868_v37 }
 0x24b   : > { %v5297_v17 = vadd.f32 %v7374_v19, %v5285_v24  ;;  %v5088_v6 = vpop.f32.mrf.mxu0 }
 0x24c   : > { %v5108_v52 = vadd.f32 %v5088_v6, %v4862_v31 }
 0x24d   : > { %v7326_v0 = vpack.c.bf16 %v5297_v17, %v5296_v39 }
 0x24e   : > { %v5277_v20 = vpop.f32.mrf.mxu3  ;;  %v5282_v3 = vadd.f32 %v5262_v62, %v5108_v52 }
 0x24f   : > { %7338 = vst [vmem:[%s9229_s30 + $0x8] sm:$0xff] %v7326_v0   ;;  %v5288_v12 = vadd.f32 %v5277_v20, %v5114_v5 }
 0x250   : > { %v5272_v45 = vpop.f32.mrf.mxu2  ;;  %v5294_v58 = vadd.f32 %v7374_v19, %v5282_v3 }
 0x251   : > { %v5105_v27 = vpop.f32.mrf.mxu1  ;;  %v5286_v31 = vadd.f32 %v5272_v45, %v5112_v8  ;;  %v5300_v62 = vadd.f32 %v7374_v19, %v5288_v12 }
 0x252   : > { %v5115_v41 = vadd.f32 %v5105_v27, %v4869_v57 }
 0x253   : > { %v5090_v47 = vpop.f32.mrf.mxu0  ;;  %v5298_v4 = vadd.f32 %v7374_v19, %v5286_v31 }
 0x254   : > { %v5109_v13 = vadd.f32 %v5090_v47, %v4863_v61 }
 0x256   : > { %v5283_v48 = vadd.f32 %v5264_v2, %v5109_v13  ;;  %v5279_v36 = vpop.f32.mrf.mxu3 }
 0x257   : > { %v5289_v32 = vadd.f32 %v5279_v36, %v5115_v41 }
 0x258   : > { %v5295_v25 = vadd.f32 %v7374_v19, %v5283_v48  ;;  %v5274_v63 = vpop.f32.mrf.mxu2 }
 0x259   : > { %v5287_v50 = vadd.f32 %v5274_v63, %v5113_v56  ;;  %v5301_v21 = vadd.f32 %v7374_v19, %v5289_v32 }
 0x25a   : > { %v7321_v46 = vpack.c.bf16 %v5295_v25, %v5294_v58 }
 0x25b   : > { %v5299_v49 = vadd.f32 %v7374_v19, %v5287_v50  ;;  %v7336_v10 = vpack.c.bf16 %v5301_v21, %v5300_v62 }
 0x25c   : > { %7322 = vst [vmem:[%s9229_s30] sm:$0xff] %v7321_v46  }
 0x25d   : > { %v7331_v1 = vpack.c.bf16 %v5299_v49, %v5298_v4  ;;  %7340 = vst [vmem:[%s9229_s30 + $0x18] sm:$0xff] %v7336_v10  }
 0x25f   : > { %7339 = vst [vmem:[%s9229_s30 + $0x10] sm:$0xff] %v7331_v1  }
 0x260 PF: > { %s17_s24 = sadd.s32 1, %s7381_s24  }
 0x261   : > { %p14_p4 = scmp.ge.s32.totalorder %s17_s24, 4  }
 0x263   :  { %16 = sbr.rel (!%p14_p4) target bundleno = 1 (0x1), region = 114 }

// kernel: custom_pan_forward.19
= control target key start
LH: loop header
LB: loop body
LE: loop exit
PB: predicated region body
PF: predicated region fallthrough
CT: control target
= control target key end

     0   :  { %s5982_s24 = smov 0   ;;  %s7098_s0 = inlined_call_operand.vmem [shape: bf16[2,6,6,128], index: 0, kind: input, shape index: {}]   ;;  %s7099_s1 = inlined_call_operand.vmem [shape: bf16[2,6,6,128], index: 1, kind: input, shape index: {}]   ;;  %s7100_s2 = inlined_call_operand.vmem [shape: bf16[2,6,6,128], index: 2, kind: input, shape index: {}]   ;;  %s7101_s3 = inlined_call_operand.vmem [shape: bf16[9,128,128], index: 3, kind: input, shape index: {}]   ;;  %s7102_s4 = inlined_call_operand.vmem [shape: bf16[9,128,128], index: 4, kind: input, shape index: {}]   ;;  %s7103_s5 = inlined_call_operand.vmem [shape: bf16[9,128,128], index: 5, kind: input, shape index: {}]   ;;  %s7104_s6 = inlined_call_operand.vmem [shape: f32[1,128], index: 6, kind: input, shape index: {}]   ;;  %s7105_s7 = inlined_call_operand.vmem [shape: bf16[2,4,4,128], index: 7, kind: output, shape index: {}]  }
   0x1 LB: > { %s4303_s25 = sadd.s32 4294967295, %s5940_s24   ;;  %p4307_p0 = scmp.ge.s32.totalorder %s5940_s24, 1  ;;  %s5940_s24 = sphi %s5982_s24, %s17_s24  }
   0x2   : > { %p257_p1 = scmp.lt.s32.totalorder %s5940_s24, 3 }
   0x4   : > { %p258_p2 = pnand %p4307_p0, %p257_p1 }
   0x5   : > { %p299_p3 = scmp.lt.s32.totalorder (!%p258_p2), %s4303_s25, 1 }
   0x6   : > { %261 = sbr.rel (%p258_p2) target bundleno = 479 (0x1df), region = 48 }
   0xb   : > { %v5723_v0 = vld [vmem:[%s7101_s3 + $0x78] sm:$0xff]  ;;  %v5722_v2 = vld [vmem:[%s7101_s3 + $0x70] sm:$0xff]  ;;  %s7117_s25 = smov (!%p299_p3, %s4303_s25), 1  ;;  %v5721_v7 = vld [vmem:[%s7101_s3 + $0x68] sm:$0xff]  ;;  %vm351_vm0 = vcmask 1041408   ;;  %vm355_vm1 = vcmask 1043458  }
   0xc   : > { %v5715_v1 = vld [vmem:[%s7101_s3 + $0x38] sm:$0xff]  ;;  %514 = vmatpush.bf16.msra.mxu0 %v5723_v0  ;;  %v5714_v3 = vld [vmem:[%s7101_s3 + $0x30] sm:$0xff]  ;;  %v5713_v8 = vld [vmem:[%s7101_s3 + $0x28] sm:$0xff]  ;;  %s6020_s21 = smul.u32 24, %s7117_s25  ;;  %vm377_vm2 = vsmask.f32 1280 }
   0xd   : > { %589 = vmatpush.bf16.msra.mxu1 %v5715_v1  ;;  %v5731_v4 = vld [vmem:[%s7101_s3 + $0xb8] sm:$0xff]  ;;  %v5730_v5 = vld [vmem:[%s7101_s3 + $0xb0] sm:$0xff]  ;;  %v5729_v10 = vld [vmem:[%s7101_s3 + $0xa8] sm:$0xff]  ;;  %vm378_vm3 = vsmask.f32 3336  ;;  %vm643_vm9 = vcmask 1040384  }
   0xe   : > { %744 = vmatpush.bf16.msra.mxu2 %v5731_v4  ;;  %v5739_v6 = vld [vmem:[%s7101_s3 + $0xf8] sm:$0xff]  ;;  %v5738_v9 = vld [vmem:[%s7101_s3 + $0xf0] sm:$0xff]  ;;  %v5720_v11 = vld [vmem:[%s7101_s3 + $0x60] sm:$0xff]  ;;  %s6038_s11 = scalar_lea.vmem %s7098_s0, %s6020_s21  ;;  %vm380_vm4 = vsmask.f32 5392  ;;  %vm644_vm10 = vcmask 1042434   ;;  %s6439_s28 = scalar_lea.vmem %s7099_s1, %s6020_s21 }
   0xf   : > { %843 = vmatpush.bf16.msra.mxu3 %v5739_v6  ;;  %v5712_v12 = vld [vmem:[%s7101_s3 + $0x20] sm:$0xff]  ;;  %v5737_v13 = vld [vmem:[%s7101_s3 + $0xe8] sm:$0xff]  ;;  %v5719_v17 = vld [vmem:[%s7101_s3 + $0x58] sm:$0xff]  ;;  %vm382_vm6 = vsmask.f32 7448  ;;  %vm646_vm12 = vcmask 1044484   ;;  %s6793_s19 = scalar_lea.vmem %s7100_s2, %s6020_s21 }
  0x10   : > { %515 = vmatpush.bf16.msra.mxu0 %v5722_v2  ;;  %v5728_v14 = vld [vmem:[%s7101_s3 + $0xa0] sm:$0xff]  ;;  %v5711_v18 = vld [vmem:[%s7101_s3 + $0x18] sm:$0xff]  ;;  %v341_v19 = vld [vmem:[%s6038_s11 + $0x8] sm:$0x7]  ;;  %vm648_vm14 = vcmask 1046534   ;;  %s5707_s18 = sshll.u32 %s7117_s25, 3 }
  0x11   : > { %590 = vmatpush.bf16.msra.mxu1 %v5714_v3  ;;  %v339_v15 = vld [vmem:[%s6038_s11] sm:$0x7]  ;;  %v340_v16 = vld [vmem:[%s6038_s11 + $0x4] sm:$0x7]  ;;  %v342_v23 = vld [vmem:[%s6038_s11 + $0xc] sm:$0x7]  ;;  %s318_s22 = scalar_lea.vmem %s7105_s7, %s5707_s18 }
  0x12   : > { %745 = vmatpush.bf16.msra.mxu2 %v5730_v5  ;;  %v347_v20 = vrot.slane %v339_v15, 2  ;;  %v348_v21 = vrot.slane %v340_v16, 2  ;;  %v5736_v22 = vld [vmem:[%s7101_s3 + $0xe0] sm:$0xff]  ;;  %v349_v24 = vrot.slane %v341_v19, 2  ;;  %v5727_v25 = vld [vmem:[%s7101_s3 + $0x98] sm:$0xff]  ;;  %v350_v26 = vrot.slane %v342_v23, 2  ;;  %vm6077_vm5 = vmor %vm377_vm2, %vm378_vm3 }
  0x13   : > { %844 = vmatpush.bf16.msra.mxu3 %v5738_v9  ;;  %v5718_v34 = vld [vmem:[%s7101_s3 + $0x50] sm:$0xff]  ;;  %v5735_v40 = vld [vmem:[%s7101_s3 + $0xd8] sm:$0xff]  ;;  %vm6091_vm7 = vmor %vm6077_vm5, %vm380_vm4 }
  0x14   : > { %516 = vmatpush.bf16.msra.mxu0 %v5721_v7  ;;  %v354_v27 = vsel %vm351_vm0, %v339_v15, %v347_v20  ;;  %v356_v28 = vsel %vm355_vm1, %v339_v15, %v347_v20  ;;  %v361_v29 = vsel %vm351_vm0, %v340_v16, %v348_v21  ;;  %v362_v31 = vsel %vm355_vm1, %v340_v16, %v348_v21  ;;  %v5710_v35 = vld [vmem:[%s7101_s3 + $0x10] sm:$0xff]  ;;  %v5717_v55 = vld [vmem:[%s7101_s3 + $0x48] sm:$0xff]  ;;  %vm6110_vm8 = vmor %vm6091_vm7, %vm382_vm6 }
  0x15   : > { %591 = vmatpush.bf16.msra.mxu1 %v5713_v8  ;;  %v358_v30 = vrot.slane %v356_v28, 2  ;;  %v367_v32 = vsel %vm351_vm0, %v341_v19, %v349_v24  ;;  %v368_v33 = vsel %vm355_vm1, %v341_v19, %v349_v24  ;;  %v364_v36 = vrot.slane %v362_v31, 2  ;;  %v5726_v45 = vld [vmem:[%s7101_s3 + $0x90] sm:$0xff]  ;;  %v5709_v56 = vld [vmem:[%s7101_s3 + $0x8] sm:$0xff]  ;;  %v5747_v16 = vld [vmem:[%s7101_s3 + $0x138] sm:$0xff] }
  0x16   : > { %746 = vmatpush.bf16.msra.mxu2 %v5729_v10  ;;  %v370_v37 = vrot.slane %v368_v33, 2  ;;  %v374_v38 = vsel %vm355_vm1, %v342_v23, %v350_v26  ;;  %v384_v42 = vshrl.u32 %v354_v27, 16  ;;  %v387_v43 = vshll.u32 %v354_v27, 16  ;;  %v5734_v61 = vld [vmem:[%s7101_s3 + $0xd0] sm:$0xff]  ;;  %v5725_v2 = vld [vmem:[%s7101_s3 + $0x88] sm:$0xff]  ;;  %v5724_v20 = vld [vmem:[%s7101_s3 + $0x80] sm:$0xff] }
  0x17   : > { %845 = vmatpush.bf16.msra.mxu3 %v5737_v13  ;;  %v376_v41 = vrot.slane %v374_v38, 2  ;;  %v393_v44 = vshll.u32 %v358_v30, 16  ;;  %v397_v46 = vshrl.u32 %v361_v29, 16  ;;  %v400_v47 = vshll.u32 %v361_v29, 16  ;;  %v5733_v21 = vld [vmem:[%s7101_s3 + $0xc8] sm:$0xff]  ;;  %v5746_v28 = vld [vmem:[%s7101_s3 + $0x130] sm:$0xff]  ;;  %vm6184_vm11 = vmor %vm643_vm9, %vm644_vm10 }
  0x18   : > { %517 = vmatpush.bf16.msra.mxu0 %v5720_v11  ;;  %v406_v48 = vshll.u32 %v364_v36, 16  ;;  %v410_v49 = vshrl.u32 %v367_v32, 16  ;;  %v373_v50 = vsel %vm351_vm0, %v342_v23, %v350_v26  ;;  %v386_v52 = vrot.slane %v384_v42, 6  ;;  %v5716_v11 = vld [vmem:[%s7101_s3 + $0x40] sm:$0xff]  ;;  %v5754_v29 = vld [vmem:[%s7101_s3 + $0x170] sm:$0xff]  ;;  %v5771_v33 = vld [vmem:[%s7101_s3 + $0x1f8] sm:$0xff] }
  0x19   : > { %592 = vmatpush.bf16.msra.mxu1 %v5712_v12  ;;  %v389_v53 = vrot.slane %v387_v43, 7  ;;  %v413_v54 = vshll.u32 %v367_v32, 16  ;;  %v395_v57 = vrot.slane %v393_v44, 7  ;;  %v399_v58 = vrot.slane %v397_v46, 6  ;;  %v5708_v12 = vld [vmem:[%s7101_s3] sm:$0xff]  ;;  %v5762_v32 = vld [vmem:[%s7101_s3 + $0x1b0] sm:$0xff]  ;;  %vm647_vm13 = vmor %vm6184_vm11, %vm646_vm12 }
  0x1a   : > { %747 = vmatpush.bf16.msra.mxu2 %v5728_v14  ;;  %v402_v59 = vrot.slane %v400_v47, 7  ;;  %v408_v60 = vrot.slane %v406_v48, 7  ;;  %v412_v63 = vrot.slane %v410_v49, 6  ;;  %v419_v1 = vshll.u32 %v370_v37, 16  ;;  %v5732_v30 = vld [vmem:[%s7101_s3 + $0xc0] sm:$0xff]  ;;  %v5761_v39 = vld [vmem:[%s7101_s3 + $0x1a8] sm:$0xff]  ;;  %vm6218_vm15 = vmor %vm647_vm13, %vm648_vm14 }
  0x1b   : > { %846 = vmatpush.bf16.msra.mxu3 %v5736_v22  ;;  %v390_v62 = vor.u32 %v389_v53, %v386_v52  ;;  %v415_v0 = vrot.slane %v413_v54, 7  ;;  %v423_v5 = vshrl.u32 %v373_v50, 16  ;;  %v426_v6 = vshll.u32 %v373_v50, 16  ;;  %v603_v36 = vld [vmem:[%s6038_s11] sm:$0x6]  ;;  %v5769_v54 = vld [vmem:[%s7101_s3 + $0x1e8] sm:$0xff] }
  0x1c   : > { %518 = vmatpush.bf16.msra.mxu0 %v5719_v17  ;;  %v403_v4 = vor.u32 %v402_v59, %v399_v58  ;;  %v432_v7 = vshll.u32 %v376_v41, 16  ;;  %v421_v10 = vrot.slane %v419_v1, 7  ;;  %v5755_v17 = vld [vmem:[%s7101_s3 + $0x178] sm:$0xff]  ;;  %v319_v37 = vld [vmem:[%s6038_s11] sm:$0x3] }
  0x1d   : > { %593 = vmatpush.bf16.msra.mxu1 %v5711_v18  ;;  %v391_v8 = vrot.slane %v390_v62, 2  ;;  %v416_v9 = vor.u32 %v415_v0, %v412_v63  ;;  %v425_v14 = vrot.slane %v423_v5, 6  ;;  %v428_v15 = vrot.slane %v426_v6, 7  ;;  %v604_v38 = vld [vmem:[%s6038_s11 + $0x4] sm:$0x6]  ;;  %v5743_v58 = vld [vmem:[%s7101_s3 + $0x118] sm:$0xff] }
  0x1e   : > { %748 = vmatpush.bf16.msra.mxu2 %v5727_v25  ;;  %v404_v13 = vrot.slane %v403_v4, 2  ;;  %v434_v24 = vrot.slane %v432_v7, 7  ;;  %v5763_v25 = vld [vmem:[%s7101_s3 + $0x1b8] sm:$0xff]  ;;  %v605_v41 = vld [vmem:[%s6038_s11 + $0x8] sm:$0x6]  ;;  %v5744_v42 = vld [vmem:[%s7101_s3 + $0x120] sm:$0xff] }
  0x1f   : > { %847 = vmatpush.bf16.msra.mxu3 %v5735_v40  ;;  %v396_v18 = vsel %vm6110_vm8, %v391_v8, %v395_v57  ;;  %v417_v19 = vrot.slane %v416_v9, 2  ;;  %v429_v23 = vor.u32 %v428_v15, %v425_v14  ;;  %v5770_v40 = vld [vmem:[%s7101_s3 + $0x1f0] sm:$0xff]  ;;  %v320_v43 = vld [vmem:[%s6038_s11 + $0x4] sm:$0x3]  ;;  %v606_v44 = vld [vmem:[%s6038_s11 + $0xc] sm:$0x6] }
  0x20   : > { %519 = vmatpush.bf16.msra.mxu0 %v5718_v34  ;;  %v409_v22 = vsel %vm6110_vm8, %v404_v13, %v408_v60  ;;  %454 = vst [vmem:[#allocation1] ss:$4 sm:$0xff] %v396_v18  ;;  %v5745_v34 = vld [vmem:[%s7101_s3 + $0x128] sm:$0xff]  ;;  %v5752_v46 = vld [vmem:[%s7101_s3 + $0x160] sm:$0xff]  ;;  %v612_v49 = vrot.slane %v604_v38, 2  ;;  %v613_v51 = vrot.slane %v605_v41, 2 }
  0x21   : > { %594 = vmatpush.bf16.msra.mxu1 %v5710_v35  ;;  %v422_v26 = vsel %vm6110_vm8, %v417_v19, %v421_v10  ;;  %457 = vst [vmem:[#allocation1 + $0x1] ss:$4 sm:$0xff] %v409_v22  ;;  %v430_v27 = vrot.slane %v429_v23, 2  ;;  %v5753_v35 = vld [vmem:[%s7101_s3 + $0x168] sm:$0xff]  ;;  %v5760_v53 = vld [vmem:[%s7101_s3 + $0x1a0] sm:$0xff]  ;;  %v5751_v59 = vld [vmem:[%s7101_s3 + $0x158] sm:$0xff] }
  0x22   : > { %749 = vmatpush.bf16.msra.mxu2 %v5726_v45  ;;  %460 = vst [vmem:[#allocation1 + $0x2] ss:$4 sm:$0xff] %v422_v26  ;;  %v611_v45 = vrot.slane %v603_v36, 2  ;;  %v321_v47 = vld [vmem:[%s6038_s11 + $0x8] sm:$0x3]  ;;  %v624_v60 = vsel %vm351_vm0, %v604_v38, %v612_v49  ;;  %v631_v62 = vsel %vm351_vm0, %v605_v41, %v613_v51  ;;  %v633_v63 = vsel %vm355_vm1, %v605_v41, %v613_v51  ;;  %v5759_v0 = vld [vmem:[%s7101_s3 + $0x198] sm:$0xff] }
  0x23   : > { %848 = vmatpush.bf16.msra.mxu3 %v5734_v61  ;;  %v435_v31 = vsel %vm6110_vm8, %v430_v27, %v434_v24  ;;  %v322_v48 = vld [vmem:[%s6038_s11 + $0xc] sm:$0x3]  ;;  %v626_v61 = vsel %vm355_vm1, %v604_v38, %v612_v49  ;;  %v5768_v1 = vld [vmem:[%s7101_s3 + $0x1e0] sm:$0xff]  ;;  %v4395_v9 = vrot.slane %v624_v60, 9  ;;  %v5750_v13 = vld [vmem:[%s7101_s3 + $0x150] sm:$0xff]  ;;  %v4397_v14 = vrot.slane %v631_v62, 9 }
  0x24   : > { %520 = vmatpush.bf16.msra.mxu0 %v5717_v55  ;;  %463 = vst [vmem:[#allocation1 + $0x3] ss:$4 sm:$0xff] %v435_v31  ;;  %v614_v55 = vrot.slane %v606_v44, 2  ;;  %v619_v57 = vsel %vm355_vm1, %v603_v36, %v611_v45  ;;  %v4501_v7 = vld [vmem:[%s6038_s11 + $0x4] sm:$0x7]  ;;  %v4396_v10 = vrot.slane %v626_v61, 9 }
  0x25   : > { %595 = vmatpush.bf16.msra.mxu1 %v5709_v56  ;;  %v617_v56 = vsel %vm351_vm0, %v603_v36, %v611_v45  ;;  %v4394_v6 = vrot.slane %v619_v57, 9  ;;  %v4398_v15 = vrot.slane %v633_v63, 9  ;;  %v4504_v19 = vld [vmem:[%s6038_s11 + $0x10] sm:$0x7]  ;;  %v5767_v23 = vld [vmem:[%s7101_s3 + $0x1d8] sm:$0xff]  ;;  %v5741_v27 = vld [vmem:[%s7101_s3 + $0x108] sm:$0xff] }
  0x26   : > { %750 = vmatpush.bf16.msra.mxu2 %v5725_v2  ;;  %v638_v2 = vsel %vm351_vm0, %v606_v44, %v614_v55  ;;  %v640_v4 = vsel %vm355_vm1, %v606_v44, %v614_v55  ;;  %v4393_v5 = vrot.slane %v617_v56, 9  ;;  %v870_v31 = vrot.slane %v4504_v19, 2  ;;  %v5740_v38 = vld [vmem:[%s7101_s3 + $0x100] sm:$0xff]  ;;  %v5787_v44 = vld [vmem:[%s7102_s4 + $0x38] sm:$0xff]  ;;  %v5765_v49 = vld [vmem:[%s7101_s3 + $0x1c8] sm:$0xff] }
  0x27   : > { %849 = vmatpush.bf16.msra.mxu3 %v5733_v21  ;;  %v4400_v18 = vrot.slane %v640_v4, 9  ;;  %v5758_v21 = vld [vmem:[%s7101_s3 + $0x190] sm:$0xff]  ;;  %v4449_v57 = vld [vmem:[%s6038_s11 + $0x4] sm:$0x3]  ;;  %v4450_v62 = vld [vmem:[%s6038_s11 + $0x8] sm:$0x3] }
  0x28   : > { %521 = vmatpush.bf16.msra.mxu0 %v5716_v11  ;;  %v4502_v11 = vld [vmem:[%s6038_s11 + $0x8] sm:$0x7]  ;;  %v653_v22 = vsel %vm6218_vm15, %v4393_v5, %v4394_v6  ;;  %v5778_v56 = vld [vmem:[%s7101_s3 + $0x230] sm:$0xff]  ;;  %v4451_v4 = vld [vmem:[%s6038_s11 + $0xc] sm:$0x3] }
  0x29   : > { %596 = vmatpush.bf16.msra.mxu1 %v5708_v12  ;;  %v5742_v12 = vld [vmem:[%s7101_s3 + $0x110] sm:$0xff]  ;;  %v868_v24 = vrot.slane %v4502_v11, 2  ;;  %v5795_v5 = vld [vmem:[%s7102_s4 + $0x78] sm:$0xff] }
  0x2a   : > { %751 = vmatpush.bf16.msra.mxu2 %v5724_v20  ;;  %v867_v20 = vrot.slane %v4501_v7, 2  ;;  %v5786_v63 = vld [vmem:[%s7102_s4 + $0x30] sm:$0xff] }
  0x2b   : > { %850 = vmatpush.bf16.msra.mxu3 %v5732_v30  ;;  %v464_v50 = vld.sshfl [vmem:[#allocation1] sm:$0xff pattern:$0x73625140]  ;;  %v661_v30 = vsel %vm6218_vm15, %v4397_v14, %v4398_v15  ;;  %v879_v36 = vsel %vm351_vm0, %v4502_v11, %v868_v24  ;;  %v4452_v14 = vld [vmem:[%s6038_s11 + $0x10] sm:$0x3] }
  0x2c   : > { %1025 = vmatpush.bf16.msrb.mxu0 %v5747_v16  ;;  %529 = vst [vmem:[#allocation1] ss:$4 sm:$0xff] %v319_v37  ;;  %v4503_v16 = vld [vmem:[%s6038_s11 + $0xc] sm:$0x7]  ;;  %v874_v45 = vsel %vm355_vm1, %v4501_v7, %v867_v20 }
  0x2d   : > { %1175 = vmatpush.bf16.msrb.mxu1 %v5755_v17  ;;  %522 = vmatmul.bf16.vlgmr.msra.gmra.mxu0 %v464_v50  ;;  %532 = vst [vmem:[#allocation1 + $0x1] ss:$4 sm:$0xff] %v320_v43  ;;  %v4399_v17 = vrot.slane %v638_v2, 9  ;;  %v869_v26 = vrot.slane %v4503_v16, 2  ;;  %v5779_v43 = vld [vmem:[%s7101_s3 + $0x238] sm:$0xff]  ;;  %v880_v50 = vsel %vm355_vm1, %v4502_v11, %v868_v24  ;;  %v5794_v24 = vld [vmem:[%s7102_s4 + $0x70] sm:$0xff] }
  0x2e   : > { %1274 = vmatpush.bf16.msrb.mxu2 %v5763_v25  ;;  %535 = vst [vmem:[#allocation1 + $0x2] ss:$4 sm:$0xff] %v321_v47  ;;  %v657_v25 = vsel %vm6218_vm15, %v4395_v9, %v4396_v10  ;;  %v911_v47 = vshll.u32 %v879_v36, 16 }
  0x2f   : > { %1456 = vmatpush.bf16.msrb.mxu3 %v5771_v33  ;;  %538 = vst [vmem:[#allocation1 + $0x3] ss:$4 sm:$0xff] %v322_v48  ;;  %v873_v33 = vsel %vm351_vm0, %v4501_v7, %v867_v20  ;;  %v885_v37 = vsel %vm351_vm0, %v4503_v16, %v869_v26  ;;  %v5756_v48 = vld [vmem:[%s7101_s3 + $0x180] sm:$0xff] }
  0x30   : > { %1026 = vmatpush.bf16.msrb.mxu0 %v5746_v28  ;;  %v5749_v28 = vld [vmem:[%s7101_s3 + $0x148] sm:$0xff]  ;;  %v895_v41 = vshrl.u32 %v873_v33, 16  ;;  %v921_v51 = vshrl.u32 %v885_v37, 16  ;;  %v924_v52 = vshll.u32 %v885_v37, 16  ;;  %v913_v2 = vrot.slane %v911_v47, 7 }
  0x31   : > { %1176 = vmatpush.bf16.msrb.mxu1 %v5754_v29  ;;  %v5793_v37 = vld [vmem:[%s7102_s4 + $0x68] sm:$0xff] }
  0x32   : > { %1275 = vmatpush.bf16.msrb.mxu2 %v5762_v32  ;;  %v665_v32 = vsel %vm6218_vm15, %v4399_v17, %v4400_v18  ;;  %v897_v60 = vrot.slane %v895_v41, 6  ;;  %v923_v7 = vrot.slane %v921_v51, 6  ;;  %v926_v9 = vrot.slane %v924_v52, 7  ;;  %v5777_v17 = vld [vmem:[%s7101_s3 + $0x228] sm:$0xff] }
  0x33   : > { %1457 = vmatpush.bf16.msrb.mxu3 %v5770_v40  ;;  %v891_v40 = vsel %vm351_vm0, %v4504_v19, %v870_v31  ;;  %v5785_v18 = vld [vmem:[%s7102_s4 + $0x28] sm:$0xff] }
  0x34   : > { %1027 = vmatpush.bf16.msrb.mxu0 %v5745_v34  ;;  %v5757_v34 = vld [vmem:[%s7101_s3 + $0x188] sm:$0xff]  ;;  %v937_v55 = vshll.u32 %v891_v40, 16 }
  0x35   : > { %1177 = vmatpush.bf16.msrb.mxu1 %v5753_v35  ;;  %v5766_v35 = vld [vmem:[%s7101_s3 + $0x1d0] sm:$0xff] }
  0x36   : > { %1276 = vmatpush.bf16.msrb.mxu2 %v5761_v39  ;;  %v539_v29 = vld.sshfl [vmem:[#allocation1] sm:$0xff pattern:$0x73625140] }
  0x37   : > { %1458 = vmatpush.bf16.msrb.mxu3 %v5769_v54  ;;  %597 = vmatmul.bf16.vlgmr.msra.gmra.mxu1 %v539_v29  ;;  %684 = vst [vmem:[#allocation1] ss:$4 sm:$0xff] %v653_v22  ;;  %v5748_v39 = vld [vmem:[%s7101_s3 + $0x140] sm:$0xff]  ;;  %v934_v54 = vshrl.u32 %v891_v40, 16  ;;  %v927_v22 = vor.u32 %v926_v9, %v923_v7  ;;  %v4555_v40 = vld [vmem:[%s6038_s11 + $0xc] sm:$0x6] }
  0x38   : > { %1028 = vmatpush.bf16.msrb.mxu0 %v5744_v42  ;;  %687 = vst [vmem:[#allocation1 + $0x1] ss:$4 sm:$0xff] %v657_v25  ;;  %v898_v42 = vshll.u32 %v873_v33, 16  ;;  %v5776_v29 = vld [vmem:[%s7101_s3 + $0x220] sm:$0xff]  ;;  %v1051_v51 = vrot.slane %v4555_v40, 2  ;;  %v5773_v9 = vld [vmem:[%s7101_s3 + $0x208] sm:$0xff] }
  0x39   : > { %1178 = vmatpush.bf16.msrb.mxu1 %v5752_v46  ;;  %690 = vst [vmem:[#allocation1 + $0x2] ss:$4 sm:$0xff] %v661_v30  ;;  %v908_v46 = vshrl.u32 %v879_v36, 16  ;;  %v4553_v33 = vld [vmem:[%s6038_s11 + $0x4] sm:$0x6] }
  0x3a   : > { %1277 = vmatpush.bf16.msrb.mxu2 %v5760_v53  ;;  %693 = vst [vmem:[#allocation1 + $0x3] ss:$4 sm:$0xff] %v665_v32  ;;  %v886_v53 = vsel %vm355_vm1, %v4503_v16, %v869_v26  ;;  %v900_v61 = vrot.slane %v898_v42, 7  ;;  %v5784_v32 = vld [vmem:[%s7102_s4 + $0x20] sm:$0xff]  ;;  %v4554_v36 = vld [vmem:[%s6038_s11 + $0x8] sm:$0x6] }
  0x3b   : > { %1459 = vmatpush.bf16.msrb.mxu3 %v5768_v1  ;;  %v910_v1 = vrot.slane %v908_v46, 6  ;;  %v888_v6 = vrot.slane %v886_v53, 2  ;;  %v4556_v42 = vld [vmem:[%s6038_s11 + $0x10] sm:$0x6]  ;;  %v1050_v47 = vrot.slane %v4554_v36, 2 }
  0x3c   : > { %1029 = vmatpush.bf16.msrb.mxu0 %v5743_v58  ;;  %v876_v58 = vrot.slane %v874_v45, 2  ;;  %v901_v15 = vor.u32 %v900_v61, %v897_v60  ;;  %v5775_v45 = vld [vmem:[%s7101_s3 + $0x218] sm:$0xff]  ;;  %v1052_v53 = vrot.slane %v4556_v42, 2  ;;  %v1071_v60 = vsel %vm355_vm1, %v4555_v40, %v1051_v51  ;;  %v4665_v61 = vld [vmem:[%s6038_s11 + $0x8] sm:$0x7] }
  0x3d   : > { %1179 = vmatpush.bf16.msrb.mxu1 %v5751_v59  ;;  %v892_v59 = vsel %vm355_vm1, %v4504_v19, %v870_v31  ;;  %v914_v19 = vor.u32 %v913_v2, %v910_v1  ;;  %v4562_v7 = vrot.slane %v1071_v60, 9 }
  0x3e   : > { %1278 = vmatpush.bf16.msrb.mxu2 %v5759_v0  ;;  %v882_v0 = vrot.slane %v880_v50, 2  ;;  %v894_v11 = vrot.slane %v892_v59, 2  ;;  %v904_v16 = vshll.u32 %v876_v58, 16  ;;  %v5774_v58 = vld [vmem:[%s7101_s3 + $0x210] sm:$0xff]  ;;  %v1069_v59 = vsel %vm351_vm0, %v4555_v40, %v1051_v51  ;;  %v4614_v51 = vld [vmem:[%s6038_s11 + $0xc] sm:$0x3] }
  0x3f   : > { %1460 = vmatpush.bf16.msrb.mxu3 %v5767_v23  ;;  %v930_v23 = vshll.u32 %v888_v6, 16  ;;  %v915_v30 = vrot.slane %v914_v19, 2  ;;  %v4561_v6 = vrot.slane %v1069_v59, 9 }
  0x40   : > { %1030 = vmatpush.bf16.msrb.mxu0 %v5742_v12  ;;  %v936_v12 = vrot.slane %v934_v54, 6  ;;  %v917_v20 = vshll.u32 %v882_v0, 16  ;;  %v943_v26 = vshll.u32 %v894_v11, 16  ;;  %v1298_v11 = vrot.slane %v4665_v61, 2 }
  0x41   : > { %1180 = vmatpush.bf16.msrb.mxu1 %v5750_v13  ;;  %v694_v10 = vld.sshfl [vmem:[#allocation1] sm:$0xff pattern:$0x73625140]  ;;  %v939_v13 = vrot.slane %v937_v55, 7 }
  0x42   : > { %1279 = vmatpush.bf16.msrb.mxu2 %v5758_v21  ;;  %783 = vst [vmem:[#allocation1] ss:$4 sm:$0xff] %v4449_v57  ;;  %v5764_v21 = vld [vmem:[%s7101_s3 + $0x1c0] sm:$0xff]  ;;  %v919_v31 = vrot.slane %v917_v20, 7  ;;  %v1064_v57 = vsel %vm355_vm1, %v4554_v36, %v1050_v47  ;;  %v1092_v20 = vsel %vm6218_vm15, %v4561_v6, %v4562_v7  ;;  %v5790_v6 = vld [vmem:[%s7102_s4 + $0x50] sm:$0xff] }
  0x43   : > { %1461 = vmatpush.bf16.msrb.mxu3 %v5766_v35  ;;  %752 = vmatmul.bf16.vlgmr.msra.gmra.mxu2 %v694_v10  ;;  %786 = vst [vmem:[#allocation1 + $0x1] ss:$4 sm:$0xff] %v4450_v62  ;;  %v940_v25 = vor.u32 %v939_v13, %v936_v12  ;;  %v932_v35 = vrot.slane %v930_v23, 7  ;;  %v1076_v62 = vsel %vm351_vm0, %v4556_v42, %v1052_v53  ;;  %v4667_v10 = vld [vmem:[%s6038_s11 + $0x10] sm:$0x7]  ;;  %v5800_v7 = vld [vmem:[%s7102_s4 + $0xa0] sm:$0xff] }
  0x44   : > { %1031 = vmatpush.bf16.msrb.mxu0 %v5741_v27  ;;  %789 = vst [vmem:[#allocation1 + $0x2] ss:$4 sm:$0xff] %v4451_v4  ;;  %v902_v27 = vrot.slane %v901_v15, 2  ;;  %v920_v46 = vsel %vm6110_vm8, %v915_v30, %v919_v31  ;;  %v4560_v4 = vrot.slane %v1064_v57, 9  ;;  %v4563_v12 = vrot.slane %v1076_v62, 9  ;;  %v5772_v30 = vld [vmem:[%s7101_s3 + $0x200] sm:$0xff] }
  0x45   : > { %1181 = vmatpush.bf16.msrb.mxu1 %v5749_v28  ;;  %792 = vst [vmem:[#allocation1 + $0x3] ss:$4 sm:$0xff] %v4452_v14  ;;  %v906_v28 = vrot.slane %v904_v16, 7  ;;  %v4668_v14 = vld [vmem:[%s6038_s11 + $0x14] sm:$0x7] }
  0x46   : > { %1280 = vmatpush.bf16.msrb.mxu2 %v5757_v34  ;;  %v928_v34 = vrot.slane %v927_v22, 2  ;;  %v1304_v22 = vsel %vm351_vm0, %v4665_v61, %v1298_v11 }
  0x47   : > { %1462 = vmatpush.bf16.msrb.mxu3 %v5765_v49  ;;  %v907_v41 = vsel %vm6110_vm8, %v902_v27, %v906_v28  ;;  %v5802_v27 = vld [vmem:[%s7102_s4 + $0xb0] sm:$0xff] }
  0x48   : > { %1032 = vmatpush.bf16.msrb.mxu0 %v5740_v38  ;;  %v941_v38 = vrot.slane %v940_v25, 2  ;;  %v933_v50 = vsel %vm6110_vm8, %v928_v34, %v932_v35  ;;  %v5782_v25 = vld [vmem:[%s7102_s4 + $0x10] sm:$0xff]  ;;  %v5791_v34 = vld [vmem:[%s7102_s4 + $0x58] sm:$0xff] }
  0x49   : > { %1182 = vmatpush.bf16.msrb.mxu1 %v5748_v39  ;;  %v945_v39 = vrot.slane %v943_v26, 7  ;;  %v5792_v26 = vld [vmem:[%s7102_s4 + $0x60] sm:$0xff]  ;;  %v5811_v35 = vld [vmem:[%s7102_s4 + $0xf8] sm:$0xff] }
  0x4a   : > { %1281 = vmatpush.bf16.msrb.mxu2 %v5756_v48  ;;  %v5783_v48 = vld [vmem:[%s7102_s4 + $0x18] sm:$0xff] }
  0x4b   : > { %1463 = vmatpush.bf16.msrb.mxu3 %v5764_v21  ;;  %v946_v52 = vsel %vm6110_vm8, %v941_v38, %v945_v39  ;;  %v1301_v21 = vrot.slane %v4668_v14, 2  ;;  %v5801_v39 = vld [vmem:[%s7102_s4 + $0xa8] sm:$0xff] }
  0x4c   : > { %1606 = vmatpush.bf16.msra.mxu0 %v5779_v43  ;;  %v1049_v43 = vrot.slane %v4553_v33, 2  ;;  %v793_v49 = vld.sshfl [vmem:[#allocation1] sm:$0xff pattern:$0x73625140] }
  0x4d   : > { %1703 = vmatpush.bf16.msra.mxu1 %v5787_v44  ;;  %v5803_v44 = vld [vmem:[%s7102_s4 + $0xb8] sm:$0xff]  ;;  %851 = vmatmul.bf16.vlgmr.msra.gmra.mxu3 %v793_v49  ;;  %965 = vst [vmem:[#allocation1] ss:$4 sm:$0xff] %v907_v41  ;;  %v1322_v31 = vsel %vm351_vm0, %v4668_v14, %v1301_v21 }
  0x4e   : > { %1885 = vmatpush.bf16.msra.mxu2 %v5795_v5  ;;  %968 = vst [vmem:[#allocation1 + $0x1] ss:$4 sm:$0xff] %v920_v46  ;;  %v1055_v54 = vsel %vm351_vm0, %v4553_v33, %v1049_v43  ;;  %v1057_v55 = vsel %vm355_vm1, %v4553_v33, %v1049_v43  ;;  %v4666_v5 = vld [vmem:[%s6038_s11 + $0xc] sm:$0x7]  ;;  %v4613_v46 = vld [vmem:[%s6038_s11 + $0x8] sm:$0x3] }
  0x4f   : > { %2035 = vmatpush.bf16.msra.mxu3 %v5803_v44  ;;  %971 = vst [vmem:[#allocation1 + $0x2] ss:$4 sm:$0xff] %v933_v50  ;;  %v4557_v0 = vrot.slane %v1055_v54, 9  ;;  %v4558_v1 = vrot.slane %v1057_v55, 9  ;;  %v1299_v16 = vrot.slane %v4666_v5, 2  ;;  %v5781_v33 = vld [vmem:[%s7102_s4 + $0x8] sm:$0xff] }
  0x50   : > { %1607 = vmatpush.bf16.msra.mxu0 %v5778_v56  ;;  %v1062_v56 = vsel %vm351_vm0, %v4554_v36, %v1050_v47  ;;  %974 = vst [vmem:[#allocation1 + $0x3] ss:$4 sm:$0xff] %v946_v52  ;;  %v1305_v36 = vsel %vm355_vm1, %v4665_v61, %v1298_v11  ;;  %v1365_v44 = vshrl.u32 %v1322_v31, 16  ;;  %v4615_v55 = vld [vmem:[%s6038_s11 + $0x10] sm:$0x3] }
  0x51   : > { %1704 = vmatpush.bf16.msra.mxu1 %v5786_v63  ;;  %v1078_v63 = vsel %vm355_vm1, %v4556_v42, %v1052_v53  ;;  %v4559_v2 = vrot.slane %v1062_v56, 9  ;;  %v1084_v15 = vsel %vm6218_vm15, %v4557_v0, %v4558_v1  ;;  %v1311_v40 = vsel %vm355_vm1, %v4666_v5, %v1299_v16  ;;  %v5810_v11 = vld [vmem:[%s7102_s4 + $0xf0] sm:$0xff] }
  0x52   : > { %1886 = vmatpush.bf16.msra.mxu2 %v5794_v24  ;;  %v4564_v13 = vrot.slane %v1078_v63, 9  ;;  %v1310_v24 = vsel %vm351_vm0, %v4666_v5, %v1299_v16  ;;  %v1307_v47 = vrot.slane %v1305_v36, 2  ;;  %v1313_v52 = vrot.slane %v1311_v40, 2  ;;  %v4616_v63 = vld [vmem:[%s6038_s11 + $0x14] sm:$0x3]  ;;  %v5780_v5 = vld [vmem:[%s7102_s4] sm:$0xff] }
  0x53   : > { %v1342_v38 = vshll.u32 %v1310_v24, 16  ;;  %2036 = vmatpush.bf16.msra.mxu3 %v5802_v27  ;;  %v1367_v61 = vrot.slane %v1365_v44, 6  ;;  %v5799_v36 = vld [vmem:[%s7102_s4 + $0x98] sm:$0xff]  ;;  %v5798_v44 = vld [vmem:[%s7102_s4 + $0x90] sm:$0xff] }
  0x54   : > { %1608 = vmatpush.bf16.msra.mxu0 %v5777_v17  ;;  %v1088_v17 = vsel %vm6218_vm15, %v4559_v2, %v4560_v4  ;;  %v1096_v23 = vsel %vm6218_vm15, %v4563_v12, %v4564_v13  ;;  %v1335_v1 = vshll.u32 %v1307_v47, 16  ;;  %v1348_v4 = vshll.u32 %v1313_v52, 16  ;;  %v5819_v40 = vld [vmem:[%s7102_s4 + $0x138] sm:$0xff]  ;;  %v5808_v47 = vld [vmem:[%s7102_s4 + $0xe0] sm:$0xff] }
  0x55   : > { %1705 = vmatpush.bf16.msra.mxu1 %v5785_v18  ;;  %v1300_v18 = vrot.slane %v4667_v10, 2  ;;  %v1344_v54 = vrot.slane %v1342_v38, 7 }
  0x56   : > { %1887 = vmatpush.bf16.msra.mxu2 %v5793_v37  ;;  %v1339_v37 = vshrl.u32 %v1310_v24, 16  ;;  %v4719_v24 = vld [vmem:[%s6038_s11 + $0x10] sm:$0x6] }
  0x57   : > { %v975_v19 = vld.sshfl [vmem:[#allocation1] sm:$0xff pattern:$0x73625140]  ;;  %v1316_v28 = vsel %vm351_vm0, %v4667_v10, %v1300_v18  ;;  %v1317_v43 = vsel %vm355_vm1, %v4667_v10, %v1300_v18  ;;  %2037 = vmatpush.bf16.msra.mxu3 %v5801_v39  ;;  %v4717_v18 = vld [vmem:[%s6038_s11 + $0x8] sm:$0x6] }
  0x58   : > { %1609 = vmatpush.bf16.msra.mxu0 %v5776_v29  ;;  %1115 = vst [vmem:[#allocation1] ss:$4 sm:$0xff] %v1084_v15  ;;  %v1326_v29 = vshrl.u32 %v1304_v22, 16  ;;  %v1352_v41 = vshrl.u32 %v1316_v28, 16  ;;  %v1355_v42 = vshll.u32 %v1316_v28, 16  ;;  %v1341_v53 = vrot.slane %v1339_v37, 6 }
  0x59   : > { %1706 = vmatpush.bf16.msra.mxu1 %v5784_v32  ;;  %1033 = vmatmul.bf16.vlgmr.msrb.gmra.mxu0 %v975_v19  ;;  %1118 = vst [vmem:[#allocation1 + $0x1] ss:$4 sm:$0xff] %v1088_v17  ;;  %v1329_v32 = vshll.u32 %v1304_v22, 16  ;;  %v1319_v56 = vrot.slane %v1317_v43, 2  ;;  %v1337_v15 = vrot.slane %v1335_v1, 7  ;;  %v1350_v17 = vrot.slane %v1348_v4, 7 }
  0x5a   : > { %1121 = vst [vmem:[#allocation1 + $0x2] ss:$4 sm:$0xff] %v1092_v20  ;;  %1888 = vmatpush.bf16.msra.mxu2 %v5792_v26  ;;  %v1328_v49 = vrot.slane %v1326_v29, 6  ;;  %v1354_v57 = vrot.slane %v1352_v41, 6  ;;  %v1345_v2 = vor.u32 %v1344_v54, %v1341_v53  ;;  %v4720_v26 = vld [vmem:[%s6038_s11 + $0x14] sm:$0x6] }
  0x5b   : > { %1124 = vst [vmem:[#allocation1 + $0x3] ss:$4 sm:$0xff] %v1096_v23  ;;  %v1331_v50 = vrot.slane %v1329_v32, 7  ;;  %v1361_v10 = vshll.u32 %v1319_v56, 16  ;;  %2038 = vmatpush.bf16.msra.mxu3 %v5800_v7  ;;  %v1480_v27 = vrot.slane %v4717_v18, 2  ;;  %v1482_v32 = vrot.slane %v4719_v24, 2 }
  0x5c   : > { %1610 = vmatpush.bf16.msra.mxu0 %v5775_v45  ;;  %v1368_v45 = vshll.u32 %v1322_v31, 16  ;;  %v1346_v16 = vrot.slane %v1345_v2, 2  ;;  %v5809_v37 = vld [vmem:[%s7102_s4 + $0xe8] sm:$0xff]  ;;  %v5788_v43 = vld [vmem:[%s7102_s4 + $0x40] sm:$0xff] }
  0x5d   : > { %1707 = vmatpush.bf16.msra.mxu1 %v5783_v48  ;;  %v1323_v48 = vsel %vm355_vm1, %v4668_v14, %v1301_v21  ;;  %v1332_v0 = vor.u32 %v1331_v50, %v1328_v49  ;;  %v1363_v20 = vrot.slane %v1361_v10, 7  ;;  %v4718_v21 = vld [vmem:[%s6038_s11 + $0xc] sm:$0x6]  ;;  %v1486_v38 = vsel %vm351_vm0, %v4717_v18, %v1480_v27  ;;  %v1719_v53 = vld [vmem:[%s6439_s28] sm:$0x7] }
  0x5e   : > { %1889 = vmatpush.bf16.msra.mxu2 %v5791_v34  ;;  %v1325_v60 = vrot.slane %v1323_v48, 2  ;;  %v1370_v62 = vrot.slane %v1368_v45, 7  ;;  %v1351_v28 = vsel %vm6110_vm8, %v1346_v16, %v1350_v17  ;;  %v1481_v29 = vrot.slane %v4718_v21, 2  ;;  %v5818_v48 = vld [vmem:[%s7102_s4 + $0x130] sm:$0xff]  ;;  %v1720_v56 = vld [vmem:[%s6439_s28 + $0x4] sm:$0x7] }
  0x5f   : > { %v1333_v14 = vrot.slane %v1332_v0, 2  ;;  %v1483_v34 = vrot.slane %v4720_v26, 2  ;;  %v1488_v39 = vsel %vm355_vm1, %v4717_v18, %v1480_v27  ;;  %2039 = vmatpush.bf16.msra.mxu3 %v5799_v36  ;;  %v1500_v45 = vsel %vm351_vm0, %v4719_v24, %v1482_v32  ;;  %v5796_v17 = vld [vmem:[%s7102_s4 + $0x80] sm:$0xff]  ;;  %v5806_v18 = vld [vmem:[%s7102_s4 + $0xd0] sm:$0xff] }
  0x60   : > { %1611 = vmatpush.bf16.msra.mxu0 %v5774_v58  ;;  %v1357_v58 = vrot.slane %v1355_v42, 7  ;;  %v1371_v12 = vor.u32 %v1370_v62, %v1367_v61  ;;  %v1374_v13 = vshll.u32 %v1325_v60, 16  ;;  %v1493_v41 = vsel %vm351_vm0, %v4718_v21, %v1481_v29  ;;  %v1722_v62 = vld [vmem:[%s6439_s28 + $0xc] sm:$0x7] }
  0x61   : > { %1708 = vmatpush.bf16.msra.mxu1 %v5782_v25  ;;  %v1338_v25 = vsel %vm6110_vm8, %v1333_v14, %v1337_v15  ;;  %v1495_v42 = vsel %vm355_vm1, %v4718_v21, %v1481_v29  ;;  %v1507_v49 = vsel %vm351_vm0, %v4720_v26, %v1483_v34  ;;  %v1509_v50 = vsel %vm355_vm1, %v4720_v26, %v1483_v34  ;;  %v5827_v15 = vld [vmem:[%s7102_s4 + $0x178] sm:$0xff]  ;;  %v1623_v34 = vld [vmem:[%s6439_s28 + $0x4] sm:$0x3] }
  0x62   : > { %v1125_v59 = vld.sshfl [vmem:[#allocation1] sm:$0xff pattern:$0x73625140]  ;;  %1890 = vmatpush.bf16.msra.mxu2 %v5790_v6  ;;  %v1372_v22 = vrot.slane %v1371_v12, 2  ;;  %v1376_v23 = vrot.slane %v1374_v13, 7  ;;  %v4722_v52 = vrot.slane %v1488_v39, 9 }
  0x63   : > { %1183 = vmatmul.bf16.vlgmr.msrb.gmra.mxu1 %v1125_v59  ;;  %1214 = vst [vmem:[#allocation1] ss:$4 sm:$0xff] %v4613_v46  ;;  %v1502_v46 = vsel %vm355_vm1, %v4719_v24, %v1482_v32  ;;  %v4723_v54 = vrot.slane %v1493_v41, 9  ;;  %2040 = vmatpush.bf16.msra.mxu3 %v5798_v44  ;;  %v1721_v59 = vld [vmem:[%s6439_s28 + $0x8] sm:$0x7]  ;;  %v4727_v60 = vrot.slane %v1507_v49, 9 }
  0x64   : > { %1612 = vmatpush.bf16.msra.mxu0 %v5773_v9  ;;  %1217 = vst [vmem:[#allocation1 + $0x1] ss:$4 sm:$0xff] %v4614_v51  ;;  %v1358_v9 = vor.u32 %v1357_v58, %v1354_v57  ;;  %v4721_v51 = vrot.slane %v1486_v38, 9  ;;  %v4725_v57 = vrot.slane %v1500_v45, 9  ;;  %v4726_v58 = vrot.slane %v1502_v46, 9  ;;  %v5807_v12 = vld [vmem:[%s7102_s4 + $0xd8] sm:$0xff] }
  0x65   : > { %1709 = vmatpush.bf16.msra.mxu1 %v5781_v33  ;;  %1220 = vst [vmem:[#allocation1 + $0x2] ss:$4 sm:$0xff] %v4615_v55  ;;  %v1377_v33 = vsel %vm6110_vm8, %v1372_v22, %v1376_v23  ;;  %v4724_v55 = vrot.slane %v1495_v42, 9  ;;  %v4728_v61 = vrot.slane %v1509_v50, 9  ;;  %v1728_v1 = vrot.slane %v1720_v56, 2  ;;  %v5817_v13 = vld [vmem:[%s7102_s4 + $0x128] sm:$0xff] }
  0x66   : > { %1223 = vst [vmem:[#allocation1 + $0x3] ss:$4 sm:$0xff] %v4616_v63  ;;  %v1359_v19 = vrot.slane %v1358_v9, 2  ;;  %v1727_v63 = vrot.slane %v1719_v53, 2  ;;  %v1515_v0 = vsel %vm6218_vm15, %v4721_v51, %v4722_v52  ;;  %v1729_v4 = vrot.slane %v1721_v59, 2  ;;  %v5816_v22 = vld [vmem:[%s7102_s4 + $0x120] sm:$0xff] }
  0x67   : > { %v1519_v2 = vsel %vm6218_vm15, %v4723_v54, %v4724_v55  ;;  %v1523_v6 = vsel %vm6218_vm15, %v4725_v57, %v4726_v58  ;;  %v1730_v7 = vrot.slane %v1722_v62, 2  ;;  %v1527_v9 = vsel %vm6218_vm15, %v4727_v60, %v4728_v61  ;;  %v5826_v23 = vld [vmem:[%s7102_s4 + $0x170] sm:$0xff]  ;;  %v1624_v39 = vld [vmem:[%s6439_s28 + $0x8] sm:$0x3]  ;;  %v5815_v54 = vld [vmem:[%s7102_s4 + $0x118] sm:$0xff] }
  0x68   : > { %1613 = vmatpush.bf16.msra.mxu0 %v5772_v30  ;;  %v1364_v31 = vsel %vm6110_vm8, %v1359_v19, %v1363_v20  ;;  %v1733_v10 = vsel %vm351_vm0, %v1719_v53, %v1727_v63  ;;  %v1739_v14 = vsel %vm351_vm0, %v1720_v56, %v1728_v1  ;;  %v1745_v16 = vsel %vm351_vm0, %v1721_v59, %v1729_v4  ;;  %v5825_v55 = vld [vmem:[%s7102_s4 + $0x168] sm:$0xff]  ;;  %v5835_v58 = vld [vmem:[%s7102_s4 + $0x1b8] sm:$0xff]  ;;  %v5804_v61 = vld [vmem:[%s7102_s4 + $0xc0] sm:$0xff] }
  0x69   : > { %1710 = vmatpush.bf16.msra.mxu1 %v5780_v5  ;;  %v1751_v19 = vsel %vm351_vm0, %v1722_v62, %v1730_v7  ;;  %v1755_v20 = vshrl.u32 %v1733_v10, 16  ;;  %v1758_v21 = vshll.u32 %v1733_v10, 16  ;;  %v1734_v24 = vsel %vm355_vm1, %v1719_v53, %v1727_v63  ;;  %v5805_v53 = vld [vmem:[%s7102_s4 + $0xc8] sm:$0xff] }
  0x6a   : > { %v1771_v26 = vshll.u32 %v1739_v14, 16  ;;  %v1740_v27 = vsel %vm355_vm1, %v1720_v56, %v1728_v1  ;;  %v1784_v29 = vshll.u32 %v1745_v16, 16  ;;  %v1794_v32 = vshrl.u32 %v1751_v19, 16  ;;  %v5824_v1 = vld [vmem:[%s7102_s4 + $0x160] sm:$0xff] }
  0x6b   : > { %v1752_v36 = vsel %vm355_vm1, %v1722_v62, %v1730_v7  ;;  %v1760_v38 = vrot.slane %v1758_v21, 7  ;;  %v5814_v62 = vld [vmem:[%s7102_s4 + $0x110] sm:$0xff] }
  0x6c   : > { %2134 = vmatpush.bf16.msrb.mxu0 %v5811_v35  ;;  %v5789_v35 = vld [vmem:[%s7102_s4 + $0x48] sm:$0xff]  ;;  %v1773_v42 = vrot.slane %v1771_v26, 7  ;;  %v1786_v46 = vrot.slane %v1784_v29, 7  ;;  %v1796_v49 = vrot.slane %v1794_v32, 6 }
  0x6d   : > { %v1224_v30 = vld.sshfl [vmem:[#allocation1] sm:$0xff pattern:$0x73625140]  ;;  %1891 = vmatpush.bf16.msra.mxu2 %v5789_v35  ;;  %2316 = vmatpush.bf16.msrb.mxu1 %v5819_v40  ;;  %v1736_v35 = vrot.slane %v1734_v24, 2  ;;  %v1742_v40 = vrot.slane %v1740_v27, 2  ;;  %v5813_v26 = vld [vmem:[%s7102_s4 + $0x108] sm:$0xff] }
  0x6e   : > { %1282 = vmatmul.bf16.vlgmr.msrb.gmra.mxu2 %v1224_v30  ;;  %1396 = vst [vmem:[#allocation1] ss:$4 sm:$0xff] %v1338_v25  ;;  %v1768_v25 = vshrl.u32 %v1739_v14, 16  ;;  %v1622_v30 = vld [vmem:[%s6439_s28] sm:$0x3]  ;;  %v5823_v27 = vld [vmem:[%s7102_s4 + $0x158] sm:$0xff] }
  0x6f   : > { %1399 = vst [vmem:[#allocation1 + $0x1] ss:$4 sm:$0xff] %v1351_v28  ;;  %v1781_v28 = vshrl.u32 %v1745_v16, 16  ;;  %v1764_v52 = vshll.u32 %v1736_v35, 16  ;;  %v1777_v57 = vshll.u32 %v1742_v40, 16  ;;  %v5822_v35 = vld [vmem:[%s7102_s4 + $0x150] sm:$0xff] }
  0x70   : > { %2135 = vmatpush.bf16.msrb.mxu0 %v5810_v11  ;;  %1402 = vst [vmem:[#allocation1 + $0x2] ss:$4 sm:$0xff] %v1364_v31  ;;  %v5797_v11 = vld [vmem:[%s7102_s4 + $0x88] sm:$0xff]  ;;  %v1746_v31 = vsel %vm355_vm1, %v1721_v59, %v1729_v4  ;;  %v1770_v41 = vrot.slane %v1768_v25, 6 }
  0x71   : > { %1405 = vst [vmem:[#allocation1 + $0x3] ss:$4 sm:$0xff] %v1377_v33  ;;  %1892 = vmatpush.bf16.msra.mxu2 %v5788_v43  ;;  %2317 = vmatpush.bf16.msrb.mxu1 %v5818_v48  ;;  %v1797_v33 = vshll.u32 %v1751_v19, 16  ;;  %v1625_v43 = vld [vmem:[%s6439_s28 + $0xc] sm:$0x3]  ;;  %v1748_v44 = vrot.slane %v1746_v31, 2 }
  0x72   : > { %2041 = vmatpush.bf16.msra.mxu3 %v5797_v11  ;;  %v1783_v45 = vrot.slane %v1781_v28, 6  ;;  %v1754_v48 = vrot.slane %v1752_v36, 2  ;;  %v1774_v56 = vor.u32 %v1773_v42, %v1770_v41  ;;  %v1779_v7 = vrot.slane %v1777_v57, 7  ;;  %v5833_v28 = vld [vmem:[%s7102_s4 + $0x1a8] sm:$0xff]  ;;  %v5843_v31 = vld [vmem:[%s7102_s4 + $0x1f8] sm:$0xff] }
  0x73   : > { %v1799_v50 = vrot.slane %v1797_v33, 7  ;;  %v1790_v60 = vshll.u32 %v1748_v44, 16  ;;  %v4965_v44 = vld [vmem:[%s6439_s28 + $0x4] sm:$0x7] }
  0x74   : > { %2136 = vmatpush.bf16.msrb.mxu0 %v5809_v37  ;;  %v1757_v37 = vrot.slane %v1755_v20, 6  ;;  %v1787_v59 = vor.u32 %v1786_v46, %v1783_v45 }
  0x75   : > { %2318 = vmatpush.bf16.msrb.mxu1 %v5817_v13  ;;  %2466 = vmatpush.bf16.msrb.mxu2 %v5827_v15  ;;  %v1800_v63 = vor.u32 %v1799_v50, %v1796_v49  ;;  %v1792_v11 = vrot.slane %v1790_v60, 7  ;;  %v1903_v15 = vld [vmem:[%s6439_s28 + $0x8] sm:$0x6]  ;;  %v4967_v50 = vld [vmem:[%s6439_s28 + $0xc] sm:$0x7] }
  0x76   : > { %2042 = vmatpush.bf16.msra.mxu3 %v5796_v17  ;;  %v1761_v51 = vor.u32 %v1760_v38, %v1757_v37  ;;  %v1788_v10 = vrot.slane %v1787_v59, 2  ;;  %v1904_v17 = vld [vmem:[%s6439_s28 + $0xc] sm:$0x6]  ;;  %v5832_v38 = vld [vmem:[%s7102_s4 + $0x1a0] sm:$0xff] }
  0x77   : > { %v1801_v13 = vrot.slane %v1800_v63, 2  ;;  %v1912_v25 = vrot.slane %v1904_v17, 2 }
  0x78   : > { %2137 = vmatpush.bf16.msrb.mxu0 %v5808_v47  ;;  %v1406_v5 = vld.sshfl [vmem:[#allocation1] sm:$0xff pattern:$0x73625140]  ;;  %v1762_v4 = vrot.slane %v1761_v51, 2 }
  0x79   : > { %1464 = vmatmul.bf16.vlgmr.msrb.gmra.mxu3 %v1406_v5  ;;  %1546 = vst [vmem:[#allocation1] ss:$4 sm:$0xff] %v1515_v0  ;;  %2319 = vmatpush.bf16.msrb.mxu1 %v5816_v22  ;;  %v1803_v0 = vshll.u32 %v1754_v48, 16  ;;  %v1766_v5 = vrot.slane %v1764_v52, 7  ;;  %v1793_v22 = vsel %vm6110_vm8, %v1788_v10, %v1792_v11  ;;  %v1936_v40 = vsel %vm351_vm0, %v1904_v17, %v1912_v25 }
  0x7a   : > { %1549 = vst [vmem:[#allocation1 + $0x1] ss:$4 sm:$0xff] %v1519_v2  ;;  %2467 = vmatpush.bf16.msrb.mxu2 %v5826_v23  ;;  %2565 = vmatpush.bf16.msrb.mxu3 %v5835_v58  ;;  %v5834_v2 = vld [vmem:[%s7102_s4 + $0x1b0] sm:$0xff]  ;;  %v1911_v23 = vrot.slane %v1903_v15, 2  ;;  %v1938_v41 = vsel %vm355_vm1, %v1904_v17, %v1912_v25  ;;  %v4863_v51 = vrot.slane %v1936_v40, 9  ;;  %v2160_v58 = vrot.slane %v4967_v50, 2 }
  0x7b   : > { %1552 = vst [vmem:[#allocation1 + $0x2] ss:$4 sm:$0xff] %v1523_v6  ;;  %v1775_v6 = vrot.slane %v1774_v56, 2  ;;  %v1805_v14 = vrot.slane %v1803_v0, 7  ;;  %v1767_v16 = vsel %vm6110_vm8, %v1762_v4, %v1766_v5  ;;  %v4864_v52 = vrot.slane %v1938_v41, 9  ;;  %v5821_v0 = vld [vmem:[%s7102_s4 + $0x148] sm:$0xff] }
  0x7c   : > { %2138 = vmatpush.bf16.msrb.mxu0 %v5807_v12  ;;  %1555 = vst [vmem:[#allocation1 + $0x3] ss:$4 sm:$0xff] %v1527_v9  ;;  %v1901_v9 = vld [vmem:[%s6439_s28] sm:$0x6]  ;;  %v1902_v12 = vld [vmem:[%s6439_s28 + $0x4] sm:$0x6]  ;;  %v1929_v36 = vsel %vm351_vm0, %v1903_v15, %v1911_v23  ;;  %v1931_v37 = vsel %vm355_vm1, %v1903_v15, %v1911_v23 }
  0x7d   : > { %2320 = vmatpush.bf16.msrb.mxu1 %v5815_v54  ;;  %v1780_v19 = vsel %vm6110_vm8, %v1775_v6, %v1779_v7  ;;  %v1910_v20 = vrot.slane %v1902_v12, 2  ;;  %v1806_v24 = vsel %vm6110_vm8, %v1801_v13, %v1805_v14  ;;  %v4861_v48 = vrot.slane %v1929_v36, 9  ;;  %v5851_v5 = vld [vmem:[%s7102_s4 + $0x238] sm:$0xff]  ;;  %v5820_v7 = vld [vmem:[%s7102_s4 + $0x140] sm:$0xff]  ;;  %v5850_v14 = vld [vmem:[%s7102_s4 + $0x230] sm:$0xff] }
  0x7e   : > { %2468 = vmatpush.bf16.msrb.mxu2 %v5825_v55  ;;  %2566 = vmatpush.bf16.msrb.mxu3 %v5834_v2  ;;  %v4862_v49 = vrot.slane %v1931_v37, 9  ;;  %v2158_v54 = vrot.slane %v4965_v44, 2  ;;  %v5841_v2 = vld [vmem:[%s7102_s4 + $0x1e8] sm:$0xff]  ;;  %v2176_v6 = vsel %vm351_vm0, %v4967_v50, %v2160_v58  ;;  %v5840_v13 = vld [vmem:[%s7102_s4 + $0x1e0] sm:$0xff] }
  0x7f   : > { %v1922_v32 = vsel %vm351_vm0, %v1902_v12, %v1910_v20  ;;  %v1924_v33 = vsel %vm355_vm1, %v1902_v12, %v1910_v20  ;;  %v2215_v20 = vshll.u32 %v2176_v6, 16  ;;  %v4914_v25 = vld [vmem:[%s6439_s28 + $0x8] sm:$0x3] }
  0x80   : > { %2139 = vmatpush.bf16.msrb.mxu0 %v5806_v18  ;;  %v1909_v18 = vrot.slane %v1901_v9, 2  ;;  %v4859_v45 = vrot.slane %v1922_v32, 9  ;;  %v4860_v46 = vrot.slane %v1924_v33, 9  ;;  %v1952_v60 = vsel %vm6218_vm15, %v4861_v48, %v4862_v49  ;;  %v5859_v49 = vld [vmem:[%s7103_s5 + $0x38] sm:$0xff] }
  0x81   : > { %2321 = vmatpush.bf16.msrb.mxu1 %v5814_v62  ;;  %v1956_v62 = vsel %vm6218_vm15, %v4863_v51, %v4864_v52  ;;  %v2164_v63 = vsel %vm351_vm0, %v4965_v44, %v2158_v54  ;;  %v2165_v15 = vsel %vm355_vm1, %v4965_v44, %v2158_v54  ;;  %v2217_v37 = vrot.slane %v2215_v20, 7  ;;  %v5829_v44 = vld [vmem:[%s7102_s4 + $0x188] sm:$0xff]  ;;  %v5828_v52 = vld [vmem:[%s7102_s4 + $0x180] sm:$0xff] }
  0x82   : > { %2469 = vmatpush.bf16.msrb.mxu2 %v5824_v1  ;;  %v1915_v29 = vsel %vm351_vm0, %v1901_v9, %v1909_v18  ;;  %2567 = vmatpush.bf16.msrb.mxu3 %v5833_v28  ;;  %v1948_v57 = vsel %vm6218_vm15, %v4859_v45, %v4860_v46  ;;  %v5831_v1 = vld [vmem:[%s7102_s4 + $0x198] sm:$0xff]  ;;  %v2186_v11 = vshrl.u32 %v2164_v63, 16  ;;  %v2189_v12 = vshll.u32 %v2164_v63, 16  ;;  %v5849_v46 = vld [vmem:[%s7102_s4 + $0x228] sm:$0xff] }
  0x83   : > { %v1556_v47 = vld.sshfl [vmem:[#allocation1] sm:$0xff pattern:$0x73625140]  ;;  %v4857_v42 = vrot.slane %v1915_v29, 9  ;;  %v5839_v45 = vld [vmem:[%s7102_s4 + $0x1d8] sm:$0xff] }
  0x84   : > { %1614 = vmatmul.bf16.vlgmr.msra.gmra.mxu0 %v1556_v47  ;;  %1643 = vst [vmem:[#allocation1] ss:$4 sm:$0xff] %v1622_v30  ;;  %v1917_v30 = vsel %vm355_vm1, %v1901_v9, %v1909_v18  ;;  %v4966_v47 = vld [vmem:[%s6439_s28 + $0x8] sm:$0x7]  ;;  %v5830_v9 = vld [vmem:[%s7102_s4 + $0x190] sm:$0xff]  ;;  %v2188_v28 = vrot.slane %v2186_v11, 6 }
  0x85   : > { %1646 = vst [vmem:[#allocation1 + $0x1] ss:$4 sm:$0xff] %v1623_v34  ;;  %2140 = vmatpush.bf16.msrb.mxu0 %v5805_v53  ;;  %2322 = vmatpush.bf16.msrb.mxu1 %v5813_v26  ;;  %v5812_v34 = vld [vmem:[%s7102_s4 + $0x100] sm:$0xff]  ;;  %v4968_v53 = vld [vmem:[%s6439_s28 + $0x10] sm:$0x7]  ;;  %v2159_v56 = vrot.slane %v4966_v47, 2 }
  0x86   : > { %1649 = vst [vmem:[#allocation1 + $0x2] ss:$4 sm:$0xff] %v1624_v39  ;;  %2470 = vmatpush.bf16.msrb.mxu2 %v5823_v27  ;;  %v5842_v39 = vld [vmem:[%s7102_s4 + $0x1f0] sm:$0xff]  ;;  %2568 = vmatpush.bf16.msrb.mxu3 %v5832_v38  ;;  %v2167_v26 = vrot.slane %v2165_v15, 2  ;;  %v2191_v29 = vrot.slane %v2189_v12, 7 }
  0x87   : > { %1652 = vst [vmem:[#allocation1 + $0x3] ss:$4 sm:$0xff] %v1625_v43  ;;  %v4858_v43 = vrot.slane %v1917_v30, 9  ;;  %v2170_v4 = vsel %vm351_vm0, %v4966_v47, %v2159_v56  ;;  %v2171_v18 = vsel %vm355_vm1, %v4966_v47, %v2159_v56  ;;  %v4915_v30 = vld [vmem:[%s6439_s28 + $0xc] sm:$0x3]  ;;  %v5848_v56 = vld [vmem:[%s7102_s4 + $0x220] sm:$0xff] }
  0x88   : > { %v2202_v17 = vshll.u32 %v2170_v4, 16 }
  0x89   : > { %2141 = vmatpush.bf16.msrb.mxu0 %v5804_v61  ;;  %2323 = vmatpush.bf16.msrb.mxu1 %v5812_v34  ;;  %v1944_v55 = vsel %vm6218_vm15, %v4857_v42, %v4858_v43  ;;  %v2161_v61 = vrot.slane %v4968_v53, 2  ;;  %v4916_v34 = vld [vmem:[%s6439_s28 + $0x10] sm:$0x3]  ;;  %v2192_v42 = vor.u32 %v2191_v29, %v2188_v28  ;;  %v2195_v43 = vshll.u32 %v2167_v26, 16  ;;  %v5856_v29 = vld [vmem:[%s7103_s5 + $0x20] sm:$0xff] }
  0x8a   : > { %2471 = vmatpush.bf16.msrb.mxu2 %v5822_v35  ;;  %2569 = vmatpush.bf16.msrb.mxu3 %v5831_v1  ;;  %v2204_v33 = vrot.slane %v2202_v17, 7  ;;  %v5018_v1 = vld [vmem:[%s6439_s28 + $0x8] sm:$0x6]  ;;  %v5846_v26 = vld [vmem:[%s7102_s4 + $0x210] sm:$0xff] }
  0x8b   : > { %v2182_v10 = vsel %vm351_vm0, %v4968_v53, %v2161_v61  ;;  %v2183_v27 = vsel %vm355_vm1, %v4968_v53, %v2161_v61  ;;  %v5838_v53 = vld [vmem:[%s7102_s4 + $0x1d0] sm:$0xff]  ;;  %v2341_v11 = vrot.slane %v5018_v1, 2  ;;  %v5837_v17 = vld [vmem:[%s7102_s4 + $0x1c8] sm:$0xff] }
  0x8c   : > { %v2225_v23 = vshrl.u32 %v2182_v10, 16 }
  0x8d   : > { %2747 = vmatpush.bf16.msra.mxu0 %v5843_v31  ;;  %v2173_v31 = vrot.slane %v2171_v18, 2  ;;  %v5847_v18 = vld [vmem:[%s7102_s4 + $0x218] sm:$0xff] }
  0x8e   : > { %v1653_v21 = vld.sshfl [vmem:[#allocation1] sm:$0xff pattern:$0x73625140]  ;;  %2472 = vmatpush.bf16.msrb.mxu2 %v5821_v0  ;;  %2570 = vmatpush.bf16.msrb.mxu3 %v5830_v9  ;;  %v2227_v40 = vrot.slane %v2225_v23, 6  ;;  %v2353_v23 = vsel %vm351_vm0, %v5018_v1, %v2341_v11 }
  0x8f   : > { %1711 = vmatmul.bf16.vlgmr.msra.gmra.mxu1 %v1653_v21  ;;  %1825 = vst [vmem:[#allocation1] ss:$4 sm:$0xff] %v1767_v16  ;;  %v2199_v16 = vshrl.u32 %v2170_v4, 16  ;;  %v4913_v21 = vld [vmem:[%s6439_s28 + $0x4] sm:$0x3]  ;;  %v2208_v48 = vshll.u32 %v2173_v31, 16 }
  0x90   : > { %1828 = vst [vmem:[#allocation1 + $0x1] ss:$4 sm:$0xff] %v1780_v19  ;;  %2897 = vmatpush.bf16.msra.mxu1 %v5851_v5  ;;  %v2212_v19 = vshrl.u32 %v2176_v6, 16  ;;  %v5019_v5 = vld [vmem:[%s6439_s28 + $0xc] sm:$0x6] }
  0x91   : > { %1831 = vst [vmem:[#allocation1 + $0x2] ss:$4 sm:$0xff] %v1793_v22  ;;  %2748 = vmatpush.bf16.msra.mxu0 %v5842_v39  ;;  %v2177_v22 = vsel %vm355_vm1, %v4967_v50, %v2160_v58  ;;  %v2201_v32 = vrot.slane %v2199_v16, 6  ;;  %v2185_v39 = vrot.slane %v2183_v27, 2  ;;  %v2193_v58 = vrot.slane %v2192_v42, 2 }
  0x92   : > { %1834 = vst [vmem:[#allocation1 + $0x3] ss:$4 sm:$0xff] %v1806_v24  ;;  %v2228_v24 = vshll.u32 %v2182_v10, 16  ;;  %2473 = vmatpush.bf16.msrb.mxu2 %v5820_v7  ;;  %v2179_v35 = vrot.slane %v2177_v22, 2  ;;  %v2214_v36 = vrot.slane %v2212_v19, 6  ;;  %2571 = vmatpush.bf16.msrb.mxu3 %v5829_v44  ;;  %v2210_v61 = vrot.slane %v2208_v48, 7 }
  0x93   : > { %v2205_v47 = vor.u32 %v2204_v33, %v2201_v32  ;;  %v5020_v7 = vld [vmem:[%s6439_s28 + $0x10] sm:$0x6]  ;;  %v5857_v19 = vld [vmem:[%s7103_s5 + $0x28] sm:$0xff]  ;;  %v5867_v22 = vld [vmem:[%s7103_s5 + $0x78] sm:$0xff] }
  0x94   : > { %2898 = vmatpush.bf16.msra.mxu1 %v5850_v14  ;;  %v2230_v41 = vrot.slane %v2228_v24, 7  ;;  %v2218_v50 = vor.u32 %v2217_v37, %v2214_v36  ;;  %v2221_v51 = vshll.u32 %v2179_v35, 16  ;;  %v2342_v14 = vrot.slane %v5019_v5, 2  ;;  %v5129_v35 = vld [vmem:[%s6439_s28 + $0x8] sm:$0x7] }
  0x95   : > { %2749 = vmatpush.bf16.msra.mxu0 %v5841_v2  ;;  %v2343_v16 = vrot.slane %v5020_v7, 2  ;;  %v2355_v24 = vsel %vm355_vm1, %v5018_v1, %v2341_v11  ;;  %v5023_v36 = vrot.slane %v2353_v23, 9  ;;  %v5132_v44 = vld [vmem:[%s6439_s28 + $0x14] sm:$0x7] }
  0x96   : > { %v2231_v54 = vor.u32 %v2230_v41, %v2227_v40  ;;  %v2219_v63 = vrot.slane %v2218_v50, 2  ;;  %v2223_v0 = vrot.slane %v2221_v51, 7  ;;  %2572 = vmatpush.bf16.msrb.mxu3 %v5828_v52  ;;  %v2360_v27 = vsel %vm351_vm0, %v5019_v5, %v2342_v14  ;;  %v5131_v41 = vld [vmem:[%s6439_s28 + $0x10] sm:$0x7] }
  0x97   : > { %v2362_v28 = vsel %vm355_vm1, %v5019_v5, %v2342_v14  ;;  %v2367_v31 = vsel %vm351_vm0, %v5020_v7, %v2343_v16  ;;  %v2369_v32 = vsel %vm355_vm1, %v5020_v7, %v2343_v16  ;;  %v5024_v37 = vrot.slane %v2355_v24, 9  ;;  %v5078_v16 = vld [vmem:[%s6439_s28 + $0xc] sm:$0x3] }
  0x98   : > { %2899 = vmatpush.bf16.msra.mxu1 %v5849_v46  ;;  %v2232_v2 = vrot.slane %v2231_v54, 2  ;;  %v5026_v40 = vrot.slane %v2362_v28, 9  ;;  %v5027_v42 = vrot.slane %v2367_v31, 9  ;;  %v2592_v52 = vrot.slane %v5132_v44, 2 }
  0x99   : > { %v1835_v59 = vld.sshfl [vmem:[#allocation1] sm:$0xff pattern:$0x73625140]  ;;  %2750 = vmatpush.bf16.msra.mxu0 %v5840_v13  ;;  %v2224_v13 = vsel %vm6110_vm8, %v2219_v63, %v2223_v0  ;;  %v2379_v48 = vsel %vm6218_vm15, %v5023_v36, %v5024_v37  ;;  %v5863_v36 = vld [vmem:[%s7103_s5 + $0x58] sm:$0xff]  ;;  %v5873_v37 = vld [vmem:[%s7103_s5 + $0xa8] sm:$0xff] }
  0x9a   : > { %1893 = vmatmul.bf16.vlgmr.msra.gmra.mxu2 %v1835_v59  ;;  %1975 = vst [vmem:[#allocation1] ss:$4 sm:$0xff] %v1944_v55  ;;  %v2234_v55 = vshll.u32 %v2185_v39, 16  ;;  %v2197_v59 = vrot.slane %v2195_v43, 7  ;;  %v5025_v39 = vrot.slane %v2360_v27, 9  ;;  %v5028_v43 = vrot.slane %v2369_v32, 9 }
  0x9b   : > { %1978 = vst [vmem:[#allocation1 + $0x1] ss:$4 sm:$0xff] %v1948_v57  ;;  %2994 = vmatpush.bf16.msra.mxu2 %v5859_v49  ;;  %v5858_v57 = vld [vmem:[%s7103_s5 + $0x30] sm:$0xff]  ;;  %v2591_v49 = vrot.slane %v5131_v41, 2  ;;  %v2613_v63 = vsel %vm351_vm0, %v5132_v44, %v2592_v52 }
  0x9c   : > { %1981 = vst [vmem:[#allocation1 + $0x2] ss:$4 sm:$0xff] %v1952_v60  ;;  %v2206_v60 = vrot.slane %v2205_v47, 2  ;;  %v2236_v4 = vrot.slane %v2234_v55, 7  ;;  %2900 = vmatpush.bf16.msra.mxu1 %v5848_v56  ;;  %v2198_v6 = vsel %vm6110_vm8, %v2193_v58, %v2197_v59  ;;  %v2383_v51 = vsel %vm6218_vm15, %v5025_v39, %v5026_v40  ;;  %v5845_v55 = vld [vmem:[%s7102_s4 + $0x208] sm:$0xff]  ;;  %v5855_v56 = vld [vmem:[%s7103_s5 + $0x18] sm:$0xff] }
  0x9d   : > { %1984 = vst [vmem:[#allocation1 + $0x3] ss:$4 sm:$0xff] %v1956_v62  ;;  %2751 = vmatpush.bf16.msra.mxu0 %v5839_v45  ;;  %v5017_v62 = vld [vmem:[%s6439_s28 + $0x4] sm:$0x6]  ;;  %v2589_v45 = vrot.slane %v5129_v35, 2  ;;  %v5875_v59 = vld [vmem:[%s7103_s5 + $0xb8] sm:$0xff] }
  0x9e   : > { %v2340_v9 = vrot.slane %v5017_v62, 2  ;;  %v2211_v10 = vsel %vm6110_vm8, %v2206_v60, %v2210_v61  ;;  %v2237_v15 = vsel %vm6110_vm8, %v2232_v2, %v2236_v4  ;;  %v2607_v60 = vsel %vm351_vm0, %v5131_v41, %v2591_v49  ;;  %v5844_v61 = vld [vmem:[%s7102_s4 + $0x200] sm:$0xff]  ;;  %v5874_v4 = vld [vmem:[%s7103_s5 + $0xb0] sm:$0xff]  ;;  %v5883_v40 = vld [vmem:[%s7103_s5 + $0xf8] sm:$0xff] }
  0x9f   : > { %2995 = vmatpush.bf16.msra.mxu2 %v5858_v57  ;;  %v2595_v54 = vsel %vm351_vm0, %v5129_v35, %v2589_v45  ;;  %v5865_v57 = vld [vmem:[%s7103_s5 + $0x68] sm:$0xff]  ;;  %v5864_v2 = vld [vmem:[%s7103_s5 + $0x60] sm:$0xff]  ;;  %v2596_v5 = vsel %vm355_vm1, %v5129_v35, %v2589_v45  ;;  %v2646_v11 = vshll.u32 %v2607_v60, 16  ;;  %v2656_v14 = vshrl.u32 %v2613_v63, 16 }
  0xa0   : > { %v2346_v20 = vsel %vm351_vm0, %v5017_v62, %v2340_v9  ;;  %2901 = vmatpush.bf16.msra.mxu1 %v5847_v18  ;;  %v2617_v0 = vshrl.u32 %v2595_v54, 16  ;;  %v2620_v1 = vshll.u32 %v2595_v54, 16  ;;  %v2614_v18 = vsel %vm355_vm1, %v5132_v44, %v2592_v52  ;;  %v5853_v35 = vld [vmem:[%s7103_s5 + $0x8] sm:$0xff]  ;;  %v5862_v44 = vld [vmem:[%s7103_s5 + $0x50] sm:$0xff] }
  0xa1   : > { %2752 = vmatpush.bf16.msra.mxu0 %v5838_v53  ;;  %v5021_v33 = vrot.slane %v2346_v20, 9  ;;  %v2387_v53 = vsel %vm6218_vm15, %v5027_v42, %v5028_v43  ;;  %v2648_v28 = vrot.slane %v2646_v11, 7  ;;  %v2658_v31 = vrot.slane %v2656_v14, 6  ;;  %v5852_v43 = vld [vmem:[%s7103_s5] sm:$0xff] }
  0xa2   : > { %v2622_v20 = vrot.slane %v2620_v1, 7 }
  0xa3   : > { %2996 = vmatpush.bf16.msra.mxu2 %v5857_v19  ;;  %v2619_v19 = vrot.slane %v2617_v0, 6 }
  0xa4   : > { %v1985_v38 = vld.sshfl [vmem:[#allocation1] sm:$0xff pattern:$0x73625140]  ;;  %2902 = vmatpush.bf16.msra.mxu1 %v5846_v26 }
  0xa5   : > { %2043 = vmatmul.bf16.vlgmr.msra.gmra.mxu3 %v1985_v38  ;;  %2074 = vst [vmem:[#allocation1] ss:$4 sm:$0xff] %v4913_v21  ;;  %v2348_v21 = vsel %vm355_vm1, %v5017_v62, %v2340_v9  ;;  %2753 = vmatpush.bf16.msra.mxu0 %v5837_v17  ;;  %v5130_v38 = vld [vmem:[%s6439_s28 + $0xc] sm:$0x7]  ;;  %v5854_v62 = vld [vmem:[%s7103_s5 + $0x10] sm:$0xff]  ;;  %v2598_v17 = vrot.slane %v2596_v5, 2 }
  0xa6   : > { %2077 = vst [vmem:[#allocation1 + $0x1] ss:$4 sm:$0xff] %v4914_v25  ;;  %v5836_v25 = vld [vmem:[%s7102_s4 + $0x1c0] sm:$0xff]  ;;  %3176 = vmatpush.bf16.msra.mxu3 %v5867_v22  ;;  %v2590_v47 = vrot.slane %v5130_v38, 2 }
  0xa7   : > { %2080 = vst [vmem:[#allocation1 + $0x2] ss:$4 sm:$0xff] %v4915_v30  ;;  %v5866_v30 = vld [vmem:[%s7103_s5 + $0x70] sm:$0xff]  ;;  %2997 = vmatpush.bf16.msra.mxu2 %v5856_v29 }
  0xa8   : > { %2083 = vst [vmem:[#allocation1 + $0x3] ss:$4 sm:$0xff] %v4916_v34  ;;  %v5022_v34 = vrot.slane %v2348_v21, 9  ;;  %v2601_v58 = vsel %vm351_vm0, %v5130_v38, %v2590_v47  ;;  %2903 = vmatpush.bf16.msra.mxu1 %v5845_v55  ;;  %v2602_v9 = vsel %vm355_vm1, %v5130_v38, %v2590_v47  ;;  %v5079_v21 = vld [vmem:[%s6439_s28 + $0x10] sm:$0x3]  ;;  %v5872_v47 = vld [vmem:[%s7103_s5 + $0xa0] sm:$0xff] }
  0xa9   : > { %2754 = vmatpush.bf16.msra.mxu0 %v5836_v25  ;;  %v2633_v7 = vshll.u32 %v2601_v58, 16  ;;  %v2604_v22 = vrot.slane %v2602_v9, 2  ;;  %v5080_v25 = vld [vmem:[%s6439_s28 + $0x14] sm:$0x3]  ;;  %v5871_v9 = vld [vmem:[%s7103_s5 + $0x98] sm:$0xff] }
  0xaa   : > { %3177 = vmatpush.bf16.msra.mxu3 %v5866_v30  ;;  %v2375_v46 = vsel %vm6218_vm15, %v5021_v33, %v5022_v34  ;;  %v2616_v30 = vrot.slane %v2614_v18, 2  ;;  %v2623_v33 = vor.u32 %v2622_v20, %v2619_v19  ;;  %v2626_v34 = vshll.u32 %v2598_v17, 16  ;;  %v5870_v17 = vld [vmem:[%s7103_s5 + $0x90] sm:$0xff]  ;;  %v5880_v20 = vld [vmem:[%s7103_s5 + $0xe0] sm:$0xff] }
  0xab   : > { %2998 = vmatpush.bf16.msra.mxu2 %v5855_v56  ;;  %v2635_v24 = vrot.slane %v2633_v7, 7  ;;  %v2639_v39 = vshll.u32 %v2604_v22, 16  ;;  %v5182_v56 = vld [vmem:[%s6439_s28 + $0xc] sm:$0x6] }
  0xac   : > { %2904 = vmatpush.bf16.msra.mxu1 %v5844_v61  ;;  %v5184_v61 = vld [vmem:[%s6439_s28 + $0x14] sm:$0x6]  ;;  %v2772_v0 = vrot.slane %v5182_v56, 2  ;;  %v5861_v7 = vld [vmem:[%s7103_s5 + $0x48] sm:$0xff] }
  0xad   : > { %v2641_v52 = vrot.slane %v2639_v39, 7 }
  0xae   : > { %3178 = vmatpush.bf16.msra.mxu3 %v5865_v57  ;;  %v2784_v14 = vsel %vm351_vm0, %v5182_v56, %v2772_v0 }
  0xaf   : > { %v2084_v12 = vld.sshfl [vmem:[#allocation1] sm:$0xff pattern:$0x73625140]  ;;  %2999 = vmatpush.bf16.msra.mxu2 %v5854_v62 }
  0xb0   : > { %2142 = vmatmul.bf16.vlgmr.msrb.gmra.mxu0 %v2084_v12  ;;  %2256 = vst [vmem:[#allocation1] ss:$4 sm:$0xff] %v2198_v6  ;;  %v2630_v6 = vshrl.u32 %v2601_v58, 16  ;;  %v5077_v12 = vld [vmem:[%s6439_s28 + $0x8] sm:$0x3] }
  0xb1   : > { %2259 = vst [vmem:[#allocation1 + $0x1] ss:$4 sm:$0xff] %v2211_v10  ;;  %3326 = vmatpush.bf16.msrb.mxu0 %v5875_v59  ;;  %v2643_v10 = vshrl.u32 %v2607_v60, 16  ;;  %v5183_v59 = vld [vmem:[%s6439_s28 + $0x10] sm:$0x6] }
  0xb2   : > { %2262 = vst [vmem:[#allocation1 + $0x2] ss:$4 sm:$0xff] %v2224_v13  ;;  %v2608_v13 = vsel %vm355_vm1, %v5131_v41, %v2591_v49  ;;  %3179 = vmatpush.bf16.msra.mxu3 %v5864_v2  ;;  %v2632_v23 = vrot.slane %v2630_v6, 6  ;;  %v2624_v49 = vrot.slane %v2623_v33, 2  ;;  %v2774_v6 = vrot.slane %v5184_v61, 2 }
  0xb3   : > { %2265 = vst [vmem:[#allocation1 + $0x3] ss:$4 sm:$0xff] %v2237_v15  ;;  %v2659_v15 = vshll.u32 %v2613_v63, 16  ;;  %v2610_v26 = vrot.slane %v2608_v13, 2  ;;  %v2645_v27 = vrot.slane %v2643_v10, 6  ;;  %3000 = vmatpush.bf16.msra.mxu2 %v5853_v35  ;;  %v5881_v10 = vld [vmem:[%s7103_s5 + $0xe8] sm:$0xff] }
  0xb4   : > { %v2636_v38 = vor.u32 %v2635_v24, %v2632_v23  ;;  %v5891_v13 = vld [vmem:[%s7103_s5 + $0x138] sm:$0xff]  ;;  %v2798_v22 = vsel %vm351_vm0, %v5184_v61, %v2774_v6  ;;  %v2800_v23 = vsel %vm355_vm1, %v5184_v61, %v2774_v6  ;;  %v3013_v35 = vld [vmem:[%s6793_s19 + $0xc] sm:$0x7]  ;;  %v2914_v6 = vld [vmem:[%s6793_s19 + $0x4] sm:$0x3] }
  0xb5   : > { %3327 = vmatpush.bf16.msrb.mxu0 %v5874_v4  ;;  %v2661_v32 = vrot.slane %v2659_v15, 7  ;;  %v2649_v41 = vor.u32 %v2648_v28, %v2645_v27  ;;  %v2652_v42 = vshll.u32 %v2610_v26, 16  ;;  %v2773_v4 = vrot.slane %v5183_v59, 2  ;;  %v3010_v26 = vld [vmem:[%s6793_s19] sm:$0x7] }
  0xb6   : > { %3180 = vmatpush.bf16.msra.mxu3 %v5863_v36  ;;  %v2786_v15 = vsel %vm355_vm1, %v5182_v56, %v2772_v0  ;;  %v5187_v27 = vrot.slane %v2784_v14, 9  ;;  %v5191_v33 = vrot.slane %v2798_v22, 9  ;;  %v3018_v36 = vrot.slane %v3010_v26, 2 }
  0xb7   : > { %v2662_v45 = vor.u32 %v2661_v32, %v2658_v31  ;;  %v2650_v54 = vrot.slane %v2649_v41, 2  ;;  %v2654_v55 = vrot.slane %v2652_v42, 7  ;;  %3001 = vmatpush.bf16.msra.mxu2 %v5852_v43  ;;  %v2791_v18 = vsel %vm351_vm0, %v5183_v59, %v2773_v4  ;;  %v3012_v32 = vld [vmem:[%s6793_s19 + $0x8] sm:$0x7] }
  0xb8   : > { %v2793_v19 = vsel %vm355_vm1, %v5183_v59, %v2773_v4  ;;  %v5188_v28 = vrot.slane %v2786_v15, 9  ;;  %v3021_v43 = vrot.slane %v3013_v35, 2  ;;  %v3025_v59 = vsel %vm355_vm1, %v3010_v26, %v3018_v36 }
  0xb9   : > { %3328 = vmatpush.bf16.msrb.mxu0 %v5873_v37  ;;  %v2663_v57 = vrot.slane %v2662_v45, 2  ;;  %v2655_v2 = vsel %vm6110_vm8, %v2650_v54, %v2654_v55  ;;  %v5190_v31 = vrot.slane %v2793_v19, 9  ;;  %v3024_v45 = vsel %vm351_vm0, %v3010_v26, %v3018_v36  ;;  %v5877_v26 = vld [vmem:[%s7103_s5 + $0xc8] sm:$0xff] }
  0xba   : > { %v2266_v50 = vld.sshfl [vmem:[#allocation1] sm:$0xff pattern:$0x73625140]  ;;  %3181 = vmatpush.bf16.msra.mxu3 %v5862_v44  ;;  %v2810_v39 = vsel %vm6218_vm15, %v5187_v27, %v5188_v28  ;;  %v3042_v54 = vsel %vm351_vm0, %v3013_v35, %v3021_v43  ;;  %v3046_v55 = vshrl.u32 %v3024_v45, 16  ;;  %v3049_v56 = vshll.u32 %v3024_v45, 16  ;;  %v5887_v27 = vld [vmem:[%s7103_s5 + $0x118] sm:$0xff] }
  0xbb   : > { %2324 = vmatmul.bf16.vlgmr.msrb.gmra.mxu1 %v2266_v50  ;;  %2406 = vst [vmem:[#allocation1] ss:$4 sm:$0xff] %v2375_v46  ;;  %v2665_v46 = vshll.u32 %v2616_v30, 16  ;;  %v2628_v50 = vrot.slane %v2626_v34, 7  ;;  %v5189_v30 = vrot.slane %v2791_v18, 9  ;;  %v5192_v34 = vrot.slane %v2800_v23, 9 }
  0xbc   : > { %2409 = vst [vmem:[#allocation1 + $0x1] ss:$4 sm:$0xff] %v2379_v48  ;;  %3425 = vmatpush.bf16.msrb.mxu1 %v5883_v40  ;;  %v5882_v48 = vld [vmem:[%s7103_s5 + $0xf0] sm:$0xff]  ;;  %v3020_v40 = vrot.slane %v3012_v32, 2  ;;  %v3085_v4 = vshrl.u32 %v3042_v54, 16  ;;  %v5897_v28 = vld [vmem:[%s7103_s5 + $0x168] sm:$0xff] }
  0xbd   : > { %2412 = vst [vmem:[#allocation1 + $0x2] ss:$4 sm:$0xff] %v2383_v51  ;;  %v2637_v51 = vrot.slane %v2636_v38, 2  ;;  %v2667_v58 = vrot.slane %v2665_v46, 7  ;;  %3329 = vmatpush.bf16.msrb.mxu0 %v5872_v47  ;;  %v2629_v60 = vsel %vm6110_vm8, %v2624_v49, %v2628_v50  ;;  %v2814_v42 = vsel %vm6218_vm15, %v5189_v30, %v5190_v31  ;;  %v5869_v46 = vld [vmem:[%s7103_s5 + $0x88] sm:$0xff]  ;;  %v5879_v47 = vld [vmem:[%s7103_s5 + $0xd8] sm:$0xff] }
  0xbe   : > { %2415 = vst [vmem:[#allocation1 + $0x3] ss:$4 sm:$0xff] %v2387_v53  ;;  %v5181_v53 = vld [vmem:[%s6439_s28 + $0x8] sm:$0x6]  ;;  %3182 = vmatpush.bf16.msra.mxu3 %v5861_v7  ;;  %v2818_v44 = vsel %vm6218_vm15, %v5191_v33, %v5192_v34  ;;  %v5899_v50 = vld [vmem:[%s7103_s5 + $0x178] sm:$0xff]  ;;  %v3027_v7 = vrot.slane %v3025_v59, 2 }
  0xbf   : > { %v2771_v62 = vrot.slane %v5181_v53, 2  ;;  %v2642_v63 = vsel %vm6110_vm8, %v2637_v51, %v2641_v52  ;;  %v2668_v5 = vsel %vm6110_vm8, %v2663_v57, %v2667_v58  ;;  %v3036_v51 = vsel %vm351_vm0, %v3012_v32, %v3020_v40  ;;  %v5868_v52 = vld [vmem:[%s7103_s5 + $0x80] sm:$0xff]  ;;  %v5898_v58 = vld [vmem:[%s7103_s5 + $0x170] sm:$0xff]  ;;  %v5907_v31 = vld [vmem:[%s7103_s5 + $0x1b8] sm:$0xff] }
  0xc0   : > { %3426 = vmatpush.bf16.msrb.mxu1 %v5882_v48  ;;  %v5889_v48 = vld [vmem:[%s7103_s5 + $0x128] sm:$0xff]  ;;  %v5888_v57 = vld [vmem:[%s7103_s5 + $0x120] sm:$0xff]  ;;  %v3075_v0 = vshll.u32 %v3036_v51, 16  ;;  %v3087_v22 = vrot.slane %v3085_v4, 6 }
  0xc1   : > { %v2777_v11 = vsel %vm351_vm0, %v5181_v53, %v2771_v62  ;;  %3330 = vmatpush.bf16.msrb.mxu0 %v5871_v9  ;;  %v3043_v9 = vsel %vm355_vm1, %v3013_v35, %v3021_v43  ;;  %v5876_v34 = vld [vmem:[%s7103_s5 + $0xc0] sm:$0xff]  ;;  %v5886_v35 = vld [vmem:[%s7103_s5 + $0x110] sm:$0xff] }
  0xc2   : > { %v5185_v24 = vrot.slane %v2777_v11, 9  ;;  %v3051_v11 = vrot.slane %v3049_v56, 7  ;;  %v3077_v19 = vrot.slane %v3075_v0, 7 }
  0xc4   : > { %3427 = vmatpush.bf16.msrb.mxu1 %v5881_v10  ;;  %v3048_v10 = vrot.slane %v3046_v55, 6 }
  0xc5   : > { %v2416_v29 = vld.sshfl [vmem:[#allocation1] sm:$0xff pattern:$0x73625140]  ;;  %3331 = vmatpush.bf16.msrb.mxu0 %v5870_v17 }
  0xc6   : > { %2474 = vmatmul.bf16.vlgmr.msrb.gmra.mxu2 %v2416_v29  ;;  %2505 = vst [vmem:[#allocation1] ss:$4 sm:$0xff] %v5077_v12  ;;  %v2779_v12 = vsel %vm355_vm1, %v5181_v53, %v2771_v62  ;;  %v3011_v29 = vld [vmem:[%s6793_s19 + $0x4] sm:$0x7]  ;;  %v5878_v53 = vld [vmem:[%s7103_s5 + $0xd0] sm:$0xff] }
  0xc7   : > { %2508 = vst [vmem:[#allocation1 + $0x1] ss:$4 sm:$0xff] %v5078_v16  ;;  %v5860_v16 = vld [vmem:[%s7103_s5 + $0x40] sm:$0xff]  ;;  %3607 = vmatpush.bf16.msrb.mxu2 %v5891_v13  ;;  %v3019_v38 = vrot.slane %v3011_v29, 2 }
  0xc8   : > { %2511 = vst [vmem:[#allocation1 + $0x2] ss:$4 sm:$0xff] %v5079_v21  ;;  %v5890_v21 = vld [vmem:[%s7103_s5 + $0x130] sm:$0xff]  ;;  %3183 = vmatpush.bf16.msra.mxu3 %v5860_v16  ;;  %3428 = vmatpush.bf16.msrb.mxu1 %v5880_v20  ;;  %v2916_v16 = vld [vmem:[%s6793_s19 + $0xc] sm:$0x3] }
  0xc9   : > { %2514 = vst [vmem:[#allocation1 + $0x3] ss:$4 sm:$0xff] %v5080_v25  ;;  %v5186_v25 = vrot.slane %v2779_v12, 9  ;;  %v3030_v49 = vsel %vm351_vm0, %v3011_v29, %v3019_v38  ;;  %3332 = vmatpush.bf16.msrb.mxu0 %v5869_v46  ;;  %v3031_v62 = vsel %vm355_vm1, %v3011_v29, %v3019_v38  ;;  %v2915_v12 = vld [vmem:[%s6793_s19 + $0x8] sm:$0x3]  ;;  %v5896_v38 = vld [vmem:[%s7103_s5 + $0x160] sm:$0xff] }
  0xca   : > { %v3062_v61 = vshll.u32 %v3030_v49, 16  ;;  %v3033_v13 = vrot.slane %v3031_v62, 2  ;;  %v5895_v62 = vld [vmem:[%s7103_s5 + $0x158] sm:$0xff] }
  0xcb   : > { %3608 = vmatpush.bf16.msrb.mxu2 %v5890_v21  ;;  %v2806_v37 = vsel %vm6218_vm15, %v5185_v24, %v5186_v25  ;;  %v3045_v21 = vrot.slane %v3043_v9, 2  ;;  %v3052_v24 = vor.u32 %v3051_v11, %v3048_v10  ;;  %v3055_v25 = vshll.u32 %v3027_v7, 16  ;;  %v5894_v7 = vld [vmem:[%s7103_s5 + $0x150] sm:$0xff]  ;;  %v5904_v11 = vld [vmem:[%s7103_s5 + $0x1a0] sm:$0xff] }
  0xcc   : > { %3429 = vmatpush.bf16.msrb.mxu1 %v5879_v47  ;;  %v3064_v15 = vrot.slane %v3062_v61, 7  ;;  %v3068_v30 = vshll.u32 %v3033_v13, 16  ;;  %v3193_v47 = vld [vmem:[%s6793_s19 + $0x4] sm:$0x6]  ;;  %v5885_v61 = vld [vmem:[%s7103_s5 + $0x108] sm:$0xff] }
  0xcd   : > { %3333 = vmatpush.bf16.msrb.mxu0 %v5868_v52  ;;  %v3195_v52 = vld [vmem:[%s6793_s19 + $0xc] sm:$0x6]  ;;  %v3201_v55 = vrot.slane %v3193_v47, 2 }
  0xce   : > { %v3070_v43 = vrot.slane %v3068_v30, 7 }
  0xcf   : > { %3609 = vmatpush.bf16.msrb.mxu2 %v5889_v48  ;;  %v3213_v4 = vsel %vm351_vm0, %v3193_v47, %v3201_v55 }
  0xd0   : > { %v2515_v1 = vld.sshfl [vmem:[#allocation1] sm:$0xff pattern:$0x73625140]  ;;  %3430 = vmatpush.bf16.msrb.mxu1 %v5878_v53 }
  0xd1   : > { %2573 = vmatmul.bf16.vlgmr.msrb.gmra.mxu3 %v2515_v1  ;;  %2687 = vst [vmem:[#allocation1] ss:$4 sm:$0xff] %v2629_v60  ;;  %v3059_v60 = vshrl.u32 %v3030_v49, 16  ;;  %v2913_v1 = vld [vmem:[%s6793_s19] sm:$0x3] }
  0xd2   : > { %2690 = vst [vmem:[#allocation1 + $0x1] ss:$4 sm:$0xff] %v2642_v63  ;;  %3757 = vmatpush.bf16.msrb.mxu3 %v5899_v50  ;;  %v3072_v63 = vshrl.u32 %v3036_v51, 16  ;;  %v3194_v50 = vld [vmem:[%s6793_s19 + $0x8] sm:$0x6] }
  0xd3   : > { %2693 = vst [vmem:[#allocation1 + $0x2] ss:$4 sm:$0xff] %v2655_v2  ;;  %v3037_v2 = vsel %vm355_vm1, %v3012_v32, %v3020_v40  ;;  %3610 = vmatpush.bf16.msrb.mxu2 %v5888_v57  ;;  %v3061_v14 = vrot.slane %v3059_v60, 6  ;;  %v3053_v40 = vrot.slane %v3052_v24, 2  ;;  %v3203_v60 = vrot.slane %v3195_v52, 2 }
  0xd4   : > { %2696 = vst [vmem:[#allocation1 + $0x3] ss:$4 sm:$0xff] %v2668_v5  ;;  %v3088_v5 = vshll.u32 %v3042_v54, 16  ;;  %v3039_v17 = vrot.slane %v3037_v2, 2  ;;  %v3074_v18 = vrot.slane %v3072_v63, 6  ;;  %3431 = vmatpush.bf16.msrb.mxu1 %v5877_v26  ;;  %v5905_v63 = vld [vmem:[%s7103_s5 + $0x1a8] sm:$0xff] }
  0xd5   : > { %v3065_v29 = vor.u32 %v3064_v15, %v3061_v14  ;;  %v5915_v2 = vld [vmem:[%s7103_s5 + $0x1f8] sm:$0xff]  ;;  %v3227_v13 = vsel %vm351_vm0, %v3195_v52, %v3203_v60  ;;  %v3229_v14 = vsel %vm355_vm1, %v3195_v52, %v3203_v60  ;;  %v5432_v26 = vld [vmem:[%s6793_s19 + $0x10] sm:$0x7]  ;;  %v5378_v60 = vld [vmem:[%s6793_s19 + $0x8] sm:$0x3] }
  0xd6   : > { %3758 = vmatpush.bf16.msrb.mxu3 %v5898_v58  ;;  %v3090_v23 = vrot.slane %v3088_v5, 7  ;;  %v3078_v32 = vor.u32 %v3077_v19, %v3074_v18  ;;  %v3081_v33 = vshll.u32 %v3039_v17, 16  ;;  %v3202_v58 = vrot.slane %v3194_v50, 2  ;;  %v5429_v17 = vld [vmem:[%s6793_s19 + $0x4] sm:$0x7] }
  0xd7   : > { %3611 = vmatpush.bf16.msrb.mxu2 %v5887_v27  ;;  %v3215_v5 = vsel %vm355_vm1, %v3193_v47, %v3201_v55  ;;  %v5323_v18 = vrot.slane %v3213_v4, 9  ;;  %v5327_v24 = vrot.slane %v3227_v13, 9  ;;  %v3449_v27 = vrot.slane %v5429_v17, 2 }
  0xd8   : > { %v3091_v36 = vor.u32 %v3090_v23, %v3087_v22  ;;  %v3079_v45 = vrot.slane %v3078_v32, 2  ;;  %v3083_v46 = vrot.slane %v3081_v33, 7  ;;  %3432 = vmatpush.bf16.msrb.mxu1 %v5876_v34  ;;  %v3220_v9 = vsel %vm351_vm0, %v3194_v50, %v3202_v58  ;;  %v5431_v23 = vld [vmem:[%s6793_s19 + $0xc] sm:$0x7] }
  0xd9   : > { %v3222_v10 = vsel %vm355_vm1, %v3194_v50, %v3202_v58  ;;  %v5324_v19 = vrot.slane %v3215_v5, 9  ;;  %v3452_v34 = vrot.slane %v5432_v26, 2  ;;  %v3456_v50 = vsel %vm355_vm1, %v5429_v17, %v3449_v27 }
  0xda   : > { %3759 = vmatpush.bf16.msrb.mxu3 %v5897_v28  ;;  %v3092_v48 = vrot.slane %v3091_v36, 2  ;;  %v3084_v57 = vsel %vm6110_vm8, %v3079_v45, %v3083_v46  ;;  %v5326_v22 = vrot.slane %v3222_v10, 9  ;;  %v3455_v36 = vsel %vm351_vm0, %v5429_v17, %v3449_v27  ;;  %v5901_v17 = vld [vmem:[%s7103_s5 + $0x188] sm:$0xff] }
  0xdb   : > { %v2697_v41 = vld.sshfl [vmem:[#allocation1] sm:$0xff pattern:$0x73625140]  ;;  %3612 = vmatpush.bf16.msrb.mxu2 %v5886_v35  ;;  %v3239_v30 = vsel %vm6218_vm15, %v5323_v18, %v5324_v19  ;;  %v3473_v45 = vsel %vm351_vm0, %v5432_v26, %v3452_v34  ;;  %v3477_v46 = vshrl.u32 %v3455_v36, 16  ;;  %v3480_v47 = vshll.u32 %v3455_v36, 16  ;;  %v5911_v18 = vld [vmem:[%s7103_s5 + $0x1d8] sm:$0xff] }
  0xdc   : > { %2755 = vmatmul.bf16.vlgmr.msra.gmra.mxu0 %v2697_v41  ;;  %2837 = vst [vmem:[#allocation1] ss:$4 sm:$0xff] %v2806_v37  ;;  %v3094_v37 = vshll.u32 %v3045_v21, 16  ;;  %v3057_v41 = vrot.slane %v3055_v25, 7  ;;  %v5325_v21 = vrot.slane %v3220_v9, 9  ;;  %v5328_v25 = vrot.slane %v3229_v14, 9 }
  0xdd   : > { %2840 = vst [vmem:[#allocation1 + $0x1] ss:$4 sm:$0xff] %v2810_v39  ;;  %3856 = vmatpush.bf16.msra.mxu0 %v5907_v31  ;;  %v5906_v39 = vld [vmem:[%s7103_s5 + $0x1b0] sm:$0xff]  ;;  %v3451_v31 = vrot.slane %v5431_v23, 2  ;;  %v3516_v58 = vshrl.u32 %v3473_v45, 16  ;;  %v5921_v19 = vld [vmem:[%s7103_s5 + $0x228] sm:$0xff] }
  0xde   : > { %2843 = vst [vmem:[#allocation1 + $0x2] ss:$4 sm:$0xff] %v2814_v42  ;;  %v3066_v42 = vrot.slane %v3065_v29, 2  ;;  %v3096_v49 = vrot.slane %v3094_v37, 7  ;;  %3760 = vmatpush.bf16.msrb.mxu3 %v5896_v38  ;;  %v3058_v51 = vsel %vm6110_vm8, %v3053_v40, %v3057_v41  ;;  %v3243_v33 = vsel %vm6218_vm15, %v5325_v21, %v5326_v22  ;;  %v5893_v37 = vld [vmem:[%s7103_s5 + $0x148] sm:$0xff]  ;;  %v5903_v38 = vld [vmem:[%s7103_s5 + $0x198] sm:$0xff] }
  0xdf   : > { %2846 = vst [vmem:[#allocation1 + $0x3] ss:$4 sm:$0xff] %v2818_v44  ;;  %v3192_v44 = vld [vmem:[%s6793_s19] sm:$0x6]  ;;  %3613 = vmatpush.bf16.msrb.mxu2 %v5885_v61  ;;  %v3247_v35 = vsel %vm6218_vm15, %v5327_v24, %v5328_v25  ;;  %v5923_v41 = vld [vmem:[%s7103_s5 + $0x238] sm:$0xff]  ;;  %v3458_v61 = vrot.slane %v3456_v50, 2 }
  0xe0   : > { %v3200_v53 = vrot.slane %v3192_v44, 2  ;;  %v3071_v54 = vsel %vm6110_vm8, %v3066_v42, %v3070_v43  ;;  %v3097_v59 = vsel %vm6110_vm8, %v3092_v48, %v3096_v49  ;;  %v3467_v42 = vsel %vm351_vm0, %v5431_v23, %v3451_v31  ;;  %v5892_v43 = vld [vmem:[%s7103_s5 + $0x140] sm:$0xff]  ;;  %v5922_v49 = vld [vmem:[%s7103_s5 + $0x230] sm:$0xff]  ;;  %v5482_v36 = vld [vmem:[%s6793_s19 + $0x8] sm:$0x6] }
  0xe1   : > { %3857 = vmatpush.bf16.msra.mxu0 %v5906_v39  ;;  %v5913_v39 = vld [vmem:[%s7103_s5 + $0x1e8] sm:$0xff]  ;;  %v5912_v48 = vld [vmem:[%s7103_s5 + $0x1e0] sm:$0xff]  ;;  %v3506_v55 = vshll.u32 %v3467_v42, 16  ;;  %v3518_v13 = vrot.slane %v3516_v58, 6  ;;  %v5910_v25 = vld [vmem:[%s7103_s5 + $0x1d0] sm:$0xff] }
  0xe2   : > { %v3206_v0 = vsel %vm351_vm0, %v3192_v44, %v3200_v53  ;;  %3761 = vmatpush.bf16.msrb.mxu3 %v5895_v62  ;;  %v3474_v62 = vsel %vm355_vm1, %v5432_v26, %v3452_v34  ;;  %v5900_v24 = vld [vmem:[%s7103_s5 + $0x180] sm:$0xff]  ;;  %v5909_v50 = vld [vmem:[%s7103_s5 + $0x1c8] sm:$0xff] }
  0xe3   : > { %v5321_v15 = vrot.slane %v3206_v0, 9  ;;  %v3482_v0 = vrot.slane %v3480_v47, 7  ;;  %v3508_v10 = vrot.slane %v3506_v55, 7 }
  0xe5   : > { %3858 = vmatpush.bf16.msra.mxu0 %v5905_v63  ;;  %v3479_v63 = vrot.slane %v3477_v46, 6 }
  0xe6   : > { %v2847_v20 = vld.sshfl [vmem:[#allocation1] sm:$0xff pattern:$0x73625140]  ;;  %3762 = vmatpush.bf16.msrb.mxu3 %v5894_v7 }
  0xe7   : > { %2905 = vmatmul.bf16.vlgmr.msra.gmra.mxu1 %v2847_v20  ;;  %2934 = vst [vmem:[#allocation1] ss:$4 sm:$0xff] %v2913_v1  ;;  %v3208_v1 = vsel %vm355_vm1, %v3192_v44, %v3200_v53  ;;  %v5430_v20 = vld [vmem:[%s6793_s19 + $0x8] sm:$0x7]  ;;  %v5902_v44 = vld [vmem:[%s7103_s5 + $0x190] sm:$0xff] }
  0xe8   : > { %2937 = vst [vmem:[#allocation1 + $0x1] ss:$4 sm:$0xff] %v2914_v6  ;;  %v5884_v6 = vld [vmem:[%s7103_s5 + $0x100] sm:$0xff]  ;;  %4038 = vmatpush.bf16.msra.mxu1 %v5915_v2  ;;  %v3450_v29 = vrot.slane %v5430_v20, 2 }
  0xe9   : > { %2940 = vst [vmem:[#allocation1 + $0x2] ss:$4 sm:$0xff] %v2915_v12  ;;  %v5914_v12 = vld [vmem:[%s7103_s5 + $0x1f0] sm:$0xff]  ;;  %3614 = vmatpush.bf16.msrb.mxu2 %v5884_v6  ;;  %3859 = vmatpush.bf16.msra.mxu0 %v5904_v11 }
  0xea   : > { %2943 = vst [vmem:[#allocation1 + $0x3] ss:$4 sm:$0xff] %v2916_v16  ;;  %v5322_v16 = vrot.slane %v3208_v1, 9  ;;  %v3461_v40 = vsel %vm351_vm0, %v5430_v20, %v3450_v29  ;;  %3763 = vmatpush.bf16.msrb.mxu3 %v5893_v37  ;;  %v3462_v53 = vsel %vm355_vm1, %v5430_v20, %v3450_v29  ;;  %v5379_v1 = vld [vmem:[%s6793_s19 + $0xc] sm:$0x3] }
  0xeb   : > { %v3493_v52 = vshll.u32 %v3461_v40, 16  ;;  %v3464_v2 = vrot.slane %v3462_v53, 2  ;;  %v5380_v6 = vld [vmem:[%s6793_s19 + $0x10] sm:$0x3] }
  0xec   : > { %4039 = vmatpush.bf16.msra.mxu1 %v5914_v12  ;;  %v3235_v28 = vsel %vm6218_vm15, %v5321_v15, %v5322_v16  ;;  %v3476_v12 = vrot.slane %v3474_v62, 2  ;;  %v3483_v15 = vor.u32 %v3482_v0, %v3479_v63  ;;  %v3486_v16 = vshll.u32 %v3458_v61, 16  ;;  %v5593_v0 = vld [vmem:[%s6793_s19 + $0x8] sm:$0x7] }
  0xed   : > { %3860 = vmatpush.bf16.msra.mxu0 %v5903_v38  ;;  %v3495_v5 = vrot.slane %v3493_v52, 7  ;;  %v3499_v21 = vshll.u32 %v3464_v2, 16 }
  0xee   : > { %3764 = vmatpush.bf16.msrb.mxu3 %v5892_v43  ;;  %v3525_v27 = vshll.u32 %v3476_v12, 16  ;;  %v3484_v29 = vrot.slane %v3483_v15, 2  ;;  %v3880_v12 = vrot.slane %v5593_v0, 2 }
  0xf0   : > { %4040 = vmatpush.bf16.msra.mxu1 %v5913_v39  ;;  %v3527_v38 = vrot.slane %v3525_v27, 7  ;;  %v5483_v39 = vld [vmem:[%s6793_s19 + $0xc] sm:$0x6] }
  0xf1   : > { %v2944_v56 = vld.sshfl [vmem:[#allocation1] sm:$0xff pattern:$0x73625140]  ;;  %3861 = vmatpush.bf16.msra.mxu0 %v5902_v44  ;;  %v3632_v44 = vrot.slane %v5482_v36, 2  ;;  %v3633_v47 = vrot.slane %v5483_v39, 2 }
  0xf2   : > { %3002 = vmatmul.bf16.vlgmr.msra.gmra.mxu2 %v2944_v56  ;;  %3116 = vst [vmem:[#allocation1] ss:$4 sm:$0xff] %v3058_v51  ;;  %v3490_v51 = vshrl.u32 %v3461_v40, 16  ;;  %v5377_v56 = vld [vmem:[%s6793_s19 + $0x4] sm:$0x3] }
  0xf3   : > { %3119 = vst [vmem:[#allocation1 + $0x1] ss:$4 sm:$0xff] %v3071_v54  ;;  %4188 = vmatpush.bf16.msra.mxu2 %v5923_v41  ;;  %v3503_v54 = vshrl.u32 %v3467_v42, 16  ;;  %v5484_v41 = vld [vmem:[%s6793_s19 + $0x10] sm:$0x6]  ;;  %v3646_v55 = vsel %vm355_vm1, %v5482_v36, %v3632_v44  ;;  %v3651_v58 = vsel %vm351_vm0, %v5483_v39, %v3633_v47 }
  0xf4   : > { %3122 = vst [vmem:[#allocation1 + $0x2] ss:$4 sm:$0xff] %v3084_v57  ;;  %v3468_v57 = vsel %vm355_vm1, %v5431_v23, %v3451_v31  ;;  %4041 = vmatpush.bf16.msra.mxu1 %v5912_v48  ;;  %v3492_v4 = vrot.slane %v3490_v51, 6  ;;  %v5919_v51 = vld [vmem:[%s7103_s5 + $0x218] sm:$0xff]  ;;  %v5488_v2 = vrot.slane %v3646_v55, 9 }
  0xf5   : > { %3125 = vst [vmem:[#allocation1 + $0x3] ss:$4 sm:$0xff] %v3097_v59  ;;  %v3519_v59 = vshll.u32 %v3473_v45, 16  ;;  %v3470_v7 = vrot.slane %v3468_v57, 2  ;;  %v3505_v9 = vrot.slane %v3503_v54, 6  ;;  %3862 = vmatpush.bf16.msra.mxu0 %v5901_v17  ;;  %v3644_v54 = vsel %vm351_vm0, %v5482_v36, %v3632_v44  ;;  %v5918_v57 = vld [vmem:[%s7103_s5 + $0x210] sm:$0xff] }
  0xf6   : > { %v3496_v20 = vor.u32 %v3495_v5, %v3492_v4  ;;  %v5594_v4 = vld [vmem:[%s6793_s19 + $0xc] sm:$0x7]  ;;  %v5489_v5 = vrot.slane %v3651_v58, 9  ;;  %v5544_v55 = vld [vmem:[%s6793_s19 + $0x14] sm:$0x3] }
  0xf7   : > { %4189 = vmatpush.bf16.msra.mxu2 %v5922_v49  ;;  %v3521_v14 = vrot.slane %v3519_v59, 7  ;;  %v3509_v22 = vor.u32 %v3508_v10, %v3505_v9  ;;  %v3512_v23 = vshll.u32 %v3470_v7, 16  ;;  %v3634_v49 = vrot.slane %v5484_v41, 2  ;;  %v5595_v7 = vld [vmem:[%s6793_s19 + $0x10] sm:$0x7] }
  0xf8   : > { %4042 = vmatpush.bf16.msra.mxu1 %v5911_v18  ;;  %v3497_v31 = vrot.slane %v3496_v20, 2  ;;  %v3653_v59 = vsel %vm355_vm1, %v5483_v39, %v3633_v47  ;;  %v5543_v47 = vld [vmem:[%s6793_s19 + $0x10] sm:$0x3] }
  0xf9   : > { %v3522_v26 = vor.u32 %v3521_v14, %v3518_v13  ;;  %v3510_v34 = vrot.slane %v3509_v22, 2  ;;  %3863 = vmatpush.bf16.msra.mxu0 %v5900_v24  ;;  %v3660_v61 = vsel %vm355_vm1, %v5484_v41, %v3634_v49  ;;  %v3881_v14 = vrot.slane %v5594_v4, 2  ;;  %v5917_v22 = vld [vmem:[%s7103_s5 + $0x208] sm:$0xff] }
  0xfa   : > { %v5492_v10 = vrot.slane %v3660_v61, 9 }
  0xfb   : > { %4190 = vmatpush.bf16.msra.mxu2 %v5921_v19  ;;  %v3523_v37 = vrot.slane %v3522_v26, 2 }
  0xfc   : > { %v3126_v32 = vld.sshfl [vmem:[#allocation1] sm:$0xff pattern:$0x73625140]  ;;  %4043 = vmatpush.bf16.msra.mxu1 %v5910_v25 }
  0xfd   : > { %3184 = vmatmul.bf16.vlgmr.msra.gmra.mxu3 %v3126_v32  ;;  %3266 = vst [vmem:[#allocation1] ss:$4 sm:$0xff] %v3235_v28  ;;  %v5920_v28 = vld [vmem:[%s7103_s5 + $0x220] sm:$0xff]  ;;  %v3501_v32 = vrot.slane %v3499_v21, 7  ;;  %v3528_v48 = vsel %vm6110_vm8, %v3523_v37, %v3527_v38  ;;  %v3886_v21 = vsel %vm351_vm0, %v5593_v0, %v3880_v12  ;;  %v5541_v38 = vld [vmem:[%s6793_s19 + $0x8] sm:$0x3] }
  0xfe   : > { %3269 = vst [vmem:[#allocation1 + $0x1] ss:$4 sm:$0xff] %v3239_v30  ;;  %v3488_v30 = vrot.slane %v3486_v16, 7  ;;  %v3882_v16 = vrot.slane %v5595_v7, 2  ;;  %v5916_v25 = vld [vmem:[%s7103_s5 + $0x200] sm:$0xff]  ;;  %v3908_v27 = vshrl.u32 %v3886_v21, 16 }
  0xff   : > { %3272 = vst [vmem:[#allocation1 + $0x2] ss:$4 sm:$0xff] %v3243_v33  ;;  %v5481_v33 = vld [vmem:[%s6793_s19 + $0x4] sm:$0x6]  ;;  %4191 = vmatpush.bf16.msra.mxu2 %v5920_v28  ;;  %v3502_v43 = vsel %vm6110_vm8, %v3497_v31, %v3501_v32  ;;  %v3911_v28 = vshll.u32 %v3886_v21, 16  ;;  %v3893_v32 = vsel %vm355_vm1, %v5594_v4, %v3881_v14 }
 0x100   : > { %3275 = vst [vmem:[#allocation1 + $0x3] ss:$4 sm:$0xff] %v3247_v35  ;;  %v3514_v35 = vrot.slane %v3512_v23, 7  ;;  %v3489_v40 = vsel %vm6110_vm8, %v3484_v29, %v3488_v30  ;;  %v3631_v42 = vrot.slane %v5481_v33, 2  ;;  %4044 = vmatpush.bf16.msra.mxu1 %v5909_v50  ;;  %v3892_v23 = vsel %vm351_vm0, %v5594_v4, %v3881_v14  ;;  %v5648_v14 = vld [vmem:[%s6793_s19 + $0x14] sm:$0x6] }
 0x101   : > { %v3898_v24 = vsel %vm351_vm0, %v5595_v7, %v3882_v16  ;;  %v3887_v29 = vsel %vm355_vm1, %v5593_v0, %v3880_v12  ;;  %v3921_v30 = vshrl.u32 %v3892_v23, 16  ;;  %v3924_v31 = vshll.u32 %v3892_v23, 16  ;;  %v5647_v12 = vld [vmem:[%s6793_s19 + $0x10] sm:$0x6] }
 0x102   : > { %v3515_v46 = vsel %vm6110_vm8, %v3510_v34, %v3514_v35  ;;  %v3637_v52 = vsel %vm351_vm0, %v5481_v33, %v3631_v42  ;;  %v3639_v53 = vsel %vm355_vm1, %v5481_v33, %v3631_v42  ;;  %v3934_v33 = vshrl.u32 %v3898_v24, 16 }
 0x103   : > { %4192 = vmatpush.bf16.msra.mxu2 %v5919_v51  ;;  %v5485_v62 = vrot.slane %v3637_v52, 9  ;;  %v5486_v63 = vrot.slane %v3639_v53, 9  ;;  %v3937_v34 = vshll.u32 %v3898_v24, 16  ;;  %v3899_v35 = vsel %vm355_vm1, %v5595_v7, %v3882_v16 }
 0x104   : > { %v3889_v39 = vrot.slane %v3887_v29, 2  ;;  %v3913_v42 = vrot.slane %v3911_v28, 7  ;;  %v3895_v44 = vrot.slane %v3893_v32, 2 }
 0x105   : > { %v3666_v13 = vsel %vm6218_vm15, %v5485_v62, %v5486_v63  ;;  %v3939_v50 = vrot.slane %v3937_v34, 7 }
 0x107   : > { %v3276_v11 = vld.sshfl [vmem:[#allocation1] sm:$0xff pattern:$0x73625140]  ;;  %4193 = vmatpush.bf16.msra.mxu2 %v5918_v57  ;;  %v3917_v57 = vshll.u32 %v3889_v39, 16 }
 0x108   : > { %3334 = vmatmul.bf16.vlgmr.msrb.gmra.mxu0 %v3276_v11  ;;  %3365 = vst [vmem:[#allocation1] ss:$4 sm:$0xff] %v5377_v56  ;;  %v5908_v56 = vld [vmem:[%s7103_s5 + $0x1c0] sm:$0xff]  ;;  %v5596_v11 = vld [vmem:[%s6793_s19 + $0x14] sm:$0x7] }
 0x109   : > { %3368 = vst [vmem:[#allocation1 + $0x1] ss:$4 sm:$0xff] %v5378_v60  ;;  %v3658_v60 = vsel %vm351_vm0, %v5484_v41, %v3634_v49  ;;  %4045 = vmatpush.bf16.msra.mxu1 %v5908_v56  ;;  %v3883_v19 = vrot.slane %v5596_v11, 2  ;;  %v3910_v41 = vrot.slane %v3908_v27, 6  ;;  %v3936_v49 = vrot.slane %v3934_v33, 6 }
 0x10a   : > { %3371 = vst [vmem:[#allocation1 + $0x2] ss:$4 sm:$0xff] %v5379_v1  ;;  %v5487_v1 = vrot.slane %v3644_v54, 9  ;;  %v5491_v9 = vrot.slane %v3658_v60, 9 }
 0x10b   : > { %3374 = vst [vmem:[#allocation1 + $0x3] ss:$4 sm:$0xff] %v5380_v6  ;;  %v5490_v6 = vrot.slane %v3653_v59, 9  ;;  %4194 = vmatpush.bf16.msra.mxu2 %v5917_v22  ;;  %v3904_v26 = vsel %vm351_vm0, %v5596_v11, %v3883_v19  ;;  %v3914_v56 = vor.u32 %v3913_v42, %v3910_v41  ;;  %v3930_v59 = vshll.u32 %v3895_v44, 16  ;;  %v523_v44 = vpop.f32.mrf.mxu0 }
 0x10c   : > { %v3670_v15 = vsel %vm6218_vm15, %v5487_v1, %v5488_v2  ;;  %v3678_v20 = vsel %vm6218_vm15, %v5491_v9, %v5492_v10  ;;  %v3947_v36 = vshrl.u32 %v3904_v26, 16  ;;  %v3950_v37 = vshll.u32 %v3904_v26, 16  ;;  %v5646_v9 = vld [vmem:[%s6793_s19 + $0xc] sm:$0x6] }
 0x10d   : > { %v3674_v18 = vsel %vm6218_vm15, %v5489_v5, %v5490_v6  ;;  %v3940_v60 = vor.u32 %v3939_v50, %v3936_v49  ;;  %v3915_v0 = vrot.slane %v3914_v56, 2  ;;  %v3919_v1 = vrot.slane %v3917_v57, 7  ;;  %v5645_v5 = vld [vmem:[%s6793_s19 + $0x8] sm:$0x6]  ;;  %v852_v49 = vpop.f32.mrf.mxu3 }
 0x10e   : > { %v3949_v53 = vrot.slane %v3947_v36, 6  ;;  %v3952_v54 = vrot.slane %v3950_v37, 7  ;;  %v3932_v4 = vrot.slane %v3930_v59, 7  ;;  %v4065_v22 = vrot.slane %v5648_v14, 2 }
 0x10f   : > { %4195 = vmatpush.bf16.msra.mxu2 %v5916_v25  ;;  %v3941_v6 = vrot.slane %v3940_v60, 2 }
 0x110   : > { %v3953_v62 = vor.u32 %v3952_v54, %v3949_v53  ;;  %v4089_v3 = vsel %vm351_vm0, %v5648_v14, %v4065_v22  ;;  %v4091_v29 = vsel %vm355_vm1, %v5648_v14, %v4065_v22 }
 0x111   : > { %v5655_v36 = vrot.slane %v4089_v3, 9  ;;  %v5656_v37 = vrot.slane %v4091_v29, 9 }
 0x112   : > { %v3375_v45 = vld.sshfl [vmem:[#allocation1] sm:$0xff pattern:$0x73625140]  ;;  %v3954_v10 = vrot.slane %v3953_v62, 2 }
 0x113   : > { %3433 = vmatmul.bf16.vlgmr.msrb.gmra.mxu1 %v3375_v45  ;;  %3547 = vst [vmem:[#allocation1] ss:$4 sm:$0xff] %v3489_v40  ;;  %v3905_v40 = vsel %vm355_vm1, %v5596_v11, %v3883_v19  ;;  %v3923_v45 = vrot.slane %v3921_v30, 6  ;;  %v4109_v42 = vsel %vm6218_vm15, %v5655_v36, %v5656_v37 }
 0x114   : > { %3550 = vst [vmem:[#allocation1 + $0x1] ss:$4 sm:$0xff] %v3502_v43  ;;  %v5542_v43 = vld [vmem:[%s6793_s19 + $0xc] sm:$0x3]  ;;  %v3907_v52 = vrot.slane %v3905_v40, 2 }
 0x115   : > { %3553 = vst [vmem:[#allocation1 + $0x2] ss:$4 sm:$0xff] %v3515_v46  ;;  %v3926_v46 = vrot.slane %v3924_v31, 7  ;;  %v854_v53 = vpop.f32.mrf.mxu3 }
 0x116   : > { %3556 = vst [vmem:[#allocation1 + $0x3] ss:$4 sm:$0xff] %v3528_v48  ;;  %v3901_v48 = vrot.slane %v3899_v35, 2  ;;  %v3956_v63 = vshll.u32 %v3907_v52, 16 }
 0x117   : > { %v3927_v58 = vor.u32 %v3926_v46, %v3923_v45  ;;  %v598_v45 = vpop.f32.mrf.mxu1  ;;  %v525_v46 = vpop.f32.mrf.mxu0 }
 0x118   : > { %v3943_v61 = vshll.u32 %v3901_v48, 16  ;;  %v3958_v11 = vrot.slane %v3956_v63, 7 }
 0x119   : > { %v3928_v2 = vrot.slane %v3927_v58, 2 }
 0x11a   : > { %v3945_v7 = vrot.slane %v3943_v61, 7  ;;  %v3959_v21 = vsel %vm6110_vm8, %v3954_v10, %v3958_v11  ;;  %v599_v61 = vadd.f32 %v598_v45, %v523_v44 }
 0x11b   : > { %v3933_v16 = vsel %vm6110_vm8, %v3928_v2, %v3932_v4 }
 0x11c   : > { %v3946_v19 = vsel %vm6110_vm8, %v3941_v6, %v3945_v7 }
 0x11d   : > { %v3557_v17 = vld.sshfl [vmem:[#allocation1] sm:$0xff pattern:$0x73625140]  ;;  %v1465_v56 = vpop.f32.mrf.mxu3 }
 0x11e   : > { %3615 = vmatmul.bf16.vlgmr.msrb.gmra.mxu2 %v3557_v17  ;;  %3697 = vst [vmem:[#allocation1] ss:$4 sm:$0xff] %v3666_v13  ;;  %v3920_v13 = vsel %vm6110_vm8, %v3915_v0, %v3919_v1  ;;  %v4063_v17 = vrot.slane %v5646_v9, 2 }
 0x11f   : > { %3700 = vst [vmem:[#allocation1 + $0x1] ss:$4 sm:$0xff] %v3670_v15  ;;  %v4062_v15 = vrot.slane %v5645_v5, 2  ;;  %v600_v48 = vpop.f32.mrf.mxu1  ;;  %v1034_v50 = vpop.f32.mrf.mxu0 }
 0x120   : > { %3703 = vst [vmem:[#allocation1 + $0x2] ss:$4 sm:$0xff] %v3674_v18  ;;  %v4075_v25 = vsel %vm351_vm0, %v5646_v9, %v4063_v17  ;;  %v4077_v26 = vsel %vm355_vm1, %v5646_v9, %v4063_v17  ;;  %v601_v4 = vadd.f32 %v600_v48, %v525_v46 }
 0x121   : > { %3706 = vst [vmem:[#allocation1 + $0x3] ss:$4 sm:$0xff] %v3678_v20  ;;  %v4064_v20 = vrot.slane %v5647_v12, 2  ;;  %v4068_v23 = vsel %vm351_vm0, %v5645_v5, %v4062_v15  ;;  %v4070_v24 = vsel %vm355_vm1, %v5645_v5, %v4062_v15  ;;  %v5651_v32 = vrot.slane %v4075_v25, 9 }
 0x122   : > { %v5649_v30 = vrot.slane %v4068_v23, 9  ;;  %v5650_v31 = vrot.slane %v4070_v24, 9  ;;  %v5652_v33 = vrot.slane %v4077_v26, 9 }
 0x123   : > { %v4082_v27 = vsel %vm351_vm0, %v5647_v12, %v4064_v20  ;;  %v4084_v28 = vsel %vm355_vm1, %v5647_v12, %v4064_v20 }
 0x124   : > { %v5653_v34 = vrot.slane %v4082_v27, 9  ;;  %v5654_v35 = vrot.slane %v4084_v28, 9  ;;  %v4101_v39 = vsel %vm6218_vm15, %v5651_v32, %v5652_v33 }
 0x125   : > { %v1467_v60 = vpop.f32.mrf.mxu3 }
 0x126   : > { %v4105_v41 = vsel %vm6218_vm15, %v5653_v34, %v5654_v35 }
 0x127   : > { %v1184_v52 = vpop.f32.mrf.mxu1  ;;  %v1036_v54 = vpop.f32.mrf.mxu0 }
 0x128   : > { %v3707_v51 = vld.sshfl [vmem:[#allocation1] sm:$0xff pattern:$0x73625140] }
 0x129   : > { %3765 = vmatmul.bf16.vlgmr.msrb.gmra.mxu3 %v3707_v51  ;;  %3796 = vst [vmem:[#allocation1] ss:$4 sm:$0xff] %v5541_v38  ;;  %v4097_v38 = vsel %vm6218_vm15, %v5649_v30, %v5650_v31 }
 0x12a   : > { %3799 = vst [vmem:[#allocation1 + $0x1] ss:$4 sm:$0xff] %v5542_v43 }
 0x12b   : > { %3802 = vst [vmem:[#allocation1 + $0x2] ss:$4 sm:$0xff] %v5543_v47  ;;  %v753_v47 = vpop.f32.mrf.mxu2 }
 0x12c   : > { %3805 = vst [vmem:[#allocation1 + $0x3] ss:$4 sm:$0xff] %v5544_v55  ;;  %v758_v0 = vadd.f32 %v753_v47, %v599_v61 }
 0x12d   : > { %v2044_v2 = vpop.f32.mrf.mxu3 }
 0x12e   : > { %v857_v5 = vadd.f32 %v852_v49, %v758_v0 }
 0x12f   : > { %v1186_v8 = vpop.f32.mrf.mxu1  ;;  %v1615_v57 = vpop.f32.mrf.mxu0 }
 0x130   : > { %v1039_v9 = vadd.f32 %v1034_v50, %v857_v5 }
 0x132   : > { %v1189_v12 = vadd.f32 %v1184_v52, %v1039_v9 }
 0x133   : > { %v3806_v18 = vld.sshfl [vmem:[#allocation1] sm:$0xff pattern:$0x73625140]  ;;  %v755_v51 = vpop.f32.mrf.mxu2 }
 0x134   : > { %3864 = vmatmul.bf16.vlgmr.msra.gmra.mxu0 %v3806_v18  ;;  %3978 = vst [vmem:[#allocation1] ss:$4 sm:$0xff] %v3920_v13  ;;  %v759_v10 = vadd.f32 %v755_v51, %v601_v4 }
 0x135   : > { %3981 = vst [vmem:[#allocation1 + $0x1] ss:$4 sm:$0xff] %v3933_v16  ;;  %v2046_v14 = vpop.f32.mrf.mxu3 }
 0x136   : > { %3984 = vst [vmem:[#allocation1 + $0x2] ss:$4 sm:$0xff] %v3946_v19  ;;  %v858_v13 = vadd.f32 %v854_v53, %v759_v10 }
 0x137   : > { %3987 = vst [vmem:[#allocation1 + $0x3] ss:$4 sm:$0xff] %v3959_v21  ;;  %v1712_v59 = vpop.f32.mrf.mxu1  ;;  %v1617_v63 = vpop.f32.mrf.mxu0 }
 0x138   : > { %v1040_v16 = vadd.f32 %v1036_v54, %v858_v13 }
 0x13a   : > { %v1190_v20 = vadd.f32 %v1186_v8, %v1040_v16 }
 0x13b   : > { %v1283_v55 = vpop.f32.mrf.mxu2 }
 0x13c   : > { %v1288_v17 = vadd.f32 %v1283_v55, %v1189_v12 }
 0x13e   : > { %v3988_v40 = vld.sshfl [vmem:[#allocation1] sm:$0xff pattern:$0x73625140]  ;;  %v1470_v21 = vadd.f32 %v1465_v56, %v1288_v17 }
 0x13f   : > { %4046 = vmatmul.bf16.vlgmr.msra.gmra.mxu1 %v3988_v40  ;;  %4128 = vst [vmem:[#allocation1] ss:$4 sm:$0xff] %v4097_v38  ;;  %v1714_v1 = vpop.f32.mrf.mxu1  ;;  %v2143_v7 = vpop.f32.mrf.mxu0 }
 0x140   : > { %4131 = vst [vmem:[#allocation1 + $0x1] ss:$4 sm:$0xff] %v4101_v39  ;;  %v1620_v23 = vadd.f32 %v1615_v57, %v1470_v21 }
 0x141   : > { %4134 = vst [vmem:[#allocation1 + $0x2] ss:$4 sm:$0xff] %v4105_v41 }
 0x142   : > { %4137 = vst [vmem:[#allocation1 + $0x3] ss:$4 sm:$0xff] %v4109_v42  ;;  %v1717_v28 = vadd.f32 %v1712_v59, %v1620_v23 }
 0x143   : > { %v1285_v58 = vpop.f32.mrf.mxu2 }
 0x144   : > { %v1289_v24 = vadd.f32 %v1285_v58, %v1190_v20 }
 0x146   : > { %v1471_v3 = vadd.f32 %v1467_v60, %v1289_v24 }
 0x147   : > { %v2325_v11 = vpop.f32.mrf.mxu1  ;;  %v2145_v18 = vpop.f32.mrf.mxu0 }
 0x148   : > { %v1621_v31 = vadd.f32 %v1617_v63, %v1471_v3 }
 0x149   : > { %v4138_v43 = vld.sshfl [vmem:[#allocation1] sm:$0xff pattern:$0x73625140] }
 0x14a   : > { %4196 = vmatmul.bf16.vlgmr.msra.gmra.mxu2 %v4138_v43  ;;  %v1718_v35 = vadd.f32 %v1714_v1, %v1621_v31 }
 0x14b   : > { %v1894_v62 = vpop.f32.mrf.mxu2 }
 0x14c   : > { %v1899_v29 = vadd.f32 %v1894_v62, %v1717_v28 }
 0x14e   : > { %v2049_v32 = vadd.f32 %v2044_v2, %v1899_v29 }
 0x14f   : > { %v2327_v19 = vpop.f32.mrf.mxu1 }
 0x150   : > { %v2148_v36 = vadd.f32 %v2143_v7, %v2049_v32 }
 0x152   : > { %v2330_v39 = vadd.f32 %v2325_v11, %v2148_v36 }
 0x153   : > { %v1896_v6 = vpop.f32.mrf.mxu2 }
 0x154   : > { %v2574_v22 = vpop.f32.mrf.mxu3  ;;  %v1900_v38 = vadd.f32 %v1896_v6, %v1718_v35 }
 0x156   : > { %v2050_v41 = vadd.f32 %v2046_v14, %v1900_v38  ;;  %v5933_v14 = vld [vmem:[%s7104_s6] ss:$0 sm:$0xff] }
 0x158   : > { %v2149_v46 = vadd.f32 %v2145_v18, %v2050_v41 }
 0x159   : > { %v2756_v26 = vpop.f32.mrf.mxu0 }
 0x15a   : > { %v2331_v48 = vadd.f32 %v2327_v19, %v2149_v46 }
 0x15b   : > { %v2475_v15 = vpop.f32.mrf.mxu2 }
 0x15c   : > { %v2576_v30 = vpop.f32.mrf.mxu3  ;;  %v2480_v42 = vadd.f32 %v2475_v15, %v2330_v39 }
 0x15e   : > { %v2579_v43 = vadd.f32 %v2574_v22, %v2480_v42 }
 0x160   : > { %v2761_v49 = vadd.f32 %v2756_v26, %v2579_v43 }
 0x161   : > { %v2758_v34 = vpop.f32.mrf.mxu0 }
 0x163   : > { %v2477_v25 = vpop.f32.mrf.mxu2 }
 0x164   : > { %v2906_v27 = vpop.f32.mrf.mxu1  ;;  %v2481_v50 = vadd.f32 %v2477_v25, %v2331_v48 }
 0x165   : > { %v2911_v51 = vadd.f32 %v2906_v27, %v2761_v49 }
 0x166   : > { %v2580_v53 = vadd.f32 %v2576_v30, %v2481_v50 }
 0x168   : > { %v2762_v57 = vadd.f32 %v2758_v34, %v2580_v53 }
 0x16c   : > { %v2908_v37 = vpop.f32.mrf.mxu1 }
 0x16d   : > { %v2912_v59 = vadd.f32 %v2908_v37, %v2762_v57 }
 0x175   : > { %v3003_v33 = vpop.f32.mrf.mxu2 }
 0x176   : > { %v3008_v54 = vadd.f32 %v3003_v33, %v2911_v51 }
 0x17d   : > { %v3005_v44 = vpop.f32.mrf.mxu2 }
 0x17e   : > { %v3009_v62 = vadd.f32 %v3005_v44, %v2912_v59 }
 0x180   : > { %v3185_v40 = vpop.f32.mrf.mxu3 }
 0x181   : > { %v3190_v8 = vadd.f32 %v3185_v40, %v3008_v54 }
 0x185   : > { %v3335_v45 = vpop.f32.mrf.mxu0 }
 0x186   : > { %v3340_v60 = vadd.f32 %v3335_v45, %v3190_v8 }
 0x188   : > { %v3187_v52 = vpop.f32.mrf.mxu3 }
 0x189   : > { %v3191_v0 = vadd.f32 %v3187_v52, %v3009_v62 }
 0x18d   : > { %v3337_v56 = vpop.f32.mrf.mxu0 }
 0x18e   : > { %v3341_v7 = vadd.f32 %v3337_v56, %v3191_v0 }
 0x190   : > { %v3434_v47 = vpop.f32.mrf.mxu1 }
 0x191   : > { %v3439_v63 = vadd.f32 %v3434_v47, %v3340_v60 }
 0x198   : > { %v3436_v58 = vpop.f32.mrf.mxu1 }
 0x199   : > { %v3440_v9 = vadd.f32 %v3436_v58, %v3341_v7 }
 0x1a1   : > { %v3616_v55 = vpop.f32.mrf.mxu2 }
 0x1a2   : > { %v3621_v1 = vadd.f32 %v3616_v55, %v3439_v63 }
 0x1a9   : > { %v3618_v2 = vpop.f32.mrf.mxu2 }
 0x1aa   : > { %v3622_v12 = vadd.f32 %v3618_v2, %v3440_v9 }
 0x1ac   : > { %v3766_v61 = vpop.f32.mrf.mxu3 }
 0x1ad   : > { %v3771_v5 = vadd.f32 %v3766_v61, %v3621_v1 }
 0x1b1   : > { %v3865_v4 = vpop.f32.mrf.mxu0 }
 0x1b2   : > { %v3870_v10 = vadd.f32 %v3865_v4, %v3771_v5 }
 0x1b4   : > { %v3768_v11 = vpop.f32.mrf.mxu3 }
 0x1b5   : > { %v3772_v16 = vadd.f32 %v3768_v11, %v3622_v12 }
 0x1b9   : > { %v3867_v18 = vpop.f32.mrf.mxu0 }
 0x1ba   : > { %v3871_v21 = vadd.f32 %v3867_v18, %v3772_v16 }
 0x1bc   : > { %v4047_v6 = vpop.f32.mrf.mxu1 }
 0x1bd   : > { %v4052_v13 = vadd.f32 %v4047_v6, %v3870_v10 }
 0x1c4   : > { %v4049_v20 = vpop.f32.mrf.mxu1 }
 0x1c5   : > { %v4053_v24 = vadd.f32 %v4049_v20, %v3871_v21 }
 0x1cd   : > { %v4197_v15 = vpop.f32.mrf.mxu2 }
 0x1ce   : > { %v4202_v17 = vadd.f32 %v4197_v15, %v4052_v13 }
 0x1d0   : > { %v4208_v19 = vadd.f32 %v5933_v14, %v4202_v17 }
 0x1d2   : > { %v4212_v22 = vrot.slane %v4208_v19, 4  ;;  %v4216_v23 = vpack.c.bf16 %v4208_v19, %v4208_v19 }
 0x1d4   : > { %v4217_v25 = vpack.c.bf16 %v4212_v22, %v4212_v22  ;;  %4220 = vst [vmem:[%s318_s22] sm:$0x3] %v4216_v23 }
 0x1d5   : > { %v4199_v26 = vpop.f32.mrf.mxu2 }
 0x1d6   : > { %4221 = vst [vmem:[%s318_s22 + $0x2] sm:$0x3] %v4217_v25  ;;  %v4203_v27 = vadd.f32 %v4199_v26, %v4053_v24 }
 0x1d8   : > { %v4209_v28 = vadd.f32 %v5933_v14, %v4203_v27 }
 0x1da   : > { %v4213_v3 = vrot.slane %v4209_v28, 4  ;;  %v4218_v29 = vpack.c.bf16 %v4209_v28, %v4209_v28 }
 0x1dc   : > { %v4219_v30 = vpack.c.bf16 %v4213_v3, %v4213_v3  ;;  %4222 = vst [vmem:[%s318_s22 + $0x4] sm:$0x3] %v4218_v29 }
 0x1de   : > { %4223 = vst [vmem:[%s318_s22 + $0x6] sm:$0x3] %v4219_v30 }
 0x1df PF: > { %s17_s24 = sadd.s32 1, %s5940_s24  }
 0x1e0   : > { %p14_p4 = scmp.ge.s32.totalorder %s17_s24, 4  }
 0x1e2   :  { %16 = sbr.rel (!%p14_p4) target bundleno = 1 (0x1), region = 195 }

</bundles_post_ra>
